<compile_context>
chip_gen: v7x
topology: tpu7x:2x2x1
jax: 0.10.0
libtpu: 0.0.40
codegen_flags: <defaults>
</compile_context>

<pallas_src>
import jax
import jax.numpy as jnp
from jax import lax
from jax.experimental import pallas as pl
from jax.experimental.pallas import tpu as pltpu

BN_EPS = 1e-5  # nn.BatchNorm2d default


def _stage(y, keep_l, keep_r, dw, pw, gamma, beta):
    """ReLU -> depthwise 3x3 (pad=1) -> pointwise 1x1 (bf16 MXU) -> BN(train)."""
    N, H, W, C = y.shape
    y = jnp.maximum(y, 0.0)                                    # ReLU (VPU)

    # dx = -1 / +1 taps: sublane rotation (XLU) + zero the wrapped column.
    y_m1 = jnp.where(keep_l, pltpu.roll(y, 1, 2), 0.0)         # input at w-1
    y_p1 = jnp.where(keep_r, pltpu.roll(y, W - 1, 2), 0.0)     # input at w+1
    cols = (y_m1, y, y_p1)

    # Combine the 3 columns for each kernel row dy (9 FMAs on the VPU).
    rows = []
    for dy in range(3):
        t = cols[0] * dw[dy, 0]
        t = t + cols[1] * dw[dy, 1]
        t = t + cols[2] * dw[dy, 2]
        rows.append(t)

    # dy = -1 / +1: shift along H (leading dim -> layout-free slices).
    zrow = jnp.zeros((N, 1, W, C), jnp.float32)
    acc = rows[1]
    acc = acc + jnp.concatenate([zrow, rows[0][:, :H - 1]], axis=1)
    acc = acc + jnp.concatenate([rows[2][:, 1:], zrow], axis=1)

    # Pointwise 1x1 conv == channel matmul (MXU, bf16 inputs, f32 accumulate).
    m = jnp.dot(acc.reshape(N * H * W, C).astype(jnp.bfloat16), pw,
                preferred_element_type=jnp.float32)

    # BatchNorm2d training semantics: biased batch stats over N*H*W.
    inv_n = jnp.float32(1.0 / (N * H * W))
    s = jnp.sum(m, axis=0, keepdims=True)
    ss = jnp.sum(m * m, axis=0, keepdims=True)
    mean = s * inv_n
    var = jnp.maximum(ss * inv_n - mean * mean, 0.0)           # clamp E[x^2]-E[x]^2
    scale = gamma * lax.rsqrt(var + BN_EPS)
    shift = beta - mean * scale
    m = m * scale + shift
    # TODO(synk): PyTorch running_mean/running_var buffer updates are not
    # produced here (forward output only).
    return m.reshape(N, H, W, C)


def middle_flow_kernel(x_ref, dw_ref, pw_ref, g_ref, b_ref, o_ref):
    i = pl.program_id(0)

    @pl.when(i == 0)
    def _():
        o_ref[...] = x_ref[...]          # seed the running activation once

    x = o_ref[...]                       # resident output block = running state
    N, H, W, C = x.shape

    # Boundary masks for the W-axis rotations (built once per block).
    w_ids = lax.broadcasted_iota(jnp.int32, (W, C), 0)
    keep_l = w_ids > 0                   # input column w-1 exists
    keep_r = w_ids < W - 1               # input column w+1 exists

    dw = dw_ref[...]                     # (1, 3, 3, 3, C)  f32
    pw = pw_ref[...]                     # (1, 3, C, C)     bf16
    g = g_ref[...]                       # (1, 3, C)        f32
    b = b_ref[...]                       # (1, 3, C)        f32

    r = x
    for s in range(3):
        r = _stage(r, keep_l, keep_r, dw[0, s], pw[0, s], g[:, s, :], b[:, s, :])

    o_ref[...] = x + r                   # identity shortcut + residual


def _vmem_limit_bytes():
    cap = 64 * 1024 * 1024               # conservative fallback (v7x per-TC VMEM)
    try:
        cap = int(pltpu.get_tpu_info().vmem_capacity_bytes)
    except Exception:
        pass
    return int(min(cap * 7 // 8, 100 * 1024 * 1024))


def middle_flow(x, dw_all, pw_all, g_all, b_all):
    N, H, W, C = x.shape
    n_blocks = dw_all.shape[0]
    # TODO(synk): at real Xception shapes (C=728, batched) add a spatial/batch
    # grid axis marked "parallel" with a two-pass (sum/sumsq accumulate, then
    # normalize) BN so stats stay global while sharding across v7x's 2 cores.
    return pl.pallas_call(
        middle_flow_kernel,
        out_shape=jax.ShapeDtypeStruct((N, H, W, C), jnp.float32),
        grid=(n_blocks,),
        in_specs=[
            pl.BlockSpec((N, H, W, C), lambda i: (0, 0, 0, 0)),        # x (resident)
            pl.BlockSpec((1, 3, 3, 3, C), lambda i: (i, 0, 0, 0, 0)),  # depthwise w
            pl.BlockSpec((1, 3, C, C), lambda i: (i, 0, 0, 0)),        # pointwise w
            pl.BlockSpec((1, 3, C), lambda i: (i, 0, 0)),              # BN gamma
            pl.BlockSpec((1, 3, C), lambda i: (i, 0, 0)),              # BN beta
        ],
        out_specs=pl.BlockSpec((N, H, W, C), lambda i: (0, 0, 0, 0)),
        compiler_params=pltpu.CompilerParams(
            dimension_semantics=("arbitrary",),   # blocks are data-dependent
            vmem_limit_bytes=_vmem_limit_bytes(),
        ),
    )(x, dw_all, pw_all, g_all, b_all)


def _reference(x, dw_all, pw_all, g_all, b_all):
    """Pure-JAX reference of the same forward (pointwise matmul in bf16)."""
    N, H, W, C = x.shape
    for bi in range(dw_all.shape[0]):
        r = x
        for s in range(3):
            y = jnp.maximum(r, 0.0)
            yp = jnp.pad(y, ((0, 0), (1, 1), (1, 1), (0, 0)))
            acc = jnp.zeros_like(y)
            for dy in range(3):
                for dx in range(3):
                    acc = acc + yp[:, dy:dy + H, dx:dx + W, :] * dw_all[bi, s, dy, dx]
            m = jnp.dot(acc.reshape(-1, C).astype(jnp.bfloat16), pw_all[bi, s],
                        preferred_element_type=jnp.float32)
            mean = jnp.mean(m, axis=0, keepdims=True)
            var = jnp.maximum(jnp.mean(m * m, axis=0, keepdims=True) - mean * mean, 0.0)
            m = (m - mean) * lax.rsqrt(var + BN_EPS) * g_all[bi, s] + b_all[bi, s]
            r = m.reshape(N, H, W, C)
        x = x + r
    return x


if __name__ == "__main__":
    # Small lane-friendly test shape (real Xception uses C=728, 19x19 spatial;
    # the synthetic test scales channels to 128 so everything stays in VMEM).
    N, H, W, C = 2, 16, 16, 128
    NUM_BLOCKS = 8   # MiddleFlow_train stacks the middle-flow block 8 times

    key = jax.random.PRNGKey(0)
    kx, kdw, kpw = jax.random.split(key, 3)
    x = jax.random.normal(kx, (N, H, W, C), dtype=jnp.float32)

    # Depthwise weights: torch (C,1,3,3) per stage -> (block, stage, ky, kx, C)
    dw_all = jax.random.normal(kdw, (NUM_BLOCKS, 3, 3, 3, C), jnp.float32) * 0.1
    # Pointwise weights: torch (Cout,Cin,1,1) -> (block, stage, Cin, Cout), bf16 for MXU
    pw_all = (jax.random.normal(kpw, (NUM_BLOCKS, 3, C, C), jnp.float32)
              * (1.0 / (C ** 0.5))).astype(jnp.bfloat16)
    # BatchNorm affine params (PyTorch default init: gamma=1, beta=0).
    g_all = jnp.ones((NUM_BLOCKS, 3, C), jnp.float32)
    b_all = jnp.zeros((NUM_BLOCKS, 3, C), jnp.float32)

    out = middle_flow(x, dw_all, pw_all, g_all, b_all)
    jax.block_until_ready(out)
    assert out.shape == (N, H, W, C)

    ref = _reference(x, dw_all, pw_all, g_all, b_all)
    rel_err = float(jnp.max(jnp.abs(out - ref)) / (jnp.max(jnp.abs(ref)) + 1e-6))
    assert rel_err < 0.05, f"kernel mismatch vs reference, rel_err={rel_err}"
    print("KERNEL_OK")
</pallas_src>

<mosaic_0001>
module attributes {stable_mosaic.version = 11 : i64} {
  func.func @middle_flow_kernel(%arg0: i32, %arg1: memref<2x16x16x128xf32, #tpu.memory_space<vmem>>, %arg2: memref<1x3x3x3x128xf32, #tpu.memory_space<vmem>>, %arg3: memref<1x3x128x128xbf16, #tpu.memory_space<vmem>>, %arg4: memref<1x3x128xf32, #tpu.memory_space<vmem>>, %arg5: memref<1x3x128xf32, #tpu.memory_space<vmem>>, %arg6: memref<2x16x16x128xf32, #tpu.memory_space<vmem>>) attributes {dimension_semantics = [#tpu.dimension_semantics<arbitrary>], iteration_bounds = array<i64: 8>, scalar_prefetch = 0 : i64, scratch_operands = 0 : i64, tpu.core_type = #tpu.core_type<tc>, window_params = [{pipeline_mode = #tpu.pipeline_mode<synchronous>, transform_indices = @transform_0, window_bounds = array<i64: 2, 16, 16, 128>}, {transform_indices = @transform_1, window_bounds = array<i64: 1, 3, 3, 3, 128>}, {transform_indices = @transform_2, window_bounds = array<i64: 1, 3, 128, 128>}, {transform_indices = @transform_3, window_bounds = array<i64: 1, 3, 128>}, {transform_indices = @transform_4, window_bounds = array<i64: 1, 3, 128>}, {pipeline_mode = #tpu.pipeline_mode<synchronous>, transform_indices = @transform_5, window_bounds = array<i64: 2, 16, 16, 128>}]} {
    %c0_i32 = arith.constant 0 : i32
    %0 = arith.cmpi eq, %arg0, %c0_i32 : i32
    %1 = arith.extui %0 : i1 to i32
    %c0_i32_0 = arith.constant 0 : i32
    %2 = arith.cmpi ne, %1, %c0_i32_0 : i32
    scf.if %2 {
      %c0_61 = arith.constant 0 : index
      %c0_62 = arith.constant 0 : index
      %c0_63 = arith.constant 0 : index
      %c0_64 = arith.constant 0 : index
      %330 = vector.load %arg1[%c0_61, %c0_62, %c0_63, %c0_64] : memref<2x16x16x128xf32, #tpu.memory_space<vmem>>, vector<2x16x16x128xf32>
      %c0_65 = arith.constant 0 : index
      %c0_66 = arith.constant 0 : index
      %c0_67 = arith.constant 0 : index
      %c0_68 = arith.constant 0 : index
      %331 = vector.load %arg6[%c0_65, %c0_66, %c0_67, %c0_68] : memref<2x16x16x128xf32, #tpu.memory_space<vmem>>, vector<2x16x16x128xf32>
      tpu.vector_store %arg6[%c0_65, %c0_66, %c0_67, %c0_68], %330 {strides = array<i32>} : memref<2x16x16x128xf32, #tpu.memory_space<vmem>>, vector<2x16x16x128xf32>,
    } else {
    }
    %c0 = arith.constant 0 : index
    %c0_1 = arith.constant 0 : index
    %c0_2 = arith.constant 0 : index
    %c0_3 = arith.constant 0 : index
    %3 = vector.load %arg6[%c0, %c0_1, %c0_2, %c0_3] : memref<2x16x16x128xf32, #tpu.memory_space<vmem>>, vector<2x16x16x128xf32>
    %4 = tpu.iota {dimensions = array<i32: 0>} : vector<16x128xi32>
    %c0_i32_4 = arith.constant 0 : i32
    %5 = vector.broadcast %c0_i32_4 : i32 to vector<16x128xi32>
    %6 = arith.cmpi sgt, %4, %5 : vector<16x128xi32>
    %c15_i32 = arith.constant 15 : i32
    %7 = vector.broadcast %c15_i32 : i32 to vector<16x128xi32>
    %8 = arith.cmpi slt, %4, %7 : vector<16x128xi32>
    %c0_5 = arith.constant 0 : index
    %c0_6 = arith.constant 0 : index
    %c0_7 = arith.constant 0 : index
    %c0_8 = arith.constant 0 : index
    %c0_9 = arith.constant 0 : index
    %9 = vector.load %arg2[%c0_5, %c0_6, %c0_7, %c0_8, %c0_9] : memref<1x3x3x3x128xf32, #tpu.memory_space<vmem>>, vector<1x3x3x3x128xf32>
    %c0_10 = arith.constant 0 : index
    %c0_11 = arith.constant 0 : index
    %c0_12 = arith.constant 0 : index
    %c0_13 = arith.constant 0 : index
    %10 = vector.load %arg3[%c0_10, %c0_11, %c0_12, %c0_13] : memref<1x3x128x128xbf16, #tpu.memory_space<vmem>>, vector<1x3x128x128xbf16>
    %c0_14 = arith.constant 0 : index
    %c0_15 = arith.constant 0 : index
    %c0_16 = arith.constant 0 : index
    %11 = vector.load %arg4[%c0_14, %c0_15, %c0_16] : memref<1x3x128xf32, #tpu.memory_space<vmem>>, vector<1x3x128xf32>
    %c0_17 = arith.constant 0 : index
    %c0_18 = arith.constant 0 : index
    %c0_19 = arith.constant 0 : index
    %12 = vector.load %arg5[%c0_17, %c0_18, %c0_19] : memref<1x3x128xf32, #tpu.memory_space<vmem>>, vector<1x3x128xf32>
    %13 = vector.extract_strided_slice %9 {offsets = [0, 0, 0, 0, 0], sizes = [1, 1, 3, 3, 128], strides = [1, 1, 1, 1, 1]} : vector<1x3x3x3x128xf32> to vector<1x1x3x3x128xf32>
    %14 = vector.shape_cast %13 : vector<1x1x3x3x128xf32> to vector<3x3x128xf32>
    %15 = vector.extract_strided_slice %10 {offsets = [0, 0, 0, 0], sizes = [1, 1, 128, 128], strides = [1, 1, 1, 1]} : vector<1x3x128x128xbf16> to vector<1x1x128x128xbf16>
    %16 = vector.shape_cast %15 : vector<1x1x128x128xbf16> to vector<128x128xbf16>
    %17 = vector.extract_strided_slice %11 {offsets = [0, 0, 0], sizes = [1, 1, 128], strides = [1, 1, 1]} : vector<1x3x128xf32> to vector<1x1x128xf32>
    %18 = vector.shape_cast %17 : vector<1x1x128xf32> to vector<1x128xf32>
    %19 = vector.extract_strided_slice %12 {offsets = [0, 0, 0], sizes = [1, 1, 128], strides = [1, 1, 1]} : vector<1x3x128xf32> to vector<1x1x128xf32>
    %20 = vector.shape_cast %19 : vector<1x1x128xf32> to vector<1x128xf32>
    %cst = arith.constant 0.000000e+00 : f32
    %21 = vector.broadcast %cst : f32 to vector<2x16x16x128xf32>
    %22 = arith.maximumf %3, %21 : vector<2x16x16x128xf32>
    %c1_i32 = arith.constant 1 : i32
    %23 = tpu.dynamic_rotate %22 by %c1_i32 dim 2 : vector<2x16x16x128xf32>, i32 -> vector<2x16x16x128xf32>
    %cst_20 = arith.constant 0.000000e+00 : f32
    %24 = vector.shape_cast %6 : vector<16x128xi1> to vector<1x1x16x128xi1>
    %25 = vector.broadcast %24 : vector<1x1x16x128xi1> to vector<2x16x16x128xi1>
    %26 = vector.broadcast %cst_20 : f32 to vector<2x16x16x128xf32>
    %27 = arith.select %25, %23, %26 : vector<2x16x16x128xi1>, vector<2x16x16x128xf32>
    %c15_i32_21 = arith.constant 15 : i32
    %28 = tpu.dynamic_rotate %22 by %c15_i32_21 dim 2 : vector<2x16x16x128xf32>, i32 -> vector<2x16x16x128xf32>
    %cst_22 = arith.constant 0.000000e+00 : f32
    %29 = vector.shape_cast %8 : vector<16x128xi1> to vector<1x1x16x128xi1>
    %30 = vector.broadcast %29 : vector<1x1x16x128xi1> to vector<2x16x16x128xi1>
    %31 = vector.broadcast %cst_22 : f32 to vector<2x16x16x128xf32>
    %32 = arith.select %30, %28, %31 : vector<2x16x16x128xi1>, vector<2x16x16x128xf32>
    %33 = vector.extract_strided_slice %14 {offsets = [0, 0, 0], sizes = [1, 1, 128], strides = [1, 1, 1]} : vector<3x3x128xf32> to vector<1x1x128xf32>
    %34 = vector.shape_cast %33 : vector<1x1x128xf32> to vector<128xf32>
    %35 = vector.shape_cast %34 : vector<128xf32> to vector<1x1x1x128xf32>
    %36 = vector.broadcast %35 : vector<1x1x1x128xf32> to vector<2x16x16x128xf32>
    %37 = arith.mulf %27, %36 : vector<2x16x16x128xf32>
    %38 = vector.extract_strided_slice %14 {offsets = [0, 1, 0], sizes = [1, 1, 128], strides = [1, 1, 1]} : vector<3x3x128xf32> to vector<1x1x128xf32>
    %39 = vector.shape_cast %38 : vector<1x1x128xf32> to vector<128xf32>
    %40 = vector.shape_cast %39 : vector<128xf32> to vector<1x1x1x128xf32>
    %41 = vector.broadcast %40 : vector<1x1x1x128xf32> to vector<2x16x16x128xf32>
    %42 = arith.mulf %22, %41 : vector<2x16x16x128xf32>
    %43 = arith.addf %37, %42 : vector<2x16x16x128xf32>
    %44 = vector.extract_strided_slice %14 {offsets = [0, 2, 0], sizes = [1, 1, 128], strides = [1, 1, 1]} : vector<3x3x128xf32> to vector<1x1x128xf32>
    %45 = vector.shape_cast %44 : vector<1x1x128xf32> to vector<128xf32>
    %46 = vector.shape_cast %45 : vector<128xf32> to vector<1x1x1x128xf32>
    %47 = vector.broadcast %46 : vector<1x1x1x128xf32> to vector<2x16x16x128xf32>
    %48 = arith.mulf %32, %47 : vector<2x16x16x128xf32>
    %49 = arith.addf %43, %48 : vector<2x16x16x128xf32>
    %50 = vector.extract_strided_slice %14 {offsets = [1, 0, 0], sizes = [1, 1, 128], strides = [1, 1, 1]} : vector<3x3x128xf32> to vector<1x1x128xf32>
    %51 = vector.shape_cast %50 : vector<1x1x128xf32> to vector<128xf32>
    %52 = vector.shape_cast %51 : vector<128xf32> to vector<1x1x1x128xf32>
    %53 = vector.broadcast %52 : vector<1x1x1x128xf32> to vector<2x16x16x128xf32>
    %54 = arith.mulf %27, %53 : vector<2x16x16x128xf32>
    %55 = vector.extract_strided_slice %14 {offsets = [1, 1, 0], sizes = [1, 1, 128], strides = [1, 1, 1]} : vector<3x3x128xf32> to vector<1x1x128xf32>
    %56 = vector.shape_cast %55 : vector<1x1x128xf32> to vector<128xf32>
    %57 = vector.shape_cast %56 : vector<128xf32> to vector<1x1x1x128xf32>
    %58 = vector.broadcast %57 : vector<1x1x1x128xf32> to vector<2x16x16x128xf32>
    %59 = arith.mulf %22, %58 : vector<2x16x16x128xf32>
    %60 = arith.addf %54, %59 : vector<2x16x16x128xf32>
    %61 = vector.extract_strided_slice %14 {offsets = [1, 2, 0], sizes = [1, 1, 128], strides = [1, 1, 1]} : vector<3x3x128xf32> to vector<1x1x128xf32>
    %62 = vector.shape_cast %61 : vector<1x1x128xf32> to vector<128xf32>
    %63 = vector.shape_cast %62 : vector<128xf32> to vector<1x1x1x128xf32>
    %64 = vector.broadcast %63 : vector<1x1x1x128xf32> to vector<2x16x16x128xf32>
    %65 = arith.mulf %32, %64 : vector<2x16x16x128xf32>
    %66 = arith.addf %60, %65 : vector<2x16x16x128xf32>
    %67 = vector.extract_strided_slice %14 {offsets = [2, 0, 0], sizes = [1, 1, 128], strides = [1, 1, 1]} : vector<3x3x128xf32> to vector<1x1x128xf32>
    %68 = vector.shape_cast %67 : vector<1x1x128xf32> to vector<128xf32>
    %69 = vector.shape_cast %68 : vector<128xf32> to vector<1x1x1x128xf32>
    %70 = vector.broadcast %69 : vector<1x1x1x128xf32> to vector<2x16x16x128xf32>
    %71 = arith.mulf %27, %70 : vector<2x16x16x128xf32>
    %72 = vector.extract_strided_slice %14 {offsets = [2, 1, 0], sizes = [1, 1, 128], strides = [1, 1, 1]} : vector<3x3x128xf32> to vector<1x1x128xf32>
    %73 = vector.shape_cast %72 : vector<1x1x128xf32> to vector<128xf32>
    %74 = vector.shape_cast %73 : vector<128xf32> to vector<1x1x1x128xf32>
    %75 = vector.broadcast %74 : vector<1x1x1x128xf32> to vector<2x16x16x128xf32>
    %76 = arith.mulf %22, %75 : vector<2x16x16x128xf32>
    %77 = arith.addf %71, %76 : vector<2x16x16x128xf32>
    %78 = vector.extract_strided_slice %14 {offsets = [2, 2, 0], sizes = [1, 1, 128], strides = [1, 1, 1]} : vector<3x3x128xf32> to vector<1x1x128xf32>
    %79 = vector.shape_cast %78 : vector<1x1x128xf32> to vector<128xf32>
    %80 = vector.shape_cast %79 : vector<128xf32> to vector<1x1x1x128xf32>
    %81 = vector.broadcast %80 : vector<1x1x1x128xf32> to vector<2x16x16x128xf32>
    %82 = arith.mulf %32, %81 : vector<2x16x16x128xf32>
    %83 = arith.addf %77, %82 : vector<2x16x16x128xf32>
    %cst_23 = arith.constant 0.000000e+00 : f32
    %84 = vector.broadcast %cst_23 : f32 to vector<2x1x16x128xf32>
    %85 = vector.extract_strided_slice %49 {offsets = [0, 0, 0, 0], sizes = [2, 15, 16, 128], strides = [1, 1, 1, 1]} : vector<2x16x16x128xf32> to vector<2x15x16x128xf32>
    %86 = tpu.concatenate %84, %85 in 1 : vector<2x1x16x128xf32>, vector<2x15x16x128xf32> -> vector<2x16x16x128xf32>
    %87 = arith.addf %66, %86 : vector<2x16x16x128xf32>
    %88 = vector.extract_strided_slice %83 {offsets = [0, 1, 0, 0], sizes = [2, 15, 16, 128], strides = [1, 1, 1, 1]} : vector<2x16x16x128xf32> to vector<2x15x16x128xf32>
    %89 = tpu.concatenate %88, %84 in 1 : vector<2x15x16x128xf32>, vector<2x1x16x128xf32> -> vector<2x16x16x128xf32>
    %90 = arith.addf %87, %89 : vector<2x16x16x128xf32>
    %91 = vector.shape_cast %90 : vector<2x16x16x128xf32> to vector<512x128xf32>
    %92 = arith.truncf %91 : vector<512x128xf32> to vector<512x128xbf16>
    %cst_24 = arith.constant dense<0.000000e+00> : vector<512x128xf32>
    %93 = tpu.matmul %92, %16, %cst_24 {dimension_numbers = #tpu.dot_dimension_numbers<[1], [0], [0], [1], [0, 0, 1, 1], [], []>} : vector<512x128xbf16>, vector<128x128xbf16>, vector<512x128xf32> -> vector<512x128xf32>
    %cst_25 = arith.constant dense<0.000000e+00> : vector<128xf32>
    %94 = vector.multi_reduction <add>, %93, %cst_25 [0] : vector<512x128xf32> to vector<128xf32>
    %95 = vector.shape_cast %94 : vector<128xf32> to vector<1x128xf32>
    %96 = arith.mulf %93, %93 : vector<512x128xf32>
    %cst_26 = arith.constant dense<0.000000e+00> : vector<128xf32>
    %97 = vector.multi_reduction <add>, %96, %cst_26 [0] : vector<512x128xf32> to vector<128xf32>
    %98 = vector.shape_cast %97 : vector<128xf32> to vector<1x128xf32>
    %cst_27 = arith.constant 0.001953125 : f32
    %99 = vector.broadcast %cst_27 : f32 to vector<1x128xf32>
    %100 = arith.mulf %95, %99 : vector<1x128xf32>
    %cst_28 = arith.constant 0.001953125 : f32
    %101 = vector.broadcast %cst_28 : f32 to vector<1x128xf32>
    %102 = arith.mulf %98, %101 : vector<1x128xf32>
    %103 = arith.mulf %100, %100 : vector<1x128xf32>
    %104 = arith.subf %102, %103 : vector<1x128xf32>
    %cst_29 = arith.constant 0.000000e+00 : f32
    %105 = vector.broadcast %cst_29 : f32 to vector<1x128xf32>
    %106 = arith.maximumf %104, %105 : vector<1x128xf32>
    %cst_30 = arith.constant 9.99999974E-6 : f32
    %107 = vector.broadcast %cst_30 : f32 to vector<1x128xf32>
    %108 = arith.addf %106, %107 : vector<1x128xf32>
    %109 = math.rsqrt %108 : vector<1x128xf32>
    %110 = arith.mulf %18, %109 : vector<1x128xf32>
    %111 = arith.mulf %100, %110 : vector<1x128xf32>
    %112 = arith.subf %20, %111 : vector<1x128xf32>
    %113 = vector.broadcast %110 : vector<1x128xf32> to vector<512x128xf32>
    %114 = arith.mulf %93, %113 : vector<512x128xf32>
    %115 = vector.broadcast %112 : vector<1x128xf32> to vector<512x128xf32>
    %116 = arith.addf %114, %115 : vector<512x128xf32>
    %117 = vector.shape_cast %116 : vector<512x128xf32> to vector<2x16x16x128xf32>
    %118 = vector.extract_strided_slice %9 {offsets = [0, 1, 0, 0, 0], sizes = [1, 1, 3, 3, 128], strides = [1, 1, 1, 1, 1]} : vector<1x3x3x3x128xf32> to vector<1x1x3x3x128xf32>
    %119 = vector.shape_cast %118 : vector<1x1x3x3x128xf32> to vector<3x3x128xf32>
    %120 = vector.extract_strided_slice %10 {offsets = [0, 1, 0, 0], sizes = [1, 1, 128, 128], strides = [1, 1, 1, 1]} : vector<1x3x128x128xbf16> to vector<1x1x128x128xbf16>
    %121 = vector.shape_cast %120 : vector<1x1x128x128xbf16> to vector<128x128xbf16>
    %122 = vector.extract_strided_slice %11 {offsets = [0, 1, 0], sizes = [1, 1, 128], strides = [1, 1, 1]} : vector<1x3x128xf32> to vector<1x1x128xf32>
    %123 = vector.shape_cast %122 : vector<1x1x128xf32> to vector<1x128xf32>
    %124 = vector.extract_strided_slice %12 {offsets = [0, 1, 0], sizes = [1, 1, 128], strides = [1, 1, 1]} : vector<1x3x128xf32> to vector<1x1x128xf32>
    %125 = vector.shape_cast %124 : vector<1x1x128xf32> to vector<1x128xf32>
    %cst_31 = arith.constant 0.000000e+00 : f32
    %126 = vector.broadcast %cst_31 : f32 to vector<2x16x16x128xf32>
    %127 = arith.maximumf %117, %126 : vector<2x16x16x128xf32>
    %c1_i32_32 = arith.constant 1 : i32
    %128 = tpu.dynamic_rotate %127 by %c1_i32_32 dim 2 : vector<2x16x16x128xf32>, i32 -> vector<2x16x16x128xf32>
    %cst_33 = arith.constant 0.000000e+00 : f32
    %129 = vector.shape_cast %6 : vector<16x128xi1> to vector<1x1x16x128xi1>
    %130 = vector.broadcast %129 : vector<1x1x16x128xi1> to vector<2x16x16x128xi1>
    %131 = vector.broadcast %cst_33 : f32 to vector<2x16x16x128xf32>
    %132 = arith.select %130, %128, %131 : vector<2x16x16x128xi1>, vector<2x16x16x128xf32>
    %c15_i32_34 = arith.constant 15 : i32
    %133 = tpu.dynamic_rotate %127 by %c15_i32_34 dim 2 : vector<2x16x16x128xf32>, i32 -> vector<2x16x16x128xf32>
    %cst_35 = arith.constant 0.000000e+00 : f32
    %134 = vector.shape_cast %8 : vector<16x128xi1> to vector<1x1x16x128xi1>
    %135 = vector.broadcast %134 : vector<1x1x16x128xi1> to vector<2x16x16x128xi1>
    %136 = vector.broadcast %cst_35 : f32 to vector<2x16x16x128xf32>
    %137 = arith.select %135, %133, %136 : vector<2x16x16x128xi1>, vector<2x16x16x128xf32>
    %138 = vector.extract_strided_slice %119 {offsets = [0, 0, 0], sizes = [1, 1, 128], strides = [1, 1, 1]} : vector<3x3x128xf32> to vector<1x1x128xf32>
    %139 = vector.shape_cast %138 : vector<1x1x128xf32> to vector<128xf32>
    %140 = vector.shape_cast %139 : vector<128xf32> to vector<1x1x1x128xf32>
    %141 = vector.broadcast %140 : vector<1x1x1x128xf32> to vector<2x16x16x128xf32>
    %142 = arith.mulf %132, %141 : vector<2x16x16x128xf32>
    %143 = vector.extract_strided_slice %119 {offsets = [0, 1, 0], sizes = [1, 1, 128], strides = [1, 1, 1]} : vector<3x3x128xf32> to vector<1x1x128xf32>
    %144 = vector.shape_cast %143 : vector<1x1x128xf32> to vector<128xf32>
    %145 = vector.shape_cast %144 : vector<128xf32> to vector<1x1x1x128xf32>
    %146 = vector.broadcast %145 : vector<1x1x1x128xf32> to vector<2x16x16x128xf32>
    %147 = arith.mulf %127, %146 : vector<2x16x16x128xf32>
    %148 = arith.addf %142, %147 : vector<2x16x16x128xf32>
    %149 = vector.extract_strided_slice %119 {offsets = [0, 2, 0], sizes = [1, 1, 128], strides = [1, 1, 1]} : vector<3x3x128xf32> to vector<1x1x128xf32>
    %150 = vector.shape_cast %149 : vector<1x1x128xf32> to vector<128xf32>
    %151 = vector.shape_cast %150 : vector<128xf32> to vector<1x1x1x128xf32>
    %152 = vector.broadcast %151 : vector<1x1x1x128xf32> to vector<2x16x16x128xf32>
    %153 = arith.mulf %137, %152 : vector<2x16x16x128xf32>
    %154 = arith.addf %148, %153 : vector<2x16x16x128xf32>
    %155 = vector.extract_strided_slice %119 {offsets = [1, 0, 0], sizes = [1, 1, 128], strides = [1, 1, 1]} : vector<3x3x128xf32> to vector<1x1x128xf32>
    %156 = vector.shape_cast %155 : vector<1x1x128xf32> to vector<128xf32>
    %157 = vector.shape_cast %156 : vector<128xf32> to vector<1x1x1x128xf32>
    %158 = vector.broadcast %157 : vector<1x1x1x128xf32> to vector<2x16x16x128xf32>
    %159 = arith.mulf %132, %158 : vector<2x16x16x128xf32>
    %160 = vector.extract_strided_slice %119 {offsets = [1, 1, 0], sizes = [1, 1, 128], strides = [1, 1, 1]} : vector<3x3x128xf32> to vector<1x1x128xf32>
    %161 = vector.shape_cast %160 : vector<1x1x128xf32> to vector<128xf32>
    %162 = vector.shape_cast %161 : vector<128xf32> to vector<1x1x1x128xf32>
    %163 = vector.broadcast %162 : vector<1x1x1x128xf32> to vector<2x16x16x128xf32>
    %164 = arith.mulf %127, %163 : vector<2x16x16x128xf32>
    %165 = arith.addf %159, %164 : vector<2x16x16x128xf32>
    %166 = vector.extract_strided_slice %119 {offsets = [1, 2, 0], sizes = [1, 1, 128], strides = [1, 1, 1]} : vector<3x3x128xf32> to vector<1x1x128xf32>
    %167 = vector.shape_cast %166 : vector<1x1x128xf32> to vector<128xf32>
    %168 = vector.shape_cast %167 : vector<128xf32> to vector<1x1x1x128xf32>
    %169 = vector.broadcast %168 : vector<1x1x1x128xf32> to vector<2x16x16x128xf32>
    %170 = arith.mulf %137, %169 : vector<2x16x16x128xf32>
    %171 = arith.addf %165, %170 : vector<2x16x16x128xf32>
    %172 = vector.extract_strided_slice %119 {offsets = [2, 0, 0], sizes = [1, 1, 128], strides = [1, 1, 1]} : vector<3x3x128xf32> to vector<1x1x128xf32>
    %173 = vector.shape_cast %172 : vector<1x1x128xf32> to vector<128xf32>
    %174 = vector.shape_cast %173 : vector<128xf32> to vector<1x1x1x128xf32>
    %175 = vector.broadcast %174 : vector<1x1x1x128xf32> to vector<2x16x16x128xf32>
    %176 = arith.mulf %132, %175 : vector<2x16x16x128xf32>
    %177 = vector.extract_strided_slice %119 {offsets = [2, 1, 0], sizes = [1, 1, 128], strides = [1, 1, 1]} : vector<3x3x128xf32> to vector<1x1x128xf32>
    %178 = vector.shape_cast %177 : vector<1x1x128xf32> to vector<128xf32>
    %179 = vector.shape_cast %178 : vector<128xf32> to vector<1x1x1x128xf32>
    %180 = vector.broadcast %179 : vector<1x1x1x128xf32> to vector<2x16x16x128xf32>
    %181 = arith.mulf %127, %180 : vector<2x16x16x128xf32>
    %182 = arith.addf %176, %181 : vector<2x16x16x128xf32>
    %183 = vector.extract_strided_slice %119 {offsets = [2, 2, 0], sizes = [1, 1, 128], strides = [1, 1, 1]} : vector<3x3x128xf32> to vector<1x1x128xf32>
    %184 = vector.shape_cast %183 : vector<1x1x128xf32> to vector<128xf32>
    %185 = vector.shape_cast %184 : vector<128xf32> to vector<1x1x1x128xf32>
    %186 = vector.broadcast %185 : vector<1x1x1x128xf32> to vector<2x16x16x128xf32>
    %187 = arith.mulf %137, %186 : vector<2x16x16x128xf32>
    %188 = arith.addf %182, %187 : vector<2x16x16x128xf32>
    %cst_36 = arith.constant 0.000000e+00 : f32
    %189 = vector.broadcast %cst_36 : f32 to vector<2x1x16x128xf32>
    %190 = vector.extract_strided_slice %154 {offsets = [0, 0, 0, 0], sizes = [2, 15, 16, 128], strides = [1, 1, 1, 1]} : vector<2x16x16x128xf32> to vector<2x15x16x128xf32>
    %191 = tpu.concatenate %189, %190 in 1 : vector<2x1x16x128xf32>, vector<2x15x16x128xf32> -> vector<2x16x16x128xf32>
    %192 = arith.addf %171, %191 : vector<2x16x16x128xf32>
    %193 = vector.extract_strided_slice %188 {offsets = [0, 1, 0, 0], sizes = [2, 15, 16, 128], strides = [1, 1, 1, 1]} : vector<2x16x16x128xf32> to vector<2x15x16x128xf32>
    %194 = tpu.concatenate %193, %189 in 1 : vector<2x15x16x128xf32>, vector<2x1x16x128xf32> -> vector<2x16x16x128xf32>
    %195 = arith.addf %192, %194 : vector<2x16x16x128xf32>
    %196 = vector.shape_cast %195 : vector<2x16x16x128xf32> to vector<512x128xf32>
    %197 = arith.truncf %196 : vector<512x128xf32> to vector<512x128xbf16>
    %cst_37 = arith.constant dense<0.000000e+00> : vector<512x128xf32>
    %198 = tpu.matmul %197, %121, %cst_37 {dimension_numbers = #tpu.dot_dimension_numbers<[1], [0], [0], [1], [0, 0, 1, 1], [], []>} : vector<512x128xbf16>, vector<128x128xbf16>, vector<512x128xf32> -> vector<512x128xf32>
    %cst_38 = arith.constant dense<0.000000e+00> : vector<128xf32>
    %199 = vector.multi_reduction <add>, %198, %cst_38 [0] : vector<512x128xf32> to vector<128xf32>
    %200 = vector.shape_cast %199 : vector<128xf32> to vector<1x128xf32>
    %201 = arith.mulf %198, %198 : vector<512x128xf32>
    %cst_39 = arith.constant dense<0.000000e+00> : vector<128xf32>
    %202 = vector.multi_reduction <add>, %201, %cst_39 [0] : vector<512x128xf32> to vector<128xf32>
    %203 = vector.shape_cast %202 : vector<128xf32> to vector<1x128xf32>
    %cst_40 = arith.constant 0.001953125 : f32
    %204 = vector.broadcast %cst_40 : f32 to vector<1x128xf32>
    %205 = arith.mulf %200, %204 : vector<1x128xf32>
    %cst_41 = arith.constant 0.001953125 : f32
    %206 = vector.broadcast %cst_41 : f32 to vector<1x128xf32>
    %207 = arith.mulf %203, %206 : vector<1x128xf32>
    %208 = arith.mulf %205, %205 : vector<1x128xf32>
    %209 = arith.subf %207, %208 : vector<1x128xf32>
    %cst_42 = arith.constant 0.000000e+00 : f32
    %210 = vector.broadcast %cst_42 : f32 to vector<1x128xf32>
    %211 = arith.maximumf %209, %210 : vector<1x128xf32>
    %cst_43 = arith.constant 9.99999974E-6 : f32
    %212 = vector.broadcast %cst_43 : f32 to vector<1x128xf32>
    %213 = arith.addf %211, %212 : vector<1x128xf32>
    %214 = math.rsqrt %213 : vector<1x128xf32>
    %215 = arith.mulf %123, %214 : vector<1x128xf32>
    %216 = arith.mulf %205, %215 : vector<1x128xf32>
    %217 = arith.subf %125, %216 : vector<1x128xf32>
    %218 = vector.broadcast %215 : vector<1x128xf32> to vector<512x128xf32>
    %219 = arith.mulf %198, %218 : vector<512x128xf32>
    %220 = vector.broadcast %217 : vector<1x128xf32> to vector<512x128xf32>
    %221 = arith.addf %219, %220 : vector<512x128xf32>
    %222 = vector.shape_cast %221 : vector<512x128xf32> to vector<2x16x16x128xf32>
    %223 = vector.extract_strided_slice %9 {offsets = [0, 2, 0, 0, 0], sizes = [1, 1, 3, 3, 128], strides = [1, 1, 1, 1, 1]} : vector<1x3x3x3x128xf32> to vector<1x1x3x3x128xf32>
    %224 = vector.shape_cast %223 : vector<1x1x3x3x128xf32> to vector<3x3x128xf32>
    %225 = vector.extract_strided_slice %10 {offsets = [0, 2, 0, 0], sizes = [1, 1, 128, 128], strides = [1, 1, 1, 1]} : vector<1x3x128x128xbf16> to vector<1x1x128x128xbf16>
    %226 = vector.shape_cast %225 : vector<1x1x128x128xbf16> to vector<128x128xbf16>
    %227 = vector.extract_strided_slice %11 {offsets = [0, 2, 0], sizes = [1, 1, 128], strides = [1, 1, 1]} : vector<1x3x128xf32> to vector<1x1x128xf32>
    %228 = vector.shape_cast %227 : vector<1x1x128xf32> to vector<1x128xf32>
    %229 = vector.extract_strided_slice %12 {offsets = [0, 2, 0], sizes = [1, 1, 128], strides = [1, 1, 1]} : vector<1x3x128xf32> to vector<1x1x128xf32>
    %230 = vector.shape_cast %229 : vector<1x1x128xf32> to vector<1x128xf32>
    %cst_44 = arith.constant 0.000000e+00 : f32
    %231 = vector.broadcast %cst_44 : f32 to vector<2x16x16x128xf32>
    %232 = arith.maximumf %222, %231 : vector<2x16x16x128xf32>
    %c1_i32_45 = arith.constant 1 : i32
    %233 = tpu.dynamic_rotate %232 by %c1_i32_45 dim 2 : vector<2x16x16x128xf32>, i32 -> vector<2x16x16x128xf32>
    %cst_46 = arith.constant 0.000000e+00 : f32
    %234 = vector.shape_cast %6 : vector<16x128xi1> to vector<1x1x16x128xi1>
    %235 = vector.broadcast %234 : vector<1x1x16x128xi1> to vector<2x16x16x128xi1>
    %236 = vector.broadcast %cst_46 : f32 to vector<2x16x16x128xf32>
    %237 = arith.select %235, %233, %236 : vector<2x16x16x128xi1>, vector<2x16x16x128xf32>
    %c15_i32_47 = arith.constant 15 : i32
    %238 = tpu.dynamic_rotate %232 by %c15_i32_47 dim 2 : vector<2x16x16x128xf32>, i32 -> vector<2x16x16x128xf32>
    %cst_48 = arith.constant 0.000000e+00 : f32
    %239 = vector.shape_cast %8 : vector<16x128xi1> to vector<1x1x16x128xi1>
    %240 = vector.broadcast %239 : vector<1x1x16x128xi1> to vector<2x16x16x128xi1>
    %241 = vector.broadcast %cst_48 : f32 to vector<2x16x16x128xf32>
    %242 = arith.select %240, %238, %241 : vector<2x16x16x128xi1>, vector<2x16x16x128xf32>
    %243 = vector.extract_strided_slice %224 {offsets = [0, 0, 0], sizes = [1, 1, 128], strides = [1, 1, 1]} : vector<3x3x128xf32> to vector<1x1x128xf32>
    %244 = vector.shape_cast %243 : vector<1x1x128xf32> to vector<128xf32>
    %245 = vector.shape_cast %244 : vector<128xf32> to vector<1x1x1x128xf32>
    %246 = vector.broadcast %245 : vector<1x1x1x128xf32> to vector<2x16x16x128xf32>
    %247 = arith.mulf %237, %246 : vector<2x16x16x128xf32>
    %248 = vector.extract_strided_slice %224 {offsets = [0, 1, 0], sizes = [1, 1, 128], strides = [1, 1, 1]} : vector<3x3x128xf32> to vector<1x1x128xf32>
    %249 = vector.shape_cast %248 : vector<1x1x128xf32> to vector<128xf32>
    %250 = vector.shape_cast %249 : vector<128xf32> to vector<1x1x1x128xf32>
    %251 = vector.broadcast %250 : vector<1x1x1x128xf32> to vector<2x16x16x128xf32>
    %252 = arith.mulf %232, %251 : vector<2x16x16x128xf32>
    %253 = arith.addf %247, %252 : vector<2x16x16x128xf32>
    %254 = vector.extract_strided_slice %224 {offsets = [0, 2, 0], sizes = [1, 1, 128], strides = [1, 1, 1]} : vector<3x3x128xf32> to vector<1x1x128xf32>
    %255 = vector.shape_cast %254 : vector<1x1x128xf32> to vector<128xf32>
    %256 = vector.shape_cast %255 : vector<128xf32> to vector<1x1x1x128xf32>
    %257 = vector.broadcast %256 : vector<1x1x1x128xf32> to vector<2x16x16x128xf32>
    %258 = arith.mulf %242, %257 : vector<2x16x16x128xf32>
    %259 = arith.addf %253, %258 : vector<2x16x16x128xf32>
    %260 = vector.extract_strided_slice %224 {offsets = [1, 0, 0], sizes = [1, 1, 128], strides = [1, 1, 1]} : vector<3x3x128xf32> to vector<1x1x128xf32>
    %261 = vector.shape_cast %260 : vector<1x1x128xf32> to vector<128xf32>
    %262 = vector.shape_cast %261 : vector<128xf32> to vector<1x1x1x128xf32>
    %263 = vector.broadcast %262 : vector<1x1x1x128xf32> to vector<2x16x16x128xf32>
    %264 = arith.mulf %237, %263 : vector<2x16x16x128xf32>
    %265 = vector.extract_strided_slice %224 {offsets = [1, 1, 0], sizes = [1, 1, 128], strides = [1, 1, 1]} : vector<3x3x128xf32> to vector<1x1x128xf32>
    %266 = vector.shape_cast %265 : vector<1x1x128xf32> to vector<128xf32>
    %267 = vector.shape_cast %266 : vector<128xf32> to vector<1x1x1x128xf32>
    %268 = vector.broadcast %267 : vector<1x1x1x128xf32> to vector<2x16x16x128xf32>
    %269 = arith.mulf %232, %268 : vector<2x16x16x128xf32>
    %270 = arith.addf %264, %269 : vector<2x16x16x128xf32>
    %271 = vector.extract_strided_slice %224 {offsets = [1, 2, 0], sizes = [1, 1, 128], strides = [1, 1, 1]} : vector<3x3x128xf32> to vector<1x1x128xf32>
    %272 = vector.shape_cast %271 : vector<1x1x128xf32> to vector<128xf32>
    %273 = vector.shape_cast %272 : vector<128xf32> to vector<1x1x1x128xf32>
    %274 = vector.broadcast %273 : vector<1x1x1x128xf32> to vector<2x16x16x128xf32>
    %275 = arith.mulf %242, %274 : vector<2x16x16x128xf32>
    %276 = arith.addf %270, %275 : vector<2x16x16x128xf32>
    %277 = vector.extract_strided_slice %224 {offsets = [2, 0, 0], sizes = [1, 1, 128], strides = [1, 1, 1]} : vector<3x3x128xf32> to vector<1x1x128xf32>
    %278 = vector.shape_cast %277 : vector<1x1x128xf32> to vector<128xf32>
    %279 = vector.shape_cast %278 : vector<128xf32> to vector<1x1x1x128xf32>
    %280 = vector.broadcast %279 : vector<1x1x1x128xf32> to vector<2x16x16x128xf32>
    %281 = arith.mulf %237, %280 : vector<2x16x16x128xf32>
    %282 = vector.extract_strided_slice %224 {offsets = [2, 1, 0], sizes = [1, 1, 128], strides = [1, 1, 1]} : vector<3x3x128xf32> to vector<1x1x128xf32>
    %283 = vector.shape_cast %282 : vector<1x1x128xf32> to vector<128xf32>
    %284 = vector.shape_cast %283 : vector<128xf32> to vector<1x1x1x128xf32>
    %285 = vector.broadcast %284 : vector<1x1x1x128xf32> to vector<2x16x16x128xf32>
    %286 = arith.mulf %232, %285 : vector<2x16x16x128xf32>
    %287 = arith.addf %281, %286 : vector<2x16x16x128xf32>
    %288 = vector.extract_strided_slice %224 {offsets = [2, 2, 0], sizes = [1, 1, 128], strides = [1, 1, 1]} : vector<3x3x128xf32> to vector<1x1x128xf32>
    %289 = vector.shape_cast %288 : vector<1x1x128xf32> to vector<128xf32>
    %290 = vector.shape_cast %289 : vector<128xf32> to vector<1x1x1x128xf32>
    %291 = vector.broadcast %290 : vector<1x1x1x128xf32> to vector<2x16x16x128xf32>
    %292 = arith.mulf %242, %291 : vector<2x16x16x128xf32>
    %293 = arith.addf %287, %292 : vector<2x16x16x128xf32>
    %cst_49 = arith.constant 0.000000e+00 : f32
    %294 = vector.broadcast %cst_49 : f32 to vector<2x1x16x128xf32>
    %295 = vector.extract_strided_slice %259 {offsets = [0, 0, 0, 0], sizes = [2, 15, 16, 128], strides = [1, 1, 1, 1]} : vector<2x16x16x128xf32> to vector<2x15x16x128xf32>
    %296 = tpu.concatenate %294, %295 in 1 : vector<2x1x16x128xf32>, vector<2x15x16x128xf32> -> vector<2x16x16x128xf32>
    %297 = arith.addf %276, %296 : vector<2x16x16x128xf32>
    %298 = vector.extract_strided_slice %293 {offsets = [0, 1, 0, 0], sizes = [2, 15, 16, 128], strides = [1, 1, 1, 1]} : vector<2x16x16x128xf32> to vector<2x15x16x128xf32>
    %299 = tpu.concatenate %298, %294 in 1 : vector<2x15x16x128xf32>, vector<2x1x16x128xf32> -> vector<2x16x16x128xf32>
    %300 = arith.addf %297, %299 : vector<2x16x16x128xf32>
    %301 = vector.shape_cast %300 : vector<2x16x16x128xf32> to vector<512x128xf32>
    %302 = arith.truncf %301 : vector<512x128xf32> to vector<512x128xbf16>
    %cst_50 = arith.constant dense<0.000000e+00> : vector<512x128xf32>
    %303 = tpu.matmul %302, %226, %cst_50 {dimension_numbers = #tpu.dot_dimension_numbers<[1], [0], [0], [1], [0, 0, 1, 1], [], []>} : vector<512x128xbf16>, vector<128x128xbf16>, vector<512x128xf32> -> vector<512x128xf32>
    %cst_51 = arith.constant dense<0.000000e+00> : vector<128xf32>
    %304 = vector.multi_reduction <add>, %303, %cst_51 [0] : vector<512x128xf32> to vector<128xf32>
    %305 = vector.shape_cast %304 : vector<128xf32> to vector<1x128xf32>
    %306 = arith.mulf %303, %303 : vector<512x128xf32>
    %cst_52 = arith.constant dense<0.000000e+00> : vector<128xf32>
    %307 = vector.multi_reduction <add>, %306, %cst_52 [0] : vector<512x128xf32> to vector<128xf32>
    %308 = vector.shape_cast %307 : vector<128xf32> to vector<1x128xf32>
    %cst_53 = arith.constant 0.001953125 : f32
    %309 = vector.broadcast %cst_53 : f32 to vector<1x128xf32>
    %310 = arith.mulf %305, %309 : vector<1x128xf32>
    %cst_54 = arith.constant 0.001953125 : f32
    %311 = vector.broadcast %cst_54 : f32 to vector<1x128xf32>
    %312 = arith.mulf %308, %311 : vector<1x128xf32>
    %313 = arith.mulf %310, %310 : vector<1x128xf32>
    %314 = arith.subf %312, %313 : vector<1x128xf32>
    %cst_55 = arith.constant 0.000000e+00 : f32
    %315 = vector.broadcast %cst_55 : f32 to vector<1x128xf32>
    %316 = arith.maximumf %314, %315 : vector<1x128xf32>
    %cst_56 = arith.constant 9.99999974E-6 : f32
    %317 = vector.broadcast %cst_56 : f32 to vector<1x128xf32>
    %318 = arith.addf %316, %317 : vector<1x128xf32>
    %319 = math.rsqrt %318 : vector<1x128xf32>
    %320 = arith.mulf %228, %319 : vector<1x128xf32>
    %321 = arith.mulf %310, %320 : vector<1x128xf32>
    %322 = arith.subf %230, %321 : vector<1x128xf32>
    %323 = vector.broadcast %320 : vector<1x128xf32> to vector<512x128xf32>
    %324 = arith.mulf %303, %323 : vector<512x128xf32>
    %325 = vector.broadcast %322 : vector<1x128xf32> to vector<512x128xf32>
    %326 = arith.addf %324, %325 : vector<512x128xf32>
    %327 = vector.shape_cast %326 : vector<512x128xf32> to vector<2x16x16x128xf32>
    %328 = arith.addf %3, %327 : vector<2x16x16x128xf32>
    %c0_57 = arith.constant 0 : index
    %c0_58 = arith.constant 0 : index
    %c0_59 = arith.constant 0 : index
    %c0_60 = arith.constant 0 : index
    %329 = vector.load %arg6[%c0_57, %c0_58, %c0_59, %c0_60] : memref<2x16x16x128xf32, #tpu.memory_space<vmem>>, vector<2x16x16x128xf32>
    tpu.vector_store %arg6[%c0_57, %c0_58, %c0_59, %c0_60], %328 {strides = array<i32>} : memref<2x16x16x128xf32, #tpu.memory_space<vmem>>, vector<2x16x16x128xf32>,
    return
  }
  func.func @transform_0(%arg0: i32) -> (i32, i32, i32, i32) {
    %c0_i32 = arith.constant 0 : i32
    %c0_i32_0 = arith.constant 0 : i32
    %c0_i32_1 = arith.constant 0 : i32
    %c0_i32_2 = arith.constant 0 : i32
    %c0_i32_3 = arith.constant 0 : i32
    return %c0_i32, %c0_i32_0, %c0_i32_1, %c0_i32_2 : i32, i32, i32, i32
  }
  func.func @transform_1(%arg0: i32) -> (i32, i32, i32, i32, i32) {
    %c0_i32 = arith.constant 0 : i32
    %c0_i32_0 = arith.constant 0 : i32
    %c0_i32_1 = arith.constant 0 : i32
    %c0_i32_2 = arith.constant 0 : i32
    %c0_i32_3 = arith.constant 0 : i32
    return %arg0, %c0_i32, %c0_i32_0, %c0_i32_1, %c0_i32_2 : i32, i32, i32, i32, i32
  }
  func.func @transform_2(%arg0: i32) -> (i32, i32, i32, i32) {
    %c0_i32 = arith.constant 0 : i32
    %c0_i32_0 = arith.constant 0 : i32
    %c0_i32_1 = arith.constant 0 : i32
    %c0_i32_2 = arith.constant 0 : i32
    return %arg0, %c0_i32, %c0_i32_0, %c0_i32_1 : i32, i32, i32, i32
  }
  func.func @transform_3(%arg0: i32) -> (i32, i32, i32) {
    %c0_i32 = arith.constant 0 : i32
    %c0_i32_0 = arith.constant 0 : i32
    %c0_i32_1 = arith.constant 0 : i32
    return %arg0, %c0_i32, %c0_i32_0 : i32, i32, i32
  }
  func.func @transform_4(%arg0: i32) -> (i32, i32, i32) {
    %c0_i32 = arith.constant 0 : i32
    %c0_i32_0 = arith.constant 0 : i32
    %c0_i32_1 = arith.constant 0 : i32
    return %arg0, %c0_i32, %c0_i32_0 : i32, i32, i32
  }
  func.func @transform_5(%arg0: i32) -> (i32, i32, i32, i32) {
    %c0_i32 = arith.constant 0 : i32
    %c0_i32_0 = arith.constant 0 : i32
    %c0_i32_1 = arith.constant 0 : i32
    %c0_i32_2 = arith.constant 0 : i32
    %c0_i32_3 = arith.constant 0 : i32
    return %c0_i32, %c0_i32_0, %c0_i32_1, %c0_i32_2 : i32, i32, i32, i32
  }
}

</mosaic_0001>

<bundles_post_ra>
// kernel: tpu_custom_call.1
= control target key start
LH: loop header
LB: loop body
LE: loop exit
PB: predicated region body
PF: predicated region fallthrough
CT: control target
= control target key end

     0   :  { %10 = vsyncpa [#allocation3], 0  ;;  %s17366_s0 = inlined_call_operand.vmem [shape: f32[2,16,16,128], index: 0, kind: input, shape index: {}]   ;;  %s17367_s1 = inlined_call_operand.vmem [shape: f32[8,3,3,3,128], index: 1, kind: input, shape index: {}]   ;;  %s17368_s2 = inlined_call_operand.hbm [shape: bf16[8,3,128,128], index: 2, kind: input, shape index: {}]   ;;  %s17369_s3 = inlined_call_operand.vmem [shape: f32[8,3,128], index: 3, kind: input, shape index: {}]   ;;  %s17370_s4 = inlined_call_operand.vmem [shape: f32[8,3,128], index: 4, kind: input, shape index: {}]   ;;  %s17371_s5 = inlined_call_operand.hbm [shape: f32[2,16,16,128], index: 5, kind: output, shape index: {}]  }
   0x1   :  { %12 = vsyncpa [#allocation3 + $0x1], 0 }
   0x2   :  { %13 = vsyncpa [#allocation4], 0  ;;  %s8225_s18 = smov 0   ;;  %s8227_s19 = smov 0  }
   0x3   :  { %s8229_s20 = smov 0   ;;  %s8231_s21 = smov 0  }
   0x4 LB: > { %s8244_s22 = sadd.s32 4294967295, %s8187_s21   ;;  %s8247_s23 = sadd.s32 1, %s8187_s21   ;;  %s8187_s21 = sphi %s8231_s21, %s18458_s21   ;;  %s8183_s20 = sphi %s8229_s20, %s18457_s20   ;;  %s8179_s19 = sphi %s8227_s19, %s18456_s19   ;;  %s8175_s18 = sphi %s8225_s18, %s18455_s18  }
   0x5   : > { %s70_s24 = ssub.s32 %s8187_s21, %s8247_s23  ;;  %s73_s25 = sadd.s32 1, %s8183_s20 }
   0x6   : > { %p71_p0 = scmp.eq.s32.totalorder %s70_s24, 0  ;;  %p80_p1 = scmp.ne.s32.totalorder %s8183_s20, %s8179_s19 }
   0x7   : > { %p81_p2 = scmp.eq.s32.totalorder %s8187_s21, 0  ;;  %p86_p3 = scmp.ne.s32.totalorder %s8179_s19, %s8175_s18 }
   0x8   : > { %s8257_s26 = scalar_select %p71_p0, %s8183_s20, %s73_s25  }
   0x9   : > { %p82_p4 = por %p81_p2, %p80_p1  ;;  %p87_p5 = scmp.eq.s32.totalorder %s8244_s22, 0 }
   0xa   : > { %p7955_p6 = scmp.lt.s32.totalorder %s8187_s21, 8  ;;  %s194_s28 = sand.u32 1, %s8183_s20  }
   0xb   : > { %p8261_p7 = por %p87_p5, %p86_p3  ;;  %s7941_s29 = smul.u32 192, %s194_s28 }
   0xc   : > { %s7942_s30 = smul.u32 3072, %s8187_s21  ;;  %p8267_p8 = pnand %p7955_p6, %p82_p4 }
   0xd   : > { %s198_s10 = scalar_lea.vmem [#allocation2], %s7941_s29  ;;  %s8279_s12 = scalar_lea.sflag [#allocation3], %s194_s28 }
   0xe   : > { %s8274_s9 = scalar_lea.hbm %s17368_s2, %s7942_s30  ;;  %s205_s11 = sshll.u32 %s198_s10, 4  ;;  %s8276_s11 = int_to_ptr.vmem [resolvable:$true] %s205_s11 }
   0xf   : > { %s8093_s13 = scalar_lea.hbm %s8274_s9, 3072  ;;  %p8095_p11 = pneg %p8267_p8 }
  0x10   : > { %p8094_p10 = scmp.ne.s32.totalorder %s8274_s9, %s8093_s13  ;;  %s8098_s16 = scalar_lea.hbm %s17368_s2, 24576 }
  0x11   : > { %p8099_p0 = scmp.lt.u32.totalorder %s8274_s9, %s17368_s2  ;;  %p8100_p1 = scmp.lt.u32.totalorder %s8098_s16, %s8093_s13 }
  0x12   : > { %p8096_p12 = pnand %p8095_p11, %p8094_p10  ;;  %p8102_p3 = scmp.lt.u32.totalorder %s8093_s13, %s8274_s9 }
  0x13   : > { %p8101_p2 = por %p8100_p1, %p8099_p0 }
  0x14   : > { %p8097_p13 = pneg %p8096_p12 }
  0x15   : > { %p8103_p4 = por %p8102_p3, %p8101_p2 }
  0x17   : > { %p8104_p5 = pnand %p8103_p4, %p8097_p13 }
  0x19   : > { %8107 = shalt.err (!%p8104_p5)
}
  0x1a   : > { %s8108_s24 = scalar_lea.vmem %s8276_s11, 3072  ;;  %s8189_s25 = smov [#allocation2]  }
  0x1b   : > { %p8109_p6 = scmp.ne.s32.totalorder %s8276_s11, %s8108_s24  ;;  %s8113_s28 = sshll.u32 %s8189_s25, 4  ;;  %s8114_s28 = int_to_ptr.vmem [resolvable:$false] %s8113_s28 }
  0x1c   : > { %s8115_s29 = scalar_lea.vmem %s8114_s28, 6144  ;;  %p8116_p9 = scmp.lt.s32.totalorder %s8276_s11, %s8114_s28 }
  0x1d   : > { %p8111_p10 = pnand %p8109_p6, %p8095_p11  ;;  %p8117_p0 = scmp.lt.s32.totalorder %s8115_s29, %s8108_s24 }
  0x1f   : > { %p8112_p12 = pneg %p8111_p10  ;;  %p8118_p1 = por %p8117_p0, %p8116_p9 }
  0x21   : > { %p8119_p2 = pnand %p8118_p1, %p8112_p12 }
  0x23   : > { %8122 = shalt.err (!%p8119_p2)
}
  0x24   : > { %s8190_s30 = smov 64   ;;  %s8191_s7 = smov 4  }
  0x25   : > { %7954 = dma.hbm_to_vmem [thread:$0]  (!%p8267_p8), %s8274_s9, 3072, %s8276_s11, %s8279_s12, %s8190_s30, %s8190_s30, %s8191_s7  }
  0x26   : > { %p227_p11 = scmp.lt.s32.totalorder %s8187_s21, 9  ;;  %p17664_p13 = scmp.ge.s32.totalorder %s8187_s21, 1 }
  0x28   : > { %p228_p3 = pnand %p17664_p13, %p227_p11 }
  0x2a   : > { %231 = sbr.rel (%p228_p3) target bundleno = 2196 (0x894), region = 40 }
  0x31   : > { %s233_s8 = sand.u32 1, %s8179_s19  }
  0x32   : > { %s7943_s10 = smul.u32 192, %s233_s8  ;;  %s234_s13 = scalar_lea.sflag [#allocation3], %s233_s8 }
  0x34   : > { %s8311_s14 = scalar_lea.vmem [#allocation2], %s7943_s10 }
  0x35   : > { %8166 = dma.done.wait (%p8261_p7), %s234_s13, 3072  }
  0x36   : > { %8168 = vsyncadd (%p8261_p7), %s234_s13, 4294964224  ;;  %p272_p9 = scmp.lt.s32.totalorder %s8244_s22, 7  ;;  %p7536_p7 = scmp.ne.s32.totalorder %s8244_s22, 0 }
  0x37   : > { %v290_v0 = vld [vmem:[%s17366_s0] sm:$0xff] (!%p7536_p7)  ;;  %v291_v1 = vld [vmem:[%s17366_s0 + $0x8] sm:$0xff] (!%p7536_p7)  ;;  %v292_v2 = vld [vmem:[%s17366_s0 + $0x10] sm:$0xff] (!%p7536_p7) }
  0x38   : > { %s273_s6 = scalar_select %p272_p9, %s8244_s22, 7 }
  0x39   : > { %289 = sbr.rel (%p7536_p7) target bundleno = 89 (0x59), region = 48  ;;  %354 = vst [vmem:[#allocation5] sm:$0xff] (!%p7536_p7), %v290_v0  ;;  %355 = vst [vmem:[#allocation5 + $0x8] sm:$0xff] (!%p7536_p7), %v291_v1  ;;  %v293_v3 = vld [vmem:[%s17366_s0 + $0x18] sm:$0xff] (!%p7536_p7)  ;;  %v294_v4 = vld [vmem:[%s17366_s0 + $0x20] sm:$0xff] (!%p7536_p7) }
  0x3a   : > { %s7944_s9 = smul.u32 36, %s273_s6  ;;  %s7534_s21 = sshll.u32 %s273_s6, 2  ;;  %356 = vst [vmem:[#allocation5 + $0x10] sm:$0xff] (!%p7536_p7), %v292_v2  ;;  %v295_v5 = vld [vmem:[%s17366_s0 + $0x28] sm:$0xff] (!%p7536_p7)  ;;  %357 = vst [vmem:[#allocation5 + $0x18] sm:$0xff] (!%p7536_p7), %v293_v3  ;;  %v296_v6 = vld [vmem:[%s17366_s0 + $0x30] sm:$0xff] (!%p7536_p7) }
  0x3b   : > { %s8322_s15 = scalar_lea.vmem %s17369_s3, %s7534_s21  ;;  %s8327_s18 = scalar_lea.vmem %s17370_s4, %s7534_s21  ;;  %358 = vst [vmem:[#allocation5 + $0x20] sm:$0xff] (!%p7536_p7), %v294_v4  ;;  %359 = vst [vmem:[#allocation5 + $0x28] sm:$0xff] (!%p7536_p7), %v295_v5  ;;  %v297_v7 = vld [vmem:[%s17366_s0 + $0x38] sm:$0xff] (!%p7536_p7)  ;;  %v298_v8 = vld [vmem:[%s17366_s0 + $0x40] sm:$0xff] (!%p7536_p7) }
  0x3c   : > { %s8332_s27 = scalar_lea.vmem %s17367_s1, %s7944_s9  ;;  %360 = vst [vmem:[#allocation5 + $0x30] sm:$0xff] (!%p7536_p7), %v296_v6  ;;  %361 = vst [vmem:[#allocation5 + $0x38] sm:$0xff] (!%p7536_p7), %v297_v7  ;;  %v299_v9 = vld [vmem:[%s17366_s0 + $0x48] sm:$0xff] (!%p7536_p7)  ;;  %v300_v10 = vld [vmem:[%s17366_s0 + $0x50] sm:$0xff] (!%p7536_p7) }
  0x3d   : > { %362 = vst [vmem:[#allocation5 + $0x40] sm:$0xff] (!%p7536_p7), %v298_v8  ;;  %v301_v11 = vld [vmem:[%s17366_s0 + $0x58] sm:$0xff] (!%p7536_p7)  ;;  %363 = vst [vmem:[#allocation5 + $0x48] sm:$0xff] (!%p7536_p7), %v299_v9  ;;  %v302_v12 = vld [vmem:[%s17366_s0 + $0x60] sm:$0xff] (!%p7536_p7) }
  0x3e   : > { %364 = vst [vmem:[#allocation5 + $0x50] sm:$0xff] (!%p7536_p7), %v300_v10  ;;  %365 = vst [vmem:[#allocation5 + $0x58] sm:$0xff] (!%p7536_p7), %v301_v11  ;;  %v303_v13 = vld [vmem:[%s17366_s0 + $0x68] sm:$0xff] (!%p7536_p7)  ;;  %v304_v14 = vld [vmem:[%s17366_s0 + $0x70] sm:$0xff] (!%p7536_p7) }
  0x3f   : > { %366 = vst [vmem:[#allocation5 + $0x60] sm:$0xff] (!%p7536_p7), %v302_v12  ;;  %367 = vst [vmem:[#allocation5 + $0x68] sm:$0xff] (!%p7536_p7), %v303_v13  ;;  %v305_v15 = vld [vmem:[%s17366_s0 + $0x78] sm:$0xff] (!%p7536_p7)  ;;  %v306_v16 = vld [vmem:[%s17366_s0 + $0x80] sm:$0xff] (!%p7536_p7) }
  0x40   : > { %368 = vst [vmem:[#allocation5 + $0x70] sm:$0xff] %v304_v14  ;;  %v307_v17 = vld [vmem:[%s17366_s0 + $0x88] sm:$0xff]  ;;  %369 = vst [vmem:[#allocation5 + $0x78] sm:$0xff] %v305_v15  ;;  %v308_v18 = vld [vmem:[%s17366_s0 + $0x90] sm:$0xff] }
  0x41   : > { %370 = vst [vmem:[#allocation5 + $0x80] sm:$0xff] %v306_v16  ;;  %371 = vst [vmem:[#allocation5 + $0x88] sm:$0xff] %v307_v17  ;;  %v309_v19 = vld [vmem:[%s17366_s0 + $0x98] sm:$0xff]  ;;  %v310_v20 = vld [vmem:[%s17366_s0 + $0xa0] sm:$0xff] }
  0x42   : > { %372 = vst [vmem:[#allocation5 + $0x90] sm:$0xff] %v308_v18  ;;  %373 = vst [vmem:[#allocation5 + $0x98] sm:$0xff] %v309_v19  ;;  %v311_v21 = vld [vmem:[%s17366_s0 + $0xa8] sm:$0xff]  ;;  %v312_v22 = vld [vmem:[%s17366_s0 + $0xb0] sm:$0xff] }
  0x43   : > { %374 = vst [vmem:[#allocation5 + $0xa0] sm:$0xff] %v310_v20  ;;  %v313_v23 = vld [vmem:[%s17366_s0 + $0xb8] sm:$0xff]  ;;  %375 = vst [vmem:[#allocation5 + $0xa8] sm:$0xff] %v311_v21  ;;  %v314_v24 = vld [vmem:[%s17366_s0 + $0xc0] sm:$0xff] }
  0x44   : > { %376 = vst [vmem:[#allocation5 + $0xb0] sm:$0xff] %v312_v22  ;;  %377 = vst [vmem:[#allocation5 + $0xb8] sm:$0xff] %v313_v23  ;;  %v315_v25 = vld [vmem:[%s17366_s0 + $0xc8] sm:$0xff]  ;;  %v316_v26 = vld [vmem:[%s17366_s0 + $0xd0] sm:$0xff] }
  0x45   : > { %378 = vst [vmem:[#allocation5 + $0xc0] sm:$0xff] %v314_v24  ;;  %379 = vst [vmem:[#allocation5 + $0xc8] sm:$0xff] %v315_v25  ;;  %v317_v27 = vld [vmem:[%s17366_s0 + $0xd8] sm:$0xff]  ;;  %v318_v28 = vld [vmem:[%s17366_s0 + $0xe0] sm:$0xff] }
  0x46   : > { %380 = vst [vmem:[#allocation5 + $0xd0] sm:$0xff] %v316_v26  ;;  %v319_v29 = vld [vmem:[%s17366_s0 + $0xe8] sm:$0xff]  ;;  %381 = vst [vmem:[#allocation5 + $0xd8] sm:$0xff] %v317_v27  ;;  %v320_v30 = vld [vmem:[%s17366_s0 + $0xf0] sm:$0xff] }
  0x47   : > { %382 = vst [vmem:[#allocation5 + $0xe0] sm:$0xff] %v318_v28  ;;  %383 = vst [vmem:[#allocation5 + $0xe8] sm:$0xff] %v319_v29  ;;  %v321_v31 = vld [vmem:[%s17366_s0 + $0xf8] sm:$0xff]  ;;  %v322_v32 = vld [vmem:[%s17366_s0 + $0x100] sm:$0xff] }
  0x48   : > { %384 = vst [vmem:[#allocation5 + $0xf0] sm:$0xff] %v320_v30  ;;  %385 = vst [vmem:[#allocation5 + $0xf8] sm:$0xff] %v321_v31  ;;  %v323_v33 = vld [vmem:[%s17366_s0 + $0x108] sm:$0xff]  ;;  %v324_v34 = vld [vmem:[%s17366_s0 + $0x110] sm:$0xff] }
  0x49   : > { %386 = vst [vmem:[#allocation5 + $0x100] sm:$0xff] %v322_v32  ;;  %v325_v35 = vld [vmem:[%s17366_s0 + $0x118] sm:$0xff]  ;;  %387 = vst [vmem:[#allocation5 + $0x108] sm:$0xff] %v323_v33  ;;  %v326_v36 = vld [vmem:[%s17366_s0 + $0x120] sm:$0xff] }
  0x4a   : > { %388 = vst [vmem:[#allocation5 + $0x110] sm:$0xff] %v324_v34  ;;  %389 = vst [vmem:[#allocation5 + $0x118] sm:$0xff] %v325_v35  ;;  %v327_v37 = vld [vmem:[%s17366_s0 + $0x128] sm:$0xff]  ;;  %v328_v38 = vld [vmem:[%s17366_s0 + $0x130] sm:$0xff] }
  0x4b   : > { %390 = vst [vmem:[#allocation5 + $0x120] sm:$0xff] %v326_v36  ;;  %391 = vst [vmem:[#allocation5 + $0x128] sm:$0xff] %v327_v37  ;;  %v329_v39 = vld [vmem:[%s17366_s0 + $0x138] sm:$0xff]  ;;  %v330_v40 = vld [vmem:[%s17366_s0 + $0x140] sm:$0xff] }
  0x4c   : > { %392 = vst [vmem:[#allocation5 + $0x130] sm:$0xff] %v328_v38  ;;  %v331_v41 = vld [vmem:[%s17366_s0 + $0x148] sm:$0xff]  ;;  %393 = vst [vmem:[#allocation5 + $0x138] sm:$0xff] %v329_v39  ;;  %v332_v42 = vld [vmem:[%s17366_s0 + $0x150] sm:$0xff] }
  0x4d   : > { %394 = vst [vmem:[#allocation5 + $0x140] sm:$0xff] %v330_v40  ;;  %395 = vst [vmem:[#allocation5 + $0x148] sm:$0xff] %v331_v41  ;;  %v333_v43 = vld [vmem:[%s17366_s0 + $0x158] sm:$0xff]  ;;  %v334_v44 = vld [vmem:[%s17366_s0 + $0x160] sm:$0xff] }
  0x4e   : > { %396 = vst [vmem:[#allocation5 + $0x150] sm:$0xff] %v332_v42  ;;  %397 = vst [vmem:[#allocation5 + $0x158] sm:$0xff] %v333_v43  ;;  %v335_v45 = vld [vmem:[%s17366_s0 + $0x168] sm:$0xff]  ;;  %v336_v46 = vld [vmem:[%s17366_s0 + $0x170] sm:$0xff] }
  0x4f   : > { %398 = vst [vmem:[#allocation5 + $0x160] sm:$0xff] %v334_v44  ;;  %v337_v47 = vld [vmem:[%s17366_s0 + $0x178] sm:$0xff]  ;;  %399 = vst [vmem:[#allocation5 + $0x168] sm:$0xff] %v335_v45  ;;  %v338_v48 = vld [vmem:[%s17366_s0 + $0x180] sm:$0xff] }
  0x50   : > { %400 = vst [vmem:[#allocation5 + $0x170] sm:$0xff] %v336_v46  ;;  %401 = vst [vmem:[#allocation5 + $0x178] sm:$0xff] %v337_v47  ;;  %v339_v49 = vld [vmem:[%s17366_s0 + $0x188] sm:$0xff]  ;;  %v340_v50 = vld [vmem:[%s17366_s0 + $0x190] sm:$0xff] }
  0x51   : > { %402 = vst [vmem:[#allocation5 + $0x180] sm:$0xff] %v338_v48  ;;  %403 = vst [vmem:[#allocation5 + $0x188] sm:$0xff] %v339_v49  ;;  %v341_v51 = vld [vmem:[%s17366_s0 + $0x198] sm:$0xff]  ;;  %v342_v52 = vld [vmem:[%s17366_s0 + $0x1a0] sm:$0xff] }
  0x52   : > { %404 = vst [vmem:[#allocation5 + $0x190] sm:$0xff] %v340_v50  ;;  %v343_v53 = vld [vmem:[%s17366_s0 + $0x1a8] sm:$0xff]  ;;  %405 = vst [vmem:[#allocation5 + $0x198] sm:$0xff] %v341_v51  ;;  %v344_v54 = vld [vmem:[%s17366_s0 + $0x1b0] sm:$0xff] }
  0x53   : > { %406 = vst [vmem:[#allocation5 + $0x1a0] sm:$0xff] %v342_v52  ;;  %407 = vst [vmem:[#allocation5 + $0x1a8] sm:$0xff] %v343_v53  ;;  %v345_v55 = vld [vmem:[%s17366_s0 + $0x1b8] sm:$0xff]  ;;  %v346_v56 = vld [vmem:[%s17366_s0 + $0x1c0] sm:$0xff] }
  0x54   : > { %408 = vst [vmem:[#allocation5 + $0x1b0] sm:$0xff] %v344_v54  ;;  %409 = vst [vmem:[#allocation5 + $0x1b8] sm:$0xff] %v345_v55  ;;  %v347_v57 = vld [vmem:[%s17366_s0 + $0x1c8] sm:$0xff]  ;;  %v348_v58 = vld [vmem:[%s17366_s0 + $0x1d0] sm:$0xff] }
  0x55   : > { %410 = vst [vmem:[#allocation5 + $0x1c0] sm:$0xff] %v346_v56  ;;  %v349_v59 = vld [vmem:[%s17366_s0 + $0x1d8] sm:$0xff]  ;;  %411 = vst [vmem:[#allocation5 + $0x1c8] sm:$0xff] %v347_v57  ;;  %v350_v60 = vld [vmem:[%s17366_s0 + $0x1e0] sm:$0xff] }
  0x56   : > { %412 = vst [vmem:[#allocation5 + $0x1d0] sm:$0xff] %v348_v58  ;;  %413 = vst [vmem:[#allocation5 + $0x1d8] sm:$0xff] %v349_v59  ;;  %v351_v61 = vld [vmem:[%s17366_s0 + $0x1e8] sm:$0xff]  ;;  %v352_v62 = vld [vmem:[%s17366_s0 + $0x1f0] sm:$0xff] }
  0x57   : > { %414 = vst [vmem:[#allocation5 + $0x1e0] sm:$0xff] %v350_v60  ;;  %415 = vst [vmem:[#allocation5 + $0x1e8] sm:$0xff] %v351_v61  ;;  %v353_v63 = vld [vmem:[%s17366_s0 + $0x1f8] sm:$0xff] }
  0x58   : > { %416 = vst [vmem:[#allocation5 + $0x1f0] sm:$0xff] %v352_v62  ;;  %417 = vst [vmem:[#allocation5 + $0x1f8] sm:$0xff] %v353_v63 }
  0x59 PF: > { %v7995_v0 = vld [vmem:[%s8311_s14] sm:$0xff]   ;;  %v482_v1 = vlaneseq  ;;  %v7996_v2 = vld [vmem:[%s8311_s14 + $0x8] sm:$0xff]   ;;  %v7997_v3 = vld [vmem:[%s8311_s14 + $0x10] sm:$0xff]   ;;  %p7956_p8 = scmp.eq.s32.totalorder %s8244_s22, 7 }
  0x5a   : > { %7685 = vmatprep.subr.bf16.mxu0 %v7995_v0  ;;  %7925 = vmatprep.subr.bf16.mxu1 %v7995_v0  ;;  %v7998_v6 = vld [vmem:[%s8311_s14 + $0x18] sm:$0xff]   ;;  %v418_v7 = vld [vmem:[#allocation5] sm:$0xff]  ;;  %v419_v8 = vld [vmem:[#allocation5 + $0x8] sm:$0xff] }
  0x5b   : > { %7686 = vmatpush3.bf16.msra.mxu0 %v7995_v0  ;;  %7933 = vmatpush3.bf16.msra.mxu1 %v7995_v0  ;;  %v8530_v4 = vshrl.u32 %v482_v1, 7  ;;  %v420_v9 = vld [vmem:[#allocation5 + $0x10] sm:$0xff]  ;;  %v421_v11 = vld [vmem:[#allocation5 + $0x18] sm:$0xff]  ;;  %v490_v12 = vld [vmem:[%s8332_s27 + $0x4] sm:$0x7]  ;;  %v8540_v13 = vmax.f32 %v418_v7, 0.0 }
  0x5c   : > { %7687 = vmatprep.subr.bf16.mxu0 %v7996_v2  ;;  %7926 = vmatprep.subr.bf16.mxu1 %v7996_v2  ;;  %v489_v15 = vld [vmem:[%s8332_s27] sm:$0x7]  ;;  %v8548_v16 = vmax.f32 %v419_v8, 0.0  ;;  %v8550_v17 = vmax.f32 %v420_v9, 0.0  ;;  %v8552_v18 = vmax.f32 %v421_v11, 0.0  ;;  %v8000_v36 = vld [vmem:[%s8311_s14 + $0x28] sm:$0xff]  }
  0x5d   : > { %17665 = vst [vmem:[#allocation8_spill] sm:$0xff] %v8530_v4  ;;  %v8533_v5 = vadd.s32 8, %v8530_v4  ;;  %v8537_v10 = vsub.s32 1, %v8530_v4  ;;  %vm485_vm0 = vcmp.gt.s32.totalorder %v8530_v4, 0  ;;  %v8545_v14 = vsub.s32 0, %v8530_v4  ;;  %v7999_v20 = vld [vmem:[%s8311_s14 + $0x20] sm:$0xff]  }
  0x5e   : > { %v612_v19 = vrot.slane %v8540_v13, 7  ;;  %vm676_vm2 = vcmp.lt.s32.totalorder %v8530_v4, 1  ;;  %v809_v21 = vrot.slane %v8540_v13, 1  ;;  %v8559_v22 = vsub.s32 2, %v8530_v4  ;;  %v491_v24 = vld [vmem:[%s8332_s27 + $0x8] sm:$0x7] }
  0x5f   : > { %17666 = vst [vmem:[#allocation9_spill] sm:$0xff] %v8533_v5  ;;  %7688 = vmatpush3.bf16.msra.mxu0 %v7996_v2  ;;  %7934 = vmatpush3.bf16.msra.mxu1 %v7996_v2  ;;  %17667 = vst [vmem:[#allocation10_spill] sm:$0xff] %v8537_v10  ;;  %vm488_vm1 = vcmp.lt.s32.totalorder %v8533_v5, 15  ;;  %v8562_v23 = vrot.slane %v490_v12, %v8537_v10  ;;  %v613_v25 = vrot.slane %v8550_v17, 7  ;;  %v644_v26 = vrot.slane %v8548_v16, 7  ;;  %v8001_v45 = vld [vmem:[%s8311_s14 + $0x30] sm:$0xff]  }
  0x60   : > { %7689 = vmatprep.subr.bf16.mxu0 %v7997_v3  ;;  %7927 = vmatprep.subr.bf16.mxu1 %v7997_v3  ;;  %17668 = vst [vmem:[#allocation11_spill] sm:$0xff] %v8545_v14  ;;  %17669 = vst [vmem:[#allocation12_spill] sm:$0xff] %v8559_v22  ;;  %v645_v27 = vrot.slane %v8552_v18, 7  ;;  %v810_v28 = vrot.slane %v8550_v17, 1  ;;  %v841_v29 = vrot.slane %v8548_v16, 1  ;;  %v842_v30 = vrot.slane %v8552_v18, 1 }
  0x61   : > { %vm873_vm3 = vcmp.lt.s32.totalorder %v8530_v4, 7  ;;  %v8573_v31 = vrot.slane %v489_v15, %v8545_v14  ;;  %v709_v32 = vsel %vm676_vm2, %v644_v26, %v612_v19  ;;  %v8580_v34 = vrot.slane %v490_v12, %v8545_v14  ;;  %v8002_v62 = vld [vmem:[%s8311_s14 + $0x38] sm:$0xff]  }
  0x62   : > { %v710_v33 = vsel %vm676_vm2, %v645_v27, %v613_v25  ;;  %v8583_v35 = vrot.slane %v489_v15, %v8537_v10  ;;  %v677_v37 = vsel %vm676_vm2, %v612_v19, %v644_v26  ;;  %v745_v38 = vsel %vm485_vm0, %v709_v32, 0.0 }
  0x63   : > { %7690 = vmatpush3.bf16.msra.mxu0 %v7997_v3  ;;  %7935 = vmatpush3.bf16.msra.mxu1 %v7997_v3  ;;  %v1390_v39 = vmul.f32 %v8562_v23, %v8540_v13  ;;  %v8593_v40 = vrot.slane %v491_v24, %v8545_v14  ;;  %v906_v41 = vsel %vm873_vm3, %v841_v29, %v809_v21  ;;  %v747_v46 = vsel %vm485_vm0, %v710_v33, 0.0  ;;  %v422_v3 = vld [vmem:[#allocation5 + $0x20] sm:$0xff] }
  0x64   : > { %7691 = vmatprep.subr.bf16.mxu0 %v7998_v6  ;;  %7928 = vmatprep.subr.bf16.mxu1 %v7998_v6  ;;  %v907_v42 = vsel %vm873_vm3, %v842_v30, %v810_v28  ;;  %v8600_v43 = vrot.slane %v489_v15, %v8559_v22  ;;  %v1391_v44 = vmul.f32 %v8562_v23, %v8548_v16  ;;  %v943_v48 = vsel %vm488_vm1, %v906_v41, 0.0 }
  0x65   : > { %v874_v47 = vsel %vm873_vm3, %v809_v21, %v841_v29  ;;  %v945_v49 = vsel %vm488_vm1, %v907_v42, 0.0  ;;  %v678_v50 = vsel %vm676_vm2, %v613_v25, %v645_v27  ;;  %v875_v51 = vsel %vm873_vm3, %v810_v28, %v842_v30 }
  0x66   : > { %v1010_v52 = vmul.f32 %v8573_v31, %v745_v38  ;;  %v1011_v53 = vmul.f32 %v8573_v31, %v677_v37  ;;  %v8620_v54 = vmul.f32 %v8573_v31, %v747_v46  ;;  %v8623_v55 = vmul.f32 %v8573_v31, %v678_v50 }
  0x67   : > { %7692 = vmatpush3.bf16.msra.mxu0 %v7998_v6  ;;  %7936 = vmatpush3.bf16.msra.mxu1 %v7998_v6  ;;  %v1322_v56 = vmul.f32 %v8580_v34, %v745_v38  ;;  %v1323_v57 = vmul.f32 %v8580_v34, %v677_v37  ;;  %v1198_v58 = vmul.f32 %v8600_v43, %v874_v47  ;;  %v423_v6 = vld [vmem:[#allocation5 + $0x28] sm:$0xff]  ;;  %v8659_v33 = vmax.f32 %v422_v3, 0.0 }
  0x68   : > { %7693 = vmatprep.subr.bf16.mxu0 %v7999_v20  ;;  %7929 = vmatprep.subr.bf16.mxu1 %v7999_v20  ;;  %v8629_v59 = vrot.slane %v490_v12, %v8559_v22  ;;  %v1654_v60 = vmul.f32 %v8593_v40, %v747_v46  ;;  %v8633_v61 = vrot.slane %v491_v24, %v8537_v10  ;;  %v8661_v37 = vmax.f32 %v423_v6, 0.0 }
  0x69   : > { %v1454_v63 = vadd.f32 %v1390_v39, %v1322_v56  ;;  %v1455_v0 = vadd.f32 %v1391_v44, %v1323_v57  ;;  %v1655_v1 = vmul.f32 %v8593_v40, %v678_v50  ;;  %v8638_v2 = vrot.slane %v491_v24, %v8559_v22 }
  0x6a   : > { %v1199_v7 = vmul.f32 %v8600_v43, %v943_v48  ;;  %v8642_v8 = vmul.f32 %v8600_v43, %v875_v51  ;;  %v1522_v9 = vmul.f32 %v8629_v59, %v874_v47  ;;  %v1523_v11 = vmul.f32 %v8629_v59, %v943_v48 }
  0x6b   : > { %7694 = vmatpush3.bf16.msra.mxu0 %v7999_v20  ;;  %7937 = vmatpush3.bf16.msra.mxu1 %v7999_v20  ;;  %v1718_v12 = vmul.f32 %v8633_v61, %v8550_v17  ;;  %v1719_v15 = vmul.f32 %v8633_v61, %v8552_v18  ;;  %v1842_v19 = vmul.f32 %v8638_v2, %v875_v51  ;;  %v614_v44 = vrot.slane %v8659_v33, 7 }
  0x6c   : > { %7695 = vmatprep.subr.bf16.mxu0 %v8000_v36  ;;  %7930 = vmatprep.subr.bf16.mxu1 %v8000_v36  ;;  %v1843_v20 = vmul.f32 %v8638_v2, %v945_v49  ;;  %v8653_v21 = vmul.f32 %v8600_v43, %v945_v49  ;;  %v1324_v24 = vmul.f32 %v8580_v34, %v747_v46  ;;  %v646_v46 = vrot.slane %v8661_v37, 7 }
  0x6d   : > { %v1325_v25 = vmul.f32 %v8580_v34, %v678_v50  ;;  %v1524_v26 = vmul.f32 %v8629_v59, %v875_v51  ;;  %v1586_v27 = vadd.f32 %v1522_v9, %v1454_v63  ;;  %v1587_v28 = vadd.f32 %v1523_v11, %v1455_v0  ;;  %v424_v0 = vld [vmem:[#allocation5 + $0x30] sm:$0xff]  ;;  %v425_v11 = vld [vmem:[#allocation5 + $0x38] sm:$0xff] }
  0x6e   : > { %v1778_v29 = vadd.f32 %v1718_v12, %v1654_v60  ;;  %v1779_v30 = vadd.f32 %v1719_v15, %v1655_v1  ;;  %v1525_v32 = vmul.f32 %v8629_v59, %v945_v49  ;;  %v1074_v38 = vmul.f32 %v8583_v35, %v8540_v13 }
  0x6f   : > { %7696 = vmatpush3.bf16.msra.mxu0 %v8000_v36  ;;  %7938 = vmatpush3.bf16.msra.mxu1 %v8000_v36  ;;  %v1075_v36 = vmul.f32 %v8583_v35, %v8548_v16  ;;  %v1392_v42 = vmul.f32 %v8562_v23, %v8550_v17  ;;  %v811_v47 = vrot.slane %v8659_v33, 1  ;;  %v843_v48 = vrot.slane %v8661_v37, 1 }
  0x70   : > { %7697 = vmatprep.subr.bf16.mxu0 %v8001_v45  ;;  %7931 = vmatprep.subr.bf16.mxu1 %v8001_v45  ;;  %v1902_v39 = vadd.f32 %v1842_v19, %v1778_v29  ;;  %v1903_v41 = vadd.f32 %v1843_v20, %v1779_v30  ;;  %v1134_v50 = vadd.f32 %v1074_v38, %v1010_v52  ;;  %v8709_v29 = vmax.f32 %v425_v11, 0.0  ;;  %v427_v11 = vld [vmem:[#allocation5 + $0x48] sm:$0xff] }
  0x71   : > { %v1135_v51 = vadd.f32 %v1075_v36, %v1011_v53  ;;  %v8675_v16 = vsel %vm676_vm2, %v614_v44, %v646_v46  ;;  %v711_v56 = vsel %vm676_vm2, %v646_v46, %v614_v44  ;;  %v8681_v57 = vsel %vm873_vm3, %v811_v47, %v843_v48 }
  0x72   : > { %v2026_v49 = vadd.f32 %v1902_v39, %v1586_v27  ;;  %v2027_v13 = vadd.f32 %v1903_v41, %v1587_v28  ;;  %v8687_v52 = vsel %vm485_vm0, %v711_v56, 0.0  ;;  %v1258_v63 = vadd.f32 %v1198_v58, %v1134_v50 }
  0x73   : > { %7698 = vmatpush3.bf16.msra.mxu0 %v8001_v45  ;;  %7939 = vmatpush3.bf16.msra.mxu1 %v8001_v45  ;;  %v908_v45 = vsel %vm873_vm3, %v843_v48, %v811_v47  ;;  %v1259_v1 = vadd.f32 %v1199_v7, %v1135_v51  ;;  %v1393_v3 = vmul.f32 %v8562_v23, %v8552_v18  ;;  %v8707_v27 = vmax.f32 %v424_v0, 0.0 }
  0x74   : > { %7699 = vmatprep.subr.bf16.mxu0 %v8002_v62  ;;  %7932 = vmatprep.subr.bf16.mxu1 %v8002_v62  ;;  %v2090_v60 = vpack.c.bf16 %v2027_v13, %v2026_v49  ;;  %v8691_v53 = vsel %vm488_vm1, %v908_v45, 0.0  ;;  %v1456_v6 = vadd.f32 %v1392_v42, %v1324_v24  ;;  %v1656_v9 = vmul.f32 %v8593_v40, %v8687_v52 }
  0x75   : > { %v1657_v12 = vmul.f32 %v8593_v40, %v8675_v16  ;;  %v1720_v15 = vmul.f32 %v8633_v61, %v8659_v33  ;;  %v1721_v58 = vmul.f32 %v8633_v61, %v8661_v37  ;;  %v1844_v7 = vmul.f32 %v8638_v2, %v8681_v57 }
  0x76   : > { %7701 = vmatprep.mubr.bf16.mxu0 %v2090_v60  ;;  %v1457_v19 = vadd.f32 %v1393_v3, %v1325_v25  ;;  %v1588_v20 = vadd.f32 %v1524_v26, %v1456_v6  ;;  %v1845_v24 = vmul.f32 %v8638_v2, %v8691_v53  ;;  %v1076_v30 = vmul.f32 %v8583_v35, %v8550_v17 }
  0x77   : > { %7700 = vmatpush3.bf16.msra.mxu0 %v8002_v62  ;;  %7940 = vmatpush3.bf16.msra.mxu1 %v8002_v62  ;;  %v1780_v62 = vadd.f32 %v1720_v15, %v1656_v9  ;;  %v1781_v28 = vadd.f32 %v1721_v58, %v1657_v12  ;;  %v615_v41 = vrot.slane %v8707_v27, 7  ;;  %v812_v36 = vrot.slane %v8707_v27, 1  ;;  %v426_v9 = vld [vmem:[#allocation5 + $0x40] sm:$0xff] }
  0x78   : > { %v1589_v38 = vadd.f32 %v1525_v32, %v1457_v19  ;;  %v1964_v39 = vadd.f32 %v1588_v20, %v1258_v63  ;;  %v647_v42 = vrot.slane %v8709_v29, 7  ;;  %v844_v44 = vrot.slane %v8709_v29, 1 }
  0x79   : > { %v1904_v25 = vadd.f32 %v1844_v7, %v1780_v62  ;;  %v1905_v26 = vadd.f32 %v1845_v24, %v1781_v28  ;;  %v1077_v47 = vmul.f32 %v8583_v35, %v8552_v18  ;;  %v1136_v48 = vadd.f32 %v1076_v30, %v8620_v54 }
  0x7a   : > { %v1965_v46 = vadd.f32 %v1589_v38, %v1259_v1  ;;  %v1326_v17 = vmul.f32 %v8580_v34, %v8687_v52  ;;  %v8724_v49 = vsel %vm676_vm2, %v615_v41, %v647_v42  ;;  %v712_v13 = vsel %vm676_vm2, %v647_v42, %v615_v41 }
  0x7b   : > { %v2028_v32 = vadd.f32 %v1964_v39, %v1904_v25  ;;  %v8730_v50 = vsel %vm873_vm3, %v812_v36, %v844_v44  ;;  %v8734_v18 = vsel %vm485_vm0, %v712_v13, 0.0  ;;  %v909_v54 = vsel %vm873_vm3, %v844_v44, %v812_v36 }
  0x7c   : > { %v2029_v51 = vadd.f32 %v1965_v46, %v1905_v26  ;;  %v1137_v56 = vadd.f32 %v1077_v47, %v8623_v55  ;;  %v8741_v45 = vsel %vm488_vm1, %v909_v54, 0.0  ;;  %v1260_v60 = vadd.f32 %v8642_v8, %v1136_v48 }
  0x7d   : > { %v1327_v63 = vmul.f32 %v8580_v34, %v8675_v16  ;;  %v1394_v0 = vmul.f32 %v8562_v23, %v8659_v33  ;;  %v1395_v6 = vmul.f32 %v8562_v23, %v8661_v37  ;;  %v1526_v55 = vmul.f32 %v8629_v59, %v8681_v57 }
  0x7e   : > { %v2091_v1 = vpack.c.bf16 %v2029_v51, %v2028_v32  ;;  %v1261_v3 = vadd.f32 %v8653_v21, %v1137_v56  ;;  %v1527_v8 = vmul.f32 %v8629_v59, %v8691_v53  ;;  %v1658_v15 = vmul.f32 %v8593_v40, %v8734_v18 }
  0x7f   : > { %v1458_v12 = vadd.f32 %v1394_v0, %v1326_v17  ;;  %v1659_v58 = vmul.f32 %v8593_v40, %v8724_v49  ;;  %v1459_v21 = vadd.f32 %v1395_v6, %v1327_v63  ;;  %v1722_v7 = vmul.f32 %v8633_v61, %v8707_v27 }
  0x80   : > { %7702 = vmatmul.mubr.bf16.vlgmr.msra.gmra.mrb[0].mxu0 %v2091_v1  ;;  %v1723_v19 = vmul.f32 %v8633_v61, %v8709_v29  ;;  %v1846_v20 = vmul.f32 %v8638_v2, %v8730_v50  ;;  %v1847_v62 = vmul.f32 %v8638_v2, %v8741_v45  ;;  %v8767_v28 = vmax.f32 %v426_v9, 0.0 }
  0x81   : > { %v1590_v24 = vadd.f32 %v1526_v55, %v1458_v12  ;;  %v8769_v30 = vmax.f32 %v427_v11, 0.0  ;;  %v1591_v38 = vadd.f32 %v1527_v8, %v1459_v21  ;;  %v1782_v39 = vadd.f32 %v1722_v7, %v1658_v15  ;;  %v428_v21 = vld [vmem:[#allocation5 + $0x50] sm:$0xff]  ;;  %v429_v7 = vld [vmem:[#allocation5 + $0x58] sm:$0xff] }
  0x82   : > { %v1783_v41 = vadd.f32 %v1723_v19, %v1659_v58  ;;  %v1014_v36 = vmul.f32 %v8573_v31, %v8687_v52  ;;  %v616_v26 = vrot.slane %v8767_v28, 7  ;;  %v813_v44 = vrot.slane %v8767_v28, 1 }
  0x83   : > { %v1966_v25 = vadd.f32 %v1590_v24, %v1260_v60  ;;  %v648_v42 = vrot.slane %v8769_v30, 7  ;;  %v1906_v46 = vadd.f32 %v1846_v20, %v1782_v39  ;;  %v1967_v48 = vadd.f32 %v1591_v38, %v1261_v3 }
  0x84   : > { %v1907_v47 = vadd.f32 %v1847_v62, %v1783_v41  ;;  %v845_v17 = vrot.slane %v8769_v30, 1  ;;  %v1015_v52 = vmul.f32 %v8573_v31, %v8675_v16  ;;  %v1078_v51 = vmul.f32 %v8583_v35, %v8659_v33 }
  0x85   : > { %v8779_v32 = vsel %vm676_vm2, %v616_v26, %v648_v42  ;;  %v713_v13 = vsel %vm676_vm2, %v648_v42, %v616_v26  ;;  %v2030_v54 = vadd.f32 %v1966_v25, %v1906_v46  ;;  %v1079_v1 = vmul.f32 %v8583_v35, %v8661_v37 }
  0x86   : > { %v2031_v56 = vadd.f32 %v1967_v48, %v1907_v47  ;;  %v8789_v60 = vsel %vm485_vm0, %v713_v13, 0.0  ;;  %v8793_v63 = vsel %vm873_vm3, %v813_v44, %v845_v17  ;;  %v910_v0 = vsel %vm873_vm3, %v845_v17, %v813_v44 }
  0x87   : > { %v1138_v16 = vadd.f32 %v1078_v51, %v1014_v36  ;;  %v1202_v33 = vmul.f32 %v8600_v43, %v8681_v57  ;;  %v8803_v6 = vsel %vm488_vm1, %v910_v0, 0.0  ;;  %v1203_v55 = vmul.f32 %v8600_v43, %v8691_v53 }
  0x88   : > { %v2092_v3 = vpack.c.bf16 %v2031_v56, %v2030_v54  ;;  %v1328_v9 = vmul.f32 %v8580_v34, %v8734_v18  ;;  %v1139_v11 = vadd.f32 %v1079_v1, %v1015_v52  ;;  %v1329_v37 = vmul.f32 %v8580_v34, %v8724_v49 }
  0x89   : > { %v1262_v12 = vadd.f32 %v1202_v33, %v1138_v16  ;;  %v1396_v8 = vmul.f32 %v8562_v23, %v8707_v27  ;;  %v1397_v57 = vmul.f32 %v8562_v23, %v8709_v29  ;;  %v1528_v15 = vmul.f32 %v8629_v59, %v8730_v50 }
  0x8a   : > { %7705 = vmatprep.mubr.bf16.mxu0 %v2092_v3  ;;  %v1529_v53 = vmul.f32 %v8629_v59, %v8741_v45  ;;  %v1660_v58 = vmul.f32 %v8593_v40, %v8789_v60  ;;  %v1263_v19 = vadd.f32 %v1203_v55, %v1139_v11  ;;  %v1661_v24 = vmul.f32 %v8593_v40, %v8779_v32 }
  0x8b   : > { %v1460_v20 = vadd.f32 %v1396_v8, %v1328_v9  ;;  %v1724_v62 = vmul.f32 %v8633_v61, %v8767_v28  ;;  %v1461_v38 = vadd.f32 %v1397_v57, %v1329_v37  ;;  %v1725_v39 = vmul.f32 %v8633_v61, %v8769_v30 }
  0x8c   : > { %v1848_v41 = vmul.f32 %v8638_v2, %v8793_v63  ;;  %v1849_v36 = vmul.f32 %v8638_v2, %v8803_v6  ;;  %v8831_v42 = vmax.f32 %v428_v21, 0.0  ;;  %v8833_v44 = vmax.f32 %v429_v7, 0.0 }
  0x8d   : > { %v1592_v25 = vadd.f32 %v1528_v15, %v1460_v20  ;;  %v1784_v26 = vadd.f32 %v1724_v62, %v1660_v58  ;;  %v1593_v46 = vadd.f32 %v1529_v53, %v1461_v38  ;;  %v1785_v47 = vadd.f32 %v1725_v39, %v1661_v24  ;;  %v430_v24 = vld [vmem:[#allocation5 + $0x60] sm:$0xff]  ;;  %v431_v39 = vld [vmem:[#allocation5 + $0x68] sm:$0xff] }
  0x8e   : > { %v1016_v48 = vmul.f32 %v8573_v31, %v8734_v18  ;;  %v1017_v17 = vmul.f32 %v8573_v31, %v8724_v49  ;;  %v617_v51 = vrot.slane %v8831_v42, 7  ;;  %v649_v54 = vrot.slane %v8833_v44, 7 }
  0x8f   : > { %v1908_v13 = vadd.f32 %v1848_v41, %v1784_v26  ;;  %v1968_v52 = vadd.f32 %v1592_v25, %v1262_v12  ;;  %v1909_v56 = vadd.f32 %v1849_v36, %v1785_v47  ;;  %v1969_v0 = vadd.f32 %v1593_v46, %v1263_v19 }
  0x90   : > { %v814_v1 = vrot.slane %v8831_v42, 1  ;;  %v846_v16 = vrot.slane %v8833_v44, 1  ;;  %v8845_v3 = vsel %vm676_vm2, %v617_v51, %v649_v54  ;;  %v714_v49 = vsel %vm676_vm2, %v649_v54, %v617_v51 }
  0x91   : > { %v2032_v33 = vadd.f32 %v1968_v52, %v1908_v13  ;;  %v1080_v18 = vmul.f32 %v8583_v35, %v8707_v27  ;;  %v2033_v55 = vadd.f32 %v1969_v0, %v1909_v56  ;;  %v8853_v9 = vsel %vm485_vm0, %v714_v49, 0.0 }
  0x92   : > { %v8857_v11 = vsel %vm873_vm3, %v814_v1, %v846_v16  ;;  %v911_v12 = vsel %vm873_vm3, %v846_v16, %v814_v1  ;;  %v1081_v8 = vmul.f32 %v8583_v35, %v8709_v29  ;;  %v1204_v57 = vmul.f32 %v8600_v43, %v8730_v50 }
  0x93   : > { %v8863_v37 = vsel %vm488_vm1, %v911_v12, 0.0  ;;  %v1140_v27 = vadd.f32 %v1080_v18, %v1016_v48  ;;  %v2093_v15 = vpack.c.bf16 %v2033_v55, %v2032_v33  ;;  %v1205_v53 = vmul.f32 %v8600_v43, %v8741_v45 }
  0x94   : > { %v1330_v58 = vmul.f32 %v8580_v34, %v8789_v60  ;;  %v1331_v21 = vmul.f32 %v8580_v34, %v8779_v32  ;;  %v1141_v7 = vadd.f32 %v1081_v8, %v1017_v17  ;;  %v1398_v20 = vmul.f32 %v8562_v23, %v8767_v28 }
  0x95   : > { %v1264_v19 = vadd.f32 %v1204_v57, %v1140_v27  ;;  %v1399_v29 = vmul.f32 %v8562_v23, %v8769_v30  ;;  %7706 = vmatmul.mubr.bf16.gmra.mrb[4].mxu0 %v2093_v15  ;;  %v1530_v50 = vmul.f32 %v8629_v59, %v8793_v63  ;;  %v1531_v45 = vmul.f32 %v8629_v59, %v8803_v6 }
  0x96   : > { %v1662_v62 = vmul.f32 %v8593_v40, %v8853_v9  ;;  %v1663_v38 = vmul.f32 %v8593_v40, %v8845_v3  ;;  %v1265_v41 = vadd.f32 %v1205_v53, %v1141_v7  ;;  %v1462_v36 = vadd.f32 %v1398_v20, %v1330_v58 }
  0x97   : > { %v1463_v25 = vadd.f32 %v1399_v29, %v1331_v21  ;;  %v1726_v26 = vmul.f32 %v8633_v61, %v8831_v42  ;;  %v1727_v46 = vmul.f32 %v8633_v61, %v8833_v44  ;;  %v1850_v47 = vmul.f32 %v8638_v2, %v8857_v11 }
  0x98   : > { %v1851_v48 = vmul.f32 %v8638_v2, %v8863_v37  ;;  %v8895_v17 = vmax.f32 %v430_v24, 0.0  ;;  %v1594_v13 = vadd.f32 %v1530_v50, %v1462_v36  ;;  %v8897_v54 = vmax.f32 %v431_v39, 0.0  ;;  %v432_v36 = vld [vmem:[#allocation5 + $0x70] sm:$0xff] }
  0x99   : > { %v1595_v52 = vadd.f32 %v1531_v45, %v1463_v25  ;;  %v1786_v51 = vadd.f32 %v1726_v26, %v1662_v62  ;;  %v1787_v56 = vadd.f32 %v1727_v46, %v1663_v38  ;;  %v1018_v16 = vmul.f32 %v8573_v31, %v8789_v60  ;;  %v433_v25 = vld [vmem:[#allocation5 + $0x78] sm:$0xff] }
  0x9a   : > { %v618_v0 = vrot.slane %v8895_v17, 7  ;;  %v815_v1 = vrot.slane %v8895_v17, 1  ;;  %v1970_v49 = vadd.f32 %v1594_v13, %v1264_v19  ;;  %v650_v55 = vrot.slane %v8897_v54, 7 }
  0x9b   : > { %v1910_v33 = vadd.f32 %v1850_v47, %v1786_v51  ;;  %v1971_v18 = vadd.f32 %v1595_v52, %v1265_v41  ;;  %v1911_v12 = vadd.f32 %v1851_v48, %v1787_v56  ;;  %v847_v8 = vrot.slane %v8897_v54, 1 }
  0x9c   : > { %v1019_v27 = vmul.f32 %v8573_v31, %v8779_v32  ;;  %v1082_v57 = vmul.f32 %v8583_v35, %v8767_v28  ;;  %v8911_v53 = vsel %vm676_vm2, %v618_v0, %v650_v55  ;;  %v715_v60 = vsel %vm676_vm2, %v650_v55, %v618_v0 }
  0x9d   : > { %v2034_v15 = vadd.f32 %v1970_v49, %v1910_v33  ;;  %v1083_v58 = vmul.f32 %v8583_v35, %v8769_v30  ;;  %v2035_v21 = vadd.f32 %v1971_v18, %v1911_v12  ;;  %v8919_v7 = vsel %vm485_vm0, %v715_v60, 0.0 }
  0x9e   : > { %v8923_v32 = vsel %vm873_vm3, %v815_v1, %v847_v8  ;;  %v912_v28 = vsel %vm873_vm3, %v847_v8, %v815_v1  ;;  %v1142_v20 = vadd.f32 %v1082_v57, %v1018_v16  ;;  %v1206_v30 = vmul.f32 %v8600_v43, %v8793_v63 }
  0x9f   : > { %v8929_v19 = vsel %vm488_vm1, %v912_v28, 0.0  ;;  %v1143_v29 = vadd.f32 %v1083_v58, %v1019_v27  ;;  %v2094_v24 = vpack.c.bf16 %v2035_v21, %v2034_v15  ;;  %v1207_v50 = vmul.f32 %v8600_v43, %v8803_v6 }
  0xa0   : > { %v1332_v45 = vmul.f32 %v8580_v34, %v8853_v9  ;;  %v1333_v62 = vmul.f32 %v8580_v34, %v8845_v3  ;;  %v1266_v38 = vadd.f32 %v1206_v30, %v1142_v20  ;;  %v1400_v39 = vmul.f32 %v8562_v23, %v8831_v42 }
  0xa1   : > { %v1401_v41 = vmul.f32 %v8562_v23, %v8833_v44  ;;  %v1532_v63 = vmul.f32 %v8629_v59, %v8857_v11  ;;  %7709 = vmatprep.mubr.bf16.mxu0 %v2094_v24  ;;  %v1267_v6 = vadd.f32 %v1207_v50, %v1143_v29  ;;  %v1533_v26 = vmul.f32 %v8629_v59, %v8863_v37 }
  0xa2   : > { %v1664_v46 = vmul.f32 %v8593_v40, %v8919_v7  ;;  %v1665_v47 = vmul.f32 %v8593_v40, %v8911_v53  ;;  %v1464_v48 = vadd.f32 %v1400_v39, %v1332_v45  ;;  %v1728_v52 = vmul.f32 %v8633_v61, %v8895_v17 }
  0xa3   : > { %v1465_v13 = vadd.f32 %v1401_v41, %v1333_v62  ;;  %v1729_v51 = vmul.f32 %v8633_v61, %v8897_v54  ;;  %v1852_v56 = vmul.f32 %v8638_v2, %v8923_v32  ;;  %v1853_v0 = vmul.f32 %v8638_v2, %v8929_v19 }
  0xa4   : > { %v8959_v1 = vmax.f32 %v432_v36, 0.0  ;;  %v8961_v16 = vmax.f32 %v433_v25, 0.0  ;;  %v1596_v33 = vadd.f32 %v1532_v63, %v1464_v48  ;;  %v1788_v18 = vadd.f32 %v1728_v52, %v1664_v46  ;;  %v434_v48 = vld [vmem:[#allocation5 + $0x80] sm:$0xff] }
  0xa5   : > { %v1597_v49 = vadd.f32 %v1533_v26, %v1465_v13  ;;  %v1789_v55 = vadd.f32 %v1729_v51, %v1665_v47  ;;  %v1021_v39 = vmul.f32 %v8573_v31, %v8845_v3  ;;  %v1084_v41 = vmul.f32 %v8583_v35, %v8831_v42  ;;  %v435_v13 = vld [vmem:[#allocation5 + $0x88] sm:$0xff] }
  0xa6   : > { %v619_v12 = vrot.slane %v8959_v1, 7  ;;  %v651_v8 = vrot.slane %v8961_v16, 7  ;;  %v816_v27 = vrot.slane %v8959_v1, 1  ;;  %v848_v57 = vrot.slane %v8961_v16, 1 }
  0xa7   : > { %v1912_v15 = vadd.f32 %v1852_v56, %v1788_v18  ;;  %v1913_v60 = vadd.f32 %v1853_v0, %v1789_v55  ;;  %v1972_v58 = vadd.f32 %v1596_v33, %v1266_v38  ;;  %v1973_v21 = vadd.f32 %v1597_v49, %v1267_v6 }
  0xa8   : > { %v8969_v28 = vsel %vm676_vm2, %v619_v12, %v651_v8  ;;  %v716_v20 = vsel %vm676_vm2, %v651_v8, %v619_v12  ;;  %v8975_v29 = vsel %vm873_vm3, %v816_v27, %v848_v57  ;;  %v913_v30 = vsel %vm873_vm3, %v848_v57, %v816_v27 }
  0xa9   : > { %v2036_v24 = vadd.f32 %v1972_v58, %v1912_v15  ;;  %v2037_v50 = vadd.f32 %v1973_v21, %v1913_v60  ;;  %v8981_v45 = vsel %vm485_vm0, %v716_v20, 0.0  ;;  %v8985_v62 = vsel %vm488_vm1, %v913_v30, 0.0 }
  0xaa   : > { %v1020_v38 = vmul.f32 %v8573_v31, %v8853_v9  ;;  %v1085_v63 = vmul.f32 %v8583_v35, %v8833_v44  ;;  %v1208_v25 = vmul.f32 %v8600_v43, %v8857_v11  ;;  %v1209_v6 = vmul.f32 %v8600_v43, %v8863_v37 }
  0xab   : > { %v2095_v36 = vpack.c.bf16 %v2037_v50, %v2036_v24  ;;  %v1334_v26 = vmul.f32 %v8580_v34, %v8919_v7  ;;  %v1335_v3 = vmul.f32 %v8580_v34, %v8911_v53  ;;  %v1402_v42 = vmul.f32 %v8562_v23, %v8895_v17 }
  0xac   : > { %v1144_v9 = vadd.f32 %v1084_v41, %v1020_v38  ;;  %v1145_v46 = vadd.f32 %v1085_v63, %v1021_v39  ;;  %v1403_v44 = vmul.f32 %v8562_v23, %v8897_v54  ;;  %v1534_v11 = vmul.f32 %v8629_v59, %v8923_v32 }
  0xad   : > { %7710 = vmatmul.mubr.bf16.gmra.mrb[8].mxu0 %v2095_v36  ;;  %v1535_v37 = vmul.f32 %v8629_v59, %v8929_v19  ;;  %v1666_v47 = vmul.f32 %v8593_v40, %v8981_v45  ;;  %v1466_v56 = vadd.f32 %v1402_v42, %v1334_v26  ;;  %v1667_v0 = vmul.f32 %v8593_v40, %v8969_v28 }
  0xae   : > { %v1268_v52 = vadd.f32 %v1208_v25, %v1144_v9  ;;  %v1269_v51 = vadd.f32 %v1209_v6, %v1145_v46  ;;  %v1467_v33 = vadd.f32 %v1403_v44, %v1335_v3  ;;  %v1730_v49 = vmul.f32 %v8633_v61, %v8959_v1 }
  0xaf   : > { %v1731_v18 = vmul.f32 %v8633_v61, %v8961_v16  ;;  %v1854_v55 = vmul.f32 %v8638_v2, %v8975_v29  ;;  %v1598_v12 = vadd.f32 %v1534_v11, %v1466_v56  ;;  %v1855_v8 = vmul.f32 %v8638_v2, %v8985_v62 }
  0xb0   : > { %v9023_v27 = vmax.f32 %v434_v48, 0.0  ;;  %v9025_v57 = vmax.f32 %v435_v13, 0.0  ;;  %v1599_v15 = vadd.f32 %v1535_v37, %v1467_v33  ;;  %v1790_v60 = vadd.f32 %v1730_v49, %v1666_v47  ;;  %v436_v33 = vld [vmem:[#allocation5 + $0x90] sm:$0xff]  ;;  %v437_v49 = vld [vmem:[#allocation5 + $0x98] sm:$0xff] }
  0xb1   : > { %v1791_v58 = vadd.f32 %v1731_v18, %v1667_v0  ;;  %v1022_v21 = vmul.f32 %v8573_v31, %v8919_v7  ;;  %v1974_v20 = vadd.f32 %v1598_v12, %v1268_v52  ;;  %v1023_v7 = vmul.f32 %v8573_v31, %v8911_v53 }
  0xb2   : > { %v620_v30 = vrot.slane %v9023_v27, 7  ;;  %v652_v24 = vrot.slane %v9025_v57, 7  ;;  %v817_v50 = vrot.slane %v9023_v27, 1  ;;  %v1914_v38 = vadd.f32 %v1854_v55, %v1790_v60 }
  0xb3   : > { %v1915_v39 = vadd.f32 %v1855_v8, %v1791_v58  ;;  %v1975_v41 = vadd.f32 %v1599_v15, %v1269_v51  ;;  %v849_v63 = vrot.slane %v9025_v57, 1  ;;  %v1086_v6 = vmul.f32 %v8583_v35, %v8895_v17 }
  0xb4   : > { %v9035_v36 = vsel %vm676_vm2, %v620_v30, %v652_v24  ;;  %v717_v25 = vsel %vm676_vm2, %v652_v24, %v620_v30  ;;  %v2038_v26 = vadd.f32 %v1974_v20, %v1914_v38  ;;  %v1087_v44 = vmul.f32 %v8583_v35, %v8897_v54 }
  0xb5   : > { %v2039_v9 = vadd.f32 %v1975_v41, %v1915_v39  ;;  %v9045_v46 = vsel %vm485_vm0, %v717_v25, 0.0  ;;  %v9049_v3 = vsel %vm873_vm3, %v817_v50, %v849_v63  ;;  %v914_v42 = vsel %vm873_vm3, %v849_v63, %v817_v50 }
  0xb6   : > { %v1146_v53 = vadd.f32 %v1086_v6, %v1022_v21  ;;  %v1210_v17 = vmul.f32 %v8600_v43, %v8923_v32  ;;  %v9059_v37 = vsel %vm488_vm1, %v914_v42, 0.0  ;;  %v1211_v47 = vmul.f32 %v8600_v43, %v8929_v19 }
  0xb7   : > { %v2096_v11 = vpack.c.bf16 %v2039_v9, %v2038_v26  ;;  %v1336_v48 = vmul.f32 %v8580_v34, %v8981_v45  ;;  %v1147_v13 = vadd.f32 %v1087_v44, %v1023_v7  ;;  %v1337_v54 = vmul.f32 %v8580_v34, %v8969_v28 }
  0xb8   : > { %v1270_v52 = vadd.f32 %v1210_v17, %v1146_v53  ;;  %v1404_v51 = vmul.f32 %v8562_v23, %v8959_v1  ;;  %v1405_v32 = vmul.f32 %v8562_v23, %v8961_v16  ;;  %v1536_v56 = vmul.f32 %v8629_v59, %v8975_v29 }
  0xb9   : > { %7713 = vmatprep.mubr.bf16.mxu0 %v2096_v11  ;;  %v1537_v19 = vmul.f32 %v8629_v59, %v8985_v62  ;;  %v1668_v0 = vmul.f32 %v8593_v40, %v9045_v46  ;;  %v1271_v18 = vadd.f32 %v1211_v47, %v1147_v13  ;;  %v1669_v12 = vmul.f32 %v8593_v40, %v9035_v36 }
  0xba   : > { %v1468_v55 = vadd.f32 %v1404_v51, %v1336_v48  ;;  %v1732_v8 = vmul.f32 %v8633_v61, %v9023_v27  ;;  %v1469_v15 = vadd.f32 %v1405_v32, %v1337_v54  ;;  %v1733_v60 = vmul.f32 %v8633_v61, %v9025_v57 }
  0xbb   : > { %v1856_v58 = vmul.f32 %v8638_v2, %v9049_v3  ;;  %v1857_v21 = vmul.f32 %v8638_v2, %v9059_v37  ;;  %v9087_v24 = vmax.f32 %v436_v33, 0.0  ;;  %v9089_v50 = vmax.f32 %v437_v49, 0.0 }
  0xbc   : > { %v1600_v20 = vadd.f32 %v1536_v56, %v1468_v55  ;;  %v1792_v30 = vadd.f32 %v1732_v8, %v1668_v0  ;;  %v1601_v38 = vadd.f32 %v1537_v19, %v1469_v15  ;;  %v1793_v39 = vadd.f32 %v1733_v60, %v1669_v12  ;;  %v438_v12 = vld [vmem:[#allocation5 + $0xa0] sm:$0xff]  ;;  %v439_v60 = vld [vmem:[#allocation5 + $0xa8] sm:$0xff] }
  0xbd   : > { %v1024_v41 = vmul.f32 %v8573_v31, %v8981_v45  ;;  %v1025_v63 = vmul.f32 %v8573_v31, %v8969_v28  ;;  %v621_v6 = vrot.slane %v9087_v24, 7  ;;  %v653_v26 = vrot.slane %v9089_v50, 7 }
  0xbe   : > { %v1916_v25 = vadd.f32 %v1856_v58, %v1792_v30  ;;  %v1976_v7 = vadd.f32 %v1600_v20, %v1270_v52  ;;  %v1917_v9 = vadd.f32 %v1857_v21, %v1793_v39  ;;  %v1977_v42 = vadd.f32 %v1601_v38, %v1271_v18 }
  0xbf   : > { %v818_v44 = vrot.slane %v9087_v24, 1  ;;  %v850_v53 = vrot.slane %v9089_v50, 1  ;;  %v9101_v11 = vsel %vm676_vm2, %v621_v6, %v653_v26  ;;  %v718_v28 = vsel %vm676_vm2, %v653_v26, %v621_v6 }
  0xc0   : > { %v2040_v17 = vadd.f32 %v1976_v7, %v1916_v25  ;;  %v1088_v45 = vmul.f32 %v8583_v35, %v8959_v1  ;;  %v2041_v47 = vadd.f32 %v1977_v42, %v1917_v9  ;;  %v9109_v48 = vsel %vm485_vm0, %v718_v28, 0.0 }
  0xc1   : > { %v9113_v13 = vsel %vm873_vm3, %v818_v44, %v850_v53  ;;  %v915_v52 = vsel %vm873_vm3, %v850_v53, %v818_v44  ;;  %v1089_v51 = vmul.f32 %v8583_v35, %v8961_v16  ;;  %v1212_v32 = vmul.f32 %v8600_v43, %v8975_v29 }
  0xc2   : > { %v9119_v54 = vsel %vm488_vm1, %v915_v52, 0.0  ;;  %v1148_v1 = vadd.f32 %v1088_v45, %v1024_v41  ;;  %v2097_v56 = vpack.c.bf16 %v2041_v47, %v2040_v17  ;;  %v1213_v19 = vmul.f32 %v8600_v43, %v8985_v62 }
  0xc3   : > { %v1338_v0 = vmul.f32 %v8580_v34, %v9045_v46  ;;  %v1339_v33 = vmul.f32 %v8580_v34, %v9035_v36  ;;  %v1149_v49 = vadd.f32 %v1089_v51, %v1025_v63  ;;  %v1406_v55 = vmul.f32 %v8562_v23, %v9023_v27 }
  0xc4   : > { %v1272_v18 = vadd.f32 %v1212_v32, %v1148_v1  ;;  %v1407_v16 = vmul.f32 %v8562_v23, %v9025_v57  ;;  %7714 = vmatmul.mubr.bf16.gmra.mrb[12].mxu0 %v2097_v56  ;;  %v1538_v29 = vmul.f32 %v8629_v59, %v9049_v3  ;;  %v1539_v62 = vmul.f32 %v8629_v59, %v9059_v37 }
  0xc5   : > { %v1670_v8 = vmul.f32 %v8593_v40, %v9109_v48  ;;  %v1671_v15 = vmul.f32 %v8593_v40, %v9101_v11  ;;  %v1273_v58 = vadd.f32 %v1213_v19, %v1149_v49  ;;  %v1470_v21 = vadd.f32 %v1406_v55, %v1338_v0 }
  0xc6   : > { %v1471_v20 = vadd.f32 %v1407_v16, %v1339_v33  ;;  %v1734_v30 = vmul.f32 %v8633_v61, %v9087_v24  ;;  %v1735_v38 = vmul.f32 %v8633_v61, %v9089_v50  ;;  %v1858_v39 = vmul.f32 %v8638_v2, %v9113_v13 }
  0xc7   : > { %v1859_v41 = vmul.f32 %v8638_v2, %v9119_v54  ;;  %v9151_v63 = vmax.f32 %v438_v12, 0.0  ;;  %v1602_v25 = vadd.f32 %v1538_v29, %v1470_v21  ;;  %v9153_v26 = vmax.f32 %v439_v60, 0.0  ;;  %v440_v21 = vld [vmem:[#allocation5 + $0xb0] sm:$0xff] }
  0xc8   : > { %v1603_v7 = vadd.f32 %v1539_v62, %v1471_v20  ;;  %v1794_v6 = vadd.f32 %v1734_v30, %v1670_v8  ;;  %v1795_v9 = vadd.f32 %v1735_v38, %v1671_v15  ;;  %v1026_v53 = vmul.f32 %v8573_v31, %v9045_v46  ;;  %v441_v20 = vld [vmem:[#allocation5 + $0xb8] sm:$0xff] }
  0xc9   : > { %v622_v42 = vrot.slane %v9151_v63, 7  ;;  %v819_v44 = vrot.slane %v9151_v63, 1  ;;  %v1978_v28 = vadd.f32 %v1602_v25, %v1272_v18  ;;  %v654_v47 = vrot.slane %v9153_v26, 7 }
  0xca   : > { %v1918_v17 = vadd.f32 %v1858_v39, %v1794_v6  ;;  %v1979_v45 = vadd.f32 %v1603_v7, %v1273_v58  ;;  %v1919_v52 = vadd.f32 %v1859_v41, %v1795_v9  ;;  %v851_v51 = vrot.slane %v9153_v26, 1 }
  0xcb   : > { %v1027_v1 = vmul.f32 %v8573_v31, %v9035_v36  ;;  %v1090_v32 = vmul.f32 %v8583_v35, %v9023_v27  ;;  %v9167_v19 = vsel %vm676_vm2, %v622_v42, %v654_v47  ;;  %v719_v46 = vsel %vm676_vm2, %v654_v47, %v622_v42 }
  0xcc   : > { %v2042_v56 = vadd.f32 %v1978_v28, %v1918_v17  ;;  %v1091_v0 = vmul.f32 %v8583_v35, %v9025_v57  ;;  %v2043_v33 = vadd.f32 %v1979_v45, %v1919_v52  ;;  %v9175_v49 = vsel %vm485_vm0, %v719_v46, 0.0 }
  0xcd   : > { %v9179_v36 = vsel %vm873_vm3, %v819_v44, %v851_v51  ;;  %v916_v27 = vsel %vm873_vm3, %v851_v51, %v819_v44  ;;  %v1150_v55 = vadd.f32 %v1090_v32, %v1026_v53  ;;  %v1214_v57 = vmul.f32 %v8600_v43, %v9049_v3 }
  0xce   : > { %v9185_v18 = vsel %vm488_vm1, %v916_v27, 0.0  ;;  %v1151_v16 = vadd.f32 %v1091_v0, %v1027_v1  ;;  %v2098_v12 = vpack.c.bf16 %v2043_v33, %v2042_v56  ;;  %v1215_v29 = vmul.f32 %v8600_v43, %v9059_v37 }
  0xcf   : > { %v1340_v62 = vmul.f32 %v8580_v34, %v9109_v48  ;;  %v1341_v8 = vmul.f32 %v8580_v34, %v9101_v11  ;;  %v1274_v15 = vadd.f32 %v1214_v57, %v1150_v55  ;;  %v1408_v60 = vmul.f32 %v8562_v23, %v9087_v24 }
  0xd0   : > { %v1409_v58 = vmul.f32 %v8562_v23, %v9089_v50  ;;  %v1540_v3 = vmul.f32 %v8629_v59, %v9113_v13  ;;  %7717 = vmatprep.mubr.bf16.mxu0 %v2098_v12  ;;  %v1275_v37 = vadd.f32 %v1215_v29, %v1151_v16  ;;  %v1541_v30 = vmul.f32 %v8629_v59, %v9119_v54 }
  0xd1   : > { %v1672_v38 = vmul.f32 %v8593_v40, %v9175_v49  ;;  %v1673_v39 = vmul.f32 %v8593_v40, %v9167_v19  ;;  %v1472_v41 = vadd.f32 %v1408_v60, %v1340_v62  ;;  %v1736_v7 = vmul.f32 %v8633_v61, %v9151_v63 }
  0xd2   : > { %v1473_v25 = vadd.f32 %v1409_v58, %v1341_v8  ;;  %v1737_v6 = vmul.f32 %v8633_v61, %v9153_v26  ;;  %v1860_v9 = vmul.f32 %v8638_v2, %v9179_v36  ;;  %v1861_v42 = vmul.f32 %v8638_v2, %v9185_v18 }
  0xd3   : > { %v9215_v44 = vmax.f32 %v440_v21, 0.0  ;;  %v9217_v53 = vmax.f32 %v441_v20, 0.0  ;;  %v1604_v17 = vadd.f32 %v1540_v3, %v1472_v41  ;;  %v1796_v45 = vadd.f32 %v1736_v7, %v1672_v38  ;;  %v442_v41 = vld [vmem:[#allocation5 + $0xc0] sm:$0xff] }
  0xd4   : > { %v1605_v28 = vadd.f32 %v1541_v30, %v1473_v25  ;;  %v1797_v47 = vadd.f32 %v1737_v6, %v1673_v39  ;;  %v1029_v60 = vmul.f32 %v8573_v31, %v9101_v11  ;;  %v1092_v58 = vmul.f32 %v8583_v35, %v9087_v24  ;;  %v443_v25 = vld [vmem:[#allocation5 + $0xc8] sm:$0xff] }
  0xd5   : > { %v623_v52 = vrot.slane %v9215_v44, 7  ;;  %v655_v51 = vrot.slane %v9217_v53, 7  ;;  %v820_v1 = vrot.slane %v9215_v44, 1  ;;  %v852_v32 = vrot.slane %v9217_v53, 1 }
  0xd6   : > { %v1920_v56 = vadd.f32 %v1860_v9, %v1796_v45  ;;  %v1921_v46 = vadd.f32 %v1861_v42, %v1797_v47  ;;  %v1980_v0 = vadd.f32 %v1604_v17, %v1274_v15  ;;  %v1981_v33 = vadd.f32 %v1605_v28, %v1275_v37 }
  0xd7   : > { %v9225_v27 = vsel %vm676_vm2, %v623_v52, %v655_v51  ;;  %v720_v55 = vsel %vm676_vm2, %v655_v51, %v623_v52  ;;  %v9231_v16 = vsel %vm873_vm3, %v820_v1, %v852_v32  ;;  %v917_v57 = vsel %vm873_vm3, %v852_v32, %v820_v1 }
  0xd8   : > { %v2044_v12 = vadd.f32 %v1980_v0, %v1920_v56  ;;  %v2045_v29 = vadd.f32 %v1981_v33, %v1921_v46  ;;  %v9237_v62 = vsel %vm485_vm0, %v720_v55, 0.0  ;;  %v9241_v8 = vsel %vm488_vm1, %v917_v57, 0.0 }
  0xd9   : > { %v1028_v15 = vmul.f32 %v8573_v31, %v9109_v48  ;;  %v1093_v3 = vmul.f32 %v8583_v35, %v9089_v50  ;;  %v1216_v20 = vmul.f32 %v8600_v43, %v9113_v13  ;;  %v1217_v37 = vmul.f32 %v8600_v43, %v9119_v54 }
  0xda   : > { %v2099_v21 = vpack.c.bf16 %v2045_v29, %v2044_v12  ;;  %v1342_v30 = vmul.f32 %v8580_v34, %v9175_v49  ;;  %v1343_v11 = vmul.f32 %v8580_v34, %v9167_v19  ;;  %v1410_v24 = vmul.f32 %v8562_v23, %v9151_v63 }
  0xdb   : > { %v1152_v48 = vadd.f32 %v1092_v58, %v1028_v15  ;;  %v1153_v38 = vadd.f32 %v1093_v3, %v1029_v60  ;;  %v1411_v50 = vmul.f32 %v8562_v23, %v9153_v26  ;;  %v1542_v13 = vmul.f32 %v8629_v59, %v9179_v36 }
  0xdc   : > { %7718 = vmatmul.mubr.bf16.gmra.mrb[16].mxu0 %v2099_v21  ;;  %v1543_v54 = vmul.f32 %v8629_v59, %v9185_v18  ;;  %v1674_v39 = vmul.f32 %v8593_v40, %v9237_v62  ;;  %v1474_v9 = vadd.f32 %v1410_v24, %v1342_v30  ;;  %v1675_v42 = vmul.f32 %v8593_v40, %v9225_v27 }
  0xdd   : > { %v1276_v7 = vadd.f32 %v1216_v20, %v1152_v48  ;;  %v1277_v6 = vadd.f32 %v1217_v37, %v1153_v38  ;;  %v1475_v17 = vadd.f32 %v1411_v50, %v1343_v11  ;;  %v1738_v28 = vmul.f32 %v8633_v61, %v9215_v44 }
  0xde   : > { %v1739_v45 = vmul.f32 %v8633_v61, %v9217_v53  ;;  %v1862_v47 = vmul.f32 %v8638_v2, %v9231_v16  ;;  %v1606_v52 = vadd.f32 %v1542_v13, %v1474_v9  ;;  %v1863_v51 = vmul.f32 %v8638_v2, %v9241_v8 }
  0xdf   : > { %v9279_v1 = vmax.f32 %v442_v41, 0.0  ;;  %v9281_v32 = vmax.f32 %v443_v25, 0.0  ;;  %v1607_v56 = vadd.f32 %v1543_v54, %v1475_v17  ;;  %v1798_v46 = vadd.f32 %v1738_v28, %v1674_v39  ;;  %v444_v17 = vld [vmem:[#allocation5 + $0xd0] sm:$0xff]  ;;  %v445_v28 = vld [vmem:[#allocation5 + $0xd8] sm:$0xff] }
  0xe0   : > { %v1799_v0 = vadd.f32 %v1739_v45, %v1675_v42  ;;  %v1030_v33 = vmul.f32 %v8573_v31, %v9175_v49  ;;  %v1982_v55 = vadd.f32 %v1606_v52, %v1276_v7  ;;  %v1031_v49 = vmul.f32 %v8573_v31, %v9167_v19 }
  0xe1   : > { %v624_v57 = vrot.slane %v9279_v1, 7  ;;  %v656_v12 = vrot.slane %v9281_v32, 7  ;;  %v821_v29 = vrot.slane %v9279_v1, 1  ;;  %v1922_v15 = vadd.f32 %v1862_v47, %v1798_v46 }
  0xe2   : > { %v1923_v60 = vadd.f32 %v1863_v51, %v1799_v0  ;;  %v1983_v58 = vadd.f32 %v1607_v56, %v1277_v6  ;;  %v853_v3 = vrot.slane %v9281_v32, 1  ;;  %v1094_v37 = vmul.f32 %v8583_v35, %v9151_v63 }
  0xe3   : > { %v9291_v21 = vsel %vm676_vm2, %v624_v57, %v656_v12  ;;  %v721_v20 = vsel %vm676_vm2, %v656_v12, %v624_v57  ;;  %v2046_v30 = vadd.f32 %v1982_v55, %v1922_v15  ;;  %v1095_v50 = vmul.f32 %v8583_v35, %v9153_v26 }
  0xe4   : > { %v2047_v48 = vadd.f32 %v1983_v58, %v1923_v60  ;;  %v9301_v38 = vsel %vm485_vm0, %v721_v20, 0.0  ;;  %v9305_v11 = vsel %vm873_vm3, %v821_v29, %v853_v3  ;;  %v918_v24 = vsel %vm873_vm3, %v853_v3, %v821_v29 }
  0xe5   : > { %v1154_v19 = vadd.f32 %v1094_v37, %v1030_v33  ;;  %v1218_v63 = vmul.f32 %v8600_v43, %v9179_v36  ;;  %v9315_v54 = vsel %vm488_vm1, %v918_v24, 0.0  ;;  %v1219_v39 = vmul.f32 %v8600_v43, %v9185_v18 }
  0xe6   : > { %v2100_v13 = vpack.c.bf16 %v2047_v48, %v2046_v30  ;;  %v1344_v41 = vmul.f32 %v8580_v34, %v9237_v62  ;;  %v1155_v25 = vadd.f32 %v1095_v50, %v1031_v49  ;;  %v1345_v26 = vmul.f32 %v8580_v34, %v9225_v27 }
  0xe7   : > { %v1278_v7 = vadd.f32 %v1218_v63, %v1154_v19  ;;  %v1412_v6 = vmul.f32 %v8562_v23, %v9215_v44  ;;  %v1413_v36 = vmul.f32 %v8562_v23, %v9217_v53  ;;  %v1544_v9 = vmul.f32 %v8629_v59, %v9231_v16 }
  0xe8   : > { %7721 = vmatprep.mubr.bf16.mxu0 %v2100_v13  ;;  %v1545_v18 = vmul.f32 %v8629_v59, %v9241_v8  ;;  %v1676_v42 = vmul.f32 %v8593_v40, %v9301_v38  ;;  %v1279_v45 = vadd.f32 %v1219_v39, %v1155_v25  ;;  %v1677_v52 = vmul.f32 %v8593_v40, %v9291_v21 }
  0xe9   : > { %v1476_v47 = vadd.f32 %v1412_v6, %v1344_v41  ;;  %v1740_v51 = vmul.f32 %v8633_v61, %v9279_v1  ;;  %v1477_v56 = vadd.f32 %v1413_v36, %v1345_v26  ;;  %v1741_v46 = vmul.f32 %v8633_v61, %v9281_v32 }
  0xea   : > { %v1864_v0 = vmul.f32 %v8638_v2, %v9305_v11  ;;  %v1865_v33 = vmul.f32 %v8638_v2, %v9315_v54  ;;  %v9343_v12 = vmax.f32 %v444_v17, 0.0  ;;  %v9345_v29 = vmax.f32 %v445_v28, 0.0 }
  0xeb   : > { %v1608_v55 = vadd.f32 %v1544_v9, %v1476_v47  ;;  %v1800_v57 = vadd.f32 %v1740_v51, %v1676_v42  ;;  %v1609_v15 = vadd.f32 %v1545_v18, %v1477_v56  ;;  %v1801_v60 = vadd.f32 %v1741_v46, %v1677_v52  ;;  %v446_v52 = vld [vmem:[#allocation5 + $0xe0] sm:$0xff]  ;;  %v447_v46 = vld [vmem:[#allocation5 + $0xe8] sm:$0xff] }
  0xec   : > { %v1032_v58 = vmul.f32 %v8573_v31, %v9237_v62  ;;  %v1033_v3 = vmul.f32 %v8573_v31, %v9225_v27  ;;  %v625_v37 = vrot.slane %v9343_v12, 7  ;;  %v657_v30 = vrot.slane %v9345_v29, 7 }
  0xed   : > { %v1924_v20 = vadd.f32 %v1864_v0, %v1800_v57  ;;  %v1984_v49 = vadd.f32 %v1608_v55, %v1278_v7  ;;  %v1925_v48 = vadd.f32 %v1865_v33, %v1801_v60  ;;  %v1985_v24 = vadd.f32 %v1609_v15, %v1279_v45 }
  0xee   : > { %v822_v50 = vrot.slane %v9343_v12, 1  ;;  %v854_v19 = vrot.slane %v9345_v29, 1  ;;  %v9357_v13 = vsel %vm676_vm2, %v625_v37, %v657_v30  ;;  %v722_v27 = vsel %vm676_vm2, %v657_v30, %v625_v37 }
  0xef   : > { %v2048_v63 = vadd.f32 %v1984_v49, %v1924_v20  ;;  %v1096_v62 = vmul.f32 %v8583_v35, %v9215_v44  ;;  %v2049_v39 = vadd.f32 %v1985_v24, %v1925_v48  ;;  %v9365_v41 = vsel %vm485_vm0, %v722_v27, 0.0 }
  0xf0   : > { %v9369_v25 = vsel %vm873_vm3, %v822_v50, %v854_v19  ;;  %v919_v7 = vsel %vm873_vm3, %v854_v19, %v822_v50  ;;  %v1097_v6 = vmul.f32 %v8583_v35, %v9217_v53  ;;  %v1220_v36 = vmul.f32 %v8600_v43, %v9231_v16 }
  0xf1   : > { %v9375_v26 = vsel %vm488_vm1, %v919_v7, 0.0  ;;  %v1156_v44 = vadd.f32 %v1096_v62, %v1032_v58  ;;  %v2101_v9 = vpack.c.bf16 %v2049_v39, %v2048_v63  ;;  %v1221_v18 = vmul.f32 %v8600_v43, %v9241_v8 }
  0xf2   : > { %v1346_v42 = vmul.f32 %v8580_v34, %v9301_v38  ;;  %v1347_v17 = vmul.f32 %v8580_v34, %v9291_v21  ;;  %v1157_v28 = vadd.f32 %v1097_v6, %v1033_v3  ;;  %v1414_v47 = vmul.f32 %v8562_v23, %v9279_v1 }
  0xf3   : > { %v1280_v45 = vadd.f32 %v1220_v36, %v1156_v44  ;;  %v1415_v53 = vmul.f32 %v8562_v23, %v9281_v32  ;;  %7722 = vmatmul.mubr.bf16.gmra.mrb[20].mxu0 %v2101_v9  ;;  %v1546_v16 = vmul.f32 %v8629_v59, %v9305_v11  ;;  %v1547_v8 = vmul.f32 %v8629_v59, %v9315_v54 }
  0xf4   : > { %v1678_v51 = vmul.f32 %v8593_v40, %v9365_v41  ;;  %v1679_v56 = vmul.f32 %v8593_v40, %v9357_v13  ;;  %v1281_v0 = vadd.f32 %v1221_v18, %v1157_v28  ;;  %v1478_v33 = vadd.f32 %v1414_v47, %v1346_v42 }
  0xf5   : > { %v1479_v55 = vadd.f32 %v1415_v53, %v1347_v17  ;;  %v1742_v57 = vmul.f32 %v8633_v61, %v9343_v12  ;;  %v1743_v15 = vmul.f32 %v8633_v61, %v9345_v29  ;;  %v1866_v60 = vmul.f32 %v8638_v2, %v9369_v25 }
  0xf6   : > { %v1867_v58 = vmul.f32 %v8638_v2, %v9375_v26  ;;  %v9407_v3 = vmax.f32 %v446_v52, 0.0  ;;  %v1610_v20 = vadd.f32 %v1546_v16, %v1478_v33  ;;  %v9409_v30 = vmax.f32 %v447_v46, 0.0  ;;  %v448_v33 = vld [vmem:[#allocation5 + $0xf0] sm:$0xff] }
  0xf7   : > { %v1611_v49 = vadd.f32 %v1547_v8, %v1479_v55  ;;  %v1802_v37 = vadd.f32 %v1742_v57, %v1678_v51  ;;  %v1803_v48 = vadd.f32 %v1743_v15, %v1679_v56  ;;  %v1034_v19 = vmul.f32 %v8573_v31, %v9301_v38  ;;  %v449_v55 = vld [vmem:[#allocation5 + $0xf8] sm:$0xff] }
  0xf8   : > { %v626_v24 = vrot.slane %v9407_v3, 7  ;;  %v823_v50 = vrot.slane %v9407_v3, 1  ;;  %v1986_v27 = vadd.f32 %v1610_v20, %v1280_v45  ;;  %v658_v39 = vrot.slane %v9409_v30, 7 }
  0xf9   : > { %v1926_v63 = vadd.f32 %v1866_v60, %v1802_v37  ;;  %v1987_v62 = vadd.f32 %v1611_v49, %v1281_v0  ;;  %v1927_v7 = vadd.f32 %v1867_v58, %v1803_v48  ;;  %v855_v6 = vrot.slane %v9409_v30, 1 }
  0xfa   : > { %v1035_v44 = vmul.f32 %v8573_v31, %v9291_v21  ;;  %v1098_v36 = vmul.f32 %v8583_v35, %v9279_v1  ;;  %v9423_v18 = vsel %vm676_vm2, %v626_v24, %v658_v39  ;;  %v723_v38 = vsel %vm676_vm2, %v658_v39, %v626_v24 }
  0xfb   : > { %v2050_v9 = vadd.f32 %v1986_v27, %v1926_v63  ;;  %v1099_v42 = vmul.f32 %v8583_v35, %v9281_v32  ;;  %v2051_v17 = vadd.f32 %v1987_v62, %v1927_v7  ;;  %v9431_v28 = vsel %vm485_vm0, %v723_v38, 0.0 }
  0xfc   : > { %v9435_v21 = vsel %vm873_vm3, %v823_v50, %v855_v6  ;;  %v920_v1 = vsel %vm873_vm3, %v855_v6, %v823_v50  ;;  %v1158_v47 = vadd.f32 %v1098_v36, %v1034_v19  ;;  %v1222_v32 = vmul.f32 %v8600_v43, %v9305_v11 }
  0xfd   : > { %v9441_v45 = vsel %vm488_vm1, %v920_v1, 0.0  ;;  %v1159_v53 = vadd.f32 %v1099_v42, %v1035_v44  ;;  %v2102_v52 = vpack.c.bf16 %v2051_v17, %v2050_v9  ;;  %v1223_v16 = vmul.f32 %v8600_v43, %v9315_v54 }
  0xfe   : > { %v1348_v8 = vmul.f32 %v8580_v34, %v9365_v41  ;;  %v1349_v51 = vmul.f32 %v8580_v34, %v9357_v13  ;;  %v1282_v56 = vadd.f32 %v1222_v32, %v1158_v47  ;;  %v1416_v46 = vmul.f32 %v8562_v23, %v9343_v12 }
  0xff   : > { %v1417_v0 = vmul.f32 %v8562_v23, %v9345_v29  ;;  %v1548_v11 = vmul.f32 %v8629_v59, %v9369_v25  ;;  %7725 = vmatprep.mubr.bf16.mxu0 %v2102_v52  ;;  %v1283_v54 = vadd.f32 %v1223_v16, %v1159_v53  ;;  %v1549_v57 = vmul.f32 %v8629_v59, %v9375_v26 }
 0x100   : > { %v1680_v15 = vmul.f32 %v8593_v40, %v9431_v28  ;;  %v1681_v60 = vmul.f32 %v8593_v40, %v9423_v18  ;;  %v1480_v58 = vadd.f32 %v1416_v46, %v1348_v8  ;;  %v1744_v49 = vmul.f32 %v8633_v61, %v9407_v3 }
 0x101   : > { %v1481_v20 = vadd.f32 %v1417_v0, %v1349_v51  ;;  %v1745_v37 = vmul.f32 %v8633_v61, %v9409_v30  ;;  %v1868_v48 = vmul.f32 %v8638_v2, %v9435_v21  ;;  %v1869_v24 = vmul.f32 %v8638_v2, %v9441_v45 }
 0x102   : > { %v9471_v50 = vmax.f32 %v448_v33, 0.0  ;;  %v9473_v19 = vmax.f32 %v449_v55, 0.0  ;;  %v1612_v63 = vadd.f32 %v1548_v11, %v1480_v58  ;;  %v1804_v62 = vadd.f32 %v1744_v49, %v1680_v15 }
 0x103   : > { %v1613_v27 = vadd.f32 %v1549_v57, %v1481_v20  ;;  %v1805_v39 = vadd.f32 %v1745_v37, %v1681_v60  ;;  %v1037_v46 = vmul.f32 %v8573_v31, %v9357_v13  ;;  %v1100_v0 = vmul.f32 %v8583_v35, %v9343_v12 }
 0x104   : > { %v627_v7 = vrot.slane %v9471_v50, 7  ;;  %v659_v6 = vrot.slane %v9473_v19, 7  ;;  %v824_v44 = vrot.slane %v9471_v50, 1  ;;  %v856_v36 = vrot.slane %v9473_v19, 1 }
 0x105   : > { %v1928_v9 = vadd.f32 %v1868_v48, %v1804_v62  ;;  %v1929_v38 = vadd.f32 %v1869_v24, %v1805_v39  ;;  %v1988_v42 = vadd.f32 %v1612_v63, %v1282_v56  ;;  %v1989_v17 = vadd.f32 %v1613_v27, %v1283_v54 }
 0x106   : > { %v692_v1 = vsel %vm676_vm2, %v627_v7, %v659_v6  ;;  %v724_v47 = vsel %vm676_vm2, %v659_v6, %v627_v7  ;;  %v889_v53 = vsel %vm873_vm3, %v824_v44, %v856_v36  ;;  %v921_v32 = vsel %vm873_vm3, %v856_v36, %v824_v44 }
 0x107   : > { %v2052_v52 = vadd.f32 %v1988_v42, %v1928_v9  ;;  %v2053_v16 = vadd.f32 %v1989_v17, %v1929_v38  ;;  %v775_v8 = vsel %vm485_vm0, %v724_v47, 0.0  ;;  %v973_v51 = vsel %vm488_vm1, %v921_v32, 0.0 }
 0x108   : > { %v1036_v56 = vmul.f32 %v8573_v31, %v9365_v41  ;;  %v1101_v11 = vmul.f32 %v8583_v35, %v9345_v29  ;;  %v1224_v55 = vmul.f32 %v8600_v43, %v9369_v25  ;;  %v1225_v54 = vmul.f32 %v8600_v43, %v9375_v26 }
 0x109   : > { %v2103_v33 = vpack.c.bf16 %v2053_v16, %v2052_v52  ;;  %v1350_v57 = vmul.f32 %v8580_v34, %v9431_v28  ;;  %v1351_v13 = vmul.f32 %v8580_v34, %v9423_v18  ;;  %v1418_v12 = vmul.f32 %v8562_v23, %v9407_v3 }
 0x10a   : > { %v1160_v41 = vadd.f32 %v1100_v0, %v1036_v56  ;;  %v1161_v15 = vadd.f32 %v1101_v11, %v1037_v46  ;;  %v1419_v29 = vmul.f32 %v8562_v23, %v9409_v30  ;;  %v1550_v25 = vmul.f32 %v8629_v59, %v9435_v21  ;;  %v450_v11 = vld [vmem:[#allocation5 + $0x100] sm:$0xff] }
 0x10b   : > { %7726 = vmatmul.mubr.bf16.gmra.mrb[24].mxu0 %v2103_v33  ;;  %v1551_v26 = vmul.f32 %v8629_v59, %v9441_v45  ;;  %v1682_v60 = vmul.f32 %v8593_v40, %v775_v8  ;;  %v1482_v49 = vadd.f32 %v1418_v12, %v1350_v57  ;;  %v1683_v37 = vmul.f32 %v8593_v40, %v692_v1  ;;  %v453_v57 = vld [vmem:[#allocation5 + $0x118] sm:$0xff] }
 0x10c   : > { %v1284_v58 = vadd.f32 %v1224_v55, %v1160_v41  ;;  %v1285_v20 = vadd.f32 %v1225_v54, %v1161_v15  ;;  %v1483_v48 = vadd.f32 %v1419_v29, %v1351_v13  ;;  %v1746_v24 = vmul.f32 %v8633_v61, %v9471_v50  ;;  %v452_v54 = vld [vmem:[#allocation5 + $0x110] sm:$0xff]  ;;  %v454_v41 = vld [vmem:[#allocation5 + $0x120] sm:$0xff] }
 0x10d   : > { %v1747_v63 = vmul.f32 %v8633_v61, %v9473_v19  ;;  %v1870_v27 = vmul.f32 %v8638_v2, %v889_v53  ;;  %v1614_v62 = vadd.f32 %v1550_v25, %v1482_v49  ;;  %v1871_v39 = vmul.f32 %v8638_v2, %v973_v51 }
 0x10e   : > { %v1038_v7 = vmul.f32 %v8573_v31, %v9431_v28  ;;  %v1039_v6 = vmul.f32 %v8573_v31, %v9423_v18  ;;  %v1615_v44 = vadd.f32 %v1551_v26, %v1483_v48  ;;  %v1806_v36 = vadd.f32 %v1746_v24, %v1682_v60 }
 0x10f   : > { %v1807_v9 = vadd.f32 %v1747_v63, %v1683_v37  ;;  %v1102_v38 = vmul.f32 %v8583_v35, %v9407_v3  ;;  %v1990_v42 = vadd.f32 %v1614_v62, %v1284_v58  ;;  %v1103_v17 = vmul.f32 %v8583_v35, %v9409_v30  ;;  %v451_v30 = vld [vmem:[#allocation5 + $0x108] sm:$0xff] }
 0x110   : > { %v1226_v47 = vmul.f32 %v8600_v43, %v9435_v21  ;;  %v1227_v32 = vmul.f32 %v8600_v43, %v9441_v45  ;;  %v1930_v28 = vadd.f32 %v1870_v27, %v1806_v36  ;;  %v1991_v16 = vadd.f32 %v1615_v44, %v1285_v20 }
 0x111   : > { %v1931_v52 = vadd.f32 %v1871_v39, %v1807_v9  ;;  %v1162_v18 = vadd.f32 %v1102_v38, %v1038_v7  ;;  %v1163_v56 = vadd.f32 %v1103_v17, %v1039_v6  ;;  %v1352_v46 = vmul.f32 %v8580_v34, %v775_v8 }
 0x112   : > { %v1353_v0 = vmul.f32 %v8580_v34, %v692_v1  ;;  %v1420_v3 = vmul.f32 %v8562_v23, %v9471_v50  ;;  %v2054_v33 = vadd.f32 %v1990_v42, %v1930_v28  ;;  %v1421_v45 = vmul.f32 %v8562_v23, %v9473_v19 }
 0x113   : > { %v2055_v55 = vadd.f32 %v1991_v16, %v1931_v52  ;;  %v1286_v21 = vadd.f32 %v1226_v47, %v1162_v18  ;;  %v1287_v15 = vadd.f32 %v1227_v32, %v1163_v56  ;;  %v1552_v8 = vmul.f32 %v8629_v59, %v889_v53 }
 0x114   : > { %v1484_v13 = vadd.f32 %v1420_v3, %v1352_v46  ;;  %v1553_v1 = vmul.f32 %v8629_v59, %v973_v51  ;;  %v1485_v29 = vadd.f32 %v1421_v45, %v1353_v0  ;;  %v9543_v50 = vmax.f32 %v450_v11, 0.0 }
 0x115   : > { %v2104_v12 = vpack.c.bf16 %v2055_v55, %v2054_v33  ;;  %v9545_v25 = vmax.f32 %v451_v30, 0.0  ;;  %v9547_v60 = vmax.f32 %v452_v54, 0.0  ;;  %v9549_v58 = vmax.f32 %v453_v57, 0.0 }
 0x116   : > { %v1616_v26 = vadd.f32 %v1552_v8, %v1484_v13  ;;  %v9551_v19 = vmax.f32 %v454_v41, 0.0  ;;  %v1617_v20 = vadd.f32 %v1553_v1, %v1485_v29  ;;  %v628_v49 = vrot.slane %v9543_v50, 7  ;;  %v455_v8 = vld [vmem:[#allocation5 + $0x128] sm:$0xff] }
 0x117   : > { %7729 = vmatprep.mubr.bf16.mxu0 %v2104_v12  ;;  %v660_v53 = vrot.slane %v9545_v25, 7  ;;  %v825_v51 = vrot.slane %v9543_v50, 1  ;;  %v629_v48 = vrot.slane %v9547_v60, 7  ;;  %v661_v24 = vrot.slane %v9549_v58, 7 }
 0x118   : > { %v1992_v37 = vadd.f32 %v1616_v26, %v1286_v21  ;;  %v826_v63 = vrot.slane %v9547_v60, 1  ;;  %v1993_v27 = vadd.f32 %v1617_v20, %v1287_v15  ;;  %v857_v7 = vrot.slane %v9545_v25, 1 }
 0x119   : > { %v693_v62 = vsel %vm676_vm2, %v628_v49, %v660_v53  ;;  %v725_v39 = vsel %vm676_vm2, %v660_v53, %v628_v49  ;;  %v694_v6 = vsel %vm676_vm2, %v629_v48, %v661_v24  ;;  %v726_v44 = vsel %vm676_vm2, %v661_v24, %v629_v48 }
 0x11a   : > { %v777_v36 = vsel %vm485_vm0, %v725_v39, 0.0  ;;  %v858_v9 = vrot.slane %v9549_v58, 1  ;;  %v2105_v38 = vpack.c.bf16 %v1993_v27, %v1992_v37  ;;  %v779_v42 = vsel %vm485_vm0, %v726_v44, 0.0 }
 0x11b   : > { %v890_v17 = vsel %vm873_vm3, %v825_v51, %v857_v7  ;;  %v922_v47 = vsel %vm873_vm3, %v857_v7, %v825_v51  ;;  %v1040_v16 = vmul.f32 %v8573_v31, %v777_v36  ;;  %v1041_v56 = vmul.f32 %v8573_v31, %v693_v62 }
 0x11c   : > { %v891_v32 = vsel %vm873_vm3, %v826_v63, %v858_v9  ;;  %v923_v28 = vsel %vm873_vm3, %v858_v9, %v826_v63  ;;  %v975_v52 = vsel %vm488_vm1, %v922_v47, 0.0  ;;  %7730 = vmatmul.mubr.bf16.gmra.mrb[28].mxu0 %v2105_v38  ;;  %v9588_v46 = vmul.f32 %v8573_v31, %v779_v42 }
 0x11d   : > { %v977_v18 = vsel %vm488_vm1, %v923_v28, 0.0  ;;  %v9591_v0 = vmul.f32 %v8573_v31, %v694_v6  ;;  %v1228_v3 = vmul.f32 %v8600_v43, %v890_v17  ;;  %v1229_v11 = vmul.f32 %v8600_v43, %v975_v52 }
 0x11e   : > { %v9596_v30 = vmul.f32 %v8600_v43, %v891_v32  ;;  %v9599_v33 = vmul.f32 %v8600_v43, %v977_v18  ;;  %v1354_v55 = vmul.f32 %v8580_v34, %v777_v36  ;;  %v1355_v21 = vmul.f32 %v8580_v34, %v693_v62 }
 0x11f   : > { %v1356_v45 = vmul.f32 %v8580_v34, %v779_v42  ;;  %v1357_v54 = vmul.f32 %v8580_v34, %v694_v6  ;;  %v1422_v57 = vmul.f32 %v8562_v23, %v9543_v50  ;;  %v1423_v41 = vmul.f32 %v8562_v23, %v9545_v25 }
 0x120   : > { %v1554_v15 = vmul.f32 %v8629_v59, %v890_v17  ;;  %v1555_v13 = vmul.f32 %v8629_v59, %v975_v52  ;;  %v1556_v1 = vmul.f32 %v8629_v59, %v891_v32  ;;  %v1557_v12 = vmul.f32 %v8629_v59, %v977_v18 }
 0x121   : > { %v1684_v29 = vmul.f32 %v8593_v40, %v779_v42  ;;  %v1685_v26 = vmul.f32 %v8593_v40, %v694_v6  ;;  %v1486_v20 = vadd.f32 %v1422_v57, %v1354_v55  ;;  %v1487_v49 = vadd.f32 %v1423_v41, %v1355_v21 }
 0x122   : > { %v1748_v53 = vmul.f32 %v8633_v61, %v9547_v60  ;;  %v1749_v51 = vmul.f32 %v8633_v61, %v9549_v58  ;;  %v1872_v37 = vmul.f32 %v8638_v2, %v891_v32  ;;  %v1873_v48 = vmul.f32 %v8638_v2, %v977_v18 }
 0x123   : > { %v9621_v24 = vmax.f32 %v455_v8, 0.0  ;;  %v630_v63 = vrot.slane %v9551_v19, 7  ;;  %v1618_v27 = vadd.f32 %v1554_v15, %v1486_v20  ;;  %v1619_v62 = vadd.f32 %v1555_v13, %v1487_v49  ;;  %v456_v49 = vld [vmem:[#allocation5 + $0x130] sm:$0xff] }
 0x124   : > { %v1808_v39 = vadd.f32 %v1748_v53, %v1684_v29  ;;  %v1809_v7 = vadd.f32 %v1749_v51, %v1685_v26  ;;  %v827_v44 = vrot.slane %v9551_v19, 1  ;;  %v1104_v9 = vmul.f32 %v8583_v35, %v9543_v50  ;;  %v457_v53 = vld [vmem:[#allocation5 + $0x138] sm:$0xff] }
 0x125   : > { %v662_v6 = vrot.slane %v9621_v24, 7  ;;  %v859_v36 = vrot.slane %v9621_v24, 1  ;;  %v1105_v17 = vmul.f32 %v8583_v35, %v9545_v25  ;;  %v1424_v47 = vmul.f32 %v8562_v23, %v9547_v60 }
 0x126   : > { %v1932_v38 = vadd.f32 %v1872_v37, %v1808_v39  ;;  %v1933_v42 = vadd.f32 %v1873_v48, %v1809_v7  ;;  %v1164_v57 = vadd.f32 %v1104_v9, %v1040_v16  ;;  %v1425_v15 = vmul.f32 %v8562_v23, %v9549_v58 }
 0x127   : > { %v9635_v32 = vsel %vm676_vm2, %v630_v63, %v662_v6  ;;  %v727_v28 = vsel %vm676_vm2, %v662_v6, %v630_v63  ;;  %v9641_v52 = vsel %vm873_vm3, %v827_v44, %v859_v36  ;;  %v924_v50 = vsel %vm873_vm3, %v859_v36, %v827_v44 }
 0x128   : > { %v2058_v18 = vadd.f32 %v1932_v38, %v1618_v27  ;;  %v2059_v55 = vadd.f32 %v1933_v42, %v1619_v62  ;;  %v9647_v25 = vsel %vm485_vm0, %v727_v28, 0.0  ;;  %v9651_v21 = vsel %vm488_vm1, %v924_v50, 0.0 }
 0x129   : > { %v1165_v41 = vadd.f32 %v1105_v17, %v1041_v56  ;;  %v1488_v13 = vadd.f32 %v1424_v47, %v1356_v45  ;;  %v1686_v29 = vmul.f32 %v8593_v40, %v9647_v25  ;;  %v1687_v26 = vmul.f32 %v8593_v40, %v9635_v32 }
 0x12a   : > { %v2106_v8 = vpack.c.bf16 %v2059_v55, %v2058_v18  ;;  %v1750_v20 = vmul.f32 %v8633_v61, %v9551_v19  ;;  %v1288_v51 = vadd.f32 %v1228_v3, %v1164_v57  ;;  %v1489_v16 = vadd.f32 %v1425_v15, %v1357_v54 }
 0x12b   : > { %v1289_v37 = vadd.f32 %v1229_v11, %v1165_v41  ;;  %v1620_v56 = vadd.f32 %v1556_v1, %v1488_v13  ;;  %v1751_v45 = vmul.f32 %v8633_v61, %v9621_v24  ;;  %v1874_v63 = vmul.f32 %v8638_v2, %v9641_v52 }
 0x12c   : > { %7733 = vmatprep.mubr.bf16.mxu1 %v2106_v8  ;;  %v1810_v48 = vadd.f32 %v1750_v20, %v1686_v29  ;;  %v1875_v27 = vmul.f32 %v8638_v2, %v9651_v21  ;;  %v1621_v62 = vadd.f32 %v1557_v12, %v1489_v16  ;;  %v9667_v7 = vmax.f32 %v456_v49, 0.0  ;;  %v458_v49 = vld [vmem:[#allocation5 + $0x140] sm:$0xff] }
 0x12d   : > { %v1996_v39 = vadd.f32 %v1620_v56, %v1288_v51  ;;  %v9669_v6 = vmax.f32 %v457_v53, 0.0  ;;  %v1811_v3 = vadd.f32 %v1751_v45, %v1687_v26  ;;  %v1106_v54 = vmul.f32 %v8583_v35, %v9547_v60  ;;  %v459_v53 = vld [vmem:[#allocation5 + $0x148] sm:$0xff] }
 0x12e   : > { %v1934_v11 = vadd.f32 %v1874_v63, %v1810_v48  ;;  %v1107_v1 = vmul.f32 %v8583_v35, %v9549_v58  ;;  %v1997_v44 = vadd.f32 %v1621_v62, %v1289_v37  ;;  %v631_v36 = vrot.slane %v9667_v7, 7 }
 0x12f   : > { %v663_v9 = vrot.slane %v9669_v6, 7  ;;  %v828_v12 = vrot.slane %v9667_v7, 1  ;;  %v1935_v38 = vadd.f32 %v1875_v27, %v1811_v3  ;;  %v860_v17 = vrot.slane %v9669_v6, 1 }
 0x130   : > { %v2060_v42 = vadd.f32 %v1996_v39, %v1934_v11  ;;  %v1166_v47 = vadd.f32 %v1106_v54, %v9588_v46  ;;  %v1167_v58 = vadd.f32 %v1107_v1, %v9591_v0  ;;  %v1358_v50 = vmul.f32 %v8580_v34, %v9647_v25 }
 0x131   : > { %v9682_v28 = vsel %vm676_vm2, %v631_v36, %v663_v9  ;;  %v728_v60 = vsel %vm676_vm2, %v663_v9, %v631_v36  ;;  %v2061_v18 = vadd.f32 %v1997_v44, %v1935_v38  ;;  %v9695_v46 = vsel %vm873_vm3, %v828_v12, %v860_v17 }
 0x132   : > { %v9691_v55 = vsel %vm485_vm0, %v728_v60, 0.0  ;;  %v925_v57 = vsel %vm873_vm3, %v860_v17, %v828_v12  ;;  %v1290_v0 = vadd.f32 %v9596_v30, %v1166_v47  ;;  %v1291_v15 = vadd.f32 %v9599_v33, %v1167_v58 }
 0x133   : > { %v9701_v41 = vsel %vm488_vm1, %v925_v57, 0.0  ;;  %v1359_v13 = vmul.f32 %v8580_v34, %v9635_v32  ;;  %v2107_v8 = vpack.c.bf16 %v2061_v18, %v2060_v42  ;;  %v1426_v29 = vmul.f32 %v8562_v23, %v9551_v19 }
 0x134   : > { %v1427_v26 = vmul.f32 %v8562_v23, %v9621_v24  ;;  %v1558_v20 = vmul.f32 %v8629_v59, %v9641_v52  ;;  %v1559_v30 = vmul.f32 %v8629_v59, %v9651_v21  ;;  %v1688_v33 = vmul.f32 %v8593_v40, %v9691_v55 }
 0x135   : > { %v1689_v51 = vmul.f32 %v8593_v40, %v9682_v28  ;;  %v1752_v37 = vmul.f32 %v8633_v61, %v9667_v7  ;;  %7734 = vmatmul.mubr.bf16.vlgmr.msra.gmra.mrb[0].mxu1 %v2107_v8  ;;  %v1490_v16 = vadd.f32 %v1426_v29, %v1358_v50  ;;  %v1753_v45 = vmul.f32 %v8633_v61, %v9669_v6 }
 0x136   : > { %v1491_v56 = vadd.f32 %v1427_v26, %v1359_v13  ;;  %v1876_v48 = vmul.f32 %v8638_v2, %v9695_v46  ;;  %v1877_v27 = vmul.f32 %v8638_v2, %v9701_v41  ;;  %v9727_v62 = vmax.f32 %v458_v49, 0.0 }
 0x137   : > { %v1812_v63 = vadd.f32 %v1752_v37, %v1688_v33  ;;  %v9729_v39 = vmax.f32 %v459_v53, 0.0  ;;  %v1622_v3 = vadd.f32 %v1558_v20, %v1490_v16  ;;  %v1813_v54 = vadd.f32 %v1753_v45, %v1689_v51  ;;  %v460_v16 = vld [vmem:[#allocation5 + $0x150] sm:$0xff] }
 0x138   : > { %v1623_v11 = vadd.f32 %v1559_v30, %v1491_v56  ;;  %v1044_v1 = vmul.f32 %v8573_v31, %v9647_v25  ;;  %v632_v36 = vrot.slane %v9727_v62, 7  ;;  %v829_v12 = vrot.slane %v9727_v62, 1  ;;  %v461_v56 = vld [vmem:[#allocation5 + $0x158] sm:$0xff] }
 0x139   : > { %v1936_v44 = vadd.f32 %v1876_v48, %v1812_v63  ;;  %v664_v9 = vrot.slane %v9729_v39, 7  ;;  %v1937_v38 = vadd.f32 %v1877_v27, %v1813_v54  ;;  %v1998_v42 = vadd.f32 %v1622_v3, %v1290_v0 }
 0x13a   : > { %v1999_v17 = vadd.f32 %v1623_v11, %v1291_v15  ;;  %v861_v47 = vrot.slane %v9729_v39, 1  ;;  %v1045_v25 = vmul.f32 %v8573_v31, %v9635_v32  ;;  %v1108_v50 = vmul.f32 %v8583_v35, %v9551_v19 }
 0x13b   : > { %v9739_v60 = vsel %vm676_vm2, %v632_v36, %v664_v9  ;;  %v729_v58 = vsel %vm676_vm2, %v664_v9, %v632_v36  ;;  %v2062_v18 = vadd.f32 %v1998_v42, %v1936_v44  ;;  %v1109_v8 = vmul.f32 %v8583_v35, %v9621_v24 }
 0x13c   : > { %v2063_v57 = vadd.f32 %v1999_v17, %v1937_v38  ;;  %v9749_v0 = vsel %vm485_vm0, %v729_v58, 0.0  ;;  %v9753_v15 = vsel %vm873_vm3, %v829_v12, %v861_v47  ;;  %v926_v13 = vsel %vm873_vm3, %v861_v47, %v829_v12 }
 0x13d   : > { %v1168_v32 = vadd.f32 %v1108_v50, %v1044_v1  ;;  %v1232_v19 = vmul.f32 %v8600_v43, %v9641_v52  ;;  %v9763_v26 = vsel %vm488_vm1, %v926_v13, 0.0  ;;  %v1233_v20 = vmul.f32 %v8600_v43, %v9651_v21 }
 0x13e   : > { %v2108_v29 = vpack.c.bf16 %v2063_v57, %v2062_v18  ;;  %v1360_v49 = vmul.f32 %v8580_v34, %v9691_v55  ;;  %v1169_v53 = vadd.f32 %v1109_v8, %v1045_v25  ;;  %v1361_v24 = vmul.f32 %v8580_v34, %v9682_v28 }
 0x13f   : > { %v1292_v30 = vadd.f32 %v1232_v19, %v1168_v32  ;;  %v1428_v33 = vmul.f32 %v8562_v23, %v9667_v7  ;;  %v1429_v52 = vmul.f32 %v8562_v23, %v9669_v6  ;;  %v1560_v51 = vmul.f32 %v8629_v59, %v9695_v46 }
 0x140   : > { %7737 = vmatprep.mubr.bf16.mxu1 %v2108_v29  ;;  %v1561_v21 = vmul.f32 %v8629_v59, %v9701_v41  ;;  %v1690_v37 = vmul.f32 %v8593_v40, %v9749_v0  ;;  %v1293_v45 = vadd.f32 %v1233_v20, %v1169_v53  ;;  %v1691_v63 = vmul.f32 %v8593_v40, %v9739_v60 }
 0x141   : > { %v1492_v48 = vadd.f32 %v1428_v33, %v1360_v49  ;;  %v1754_v27 = vmul.f32 %v8633_v61, %v9727_v62  ;;  %v1493_v3 = vadd.f32 %v1429_v52, %v1361_v24  ;;  %v1755_v11 = vmul.f32 %v8633_v61, %v9729_v39 }
 0x142   : > { %v1878_v54 = vmul.f32 %v8638_v2, %v9753_v15  ;;  %v1879_v1 = vmul.f32 %v8638_v2, %v9763_v26  ;;  %v9791_v9 = vmax.f32 %v460_v16, 0.0  ;;  %v9793_v12 = vmax.f32 %v461_v56, 0.0 }
 0x143   : > { %v1624_v44 = vadd.f32 %v1560_v51, %v1492_v48  ;;  %v1814_v36 = vadd.f32 %v1754_v27, %v1690_v37  ;;  %v1625_v38 = vadd.f32 %v1561_v21, %v1493_v3  ;;  %v1815_v42 = vadd.f32 %v1755_v11, %v1691_v63  ;;  %v462_v63 = vld [vmem:[#allocation5 + $0x160] sm:$0xff]  ;;  %v463_v11 = vld [vmem:[#allocation5 + $0x168] sm:$0xff] }
 0x144   : > { %v1046_v17 = vmul.f32 %v8573_v31, %v9691_v55  ;;  %v1047_v47 = vmul.f32 %v8573_v31, %v9682_v28  ;;  %v633_v50 = vrot.slane %v9791_v9, 7  ;;  %v665_v18 = vrot.slane %v9793_v12, 7 }
 0x145   : > { %v1938_v58 = vadd.f32 %v1878_v54, %v1814_v36  ;;  %v2000_v25 = vadd.f32 %v1624_v44, %v1292_v30  ;;  %v1939_v57 = vadd.f32 %v1879_v1, %v1815_v42  ;;  %v2001_v13 = vadd.f32 %v1625_v38, %v1293_v45 }
 0x146   : > { %v830_v8 = vrot.slane %v9791_v9, 1  ;;  %v862_v32 = vrot.slane %v9793_v12, 1  ;;  %v9805_v29 = vsel %vm676_vm2, %v633_v50, %v665_v18  ;;  %v730_v28 = vsel %vm676_vm2, %v665_v18, %v633_v50 }
 0x147   : > { %v2064_v19 = vadd.f32 %v2000_v25, %v1938_v58  ;;  %v1110_v55 = vmul.f32 %v8583_v35, %v9667_v7  ;;  %v2065_v20 = vadd.f32 %v2001_v13, %v1939_v57  ;;  %v9813_v49 = vsel %vm485_vm0, %v730_v28, 0.0 }
 0x148   : > { %v9817_v53 = vsel %vm873_vm3, %v830_v8, %v862_v32  ;;  %v927_v30 = vsel %vm873_vm3, %v862_v32, %v830_v8  ;;  %v1111_v33 = vmul.f32 %v8583_v35, %v9669_v6  ;;  %v1234_v52 = vmul.f32 %v8600_v43, %v9695_v46 }
 0x149   : > { %v9823_v24 = vsel %vm488_vm1, %v927_v30, 0.0  ;;  %v1170_v7 = vadd.f32 %v1110_v55, %v1046_v17  ;;  %v2109_v51 = vpack.c.bf16 %v2065_v20, %v2064_v19  ;;  %v1235_v21 = vmul.f32 %v8600_v43, %v9701_v41 }
 0x14a   : > { %v1362_v37 = vmul.f32 %v8580_v34, %v9749_v0  ;;  %v1363_v16 = vmul.f32 %v8580_v34, %v9739_v60  ;;  %v1171_v56 = vadd.f32 %v1111_v33, %v1047_v47  ;;  %v1430_v48 = vmul.f32 %v8562_v23, %v9727_v62 }
 0x14b   : > { %v1294_v45 = vadd.f32 %v1234_v52, %v1170_v7  ;;  %v1431_v6 = vmul.f32 %v8562_v23, %v9729_v39  ;;  %7738 = vmatmul.mubr.bf16.gmra.mrb[4].mxu1 %v2109_v51  ;;  %v1562_v46 = vmul.f32 %v8629_v59, %v9753_v15  ;;  %v1563_v41 = vmul.f32 %v8629_v59, %v9763_v26 }
 0x14c   : > { %v1692_v27 = vmul.f32 %v8593_v40, %v9813_v49  ;;  %v1693_v3 = vmul.f32 %v8593_v40, %v9805_v29  ;;  %v1295_v54 = vadd.f32 %v1235_v21, %v1171_v56  ;;  %v1494_v1 = vadd.f32 %v1430_v48, %v1362_v37 }
 0x14d   : > { %v1495_v44 = vadd.f32 %v1431_v6, %v1363_v16  ;;  %v1756_v36 = vmul.f32 %v8633_v61, %v9791_v9  ;;  %v1757_v38 = vmul.f32 %v8633_v61, %v9793_v12  ;;  %v1880_v42 = vmul.f32 %v8638_v2, %v9817_v53 }
 0x14e   : > { %v1881_v17 = vmul.f32 %v8638_v2, %v9823_v24  ;;  %v9855_v47 = vmax.f32 %v462_v63, 0.0  ;;  %v1626_v58 = vadd.f32 %v1562_v46, %v1494_v1  ;;  %v9857_v18 = vmax.f32 %v463_v11, 0.0 }
 0x14f   : > { %v1627_v25 = vadd.f32 %v1563_v41, %v1495_v44  ;;  %v1816_v50 = vadd.f32 %v1756_v36, %v1692_v27  ;;  %v1817_v57 = vadd.f32 %v1757_v38, %v1693_v3  ;;  %v1048_v32 = vmul.f32 %v8573_v31, %v9749_v0 }
 0x150   : > { %v634_v13 = vrot.slane %v9855_v47, 7  ;;  %v831_v8 = vrot.slane %v9855_v47, 1  ;;  %v2002_v28 = vadd.f32 %v1626_v58, %v1294_v45  ;;  %v666_v20 = vrot.slane %v9857_v18, 7 }
 0x151   : > { %v1940_v19 = vadd.f32 %v1880_v42, %v1816_v50  ;;  %v2003_v55 = vadd.f32 %v1627_v25, %v1295_v54  ;;  %v1941_v30 = vadd.f32 %v1881_v17, %v1817_v57  ;;  %v863_v33 = vrot.slane %v9857_v18, 1  ;;  %v464_v42 = vld [vmem:[#allocation5 + $0x170] sm:$0xff] }
 0x152   : > { %v1049_v7 = vmul.f32 %v8573_v31, %v9739_v60  ;;  %v1112_v52 = vmul.f32 %v8583_v35, %v9727_v62  ;;  %v9871_v21 = vsel %vm676_vm2, %v634_v13, %v666_v20  ;;  %v731_v0 = vsel %vm676_vm2, %v666_v20, %v634_v13 }
 0x153   : > { %v2066_v51 = vadd.f32 %v2002_v28, %v1940_v19  ;;  %v1113_v37 = vmul.f32 %v8583_v35, %v9729_v39  ;;  %v9877_v16 = vpop.f32.mrb[0].mxu0  ;;  %v2067_v56 = vadd.f32 %v2003_v55, %v1941_v30  ;;  %v9881_v60 = vsel %vm485_vm0, %v731_v0, 0.0 }
 0x154   : > { %v9885_v62 = vsel %vm873_vm3, %v831_v8, %v863_v33  ;;  %v928_v45 = vsel %vm873_vm3, %v863_v33, %v831_v8  ;;  %v9889_v48 = vpop.f32.mrb[1].mxu0  ;;  %v1172_v39 = vadd.f32 %v1112_v52, %v1048_v32  ;;  %v1236_v46 = vmul.f32 %v8600_v43, %v9753_v15 }
 0x155   : > { %v9893_v6 = vsel %vm488_vm1, %v928_v45, 0.0  ;;  %v1173_v63 = vadd.f32 %v1113_v37, %v1049_v7  ;;  %v9897_v41 = vpop.f32.mrb[2].mxu0  ;;  %v2110_v27 = vpack.c.bf16 %v2067_v56, %v2066_v51  ;;  %v1237_v3 = vmul.f32 %v8600_v43, %v9763_v26  ;;  %v465_v26 = vld [vmem:[#allocation5 + $0x178] sm:$0xff] }
 0x156   : > { %v1364_v11 = vmul.f32 %v8580_v34, %v9813_v49  ;;  %v1365_v54 = vmul.f32 %v8580_v34, %v9805_v29  ;;  %v9905_v1 = vpop.f32.mrb[3].mxu0  ;;  %v1296_v44 = vadd.f32 %v1236_v46, %v1172_v39  ;;  %v1432_v36 = vmul.f32 %v8562_v23, %v9791_v9 }
 0x157   : > { %v1433_v15 = vmul.f32 %v8562_v23, %v9793_v12  ;;  %v1564_v38 = vmul.f32 %v8629_v59, %v9817_v53  ;;  %7741 = vmatprep.mubr.bf16.mxu1 %v2110_v27  ;;  %v1297_v17 = vadd.f32 %v1237_v3, %v1173_v63  ;;  %v1565_v58 = vmul.f32 %v8629_v59, %v9823_v24 }
 0x158   : > { %v1694_v25 = vmul.f32 %v8593_v40, %v9881_v60  ;;  %v1695_v50 = vmul.f32 %v8593_v40, %v9871_v21  ;;  %v1496_v57 = vadd.f32 %v1432_v36, %v1364_v11  ;;  %v1758_v8 = vmul.f32 %v8633_v61, %v9855_v47 }
 0x159   : > { %v1497_v13 = vadd.f32 %v1433_v15, %v1365_v54  ;;  %v1759_v32 = vmul.f32 %v8633_v61, %v9857_v18  ;;  %v1882_v19 = vmul.f32 %v8638_v2, %v9885_v62  ;;  %v1883_v28 = vmul.f32 %v8638_v2, %v9893_v6 }
 0x15a   : > { %v9927_v55 = vmax.f32 %v464_v42, 0.0  ;;  %v9929_v20 = vmax.f32 %v465_v26, 0.0  ;;  %v1628_v30 = vadd.f32 %v1564_v38, %v1496_v57  ;;  %v1818_v7 = vadd.f32 %v1758_v8, %v1694_v25 }
 0x15b   : > { %v1629_v33 = vadd.f32 %v1565_v58, %v1497_v13  ;;  %v1819_v52 = vadd.f32 %v1759_v32, %v1695_v50  ;;  %v1050_v42 = vmul.f32 %v8573_v31, %v9813_v49  ;;  %v1051_v26 = vmul.f32 %v8573_v31, %v9805_v29 }
 0x15c   : > { %v635_v51 = vrot.slane %v9927_v55, 7  ;;  %v667_v0 = vrot.slane %v9929_v20, 7  ;;  %v832_v37 = vrot.slane %v9927_v55, 1  ;;  %v864_v56 = vrot.slane %v9929_v20, 1 }
 0x15d   : > { %v1942_v45 = vadd.f32 %v1882_v19, %v1818_v7  ;;  %v1943_v39 = vadd.f32 %v1883_v28, %v1819_v52  ;;  %v2004_v63 = vadd.f32 %v1628_v30, %v1296_v44  ;;  %v2005_v46 = vadd.f32 %v1629_v33, %v1297_v17  ;;  %v466_v19 = vld [vmem:[#allocation5 + $0x180] sm:$0xff]  ;;  %v467_v28 = vld [vmem:[#allocation5 + $0x188] sm:$0xff] }
 0x15e   : > { %v9937_v27 = vsel %vm676_vm2, %v635_v51, %v667_v0  ;;  %v732_v3 = vsel %vm676_vm2, %v667_v0, %v635_v51  ;;  %v9943_v11 = vsel %vm873_vm3, %v832_v37, %v864_v56  ;;  %v929_v54 = vsel %vm873_vm3, %v864_v56, %v832_v37 }
 0x15f   : > { %v2068_v36 = vadd.f32 %v2004_v63, %v1942_v45  ;;  %v2069_v15 = vadd.f32 %v2005_v46, %v1943_v39  ;;  %v9949_v44 = vsel %vm485_vm0, %v732_v3, 0.0  ;;  %v9953_v38 = vsel %vm488_vm1, %v929_v54, 0.0 }
 0x160   : > { %v1114_v17 = vmul.f32 %v8583_v35, %v9791_v9  ;;  %v1115_v58 = vmul.f32 %v8583_v35, %v9793_v12  ;;  %v1238_v50 = vmul.f32 %v8600_v43, %v9817_v53  ;;  %v1239_v57 = vmul.f32 %v8600_v43, %v9823_v24 }
 0x161   : > { %v2111_v25 = vpack.c.bf16 %v2069_v15, %v2068_v36  ;;  %v1366_v13 = vmul.f32 %v8580_v34, %v9881_v60  ;;  %v1367_v29 = vmul.f32 %v8580_v34, %v9871_v21  ;;  %v1434_v9 = vmul.f32 %v8562_v23, %v9855_v47 }
 0x162   : > { %v1174_v49 = vadd.f32 %v1114_v17, %v1050_v42  ;;  %v1175_v8 = vadd.f32 %v1115_v58, %v1051_v26  ;;  %v1435_v12 = vmul.f32 %v8562_v23, %v9857_v18  ;;  %v1566_v53 = vmul.f32 %v8629_v59, %v9885_v62 }
 0x163   : > { %7742 = vmatmul.mubr.bf16.gmra.mrb[8].mxu1 %v2111_v25  ;;  %v1567_v24 = vmul.f32 %v8629_v59, %v9893_v6  ;;  %v1696_v32 = vmul.f32 %v8593_v40, %v9949_v44  ;;  %v1498_v7 = vadd.f32 %v1434_v9, %v1366_v13  ;;  %v1697_v52 = vmul.f32 %v8593_v40, %v9937_v27 }
 0x164   : > { %v1298_v30 = vadd.f32 %v1238_v50, %v1174_v49  ;;  %v1299_v33 = vadd.f32 %v1239_v57, %v1175_v8  ;;  %v1499_v51 = vadd.f32 %v1435_v12, %v1367_v29  ;;  %v1760_v0 = vmul.f32 %v8633_v61, %v9927_v55 }
 0x165   : > { %v1761_v37 = vmul.f32 %v8633_v61, %v9929_v20  ;;  %v1884_v56 = vmul.f32 %v8638_v2, %v9943_v11  ;;  %v1630_v45 = vadd.f32 %v1566_v53, %v1498_v7  ;;  %v1885_v39 = vmul.f32 %v8638_v2, %v9953_v38 }
 0x166   : > { %v9991_v63 = vmax.f32 %v466_v19, 0.0  ;;  %v9993_v46 = vmax.f32 %v467_v28, 0.0  ;;  %v1631_v3 = vadd.f32 %v1567_v24, %v1499_v51  ;;  %v1820_v54 = vadd.f32 %v1760_v0, %v1696_v32 }
 0x167   : > { %v1821_v36 = vadd.f32 %v1761_v37, %v1697_v52  ;;  %v1052_v15 = vmul.f32 %v8573_v31, %v9881_v60  ;;  %v2006_v42 = vadd.f32 %v1630_v45, %v1298_v30  ;;  %v1053_v29 = vmul.f32 %v8573_v31, %v9871_v21 }
 0x168   : > { %v636_v26 = vrot.slane %v9991_v63, 7  ;;  %v668_v17 = vrot.slane %v9993_v46, 7  ;;  %v833_v58 = vrot.slane %v9991_v63, 1  ;;  %v1944_v25 = vadd.f32 %v1884_v56, %v1820_v54  ;;  %v10001_v49 = vpop.f32.mrb[4].mxu0 }
 0x169   : > { %v1945_v50 = vadd.f32 %v1885_v39, %v1821_v36  ;;  %v2007_v57 = vadd.f32 %v1631_v3, %v1299_v33  ;;  %v865_v13 = vrot.slane %v9993_v46, 1  ;;  %v1116_v9 = vmul.f32 %v8583_v35, %v9855_v47  ;;  %v10013_v12 = vpop.f32.mrb[5].mxu0  ;;  %v468_v36 = vld [vmem:[#allocation5 + $0x190] sm:$0xff] }
 0x16a   : > { %v10005_v8 = vsel %vm676_vm2, %v636_v26, %v668_v17  ;;  %v733_v60 = vsel %vm676_vm2, %v668_v17, %v636_v26  ;;  %v2070_v53 = vadd.f32 %v2006_v42, %v1944_v25  ;;  %v10023_v28 = vpop.f32.mrb[6].mxu0  ;;  %v1117_v47 = vmul.f32 %v8583_v35, %v9857_v18 }
 0x16b   : > { %v2071_v24 = vadd.f32 %v2007_v57, %v1945_v50  ;;  %v10017_v32 = vsel %vm485_vm0, %v733_v60, 0.0  ;;  %v10021_v19 = vsel %vm873_vm3, %v833_v58, %v865_v13  ;;  %v930_v21 = vsel %vm873_vm3, %v865_v13, %v833_v58  ;;  %v10031_v7 = vpop.f32.mrb[7].mxu0 }
 0x16c   : > { %v1176_v30 = vadd.f32 %v1116_v9, %v1052_v15  ;;  %v1240_v33 = vmul.f32 %v8600_v43, %v9885_v62  ;;  %v10035_v51 = vsel %vm488_vm1, %v930_v21, 0.0  ;;  %v1241_v0 = vmul.f32 %v8600_v43, %v9893_v6  ;;  %v469_v15 = vld [vmem:[#allocation5 + $0x198] sm:$0xff] }
 0x16d   : > { %v2112_v52 = vpack.c.bf16 %v2071_v24, %v2070_v53  ;;  %v1368_v37 = vmul.f32 %v8580_v34, %v9949_v44  ;;  %v1177_v56 = vadd.f32 %v1117_v47, %v1053_v29  ;;  %v1369_v18 = vmul.f32 %v8580_v34, %v9937_v27 }
 0x16e   : > { %v1300_v45 = vadd.f32 %v1240_v33, %v1176_v30  ;;  %v1436_v62 = vmul.f32 %v8562_v23, %v9927_v55  ;;  %v1437_v39 = vmul.f32 %v8562_v23, %v9929_v20  ;;  %v1568_v3 = vmul.f32 %v8629_v59, %v9943_v11 }
 0x16f   : > { %7745 = vmatprep.mubr.bf16.mxu1 %v2112_v52  ;;  %v1569_v6 = vmul.f32 %v8629_v59, %v9953_v38  ;;  %v1698_v54 = vmul.f32 %v8593_v40, %v10017_v32  ;;  %v1301_v42 = vadd.f32 %v1241_v0, %v1177_v56  ;;  %v1699_v17 = vmul.f32 %v8593_v40, %v10005_v8 }
 0x170   : > { %v1500_v26 = vadd.f32 %v1436_v62, %v1368_v37  ;;  %v1762_v58 = vmul.f32 %v8633_v61, %v9991_v63  ;;  %v1501_v25 = vadd.f32 %v1437_v39, %v1369_v18  ;;  %v1763_v50 = vmul.f32 %v8633_v61, %v9993_v46 }
 0x171   : > { %v1886_v57 = vmul.f32 %v8638_v2, %v10021_v19  ;;  %v1887_v13 = vmul.f32 %v8638_v2, %v10035_v51  ;;  %v10063_v9 = vmax.f32 %v468_v36, 0.0  ;;  %v10065_v53 = vmax.f32 %v469_v15, 0.0 }
 0x172   : > { %v1632_v60 = vadd.f32 %v1568_v3, %v1500_v26  ;;  %v1822_v29 = vadd.f32 %v1762_v58, %v1698_v54  ;;  %v1633_v24 = vadd.f32 %v1569_v6, %v1501_v25  ;;  %v1823_v21 = vadd.f32 %v1763_v50, %v1699_v17 }
 0x173   : > { %v1054_v47 = vmul.f32 %v8573_v31, %v9949_v44  ;;  %v1055_v30 = vmul.f32 %v8573_v31, %v9937_v27  ;;  %v637_v0 = vrot.slane %v10063_v9, 7  ;;  %v669_v37 = vrot.slane %v10065_v53, 7 }
 0x174   : > { %v1946_v33 = vadd.f32 %v1886_v57, %v1822_v29  ;;  %v2008_v52 = vadd.f32 %v1632_v60, %v1300_v45  ;;  %v1947_v56 = vadd.f32 %v1887_v13, %v1823_v21  ;;  %v2009_v18 = vadd.f32 %v1633_v24, %v1301_v42  ;;  %v470_v24 = vld [vmem:[#allocation5 + $0x1a0] sm:$0xff] }
 0x175   : > { %v834_v62 = vrot.slane %v10063_v9, 1  ;;  %v866_v39 = vrot.slane %v10065_v53, 1  ;;  %v10077_v6 = vsel %vm676_vm2, %v637_v0, %v669_v37  ;;  %v734_v27 = vsel %vm676_vm2, %v669_v37, %v637_v0 }
 0x176   : > { %v2072_v3 = vadd.f32 %v2008_v52, %v1946_v33  ;;  %v1118_v44 = vmul.f32 %v8583_v35, %v9927_v55  ;;  %v2073_v45 = vadd.f32 %v2009_v18, %v1947_v56  ;;  %v10085_v54 = vsel %vm485_vm0, %v734_v27, 0.0 }
 0x177   : > { %v10089_v36 = vsel %vm873_vm3, %v834_v62, %v866_v39  ;;  %v931_v15 = vsel %vm873_vm3, %v866_v39, %v834_v62  ;;  %v1119_v26 = vmul.f32 %v8583_v35, %v9929_v20  ;;  %v1242_v17 = vmul.f32 %v8600_v43, %v9943_v11 }
 0x178   : > { %v10095_v42 = vsel %vm488_vm1, %v931_v15, 0.0  ;;  %v1178_v55 = vadd.f32 %v1118_v44, %v1054_v47  ;;  %v2113_v58 = vpack.c.bf16 %v2073_v45, %v2072_v3  ;;  %v1243_v25 = vmul.f32 %v8600_v43, %v9953_v38 }
 0x179   : > { %v1370_v50 = vmul.f32 %v8580_v34, %v10017_v32  ;;  %v1371_v57 = vmul.f32 %v8580_v34, %v10005_v8  ;;  %v1179_v13 = vadd.f32 %v1119_v26, %v1055_v30  ;;  %v1438_v29 = vmul.f32 %v8562_v23, %v9991_v63  ;;  %v471_v30 = vld [vmem:[#allocation5 + $0x1a8] sm:$0xff] }
 0x17a   : > { %v1302_v60 = vadd.f32 %v1242_v17, %v1178_v55  ;;  %v1439_v20 = vmul.f32 %v8562_v23, %v9993_v46  ;;  %7746 = vmatmul.mubr.bf16.gmra.mrb[12].mxu1 %v2113_v58  ;;  %v1570_v11 = vmul.f32 %v8629_v59, %v10021_v19  ;;  %v1571_v38 = vmul.f32 %v8629_v59, %v10035_v51 }
 0x17b   : > { %v1700_v21 = vmul.f32 %v8593_v40, %v10085_v54  ;;  %v1701_v47 = vmul.f32 %v8593_v40, %v10077_v6  ;;  %v1303_v33 = vadd.f32 %v1243_v25, %v1179_v13  ;;  %v1502_v52 = vadd.f32 %v1438_v29, %v1370_v50 }
 0x17c   : > { %v1503_v0 = vadd.f32 %v1439_v20, %v1371_v57  ;;  %v1764_v37 = vmul.f32 %v8633_v61, %v10063_v9  ;;  %v1765_v56 = vmul.f32 %v8633_v61, %v10065_v53  ;;  %v1888_v18 = vmul.f32 %v8638_v2, %v10089_v36 }
 0x17d   : > { %v1889_v62 = vmul.f32 %v8638_v2, %v10095_v42  ;;  %v10127_v39 = vmax.f32 %v470_v24, 0.0  ;;  %v1634_v3 = vadd.f32 %v1570_v11, %v1502_v52  ;;  %v10129_v45 = vmax.f32 %v471_v30, 0.0 }
 0x17e   : > { %v1635_v27 = vadd.f32 %v1571_v38, %v1503_v0  ;;  %v1824_v44 = vadd.f32 %v1764_v37, %v1700_v21  ;;  %v1825_v15 = vadd.f32 %v1765_v56, %v1701_v47  ;;  %v1056_v17 = vmul.f32 %v8573_v31, %v10017_v32 }
 0x17f   : > { %v638_v26 = vrot.slane %v10127_v39, 7  ;;  %v835_v55 = vrot.slane %v10127_v39, 1  ;;  %v2010_v25 = vadd.f32 %v1634_v3, %v1302_v60  ;;  %v670_v57 = vrot.slane %v10129_v45, 7 }
 0x180   : > { %v1948_v58 = vadd.f32 %v1888_v18, %v1824_v44  ;;  %v2011_v50 = vadd.f32 %v1635_v27, %v1303_v33  ;;  %v10136_v13 = vpop.f32.mrb[8].mxu0  ;;  %v1949_v29 = vadd.f32 %v1889_v62, %v1825_v15  ;;  %v867_v20 = vrot.slane %v10129_v45, 1 }
 0x181   : > { %v1057_v24 = vmul.f32 %v8573_v31, %v10005_v8  ;;  %v1120_v11 = vmul.f32 %v8583_v35, %v9991_v63  ;;  %v10143_v38 = vpop.f32.mrb[9].mxu0  ;;  %v10147_v32 = vsel %vm676_vm2, %v638_v26, %v670_v57  ;;  %v735_v60 = vsel %vm676_vm2, %v670_v57, %v638_v26 }
 0x182   : > { %v2074_v21 = vadd.f32 %v2010_v25, %v1948_v58  ;;  %v1121_v47 = vmul.f32 %v8583_v35, %v9993_v46  ;;  %v10153_v30 = vpop.f32.mrb[10].mxu0  ;;  %v2075_v33 = vadd.f32 %v2011_v50, %v1949_v29  ;;  %v10157_v8 = vsel %vm485_vm0, %v735_v60, 0.0  ;;  %v473_v58 = vld [vmem:[#allocation5 + $0x1b8] sm:$0xff] }
 0x183   : > { %v10161_v63 = vsel %vm873_vm3, %v835_v55, %v867_v20  ;;  %v932_v52 = vsel %vm873_vm3, %v867_v20, %v835_v55  ;;  %v10165_v0 = vpop.f32.mrb[11].mxu0  ;;  %v1180_v46 = vadd.f32 %v1120_v11, %v1056_v17  ;;  %v1244_v18 = vmul.f32 %v8600_v43, %v10021_v19  ;;  %v472_v17 = vld [vmem:[#allocation5 + $0x1b0] sm:$0xff] }
 0x184   : > { %v10169_v37 = vsel %vm488_vm1, %v932_v52, 0.0  ;;  %v1181_v56 = vadd.f32 %v1121_v47, %v1057_v24  ;;  %v2114_v62 = vpack.c.bf16 %v2075_v33, %v2074_v21  ;;  %v1245_v3 = vmul.f32 %v8600_v43, %v10035_v51 }
 0x185   : > { %v1372_v27 = vmul.f32 %v8580_v34, %v10085_v54  ;;  %v1373_v44 = vmul.f32 %v8580_v34, %v10077_v6  ;;  %v1304_v15 = vadd.f32 %v1244_v18, %v1180_v46  ;;  %v1440_v26 = vmul.f32 %v8562_v23, %v10063_v9 }
 0x186   : > { %v1441_v55 = vmul.f32 %v8562_v23, %v10065_v53  ;;  %v1572_v19 = vmul.f32 %v8629_v59, %v10089_v36  ;;  %7749 = vmatprep.mubr.bf16.mxu1 %v2114_v62  ;;  %v1305_v51 = vadd.f32 %v1245_v3, %v1181_v56  ;;  %v1573_v25 = vmul.f32 %v8629_v59, %v10095_v42 }
 0x187   : > { %v1702_v50 = vmul.f32 %v8593_v40, %v10157_v8  ;;  %v1703_v57 = vmul.f32 %v8593_v40, %v10147_v32  ;;  %v1504_v29 = vadd.f32 %v1440_v26, %v1372_v27  ;;  %v1766_v24 = vmul.f32 %v8633_v61, %v10127_v39 }
 0x188   : > { %v1505_v20 = vadd.f32 %v1441_v55, %v1373_v44  ;;  %v1767_v11 = vmul.f32 %v8633_v61, %v10129_v45  ;;  %v1890_v21 = vmul.f32 %v8638_v2, %v10161_v63  ;;  %v1891_v60 = vmul.f32 %v8638_v2, %v10169_v37 }
 0x189   : > { %v10199_v47 = vmax.f32 %v472_v17, 0.0  ;;  %v10201_v33 = vmax.f32 %v473_v58, 0.0  ;;  %v1636_v52 = vadd.f32 %v1572_v19, %v1504_v29  ;;  %v1826_v56 = vadd.f32 %v1766_v24, %v1702_v50 }
 0x18a   : > { %v1637_v46 = vadd.f32 %v1573_v25, %v1505_v20  ;;  %v1827_v18 = vadd.f32 %v1767_v11, %v1703_v57  ;;  %v1058_v29 = vmul.f32 %v8573_v31, %v10085_v54  ;;  %v1059_v20 = vmul.f32 %v8573_v31, %v10077_v6 }
 0x18b   : > { %v639_v62 = vrot.slane %v10199_v47, 7  ;;  %v671_v3 = vrot.slane %v10201_v33, 7  ;;  %v836_v27 = vrot.slane %v10199_v47, 1  ;;  %v868_v44 = vrot.slane %v10201_v33, 1 }
 0x18c   : > { %v1950_v26 = vadd.f32 %v1890_v21, %v1826_v56  ;;  %v1951_v55 = vadd.f32 %v1891_v60, %v1827_v18  ;;  %v2012_v22 = vadd.f32 %v1636_v52, %v1304_v15  ;;  %v2013_v10 = vadd.f32 %v1637_v46, %v1305_v51  ;;  %v474_v56 = vld [vmem:[#allocation5 + $0x1c0] sm:$0xff]  ;;  %v475_v18 = vld [vmem:[#allocation5 + $0x1c8] sm:$0xff] }
 0x18d   : > { %v10209_v17 = vsel %vm676_vm2, %v639_v62, %v671_v3  ;;  %v736_v19 = vsel %vm676_vm2, %v671_v3, %v639_v62  ;;  %v10215_v58 = vsel %vm873_vm3, %v836_v27, %v868_v44  ;;  %v933_v25 = vsel %vm873_vm3, %v868_v44, %v836_v27 }
 0x18e   : > { %v2076_v50 = vadd.f32 %v2012_v22, %v1950_v26  ;;  %v2077_v57 = vadd.f32 %v2013_v10, %v1951_v55  ;;  %v10221_v15 = vsel %vm485_vm0, %v736_v19, 0.0  ;;  %v10225_v51 = vsel %vm488_vm1, %v933_v25, 0.0 }
 0x18f   : > { %v1122_v24 = vmul.f32 %v8583_v35, %v10063_v9  ;;  %v1123_v10 = vmul.f32 %v8583_v35, %v10065_v53  ;;  %v1246_v11 = vmul.f32 %v8600_v43, %v10089_v36  ;;  %v1247_v21 = vmul.f32 %v8600_v43, %v10095_v42 }
 0x190   : > { %v2115_v22 = vpack.c.bf16 %v2077_v57, %v2076_v50  ;;  %v1374_v60 = vmul.f32 %v8580_v34, %v10157_v8  ;;  %v1375_v6 = vmul.f32 %v8580_v34, %v10147_v32  ;;  %v1442_v9 = vmul.f32 %v8562_v23, %v10127_v39 }
 0x191   : > { %v1182_v54 = vadd.f32 %v1122_v24, %v1058_v29  ;;  %v1183_v52 = vadd.f32 %v1123_v10, %v1059_v20  ;;  %v1443_v53 = vmul.f32 %v8562_v23, %v10129_v45  ;;  %v1574_v36 = vmul.f32 %v8629_v59, %v10161_v63 }
 0x192   : > { %7750 = vmatmul.mubr.bf16.gmra.mrb[16].mxu1 %v2115_v22  ;;  %v1575_v42 = vmul.f32 %v8629_v59, %v10169_v37  ;;  %v1704_v46 = vmul.f32 %v8593_v40, %v10221_v15  ;;  %v1506_v27 = vadd.f32 %v1442_v9, %v1374_v60  ;;  %v1705_v44 = vmul.f32 %v8593_v40, %v10209_v17 }
 0x193   : > { %v1306_v62 = vadd.f32 %v1246_v11, %v1182_v54  ;;  %v1307_v3 = vadd.f32 %v1247_v21, %v1183_v52  ;;  %v1507_v26 = vadd.f32 %v1443_v53, %v1375_v6  ;;  %v1768_v55 = vmul.f32 %v8633_v61, %v10199_v47 }
 0x194   : > { %v1769_v19 = vmul.f32 %v8633_v61, %v10201_v33  ;;  %v1892_v25 = vmul.f32 %v8638_v2, %v10215_v58  ;;  %v1638_v50 = vadd.f32 %v1574_v36, %v1506_v27  ;;  %v1893_v57 = vmul.f32 %v8638_v2, %v10225_v51 }
 0x195   : > { %v10263_v29 = vmax.f32 %v474_v56, 0.0  ;;  %v10265_v20 = vmax.f32 %v475_v18, 0.0  ;;  %v1639_v24 = vadd.f32 %v1575_v42, %v1507_v26  ;;  %v1828_v10 = vadd.f32 %v1768_v55, %v1704_v46 }
 0x196   : > { %v1829_v22 = vadd.f32 %v1769_v19, %v1705_v44  ;;  %v1060_v11 = vmul.f32 %v8573_v31, %v10157_v8  ;;  %v2014_v21 = vadd.f32 %v1638_v50, %v1306_v62  ;;  %v1061_v46 = vmul.f32 %v8573_v31, %v10147_v32 }
 0x197   : > { %v640_v60 = vrot.slane %v10263_v29, 7  ;;  %v672_v54 = vrot.slane %v10265_v20, 7  ;;  %v837_v52 = vrot.slane %v10263_v29, 1  ;;  %v1952_v6 = vadd.f32 %v1892_v25, %v1828_v10  ;;  %v10273_v56 = vpop.f32.mrb[12].mxu0 }
 0x198   : > { %v1953_v9 = vadd.f32 %v1893_v57, %v1829_v22  ;;  %v2015_v53 = vadd.f32 %v1639_v24, %v1307_v3  ;;  %v869_v36 = vrot.slane %v10265_v20, 1  ;;  %17670 = vst [vmem:[#allocation13_spill] sm:$0xff] %v10273_v56  ;;  %v1124_v18 = vmul.f32 %v8583_v35, %v10127_v39  ;;  %v10285_v62 = vpop.f32.mrb[13].mxu0 }
 0x199   : > { %v10277_v42 = vsel %vm676_vm2, %v640_v60, %v672_v54  ;;  %v737_v8 = vsel %vm676_vm2, %v672_v54, %v640_v60  ;;  %v2078_v3 = vadd.f32 %v2014_v21, %v1952_v6  ;;  %v10295_v55 = vpop.f32.mrb[14].mxu0  ;;  %v1125_v39 = vmul.f32 %v8583_v35, %v10129_v45  ;;  %v476_v6 = vld [vmem:[#allocation5 + $0x1d0] sm:$0xff] }
 0x19a   : > { %v2079_v27 = vadd.f32 %v2015_v53, %v1953_v9  ;;  %v10289_v44 = vsel %vm485_vm0, %v737_v8, 0.0  ;;  %v10293_v26 = vsel %vm873_vm3, %v837_v52, %v869_v36  ;;  %17671 = vst [vmem:[#allocation14_spill] sm:$0xff] %v10295_v55  ;;  %v934_v32 = vsel %vm873_vm3, %v869_v36, %v837_v52  ;;  %v10303_v50 = vpop.f32.mrb[15].mxu0  ;;  %v477_v9 = vld [vmem:[#allocation5 + $0x1d8] sm:$0xff] }
 0x19b   : > { %v1184_v19 = vadd.f32 %v1124_v18, %v1060_v11  ;;  %v1248_v25 = vmul.f32 %v8600_v43, %v10161_v63  ;;  %17672 = vst [vmem:[#allocation15_spill] sm:$0xff] %v10303_v50  ;;  %v10307_v24 = vsel %vm488_vm1, %v934_v32, 0.0  ;;  %v1249_v10 = vmul.f32 %v8600_v43, %v10169_v37 }
 0x19c   : > { %v2116_v57 = vpack.c.bf16 %v2079_v27, %v2078_v3  ;;  %v1376_v22 = vmul.f32 %v8580_v34, %v10221_v15  ;;  %v1185_v21 = vadd.f32 %v1125_v39, %v1061_v46  ;;  %v1377_v45 = vmul.f32 %v8580_v34, %v10209_v17 }
 0x19d   : > { %v1308_v60 = vadd.f32 %v1248_v25, %v1184_v19  ;;  %v1444_v63 = vmul.f32 %v8562_v23, %v10199_v47  ;;  %v1445_v11 = vmul.f32 %v8562_v23, %v10201_v33  ;;  %v1576_v54 = vmul.f32 %v8629_v59, %v10215_v58 }
 0x19e   : > { %7753 = vmatprep.mubr.bf16.mxu1 %v2116_v57  ;;  %v1577_v37 = vmul.f32 %v8629_v59, %v10225_v51  ;;  %v1706_v52 = vmul.f32 %v8593_v40, %v10289_v44  ;;  %v1309_v53 = vadd.f32 %v1249_v10, %v1185_v21  ;;  %v1707_v8 = vmul.f32 %v8593_v40, %v10277_v42 }
 0x19f   : > { %v1508_v36 = vadd.f32 %v1444_v63, %v1376_v22  ;;  %v1770_v46 = vmul.f32 %v8633_v61, %v10263_v29  ;;  %v1509_v18 = vadd.f32 %v1445_v11, %v1377_v45  ;;  %v1771_v3 = vmul.f32 %v8633_v61, %v10265_v20 }
 0x1a0   : > { %v1894_v27 = vmul.f32 %v8638_v2, %v10293_v26  ;;  %v1895_v32 = vmul.f32 %v8638_v2, %v10307_v24  ;;  %v10335_v25 = vmax.f32 %v476_v6, 0.0  ;;  %v10337_v57 = vmax.f32 %v477_v9, 0.0 }
 0x1a1   : > { %v1640_v39 = vadd.f32 %v1576_v54, %v1508_v36  ;;  %v1830_v19 = vadd.f32 %v1770_v46, %v1706_v52  ;;  %v1641_v10 = vadd.f32 %v1577_v37, %v1509_v18  ;;  %v1831_v22 = vadd.f32 %v1771_v3, %v1707_v8 }
 0x1a2   : > { %v1062_v21 = vmul.f32 %v8573_v31, %v10221_v15  ;;  %v1063_v45 = vmul.f32 %v8573_v31, %v10209_v17  ;;  %v641_v14 = vrot.slane %v10335_v25, 7  ;;  %v673_v55 = vrot.slane %v10337_v57, 7 }
 0x1a3   : > { %v1954_v63 = vadd.f32 %v1894_v27, %v1830_v19  ;;  %v2016_v11 = vadd.f32 %v1640_v39, %v1308_v60  ;;  %v1955_v54 = vadd.f32 %v1895_v32, %v1831_v22  ;;  %v2017_v52 = vadd.f32 %v1641_v10, %v1309_v53 }
 0x1a4   : > { %v838_v6 = vrot.slane %v10335_v25, 1  ;;  %v870_v9 = vrot.slane %v10337_v57, 1  ;;  %v10349_v36 = vsel %vm676_vm2, %v641_v14, %v673_v55  ;;  %v738_v17 = vsel %vm676_vm2, %v673_v55, %v641_v14 }
 0x1a5   : > { %v2080_v37 = vadd.f32 %v2016_v11, %v1954_v63  ;;  %v1126_v15 = vmul.f32 %v8583_v35, %v10199_v47  ;;  %v2081_v60 = vadd.f32 %v2017_v52, %v1955_v54  ;;  %v10357_v8 = vsel %vm485_vm0, %v738_v17, 0.0  ;;  %v479_v11 = vld [vmem:[#allocation5 + $0x1e8] sm:$0xff] }
 0x1a6   : > { %v10361_v53 = vsel %vm873_vm3, %v838_v6, %v870_v9  ;;  %v935_v46 = vsel %vm873_vm3, %v870_v9, %v838_v6  ;;  %v1127_v14 = vmul.f32 %v8583_v35, %v10201_v33  ;;  %v1250_v55 = vmul.f32 %v8600_v43, %v10215_v58 }
 0x1a7   : > { %v10367_v18 = vsel %vm488_vm1, %v935_v46, 0.0  ;;  %v1186_v47 = vadd.f32 %v1126_v15, %v1062_v21  ;;  %v2117_v3 = vpack.c.bf16 %v2081_v60, %v2080_v37  ;;  %v1251_v27 = vmul.f32 %v8600_v43, %v10225_v51  ;;  %v478_v21 = vld [vmem:[#allocation5 + $0x1e0] sm:$0xff] }
 0x1a8   : > { %v1378_v32 = vmul.f32 %v8580_v34, %v10289_v44  ;;  %v1379_v39 = vmul.f32 %v8580_v34, %v10277_v42  ;;  %v1187_v19 = vadd.f32 %v1127_v14, %v1063_v45  ;;  %v1446_v22 = vmul.f32 %v8562_v23, %v10263_v29 }
 0x1a9   : > { %v1310_v10 = vadd.f32 %v1250_v55, %v1186_v47  ;;  %v1447_v33 = vmul.f32 %v8562_v23, %v10265_v20  ;;  %7754 = vmatmul.mubr.bf16.gmra.mrb[20].mxu1 %v2117_v3  ;;  %v1578_v58 = vmul.f32 %v8629_v59, %v10293_v26  ;;  %v1579_v51 = vmul.f32 %v8629_v59, %v10307_v24 }
 0x1aa   : > { %v1708_v63 = vmul.f32 %v8593_v40, %v10357_v8  ;;  %v1709_v45 = vmul.f32 %v8593_v40, %v10349_v36  ;;  %v1311_v54 = vadd.f32 %v1251_v27, %v1187_v19  ;;  %v1510_v52 = vadd.f32 %v1446_v22, %v1378_v32 }
 0x1ab   : > { %v1511_v6 = vadd.f32 %v1447_v33, %v1379_v39  ;;  %v1772_v9 = vmul.f32 %v8633_v61, %v10335_v25  ;;  %v1773_v37 = vmul.f32 %v8633_v61, %v10337_v57  ;;  %v1896_v17 = vmul.f32 %v8638_v2, %v10361_v53 }
 0x1ac   : > { %v1897_v15 = vmul.f32 %v8638_v2, %v10367_v18  ;;  %v10399_v60 = vmax.f32 %v478_v21, 0.0  ;;  %v1642_v46 = vadd.f32 %v1578_v58, %v1510_v52  ;;  %v10401_v55 = vmax.f32 %v479_v11, 0.0 }
 0x1ad   : > { %v1643_v14 = vadd.f32 %v1579_v51, %v1511_v6  ;;  %v1832_v47 = vadd.f32 %v1772_v9, %v1708_v63  ;;  %v1833_v3 = vadd.f32 %v1773_v37, %v1709_v45  ;;  %v1064_v39 = vmul.f32 %v8573_v31, %v10289_v44 }
 0x1ae   : > { %v642_v27 = vrot.slane %v10399_v60, 7  ;;  %v839_v32 = vrot.slane %v10399_v60, 1  ;;  %v2018_v22 = vadd.f32 %v1642_v46, %v1310_v10  ;;  %v674_v56 = vrot.slane %v10401_v55, 7 }
 0x1af   : > { %v1956_v19 = vadd.f32 %v1896_v17, %v1832_v47  ;;  %v2019_v33 = vadd.f32 %v1643_v14, %v1311_v54  ;;  %v10408_v21 = vpop.f32.mrb[16].mxu0  ;;  %v1957_v58 = vadd.f32 %v1897_v15, %v1833_v3  ;;  %v871_v51 = vrot.slane %v10401_v55, 1 }
 0x1b0   : > { %17673 = vst [vmem:[#allocation16_spill] sm:$0xff] %v10408_v21  ;;  %v1065_v63 = vmul.f32 %v8573_v31, %v10277_v42  ;;  %v1128_v45 = vmul.f32 %v8583_v35, %v10263_v29  ;;  %v10415_v11 = vpop.f32.mrb[17].mxu0  ;;  %v10419_v44 = vsel %vm676_vm2, %v642_v27, %v674_v56  ;;  %v739_v10 = vsel %vm676_vm2, %v674_v56, %v642_v27 }
 0x1b1   : > { %17674 = vst [vmem:[#allocation17_spill] sm:$0xff] %v10415_v11  ;;  %v2082_v52 = vadd.f32 %v2018_v22, %v1956_v19  ;;  %v1129_v54 = vmul.f32 %v8583_v35, %v10265_v20  ;;  %v10425_v6 = vpop.f32.mrb[18].mxu0  ;;  %v2083_v9 = vadd.f32 %v2019_v33, %v1957_v58  ;;  %v10429_v42 = vsel %vm485_vm0, %v739_v10, 0.0  ;;  %v480_v22 = vld [vmem:[#allocation5 + $0x1f0] sm:$0xff]  ;;  %v481_v33 = vld [vmem:[#allocation5 + $0x1f8] sm:$0xff] }
 0x1b2   : > { %17675 = vst [vmem:[#allocation18_spill] sm:$0xff] %v10425_v6  ;;  %v10433_v29 = vsel %vm873_vm3, %v839_v32, %v871_v51  ;;  %v936_v37 = vsel %vm873_vm3, %v871_v51, %v839_v32  ;;  %v10437_v17 = vpop.f32.mrb[19].mxu0  ;;  %v1188_v20 = vadd.f32 %v1128_v45, %v1064_v39  ;;  %v1252_v46 = vmul.f32 %v8600_v43, %v10293_v26 }
 0x1b3   : > { %17676 = vst [vmem:[#allocation19_spill] sm:$0xff] %v10437_v17  ;;  %v10441_v56 = vsel %vm488_vm1, %v936_v37, 0.0  ;;  %v1189_v15 = vadd.f32 %v1129_v54, %v1065_v63  ;;  %v2118_v14 = vpack.c.bf16 %v2083_v9, %v2082_v52  ;;  %v1253_v47 = vmul.f32 %v8600_v43, %v10307_v24 }
 0x1b4   : > { %v1380_v3 = vmul.f32 %v8580_v34, %v10357_v8  ;;  %v1381_v27 = vmul.f32 %v8580_v34, %v10349_v36  ;;  %v1312_v32 = vadd.f32 %v1252_v46, %v1188_v20  ;;  %v1448_v19 = vmul.f32 %v8562_v23, %v10335_v25 }
 0x1b5   : > { %v1449_v39 = vmul.f32 %v8562_v23, %v10337_v57  ;;  %v1580_v26 = vmul.f32 %v8629_v59, %v10361_v53  ;;  %7757 = vmatprep.mubr.bf16.mxu1 %v2118_v14  ;;  %v1313_v24 = vadd.f32 %v1253_v47, %v1189_v15  ;;  %v1581_v58 = vmul.f32 %v8629_v59, %v10367_v18 }
 0x1b6   : > { %v1710_v51 = vmul.f32 %v8593_v40, %v10429_v42  ;;  %v1711_v63 = vmul.f32 %v8593_v40, %v10419_v44  ;;  %v1512_v45 = vadd.f32 %v1448_v19, %v1380_v3  ;;  %v1774_v10 = vmul.f32 %v8633_v61, %v10399_v60 }
 0x1b7   : > { %v1513_v52 = vadd.f32 %v1449_v39, %v1381_v27  ;;  %v1775_v54 = vmul.f32 %v8633_v61, %v10401_v55  ;;  %v1898_v9 = vmul.f32 %v8638_v2, %v10433_v29  ;;  %v1899_v37 = vmul.f32 %v8638_v2, %v10441_v56 }
 0x1b8   : > { %v10471_v20 = vmax.f32 %v480_v22, 0.0  ;;  %v10473_v15 = vmax.f32 %v481_v33, 0.0  ;;  %v1644_v46 = vadd.f32 %v1580_v26, %v1512_v45  ;;  %v1834_v47 = vadd.f32 %v1774_v10, %v1710_v51 }
 0x1b9   : > { %v1645_v14 = vadd.f32 %v1581_v58, %v1513_v52  ;;  %v1835_v3 = vadd.f32 %v1775_v54, %v1711_v63  ;;  %v1067_v52 = vmul.f32 %v8573_v31, %v10349_v36  ;;  %v1130_v10 = vmul.f32 %v8583_v35, %v10335_v25 }
 0x1ba   : > { %v643_v27 = vrot.slane %v10471_v20, 7  ;;  %v675_v19 = vrot.slane %v10473_v15, 7  ;;  %v840_v39 = vrot.slane %v10471_v20, 1  ;;  %v872_v6 = vrot.slane %v10473_v15, 1 }
 0x1bb   : > { %v1958_v21 = vadd.f32 %v1898_v9, %v1834_v47  ;;  %v1959_v17 = vadd.f32 %v1899_v37, %v1835_v3  ;;  %v2020_v11 = vadd.f32 %v1644_v46, %v1312_v32  ;;  %v2021_v50 = vadd.f32 %v1645_v14, %v1313_v24 }
 0x1bc   : > { %v708_v22 = vsel %vm676_vm2, %v643_v27, %v675_v19  ;;  %v740_v26 = vsel %vm676_vm2, %v675_v19, %v643_v27  ;;  %v905_v33 = vsel %vm873_vm3, %v840_v39, %v872_v6  ;;  %v937_v58 = vsel %vm873_vm3, %v872_v6, %v840_v39 }
 0x1bd   : > { %v2084_v51 = vadd.f32 %v2020_v11, %v1958_v21  ;;  %v2085_v63 = vadd.f32 %v2021_v50, %v1959_v17  ;;  %v807_v45 = vsel %vm485_vm0, %v740_v26, 0.0  ;;  %v1005_v32 = vsel %vm488_vm1, %v937_v58, 0.0 }
 0x1be   : > { %v1066_v24 = vmul.f32 %v8573_v31, %v10357_v8  ;;  %v1131_v6 = vmul.f32 %v8583_v35, %v10337_v57  ;;  %v1254_v50 = vmul.f32 %v8600_v43, %v10361_v53  ;;  %v1255_v11 = vmul.f32 %v8600_v43, %v10367_v18 }
 0x1bf   : > { %v2119_v21 = vpack.c.bf16 %v2085_v63, %v2084_v51  ;;  %v1382_v17 = vmul.f32 %v8580_v34, %v10429_v42  ;;  %v1383_v36 = vmul.f32 %v8580_v34, %v10419_v44  ;;  %v1450_v25 = vmul.f32 %v8562_v23, %v10399_v60 }
 0x1c0   : > { %v1190_v8 = vadd.f32 %v1130_v10, %v1066_v24  ;;  %v1191_v54 = vadd.f32 %v1131_v6, %v1067_v52  ;;  %v1451_v57 = vmul.f32 %v8562_v23, %v10401_v55  ;;  %v1582_v53 = vmul.f32 %v8629_v59, %v10433_v29 }
 0x1c1   : > { %7758 = vmatmul.mubr.bf16.gmra.mrb[24].mxu1 %v2119_v21  ;;  %v1583_v18 = vmul.f32 %v8629_v59, %v10441_v56  ;;  %v1712_v9 = vmul.f32 %v8593_v40, %v807_v45  ;;  %v1514_v14 = vadd.f32 %v1450_v25, %v1382_v17  ;;  %v1713_v47 = vmul.f32 %v8593_v40, %v708_v22 }
 0x1c2   : > { %v1314_v37 = vadd.f32 %v1254_v50, %v1190_v8  ;;  %v1315_v46 = vadd.f32 %v1255_v11, %v1191_v54  ;;  %v1515_v3 = vadd.f32 %v1451_v57, %v1383_v36  ;;  %v1776_v27 = vmul.f32 %v8633_v61, %v10471_v20 }
 0x1c3   : > { %v1777_v19 = vmul.f32 %v8633_v61, %v10473_v15  ;;  %v1900_v39 = vmul.f32 %v8638_v2, %v905_v33  ;;  %v1646_v26 = vadd.f32 %v1582_v53, %v1514_v14  ;;  %v1901_v58 = vmul.f32 %v8638_v2, %v1005_v32 }
 0x1c4   : > { %v1068_v51 = vmul.f32 %v8573_v31, %v10429_v42  ;;  %v1069_v63 = vmul.f32 %v8573_v31, %v10419_v44  ;;  %v1647_v24 = vadd.f32 %v1583_v18, %v1515_v3  ;;  %v1836_v40 = vadd.f32 %v1776_v27, %v1712_v9 }
 0x1c5   : > { %v1837_v52 = vadd.f32 %v1777_v19, %v1713_v47  ;;  %v1132_v10 = vmul.f32 %v8583_v35, %v10399_v60  ;;  %v2022_v6 = vadd.f32 %v1646_v26, %v1314_v37  ;;  %v1133_v61 = vmul.f32 %v8583_v35, %v10401_v55 }
 0x1c6   : > { %v1256_v21 = vmul.f32 %v8600_v43, %v10433_v29  ;;  %v1257_v2 = vmul.f32 %v8600_v43, %v10441_v56  ;;  %v1960_v42 = vadd.f32 %v1900_v39, %v1836_v40  ;;  %v2023_v11 = vadd.f32 %v1647_v24, %v1315_v46  ;;  %v10535_v44 = vpop.f32.mrb[20].mxu0 }
 0x1c7   : > { %v1961_v50 = vadd.f32 %v1901_v58, %v1837_v52  ;;  %v1192_v31 = vadd.f32 %v1132_v10, %v1068_v51  ;;  %v1193_v17 = vadd.f32 %v1133_v61, %v1069_v63  ;;  %v1384_v8 = vmul.f32 %v8580_v34, %v807_v45  ;;  %v10541_v55 = vpop.f32.mrb[21].mxu0 }
 0x1c8   : > { %v1385_v60 = vmul.f32 %v8580_v34, %v708_v22  ;;  %v1452_v35 = vmul.f32 %v8562_v23, %v10471_v20  ;;  %v2086_v29 = vadd.f32 %v2022_v6, %v1960_v42  ;;  %v1453_v43 = vmul.f32 %v8562_v23, %v10473_v15  ;;  %v10545_v56 = vpop.f32.mrb[22].mxu0 }
 0x1c9   : > { %v2087_v54 = vadd.f32 %v2023_v11, %v1961_v50  ;;  %v1316_v36 = vadd.f32 %v1256_v21, %v1192_v31  ;;  %v1584_v57 = vmul.f32 %v8629_v59, %v905_v33  ;;  %v1585_v45 = vmul.f32 %v8629_v59, %v1005_v32  ;;  %v10549_v53 = vpop.f32.mrb[23].mxu0 }
 0x1ca   : > { %v1516_v25 = vadd.f32 %v1452_v35, %v1384_v8  ;;  %v1317_v22 = vadd.f32 %v1257_v2, %v1193_v17  ;;  %v1517_v20 = vadd.f32 %v1453_v43, %v1385_v60  ;;  %v2459_v9 = vadd.f32 %v9905_v1, %v9889_v48 }
 0x1cb   : > { %v2120_v34 = vpack.c.bf16 %v2087_v54, %v2086_v29  ;;  %v2528_v23 = vmul.f32 %v9889_v48, %v9889_v48  ;;  %v2529_v15 = vmul.f32 %v9905_v1, %v9905_v1  ;;  %v2530_v46 = vmul.f32 %v9877_v16, %v9877_v16 }
 0x1cc   : > { %v1648_v18 = vadd.f32 %v1584_v57, %v1516_v25  ;;  %v1649_v37 = vadd.f32 %v1585_v45, %v1517_v20  ;;  %v2460_v59 = vadd.f32 %v9877_v16, %v2459_v9  ;;  %v2531_v27 = vmul.f32 %v9897_v41, %v9897_v41 }
 0x1cd   : > { %7761 = vmatprep.mubr.bf16.mxu1 %v2120_v34  ;;  %v2592_v14 = vadd.f32 %v2529_v15, %v2528_v23  ;;  %v2532_v39 = vmul.f32 %v10013_v12, %v10013_v12  ;;  %v2533_v51 = vmul.f32 %v10031_v7, %v10031_v7  ;;  %v2534_v52 = vmul.f32 %v10001_v49, %v10001_v49  ;;  %v17678_v15 = vld [vmem:[#allocation13_spill] sm:$0xff] }
 0x1ce   : > { %v2024_v33 = vadd.f32 %v1648_v18, %v1316_v36  ;;  %v2025_v32 = vadd.f32 %v1649_v37, %v1317_v22  ;;  %v2461_v47 = vadd.f32 %v9897_v41, %v2460_v59  ;;  %v2535_v61 = vmul.f32 %v10023_v28, %v10023_v28  ;;  %v17677_v18 = vld [vmem:[#allocation15_spill] sm:$0xff] }
 0x1cf   : > { %v2593_v19 = vadd.f32 %v2592_v14, %v2530_v46  ;;  %v2536_v2 = vmul.f32 %v10143_v38, %v10143_v38  ;;  %v2537_v11 = vmul.f32 %v10165_v0, %v10165_v0  ;;  %v2538_v35 = vmul.f32 %v10136_v13, %v10136_v13  ;;  %v17679_v46 = vld [vmem:[#allocation14_spill] sm:$0xff] }
 0x1d0   : > { %v2121_v3 = vpack.c.bf16 %v2025_v32, %v2024_v33  ;;  %v2462_v26 = vadd.f32 %v2461_v47, %v10013_v12  ;;  %v2539_v25 = vmul.f32 %v10153_v30, %v10153_v30  ;;  %v2540_v45 = vmul.f32 %v10285_v62, %v10285_v62 }
 0x1d1   : > { %v2594_v58 = vadd.f32 %v2593_v19, %v2531_v27  ;;  %v2541_v9 = vmul.f32 %v17677_v18, %v17677_v18  ;;  %v2542_v59 = vmul.f32 %v17678_v15, %v17678_v15  ;;  %v2543_v47 = vmul.f32 %v17679_v46, %v17679_v46  ;;  %v17680_v27 = vld [vmem:[#allocation17_spill] sm:$0xff] }
 0x1d2   : > { %7762 = vmatmul.mubr.bf16.gmra.mrb[28].mxu1 %v2121_v3  ;;  %v2463_v63 = vadd.f32 %v2462_v26, %v10031_v7  ;;  %v2544_v19 = vmul.f32 %v17680_v27, %v17680_v27 }
 0x1d3   : > { %v2595_v24 = vadd.f32 %v2594_v58, %v2532_v39  ;;  %v17681_v58 = vld [vmem:[#allocation19_spill] sm:$0xff] }
 0x1d4   : > { %v2464_v40 = vadd.f32 %v10001_v49, %v2463_v63 }
 0x1d5   : > { %v2596_v10 = vadd.f32 %v2595_v24, %v2533_v51  ;;  %v2545_v51 = vmul.f32 %v17681_v58, %v17681_v58 }
 0x1d6   : > { %v2465_v6 = vadd.f32 %v10023_v28, %v2464_v40  ;;  %v17682_v40 = vld [vmem:[#allocation16_spill] sm:$0xff] }
 0x1d7   : > { %v2597_v21 = vadd.f32 %v2596_v10, %v2534_v52  ;;  %v2546_v10 = vmul.f32 %v17682_v40, %v17682_v40 }
 0x1d8   : > { %v2466_v42 = vadd.f32 %v2465_v6, %v10143_v38 }
 0x1d9   : > { %v2598_v50 = vadd.f32 %v2597_v21, %v2535_v61  ;;  %v17683_v61 = vld [vmem:[#allocation18_spill] sm:$0xff] }
 0x1da   : > { %v2467_v31 = vadd.f32 %v2466_v42, %v10165_v0  ;;  %v2547_v42 = vmul.f32 %v17683_v61, %v17683_v61 }
 0x1db   : > { %v2599_v17 = vadd.f32 %v2598_v50, %v2536_v2 }
 0x1dc   : > { %v2468_v8 = vadd.f32 %v10136_v13, %v2467_v31 }
 0x1dd   : > { %v2600_v29 = vadd.f32 %v2599_v17, %v2537_v11  ;;  %v2548_v11 = vmul.f32 %v10541_v55, %v10541_v55 }
 0x1de   : > { %v10582_v60 = vpop.f32.mrb[24].mxu0  ;;  %v2469_v43 = vadd.f32 %v10153_v30, %v2468_v8 }
 0x1df   : > { %v10586_v54 = vpop.f32.mrb[25].mxu0  ;;  %v2601_v57 = vadd.f32 %v2600_v29, %v2538_v35  ;;  %v2549_v29 = vmul.f32 %v10549_v53, %v10549_v53 }
 0x1e0   : > { %v10589_v36 = vpop.f32.mrb[26].mxu0  ;;  %v2470_v22 = vadd.f32 %v2469_v43, %v10285_v62 }
 0x1e1   : > { %v10595_v34 = vpop.f32.mrb[27].mxu0  ;;  %v2602_v20 = vadd.f32 %v2601_v57, %v2539_v25 }
 0x1e2   : > { %v2471_v37 = vadd.f32 %v2470_v22, %v17677_v18  ;;  %v2550_v22 = vmul.f32 %v10535_v44, %v10535_v44 }
 0x1e3   : > { %v2603_v23 = vadd.f32 %v2602_v20, %v2540_v45 }
 0x1e4   : > { %v2472_v33 = vadd.f32 %v17678_v15, %v2471_v37  ;;  %v2551_v37 = vmul.f32 %v10545_v56, %v10545_v56 }
 0x1e5   : > { %v2604_v32 = vadd.f32 %v2603_v23, %v2541_v9 }
 0x1e6   : > { %v2473_v14 = vadd.f32 %v17679_v46, %v2472_v33  ;;  %v2552_v33 = vmul.f32 %v10586_v54, %v10586_v54 }
 0x1e7   : > { %v2605_v3 = vadd.f32 %v2604_v32, %v2542_v59 }
 0x1e8   : > { %v2474_v39 = vadd.f32 %v2473_v14, %v17680_v27  ;;  %v2553_v14 = vmul.f32 %v10595_v34, %v10595_v34 }
 0x1e9   : > { %v2606_v26 = vadd.f32 %v2605_v3, %v2543_v47 }
 0x1ea   : > { %v2475_v63 = vadd.f32 %v2474_v39, %v17681_v58  ;;  %v2554_v39 = vmul.f32 %v10582_v60, %v10582_v60 }
 0x1eb   : > { %v2607_v24 = vadd.f32 %v2606_v26, %v2544_v19 }
 0x1ec   : > { %v2476_v52 = vadd.f32 %v17682_v40, %v2475_v63  ;;  %v2555_v63 = vmul.f32 %v10589_v36, %v10589_v36 }
 0x1ed   : > { %v2608_v6 = vadd.f32 %v2607_v24, %v2545_v51 }
 0x1ee   : > { %v2477_v21 = vadd.f32 %v17683_v61, %v2476_v52 }
 0x1ef   : > { %v10617_v2 = vpop.f32.mrb[28].mxu0  ;;  %v2609_v50 = vadd.f32 %v2608_v6, %v2546_v10 }
 0x1f0   : > { %v10623_v31 = vpop.f32.mrb[29].mxu0  ;;  %v2478_v17 = vadd.f32 %v2477_v21, %v10541_v55 }
 0x1f1   : > { %v10626_v8 = vpop.f32.mrb[30].mxu0  ;;  %v2610_v35 = vadd.f32 %v2609_v50, %v2547_v42  ;;  %v2556_v52 = vmul.f32 %v10623_v31, %v10623_v31 }
 0x1f2   : > { %v10630_v43 = vpop.f32.mrb[31].mxu0  ;;  %v2479_v25 = vadd.f32 %v2478_v17, %v10549_v53  ;;  %v2558_v17 = vmul.f32 %v10617_v2, %v10617_v2 }
 0x1f3   : > { %v2611_v57 = vadd.f32 %v2610_v35, %v2548_v11  ;;  %v2557_v21 = vmul.f32 %v10630_v43, %v10630_v43 }
 0x1f4   : > { %v2480_v45 = vadd.f32 %v10535_v44, %v2479_v25  ;;  %v2559_v25 = vmul.f32 %v10626_v8, %v10626_v8 }
 0x1f5   : > { %v2612_v20 = vadd.f32 %v2611_v57, %v2549_v29 }
 0x1f6   : > { %v2481_v9 = vadd.f32 %v10545_v56, %v2480_v45 }
 0x1f7   : > { %v2613_v23 = vadd.f32 %v2612_v20, %v2550_v22 }
 0x1f8   : > { %v2482_v59 = vadd.f32 %v2481_v9, %v10586_v54 }
 0x1f9   : > { %v2614_v32 = vadd.f32 %v2613_v23, %v2551_v37 }
 0x1fa   : > { %v2483_v47 = vadd.f32 %v2482_v59, %v10595_v34 }
 0x1fb   : > { %v2615_v3 = vadd.f32 %v2614_v32, %v2552_v33 }
 0x1fc   : > { %v2484_v19 = vadd.f32 %v10582_v60, %v2483_v47 }
 0x1fd   : > { %v2616_v26 = vadd.f32 %v2615_v3, %v2553_v14 }
 0x1fe   : > { %v2485_v51 = vadd.f32 %v10589_v36, %v2484_v19 }
 0x1ff   : > { %v2617_v24 = vadd.f32 %v2616_v26, %v2554_v39 }
 0x200   : > { %v2486_v10 = vadd.f32 %v2485_v51, %v10623_v31 }
 0x201   : > { %v2618_v6 = vadd.f32 %v2617_v24, %v2555_v63 }
 0x202   : > { %v2487_v42 = vadd.f32 %v2486_v10, %v10630_v43 }
 0x203   : > { %v2619_v50 = vadd.f32 %v2618_v6, %v2556_v52 }
 0x204   : > { %v2488_v11 = vadd.f32 %v10617_v2, %v2487_v42 }
 0x205   : > { %v2620_v35 = vadd.f32 %v2619_v50, %v2557_v21 }
 0x206   : > { %v2489_v29 = vadd.f32 %v10626_v8, %v2488_v11 }
 0x207   : > { %v2621_v57 = vadd.f32 %v2620_v35, %v2558_v17 }
 0x208   : > { %v10663_v45 = vpop.f32.mrb[0].mxu1 }
 0x209   : > { %v10665_v22 = vpop.f32.mrb[1].mxu1  ;;  %v2622_v37 = vadd.f32 %v2621_v57, %v2559_v25  ;;  %v2562_v47 = vmul.f32 %v10663_v45, %v10663_v45 }
 0x20a   : > { %v2490_v20 = vadd.f32 %v2489_v29, %v10665_v22  ;;  %v2560_v9 = vmul.f32 %v10665_v22, %v10665_v22  ;;  %v10670_v23 = vpop.f32.mrb[2].mxu1 }
 0x20b   : > { %v10672_v33 = vpop.f32.mrb[3].mxu1  ;;  %v2563_v39 = vmul.f32 %v10670_v23, %v10670_v23 }
 0x20c   : > { %v2623_v59 = vadd.f32 %v2622_v37, %v2560_v9  ;;  %v2491_v32 = vadd.f32 %v2490_v20, %v10672_v33  ;;  %v2561_v14 = vmul.f32 %v10672_v33, %v10672_v33 }
 0x20e   : > { %v2492_v3 = vadd.f32 %v10663_v45, %v2491_v32  ;;  %v2624_v19 = vadd.f32 %v2623_v59, %v2561_v14 }
 0x210   : > { %v2625_v26 = vadd.f32 %v2624_v19, %v2562_v47  ;;  %v2493_v51 = vadd.f32 %v10670_v23, %v2492_v3 }
 0x212   : > { %v2626_v63 = vadd.f32 %v2625_v26, %v2563_v39 }
 0x21e   : > { %v10683_v24 = vpop.f32.mrb[4].mxu1 }
 0x21f   : > { %v10685_v52 = vpop.f32.mrb[5].mxu1  ;;  %v2566_v35 = vmul.f32 %v10683_v24, %v10683_v24 }
 0x220   : > { %v2494_v10 = vadd.f32 %v2493_v51, %v10685_v52  ;;  %v2564_v6 = vmul.f32 %v10685_v52, %v10685_v52  ;;  %v10690_v21 = vpop.f32.mrb[6].mxu1 }
 0x221   : > { %v10692_v42 = vpop.f32.mrb[7].mxu1  ;;  %v2567_v57 = vmul.f32 %v10690_v21, %v10690_v21 }
 0x222   : > { %v2627_v50 = vadd.f32 %v2626_v63, %v2564_v6  ;;  %v2495_v11 = vadd.f32 %v2494_v10, %v10692_v42  ;;  %v2565_v17 = vmul.f32 %v10692_v42, %v10692_v42 }
 0x224   : > { %v2496_v29 = vadd.f32 %v10683_v24, %v2495_v11  ;;  %v2628_v25 = vadd.f32 %v2627_v50, %v2565_v17 }
 0x226   : > { %v2629_v20 = vadd.f32 %v2628_v25, %v2566_v35  ;;  %v2497_v9 = vadd.f32 %v10690_v21, %v2496_v29 }
 0x228   : > { %v2630_v37 = vadd.f32 %v2629_v20, %v2567_v57 }
 0x236   : > { %v10703_v59 = vpop.f32.mrb[8].mxu1 }
 0x237   : > { %17684 = vst [vmem:[#allocation15_spill] sm:$0xff] %v10703_v59  ;;  %v10705_v32 = vpop.f32.mrb[9].mxu1  ;;  %v2570_v63 = vmul.f32 %v10703_v59, %v10703_v59 }
 0x238   : > { %v2498_v14 = vadd.f32 %v2497_v9, %v10705_v32  ;;  %v2568_v47 = vmul.f32 %v10705_v32, %v10705_v32  ;;  %v10710_v3 = vpop.f32.mrb[10].mxu1 }
 0x239   : > { %17685 = vst [vmem:[#allocation13_spill] sm:$0xff] %v10710_v3  ;;  %v10712_v19 = vpop.f32.mrb[11].mxu1  ;;  %v2571_v50 = vmul.f32 %v10710_v3, %v10710_v3 }
 0x23a   : > { %17686 = vst [vmem:[#allocation14_spill] sm:$0xff] %v10712_v19  ;;  %v2631_v39 = vadd.f32 %v2630_v37, %v2568_v47  ;;  %v2499_v26 = vadd.f32 %v2498_v14, %v10712_v19  ;;  %v2569_v51 = vmul.f32 %v10712_v19, %v10712_v19 }
 0x23c   : > { %v2500_v10 = vadd.f32 %v10703_v59, %v2499_v26  ;;  %v2632_v6 = vadd.f32 %v2631_v39, %v2569_v51 }
 0x23e   : > { %v2633_v11 = vadd.f32 %v2632_v6, %v2570_v63  ;;  %v2501_v17 = vadd.f32 %v10710_v3, %v2500_v10 }
 0x240   : > { %v2634_v35 = vadd.f32 %v2633_v11, %v2571_v50 }
 0x24d   : > { %v10723_v29 = vpop.f32.mrb[12].mxu1 }
 0x24e   : > { %17687 = vst [vmem:[#allocation17_spill] sm:$0xff] %v10723_v29  ;;  %v10725_v25 = vpop.f32.mrb[13].mxu1  ;;  %v2574_v26 = vmul.f32 %v10723_v29, %v10723_v29 }
 0x24f   : > { %17688 = vst [vmem:[#allocation19_spill] sm:$0xff] %v10725_v25  ;;  %v2502_v57 = vadd.f32 %v2501_v17, %v10725_v25  ;;  %v2572_v20 = vmul.f32 %v10725_v25, %v10725_v25  ;;  %v10730_v9 = vpop.f32.mrb[14].mxu1 }
 0x250   : > { %17689 = vst [vmem:[#allocation16_spill] sm:$0xff] %v10730_v9  ;;  %v10732_v37 = vpop.f32.mrb[15].mxu1  ;;  %v2575_v10 = vmul.f32 %v10730_v9, %v10730_v9 }
 0x251   : > { %17690 = vst [vmem:[#allocation18_spill] sm:$0xff] %v10732_v37  ;;  %v2635_v14 = vadd.f32 %v2634_v35, %v2572_v20  ;;  %v2503_v47 = vadd.f32 %v2502_v57, %v10732_v37  ;;  %v2573_v39 = vmul.f32 %v10732_v37, %v10732_v37 }
 0x253   : > { %v2504_v51 = vadd.f32 %v10723_v29, %v2503_v47  ;;  %v2636_v63 = vadd.f32 %v2635_v14, %v2573_v39 }
 0x255   : > { %v2637_v6 = vadd.f32 %v2636_v63, %v2574_v26  ;;  %v2505_v50 = vadd.f32 %v10730_v9, %v2504_v51 }
 0x257   : > { %v2638_v11 = vadd.f32 %v2637_v6, %v2575_v10 }
 0x265   : > { %v10743_v17 = vpop.f32.mrb[16].mxu1 }
 0x266   : > { %17691 = vst [vmem:[#allocation20_spill] sm:$0xff] %v10743_v17  ;;  %v10745_v35 = vpop.f32.mrb[17].mxu1  ;;  %v2578_v51 = vmul.f32 %v10743_v17, %v10743_v17 }
 0x267   : > { %17692 = vst [vmem:[#allocation21_spill] sm:$0xff] %v10745_v35  ;;  %v2506_v57 = vadd.f32 %v2505_v50, %v10745_v35  ;;  %v2576_v20 = vmul.f32 %v10745_v35, %v10745_v35  ;;  %v10750_v5 = vpop.f32.mrb[18].mxu1 }
 0x268   : > { %17693 = vst [vmem:[#allocation22_spill] sm:$0xff] %v10750_v5  ;;  %v10752_v47 = vpop.f32.mrb[19].mxu1  ;;  %v2579_v6 = vmul.f32 %v10750_v5, %v10750_v5 }
 0x269   : > { %17694 = vst [vmem:[#allocation23_spill] sm:$0xff] %v10752_v47  ;;  %v2639_v14 = vadd.f32 %v2638_v11, %v2576_v20  ;;  %v2507_v39 = vadd.f32 %v2506_v57, %v10752_v47  ;;  %v2577_v26 = vmul.f32 %v10752_v47, %v10752_v47 }
 0x26b   : > { %v2508_v63 = vadd.f32 %v10743_v17, %v2507_v39  ;;  %v2640_v10 = vadd.f32 %v2639_v14, %v2577_v26 }
 0x26d   : > { %v2641_v50 = vadd.f32 %v2640_v10, %v2578_v51  ;;  %v2509_v4 = vadd.f32 %v10750_v5, %v2508_v63 }
 0x26f   : > { %v2642_v35 = vadd.f32 %v2641_v50, %v2579_v6 }
 0x27c   : > { %v10763_v9 = vpop.f32.mrb[20].mxu1 }
 0x27d   : > { %17695 = vst [vmem:[#allocation24_spill] sm:$0xff] %v10763_v9  ;;  %v10765_v11 = vpop.f32.mrb[21].mxu1  ;;  %v2582_v10 = vmul.f32 %v10763_v9, %v10763_v9 }
 0x27e   : > { %17696 = vst [vmem:[#allocation25_spill] sm:$0xff] %v10765_v11  ;;  %v2510_v57 = vadd.f32 %v2509_v4, %v10765_v11  ;;  %v2580_v20 = vmul.f32 %v10765_v11, %v10765_v11  ;;  %v10770_v39 = vpop.f32.mrb[22].mxu1 }
 0x27f   : > { %17697 = vst [vmem:[#allocation26_spill] sm:$0xff] %v10770_v39  ;;  %v10772_v14 = vpop.f32.mrb[23].mxu1  ;;  %v2583_v50 = vmul.f32 %v10770_v39, %v10770_v39 }
 0x280   : > { %17698 = vst [vmem:[#allocation27_spill] sm:$0xff] %v10772_v14  ;;  %v2643_v26 = vadd.f32 %v2642_v35, %v2580_v20  ;;  %v2511_v51 = vadd.f32 %v2510_v57, %v10772_v14  ;;  %v2581_v63 = vmul.f32 %v10772_v14, %v10772_v14  ;;  %v8003_v20 = vld [vmem:[%s8311_s14 + $0x40] sm:$0xff]   ;;  %v8004_v57 = vld [vmem:[%s8311_s14 + $0x48] sm:$0xff]   ;;  %v8005_v14 = vld [vmem:[%s8311_s14 + $0x50] sm:$0xff]  }
 0x281   : > { %7765 = vmatprep.subr.bf16.mxu1 %v8003_v20 }
 0x282   : > { %v2512_v4 = vadd.f32 %v10763_v9, %v2511_v51  ;;  %v2644_v6 = vadd.f32 %v2643_v26, %v2581_v63  ;;  %7766 = vmatpush3.bf16.msra.mxu1 %v8003_v20  ;;  %v8006_v51 = vld [vmem:[%s8311_s14 + $0x58] sm:$0xff]  }
 0x283   : > { %7767 = vmatprep.subr.bf16.mxu1 %v8004_v57 }
 0x284   : > { %v2645_v11 = vadd.f32 %v2644_v6, %v2582_v10  ;;  %v2513_v5 = vadd.f32 %v10770_v39, %v2512_v4  ;;  %v8008_v39 = vld [vmem:[%s8311_s14 + $0x68] sm:$0xff]  }
 0x286   : > { %v2646_v35 = vadd.f32 %v2645_v11, %v2583_v50  ;;  %7768 = vmatpush3.bf16.msra.mxu1 %v8004_v57  ;;  %v8007_v50 = vld [vmem:[%s8311_s14 + $0x60] sm:$0xff]  }
 0x287   : > { %7769 = vmatprep.subr.bf16.mxu1 %v8005_v14 }
 0x28a   : > { %7770 = vmatpush3.bf16.msra.mxu1 %v8005_v14 }
 0x28b   : > { %7771 = vmatprep.subr.bf16.mxu1 %v8006_v51 }
 0x28e   : > { %7772 = vmatpush3.bf16.msra.mxu1 %v8006_v51  ;;  %v8009_v51 = vld [vmem:[%s8311_s14 + $0x70] sm:$0xff]  }
 0x28f   : > { %7773 = vmatprep.subr.bf16.mxu1 %v8007_v50 }
 0x292   : > { %7774 = vmatpush3.bf16.msra.mxu1 %v8007_v50 }
 0x293   : > { %7775 = vmatprep.subr.bf16.mxu1 %v8008_v39 }
 0x294   : > { %v10787_v26 = vpop.f32.mrb[24].mxu1 }
 0x295   : > { %17699 = vst [vmem:[#allocation28_spill] sm:$0xff] %v10787_v26  ;;  %v10789_v63 = vpop.f32.mrb[25].mxu1 }
 0x296   : > { %17700 = vst [vmem:[#allocation29_spill] sm:$0xff] %v10789_v63  ;;  %v2514_v10 = vadd.f32 %v2513_v5, %v10789_v63  ;;  %v2584_v11 = vmul.f32 %v10789_v63, %v10789_v63  ;;  %v10794_v4 = vpop.f32.mrb[26].mxu1  ;;  %v2586_v5 = vmul.f32 %v10787_v26, %v10787_v26  ;;  %7776 = vmatpush3.bf16.msra.mxu1 %v8008_v39 }
 0x297   : > { %17701 = vst [vmem:[#allocation30_spill] sm:$0xff] %v10794_v4  ;;  %v10796_v6 = vpop.f32.mrb[27].mxu1  ;;  %7777 = vmatprep.subr.bf16.mxu1 %v8009_v51 }
 0x298   : > { %17702 = vst [vmem:[#allocation31_spill] sm:$0xff] %v10796_v6  ;;  %v2647_v20 = vadd.f32 %v2646_v35, %v2584_v11  ;;  %v2515_v14 = vadd.f32 %v2514_v10, %v10796_v6  ;;  %v2585_v57 = vmul.f32 %v10796_v6, %v10796_v6  ;;  %v2587_v35 = vmul.f32 %v10794_v4, %v10794_v4  ;;  %v8010_v6 = vld [vmem:[%s8311_s14 + $0x78] sm:$0xff]  }
 0x29a   : > { %v2516_v63 = vadd.f32 %v10787_v26, %v2515_v14  ;;  %v2648_v9 = vadd.f32 %v2647_v20, %v2585_v57  ;;  %7778 = vmatpush3.bf16.msra.mxu1 %v8009_v51 }
 0x29b   : > { %7779 = vmatprep.subr.bf16.mxu1 %v8010_v6 }
 0x29c   : > { %v2649_v11 = vadd.f32 %v2648_v9, %v2586_v5  ;;  %v2517_v10 = vadd.f32 %v10794_v4, %v2516_v63 }
 0x29e   : > { %v2650_v17 = vadd.f32 %v2649_v11, %v2587_v35  ;;  %7780 = vmatpush3.bf16.msra.mxu1 %v8010_v6 }
 0x2a5   : > { %v10811_v47 = vpop.f32.mrb[28].mxu1 }
 0x2a6   : > { %17703 = vst [vmem:[#allocation32_spill] sm:$0xff] %v10811_v47  ;;  %v10813_v14 = vpop.f32.mrb[29].mxu1  ;;  %v2590_v51 = vmul.f32 %v10811_v47, %v10811_v47 }
 0x2a7   : > { %17704 = vst [vmem:[#allocation33_spill] sm:$0xff] %v10813_v14  ;;  %v2518_v50 = vadd.f32 %v2517_v10, %v10813_v14  ;;  %v2588_v20 = vmul.f32 %v10813_v14, %v10813_v14  ;;  %v10818_v57 = vpop.f32.mrb[30].mxu1 }
 0x2a8   : > { %17705 = vst [vmem:[#allocation34_spill] sm:$0xff] %v10818_v57  ;;  %v2447_v9 = vpop.f32.mrb[31].mxu1  ;;  %v2591_v6 = vmul.f32 %v10818_v57, %v10818_v57 }
 0x2a9   : > { %v2651_v63 = vadd.f32 %v2650_v17, %v2588_v20  ;;  %v2519_v5 = vadd.f32 %v2518_v50, %v2447_v9  ;;  %v2589_v39 = vmul.f32 %v2447_v9, %v2447_v9 }
 0x2ab   : > { %v2520_v35 = vadd.f32 %v10811_v47, %v2519_v5  ;;  %v2652_v11 = vadd.f32 %v2651_v63, %v2589_v39 }
 0x2ad   : > { %v2521_v10 = vadd.f32 %v10818_v57, %v2520_v35  ;;  %v2653_v4 = vadd.f32 %v2652_v11, %v2590_v51  ;;  %v17706_v57 = vld [vmem:[#allocation11_spill] sm:$0xff] }
 0x2af   : > { %v2522_v26 = vrot.slane %v2521_v10, 4  ;;  %v2654_v14 = vadd.f32 %v2653_v4, %v2591_v6  ;;  %v546_v6 = vld [vmem:[%s8322_s15] sm:$0x7] }
 0x2b1   : > { %v2523_v29 = vadd.f32 %v2522_v26, %v2521_v10  ;;  %v2655_v37 = vrot.slane %v2654_v14, 4 }
 0x2b3   : > { %v2524_v25 = vrot.slane %v2523_v29, 2  ;;  %v2656_v17 = vadd.f32 %v2655_v37, %v2654_v14  ;;  %v493_v37 = vld [vmem:[%s8332_s27 + $0x10] sm:$0x7] }
 0x2b4   : > { %v10831_v19 = vrot.slane %v493_v37, %v17706_v57 }
 0x2b5   : > { %v2525_v50 = vadd.f32 %v2524_v25, %v2523_v29  ;;  %v2657_v20 = vrot.slane %v2656_v17, 2  ;;  %v492_v29 = vld [vmem:[%s8332_s27 + $0xc] sm:$0x7]  ;;  %v494_v25 = vld [vmem:[%s8332_s27 + $0x14] sm:$0x7] }
 0x2b6   : > { %17707 = vst [vmem:[#allocation35_spill] sm:$0xff] %v10831_v19  ;;  %v17729_v19 = vld [vmem:[#allocation22_spill] sm:$0xff] }
 0x2b7   : > { %v2526_v3 = vrot.slane %v2525_v50, 1  ;;  %v2658_v63 = vadd.f32 %v2657_v20, %v2656_v17 }
 0x2b9   : > { %v2527_v5 = vadd.f32 %v2526_v3, %v2525_v50  ;;  %v2659_v39 = vrot.slane %v2658_v63, 1  ;;  %v17708_v3 = vld [vmem:[#allocation10_spill] sm:$0xff]  ;;  %v17710_v50 = vld [vmem:[#allocation12_spill] sm:$0xff] }
 0x2ba   : > { %v10834_v17 = vrot.slane %v493_v37, %v17708_v3  ;;  %v10837_v20 = vrot.slane %v493_v37, %v17710_v50 }
 0x2bb   : > { %v2660_v47 = vadd.f32 %v2659_v39, %v2658_v63  ;;  %v2661_v59 = vmul.f32 0.001953125, %v2527_v5  ;;  %v10841_v63 = vrot.slane %v492_v29, %v17708_v3  ;;  %v10844_v5 = vrot.slane %v494_v25, %v17708_v3  ;;  %v17723_v3 = vld [vmem:[#allocation18_spill] sm:$0xff] }
 0x2bc   : > { %17709 = vst [vmem:[#allocation36_spill] sm:$0xff] %v10834_v17  ;;  %17711 = vst [vmem:[#allocation37_spill] sm:$0xff] %v10837_v20  ;;  %v17728_v20 = vld [vmem:[#allocation20_spill] sm:$0xff]  ;;  %v17737_v17 = vld [vmem:[#allocation26_spill] sm:$0xff] }
 0x2bd   : > { %v2662_v51 = vmul.f32 0.001953125, %v2660_v47  ;;  %v2663_v35 = vmul.f32 %v2661_v59, %v2661_v59  ;;  %v547_v47 = vld [vmem:[%s8327_s18] sm:$0x7]  ;;  %17712 = vst [vmem:[#allocation38_spill] sm:$0xff] %v10841_v63  ;;  %17713 = vst [vmem:[#allocation39_spill] sm:$0xff] %v10844_v5  ;;  %v17739_v63 = vld [vmem:[#allocation29_spill] sm:$0xff] }
 0x2be   : > { %v17735_v5 = vld [vmem:[#allocation24_spill] sm:$0xff] }
 0x2bf   : > { %v2664_v4 = vsub.f32 %v2662_v51, %v2663_v35  ;;  %v10850_v35 = vrot.slane %v492_v29, %v17706_v57 }
 0x2c1   : > { %v2665_v26 = vmax.f32 %v2664_v4, 0.0  ;;  %17714 = vst [vmem:[#allocation40_spill] sm:$0xff] %v10850_v35  ;;  %v10853_v4 = vrot.slane %v492_v29, %v17710_v50  ;;  %v17733_v35 = vld [vmem:[#allocation27_spill] sm:$0xff] }
 0x2c3   : > { %v2666_v11 = vadd.f32 1e-05, %v2665_v26  ;;  %17715 = vst [vmem:[#allocation41_spill] sm:$0xff] %v10853_v4  ;;  %v10856_v26 = vrot.slane %v494_v25, %v17706_v57  ;;  %v17731_v4 = vld [vmem:[#allocation25_spill] sm:$0xff] }
 0x2c5   : > { %8019 = vrsqrt.f32 %v2666_v11  ;;  %17716 = vst [vmem:[#allocation42_spill] sm:$0xff] %v10856_v26  ;;  %v10859_v11 = vrot.slane %v494_v25, %v17710_v50  ;;  %v17722_v50 = vld [vmem:[#allocation19_spill] sm:$0xff] }
 0x2c6   : > { %v17727_v26 = vld [vmem:[#allocation23_spill] sm:$0xff] }
 0x2c7   : > { %17717 = vst [vmem:[#allocation43_spill] sm:$0xff] %v10859_v11  ;;  %v17726_v11 = vld [vmem:[#allocation21_spill] sm:$0xff] }
 0x2cf   : > { %v8020_v14 = vpop.eup %8019 }
 0x2d0   : > { %v2668_v10 = vmul.f32 %v8020_v14, %v546_v6 }
 0x2d2   : > { %v2669_v39 = vmul.f32 %v2668_v10, %v2661_v59  ;;  %v10847_v51 = vrot.slane %v2668_v10, %v17706_v57 }
 0x2d4   : > { %v2670_v6 = vsub.f32 %v547_v47, %v2669_v39  ;;  %v2736_v37 = vmul.f32 %v10847_v51, %v2447_v9  ;;  %v10864_v59 = vmul.f32 %v10847_v51, %v9889_v48  ;;  %v10868_v14 = vmul.f32 %v10847_v51, %v9905_v1 }
 0x2d5   : > { %v10872_v29 = vmul.f32 %v9877_v16, %v10847_v51  ;;  %v10876_v10 = vmul.f32 %v9897_v41, %v10847_v51  ;;  %v10880_v25 = vmul.f32 %v10847_v51, %v10013_v12  ;;  %v10884_v48 = vmul.f32 %v10847_v51, %v10031_v7 }
 0x2d6   : > { %v10887_v9 = vrot.slane %v2670_v6, %v17706_v57  ;;  %v10891_v1 = vmul.f32 %v10001_v49, %v10847_v51  ;;  %v10895_v16 = vmul.f32 %v10023_v28, %v10847_v51  ;;  %v10899_v41 = vmul.f32 %v10847_v51, %v10143_v38  ;;  %v17721_v6 = vld [vmem:[#allocation13_spill] sm:$0xff] }
 0x2d7   : > { %v10903_v12 = vmul.f32 %v10847_v51, %v10165_v0  ;;  %v10907_v7 = vmul.f32 %v10136_v13, %v10847_v51  ;;  %v10911_v49 = vmul.f32 %v10153_v30, %v10847_v51  ;;  %v10915_v28 = vmul.f32 %v10847_v51, %v10285_v62  ;;  %v17724_v57 = vld [vmem:[#allocation17_spill] sm:$0xff] }
 0x2d8   : > { %v2804_v47 = vadd.f32 %v10887_v9, %v2736_v37  ;;  %v10920_v38 = vmul.f32 %v10847_v51, %v17677_v18  ;;  %v10924_v0 = vmul.f32 %v17678_v15, %v10847_v51  ;;  %v10928_v13 = vmul.f32 %v17679_v46, %v10847_v51  ;;  %v17719_v37 = vld [vmem:[#allocation14_spill] sm:$0xff] }
 0x2d9   : > { %v10932_v30 = vmul.f32 %v10847_v51, %v17680_v27  ;;  %v10936_v62 = vmul.f32 %v10847_v51, %v17681_v58  ;;  %v10940_v18 = vmul.f32 %v17682_v40, %v10847_v51  ;;  %v10944_v15 = vmul.f32 %v17683_v61, %v10847_v51 }
 0x2da   : > { %v10946_v39 = vmax.f32 %v2804_v47, 0.0  ;;  %v10950_v46 = vmul.f32 %v10847_v51, %v10541_v55  ;;  %v10954_v27 = vmul.f32 %v10847_v51, %v10549_v53  ;;  %v10958_v58 = vmul.f32 %v10535_v44, %v10847_v51  ;;  %v17720_v47 = vld [vmem:[#allocation15_spill] sm:$0xff] }
 0x2db   : > { %v10962_v40 = vmul.f32 %v10545_v56, %v10847_v51  ;;  %v10966_v61 = vmul.f32 %v10847_v51, %v10586_v54  ;;  %v10970_v55 = vmul.f32 %v10847_v51, %v10595_v34  ;;  %v10974_v53 = vmul.f32 %v10582_v60, %v10847_v51 }
 0x2dc   : > { %17718 = vst [vmem:[#allocation44_spill] sm:$0xff] %v10946_v39  ;;  %v10979_v44 = vmul.f32 %v10589_v36, %v10847_v51  ;;  %v10983_v56 = vmul.f32 %v10847_v51, %v10623_v31  ;;  %v10987_v54 = vmul.f32 %v10847_v51, %v10630_v43  ;;  %v10991_v34 = vmul.f32 %v10617_v2, %v10847_v51  ;;  %v17725_v39 = vld [vmem:[#allocation16_spill] sm:$0xff] }
 0x2dd   : > { %v10995_v60 = vmul.f32 %v10626_v8, %v10847_v51  ;;  %v10999_v36 = vmul.f32 %v10847_v51, %v10665_v22  ;;  %v11003_v31 = vmul.f32 %v10847_v51, %v10672_v33  ;;  %v11007_v43 = vmul.f32 %v10663_v45, %v10847_v51 }
 0x2de   : > { %v11011_v2 = vmul.f32 %v10670_v23, %v10847_v51  ;;  %v11015_v8 = vmul.f32 %v10847_v51, %v10685_v52  ;;  %v11019_v22 = vmul.f32 %v10847_v51, %v10692_v42  ;;  %v11023_v33 = vmul.f32 %v10683_v24, %v10847_v51 }
 0x2df   : > { %v11027_v45 = vmul.f32 %v10690_v21, %v10847_v51  ;;  %v11031_v23 = vmul.f32 %v10847_v51, %v10705_v32  ;;  %v11035_v52 = vmul.f32 %v10847_v51, %v17719_v37  ;;  %v11039_v42 = vmul.f32 %v17720_v47, %v10847_v51 }
 0x2e0   : > { %v11043_v24 = vmul.f32 %v17721_v6, %v10847_v51  ;;  %v11047_v21 = vmul.f32 %v10847_v51, %v17722_v50  ;;  %v11051_v32 = vmul.f32 %v10847_v51, %v17723_v3  ;;  %v11055_v37 = vmul.f32 %v17724_v57, %v10847_v51 }
 0x2e1   : > { %v11059_v47 = vmul.f32 %v17725_v39, %v10847_v51  ;;  %v11063_v6 = vmul.f32 %v10847_v51, %v17726_v11  ;;  %v11067_v50 = vmul.f32 %v10847_v51, %v17727_v26  ;;  %v11071_v3 = vmul.f32 %v17728_v20, %v10847_v51 }
 0x2e2   : > { %v11075_v57 = vmul.f32 %v17729_v19, %v10847_v51  ;;  %v11079_v39 = vmul.f32 %v10847_v51, %v17731_v4  ;;  %v11083_v11 = vmul.f32 %v10847_v51, %v17733_v35  ;;  %v11087_v26 = vmul.f32 %v17735_v5, %v10847_v51 }
 0x2e3   : > { %v11091_v20 = vmul.f32 %v17737_v17, %v10847_v51  ;;  %v11095_v19 = vmul.f32 %v10847_v51, %v17739_v63 }
 0x2e4   : > { %17730 = vst [vmem:[#allocation14_spill] sm:$0xff] %v11075_v57  ;;  %17732 = vst [vmem:[#allocation15_spill] sm:$0xff] %v11079_v39  ;;  %v17741_v57 = vld [vmem:[#allocation31_spill] sm:$0xff]  ;;  %v17743_v39 = vld [vmem:[#allocation28_spill] sm:$0xff] }
 0x2e5   : > { %17734 = vst [vmem:[#allocation13_spill] sm:$0xff] %v11083_v11  ;;  %17736 = vst [vmem:[#allocation19_spill] sm:$0xff] %v11087_v26  ;;  %v11099_v4 = vmul.f32 %v10847_v51, %v17741_v57  ;;  %v11103_v35 = vmul.f32 %v17743_v39, %v10847_v51  ;;  %v17745_v11 = vld [vmem:[#allocation30_spill] sm:$0xff]  ;;  %v17747_v26 = vld [vmem:[#allocation33_spill] sm:$0xff]  ;;  %v11123_v39 = vadd.f32 %v10887_v9, %v10864_v59 }
 0x2e6   : > { %17738 = vst [vmem:[#allocation18_spill] sm:$0xff] %v11091_v20  ;;  %17740 = vst [vmem:[#allocation17_spill] sm:$0xff] %v11095_v19  ;;  %v11107_v5 = vmul.f32 %v17745_v11, %v10847_v51  ;;  %v11111_v17 = vmul.f32 %v10847_v51, %v17747_v26  ;;  %v17749_v20 = vld [vmem:[#allocation32_spill] sm:$0xff]  ;;  %v17751_v19 = vld [vmem:[#allocation34_spill] sm:$0xff]  ;;  %v2744_v11 = vadd.f32 %v10887_v9, %v10868_v14 }
 0x2e7   : > { %17742 = vst [vmem:[#allocation16_spill] sm:$0xff] %v11099_v4  ;;  %17744 = vst [vmem:[#allocation21_spill] sm:$0xff] %v11103_v35  ;;  %v11115_v63 = vmul.f32 %v17749_v20, %v10847_v51  ;;  %v11119_v57 = vmul.f32 %v17751_v19, %v10847_v51  ;;  %v2746_v26 = vadd.f32 %v10887_v9, %v10876_v10 }
 0x2e8   : > { %17746 = vst [vmem:[#allocation23_spill] sm:$0xff] %v11107_v5  ;;  %17748 = vst [vmem:[#allocation20_spill] sm:$0xff] %v11111_v17  ;;  %v2745_v5 = vadd.f32 %v10887_v9, %v10872_v29  ;;  %v2747_v20 = vadd.f32 %v10887_v9, %v10880_v25  ;;  %v2748_v51 = vadd.f32 %v10887_v9, %v10884_v48 }
 0x2e9   : > { %17750 = vst [vmem:[#allocation22_spill] sm:$0xff] %v11115_v63  ;;  %17752 = vst [vmem:[#allocation25_spill] sm:$0xff] %v11119_v57  ;;  %v2749_v19 = vadd.f32 %v10887_v9, %v10891_v1  ;;  %v2750_v59 = vadd.f32 %v10887_v9, %v10895_v16  ;;  %v2751_v14 = vadd.f32 %v10887_v9, %v10899_v41 }
 0x2ea   : > { %17753 = vst [vmem:[#allocation27_spill] sm:$0xff] %v11123_v39  ;;  %v2752_v29 = vadd.f32 %v10887_v9, %v10903_v12  ;;  %v2753_v10 = vadd.f32 %v10887_v9, %v10907_v7  ;;  %v2754_v25 = vadd.f32 %v10887_v9, %v10911_v49  ;;  %v2755_v48 = vadd.f32 %v10887_v9, %v10915_v28 }
 0x2eb   : > { %v2756_v1 = vadd.f32 %v10887_v9, %v10920_v38  ;;  %v2757_v16 = vadd.f32 %v10887_v9, %v10924_v0  ;;  %v2758_v41 = vadd.f32 %v10887_v9, %v10928_v13  ;;  %v2759_v12 = vadd.f32 %v10887_v9, %v10932_v30  ;;  %v17754_v39 = vld [vmem:[#allocation14_spill] sm:$0xff]  ;;  %v17755_v57 = vld [vmem:[#allocation15_spill] sm:$0xff] }
 0x2ec   : > { %v2760_v7 = vadd.f32 %v10887_v9, %v10936_v62  ;;  %v2761_v49 = vadd.f32 %v10887_v9, %v10940_v18  ;;  %v2762_v28 = vadd.f32 %v10887_v9, %v10944_v15  ;;  %v2763_v38 = vadd.f32 %v10887_v9, %v10950_v46  ;;  %v17756_v63 = vld [vmem:[#allocation13_spill] sm:$0xff]  ;;  %v17757_v17 = vld [vmem:[#allocation19_spill] sm:$0xff] }
 0x2ed   : > { %v2764_v0 = vadd.f32 %v10887_v9, %v10954_v27  ;;  %v2765_v13 = vadd.f32 %v10887_v9, %v10958_v58  ;;  %v2766_v30 = vadd.f32 %v10887_v9, %v10962_v40  ;;  %v2767_v62 = vadd.f32 %v10887_v9, %v10966_v61  ;;  %v17758_v35 = vld [vmem:[#allocation18_spill] sm:$0xff]  ;;  %v17759_v4 = vld [vmem:[#allocation17_spill] sm:$0xff] }
 0x2ee   : > { %v2768_v18 = vadd.f32 %v10887_v9, %v10970_v55  ;;  %v2769_v15 = vadd.f32 %v10887_v9, %v10974_v53  ;;  %v2770_v46 = vadd.f32 %v10887_v9, %v10979_v44  ;;  %v2771_v27 = vadd.f32 %v10887_v9, %v10983_v56 }
 0x2ef   : > { %v2772_v58 = vadd.f32 %v10887_v9, %v10987_v54  ;;  %v2773_v40 = vadd.f32 %v10887_v9, %v10991_v34  ;;  %v2774_v61 = vadd.f32 %v10887_v9, %v10995_v60  ;;  %v2775_v55 = vadd.f32 %v10887_v9, %v10999_v36 }
 0x2f0   : > { %v2776_v53 = vadd.f32 %v10887_v9, %v11003_v31  ;;  %v2777_v44 = vadd.f32 %v10887_v9, %v11007_v43  ;;  %v2778_v56 = vadd.f32 %v10887_v9, %v11011_v2  ;;  %v2779_v54 = vadd.f32 %v10887_v9, %v11015_v8 }
 0x2f1   : > { %v2780_v34 = vadd.f32 %v10887_v9, %v11019_v22  ;;  %v2781_v60 = vadd.f32 %v10887_v9, %v11023_v33  ;;  %v2782_v36 = vadd.f32 %v10887_v9, %v11027_v45  ;;  %v2783_v31 = vadd.f32 %v10887_v9, %v11031_v23 }
 0x2f2   : > { %v2784_v43 = vadd.f32 %v10887_v9, %v11035_v52  ;;  %v2785_v2 = vadd.f32 %v10887_v9, %v11039_v42  ;;  %v2786_v8 = vadd.f32 %v10887_v9, %v11043_v24  ;;  %v2787_v22 = vadd.f32 %v10887_v9, %v11047_v21 }
 0x2f3   : > { %v2788_v33 = vadd.f32 %v10887_v9, %v11051_v32  ;;  %v2789_v45 = vadd.f32 %v10887_v9, %v11055_v37  ;;  %v2790_v23 = vadd.f32 %v10887_v9, %v11059_v47  ;;  %v2791_v52 = vadd.f32 %v10887_v9, %v11063_v6 }
 0x2f4   : > { %v2792_v42 = vadd.f32 %v10887_v9, %v11067_v50  ;;  %v2793_v24 = vadd.f32 %v10887_v9, %v11071_v3  ;;  %v2794_v21 = vadd.f32 %v10887_v9, %v17754_v39  ;;  %v2795_v32 = vadd.f32 %v10887_v9, %v17755_v57  ;;  %v17760_v3 = vld [vmem:[#allocation16_spill] sm:$0xff]  ;;  %v17761_v57 = vld [vmem:[#allocation21_spill] sm:$0xff] }
 0x2f5   : > { %v2796_v37 = vadd.f32 %v10887_v9, %v17756_v63  ;;  %v2797_v47 = vadd.f32 %v10887_v9, %v17757_v17  ;;  %v2798_v6 = vadd.f32 %v10887_v9, %v17758_v35  ;;  %v2799_v50 = vadd.f32 %v10887_v9, %v17759_v4  ;;  %v17762_v17 = vld [vmem:[#allocation23_spill] sm:$0xff]  ;;  %v17763_v4 = vld [vmem:[#allocation20_spill] sm:$0xff] }
 0x2f6   : > { %v2800_v39 = vadd.f32 %v10887_v9, %v17760_v3  ;;  %v2801_v63 = vadd.f32 %v10887_v9, %v17761_v57  ;;  %v2802_v35 = vadd.f32 %v10887_v9, %v17762_v17  ;;  %v2803_v3 = vadd.f32 %v10887_v9, %v17763_v4  ;;  %v17764_v57 = vld [vmem:[#allocation22_spill] sm:$0xff]  ;;  %v17765_v4 = vld [vmem:[#allocation25_spill] sm:$0xff] }
 0x2f7   : > { %v2805_v17 = vadd.f32 %v10887_v9, %v17764_v57  ;;  %v2806_v57 = vadd.f32 %v10887_v9, %v17765_v4  ;;  %v17766_v4 = vld [vmem:[#allocation27_spill] sm:$0xff] }
 0x2f8   : > { %v11250_v9 = vmax.f32 %v17766_v4, 0.0  ;;  %v11252_v4 = vmax.f32 %v2744_v11, 0.0  ;;  %v11256_v11 = vmax.f32 %v2746_v26, 0.0  ;;  %v11264_v26 = vmax.f32 %v2750_v59, 0.0 }
 0x2f9   : > { %v11280_v59 = vmax.f32 %v2758_v41, 0.0  ;;  %v11300_v41 = vmax.f32 %v2768_v18, 0.0  ;;  %v11320_v18 = vmax.f32 %v2778_v56, 0.0  ;;  %v11340_v56 = vmax.f32 %v2788_v33, 0.0 }
 0x2fa   : > { %17767 = vst [vmem:[#allocation24_spill] sm:$0xff] %v11250_v9  ;;  %17768 = vst [vmem:[#allocation26_spill] sm:$0xff] %v11252_v4  ;;  %v11254_v9 = vmax.f32 %v2745_v5, 0.0  ;;  %v11258_v4 = vmax.f32 %v2747_v20, 0.0  ;;  %v11260_v5 = vmax.f32 %v2748_v51, 0.0  ;;  %v11268_v20 = vmax.f32 %v2752_v29, 0.0 }
 0x2fb   : > { %17770 = vst [vmem:[#allocation31_spill] sm:$0xff] %v11256_v11  ;;  %17774 = vst [vmem:[#allocation32_spill] sm:$0xff] %v11264_v26  ;;  %v11266_v11 = vmax.f32 %v2751_v14, 0.0  ;;  %v11272_v51 = vmax.f32 %v2754_v25, 0.0  ;;  %v11282_v26 = vmax.f32 %v2759_v12, 0.0  ;;  %v11284_v14 = vmax.f32 %v2760_v7, 0.0 }
 0x2fc   : > { %17769 = vst [vmem:[#allocation29_spill] sm:$0xff] %v11254_v9  ;;  %17771 = vst [vmem:[#allocation28_spill] sm:$0xff] %v11258_v4  ;;  %v11262_v9 = vmax.f32 %v2749_v19, 0.0  ;;  %v11270_v4 = vmax.f32 %v2753_v10, 0.0  ;;  %v11276_v19 = vmax.f32 %v2756_v1, 0.0  ;;  %v11288_v29 = vmax.f32 %v2762_v28, 0.0 }
 0x2fd   : > { %17772 = vst [vmem:[#allocation30_spill] sm:$0xff] %v11260_v5  ;;  %17775 = vst [vmem:[#allocation34_spill] sm:$0xff] %v11266_v11  ;;  %v11274_v5 = vmax.f32 %v2755_v48, 0.0  ;;  %v11286_v11 = vmax.f32 %v2761_v49, 0.0  ;;  %v11290_v10 = vmax.f32 %v2763_v38, 0.0  ;;  %v11292_v25 = vmax.f32 %v2764_v0, 0.0 }
 0x2fe   : > { %17773 = vst [vmem:[#allocation33_spill] sm:$0xff] %v11262_v9  ;;  %v11278_v9 = vmax.f32 %v2757_v16, 0.0  ;;  %v11294_v48 = vmax.f32 %v2765_v13, 0.0  ;;  %v11296_v1 = vmax.f32 %v2766_v30, 0.0  ;;  %v11298_v16 = vmax.f32 %v2767_v62, 0.0  ;;  %17780 = vst [vmem:[#allocation18_spill] sm:$0xff] %v11300_v41 }
 0x2ff   : > { %17776 = vst [vmem:[#allocation14_spill] sm:$0xff] %v11290_v10  ;;  %v11302_v12 = vmax.f32 %v2769_v15, 0.0  ;;  %v11304_v7 = vmax.f32 %v2770_v46, 0.0  ;;  %v11306_v49 = vmax.f32 %v2771_v27, 0.0  ;;  %v11308_v28 = vmax.f32 %v2772_v58, 0.0  ;;  %17790 = vst [vmem:[#allocation46_spill] sm:$0xff] %v11320_v18 }
 0x300   : > { %17777 = vst [vmem:[#allocation15_spill] sm:$0xff] %v11294_v48  ;;  %17778 = vst [vmem:[#allocation13_spill] sm:$0xff] %v11296_v1  ;;  %v11310_v38 = vmax.f32 %v2773_v40, 0.0  ;;  %v11312_v0 = vmax.f32 %v2774_v61, 0.0  ;;  %v11314_v13 = vmax.f32 %v2775_v55, 0.0  ;;  %v11316_v30 = vmax.f32 %v2776_v53, 0.0 }
 0x301   : > { %17779 = vst [vmem:[#allocation19_spill] sm:$0xff] %v11298_v16  ;;  %17781 = vst [vmem:[#allocation17_spill] sm:$0xff] %v11302_v12  ;;  %v11318_v62 = vmax.f32 %v2777_v44, 0.0  ;;  %v11322_v15 = vmax.f32 %v2779_v54, 0.0  ;;  %v11324_v46 = vmax.f32 %v2780_v34, 0.0  ;;  %v11326_v27 = vmax.f32 %v2781_v60, 0.0 }
 0x302   : > { %17782 = vst [vmem:[#allocation16_spill] sm:$0xff] %v11304_v7  ;;  %17783 = vst [vmem:[#allocation21_spill] sm:$0xff] %v11306_v49  ;;  %v11328_v58 = vmax.f32 %v2782_v36, 0.0  ;;  %v11330_v40 = vmax.f32 %v2783_v31, 0.0  ;;  %v11332_v61 = vmax.f32 %v2784_v43, 0.0  ;;  %v11334_v55 = vmax.f32 %v2785_v2, 0.0 }
 0x303   : > { %17784 = vst [vmem:[#allocation23_spill] sm:$0xff] %v11308_v28  ;;  %17785 = vst [vmem:[#allocation20_spill] sm:$0xff] %v11310_v38  ;;  %v11336_v53 = vmax.f32 %v2786_v8, 0.0  ;;  %v11338_v44 = vmax.f32 %v2787_v22, 0.0  ;;  %v11342_v54 = vmax.f32 %v2789_v45, 0.0  ;;  %v11344_v34 = vmax.f32 %v2790_v23, 0.0 }
 0x304   : > { %17786 = vst [vmem:[#allocation22_spill] sm:$0xff] %v11312_v0  ;;  %17787 = vst [vmem:[#allocation25_spill] sm:$0xff] %v11314_v13  ;;  %v11346_v60 = vmax.f32 %v2791_v52, 0.0  ;;  %v11348_v36 = vmax.f32 %v2792_v42, 0.0  ;;  %v11350_v31 = vmax.f32 %v2793_v24, 0.0  ;;  %v11352_v43 = vmax.f32 %v2794_v21, 0.0 }
 0x305   : > { %17788 = vst [vmem:[#allocation27_spill] sm:$0xff] %v11316_v30  ;;  %17789 = vst [vmem:[#allocation45_spill] sm:$0xff] %v11318_v62  ;;  %v11354_v2 = vmax.f32 %v2795_v32, 0.0  ;;  %v11356_v8 = vmax.f32 %v2796_v37, 0.0  ;;  %v11358_v22 = vmax.f32 %v2797_v47, 0.0  ;;  %v11360_v33 = vmax.f32 %v2798_v6, 0.0 }
 0x306   : > { %17791 = vst [vmem:[#allocation47_spill] sm:$0xff] %v11322_v15  ;;  %17792 = vst [vmem:[#allocation48_spill] sm:$0xff] %v11324_v46  ;;  %v11362_v45 = vmax.f32 %v2799_v50, 0.0  ;;  %v11364_v23 = vmax.f32 %v2800_v39, 0.0  ;;  %v11366_v52 = vmax.f32 %v2801_v63, 0.0  ;;  %v11368_v42 = vmax.f32 %v2802_v35, 0.0 }
 0x307   : > { %17793 = vst [vmem:[#allocation49_spill] sm:$0xff] %v11326_v27  ;;  %17794 = vst [vmem:[#allocation50_spill] sm:$0xff] %v11328_v58  ;;  %v11370_v24 = vmax.f32 %v2803_v3, 0.0  ;;  %v11372_v21 = vmax.f32 %v2805_v17, 0.0  ;;  %v11374_v32 = vmax.f32 %v2806_v57, 0.0  ;;  %v17818_v37 = vld [vmem:[#allocation24_spill] sm:$0xff] }
 0x308   : > { %17795 = vst [vmem:[#allocation51_spill] sm:$0xff] %v11330_v40  ;;  %17796 = vst [vmem:[#allocation52_spill] sm:$0xff] %v11332_v61  ;;  %v17819_v47 = vld [vmem:[#allocation29_spill] sm:$0xff]  ;;  %v17820_v6 = vld [vmem:[#allocation28_spill] sm:$0xff]  ;;  %v3063_v3 = vrot.slane %v17818_v37, 1 }
 0x309   : > { %17797 = vst [vmem:[#allocation53_spill] sm:$0xff] %v11334_v55  ;;  %17798 = vst [vmem:[#allocation54_spill] sm:$0xff] %v11336_v53  ;;  %v17821_v50 = vld [vmem:[#allocation33_spill] sm:$0xff]  ;;  %v17822_v39 = vld [vmem:[#allocation34_spill] sm:$0xff]  ;;  %v3064_v27 = vrot.slane %v17819_v47, 1 }
 0x30a   : > { %17799 = vst [vmem:[#allocation55_spill] sm:$0xff] %v11338_v44  ;;  %17800 = vst [vmem:[#allocation56_spill] sm:$0xff] %v11340_v56  ;;  %v17823_v55 = vld [vmem:[#allocation26_spill] sm:$0xff]  ;;  %v17824_v44 = vld [vmem:[#allocation31_spill] sm:$0xff] }
 0x30b   : > { %17801 = vst [vmem:[#allocation57_spill] sm:$0xff] %v11342_v54  ;;  %17802 = vst [vmem:[#allocation58_spill] sm:$0xff] %v11344_v34  ;;  %v17825_v54 = vld [vmem:[#allocation30_spill] sm:$0xff]  ;;  %v17845_v30 = vld [vmem:[#allocation35_spill] sm:$0xff] }
 0x30c   : > { %17803 = vst [vmem:[#allocation59_spill] sm:$0xff] %v11346_v60  ;;  %17804 = vst [vmem:[#allocation60_spill] sm:$0xff] %v11348_v36  ;;  %v2904_v36 = vrot.slane %v17824_v44, 7  ;;  %v17826_v60 = vld [vmem:[#allocation32_spill] sm:$0xff]  ;;  %v3097_v35 = vrot.slane %v17825_v54, 1 }
 0x30d   : > { %17805 = vst [vmem:[#allocation61_spill] sm:$0xff] %v11350_v31  ;;  %17806 = vst [vmem:[#allocation62_spill] sm:$0xff] %v11352_v43 }
 0x30e   : > { %17807 = vst [vmem:[#allocation63_spill] sm:$0xff] %v11354_v2  ;;  %17808 = vst [vmem:[#allocation64_spill] sm:$0xff] %v11356_v8  ;;  %v17836_v8 = vld [vmem:[#allocation36_spill] sm:$0xff] }
 0x30f   : > { %17809 = vst [vmem:[#allocation65_spill] sm:$0xff] %v11358_v22  ;;  %17810 = vst [vmem:[#allocation66_spill] sm:$0xff] %v11360_v33  ;;  %v2903_v33 = vrot.slane %v17823_v55, 7  ;;  %v3641_v17 = vmul.f32 %v17836_v8, %v17819_v47  ;;  %v3642_v43 = vmul.f32 %v17836_v8, %v17824_v44 }
 0x310   : > { %17811 = vst [vmem:[#allocation67_spill] sm:$0xff] %v11362_v45  ;;  %17812 = vst [vmem:[#allocation68_spill] sm:$0xff] %v11364_v23  ;;  %v17833_v23 = vrot.slane %v17825_v54, 7 }
 0x311   : > { %17813 = vst [vmem:[#allocation69_spill] sm:$0xff] %v11366_v52  ;;  %17814 = vst [vmem:[#allocation70_spill] sm:$0xff] %v11368_v42  ;;  %v17832_v52 = vrot.slane %v17820_v6, 7 }
 0x312   : > { %17815 = vst [vmem:[#allocation71_spill] sm:$0xff] %v11370_v24  ;;  %17816 = vst [vmem:[#allocation72_spill] sm:$0xff] %v11372_v21  ;;  %v3095_v24 = vrot.slane %v17823_v55, 1  ;;  %v17837_v21 = vld [vmem:[#allocation39_spill] sm:$0xff] }
 0x313   : > { %17817 = vst [vmem:[#allocation73_spill] sm:$0xff] %v11374_v32  ;;  %v11445_v63 = vsel %vm676_vm2, %v17833_v23, %v17832_v52  ;;  %v17835_v52 = vld [vmem:[#allocation38_spill] sm:$0xff]  ;;  %v11467_v2 = vmul.f32 %v17837_v21, %v17820_v6  ;;  %v3970_v40 = vmul.f32 %v17837_v21, %v17825_v54  ;;  %v17838_v23 = vrot.slane %v17818_v37, 7 }
 0x314   : > { %v3323_v31 = vmul.f32 %v17835_v52, %v17818_v37  ;;  %v3324_v57 = vmul.f32 %v17835_v52, %v17823_v55  ;;  %v17839_v32 = vrot.slane %v17819_v47, 7  ;;  %v3127_v15 = vsel %vm873_vm3, %v3063_v3, %v3095_v24 }
 0x315   : > { %v2935_v42 = vsel %vm676_vm2, %v17838_v23, %v2903_v33  ;;  %v17840_v45 = vmov %v17838_v23 }
 0x316   : > { %v11479_v22 = vsel %vm676_vm2, %v17839_v32, %v2904_v36  ;;  %v2967_v34 = vsel %vm676_vm2, %v2903_v33, %v17840_v45  ;;  %v17841_v53 = vmov %v17839_v32  ;;  %v3096_v32 = vrot.slane %v17824_v44, 1  ;;  %v17842_v45 = vld [vmem:[#allocation40_spill] sm:$0xff] }
 0x317   : > { %v2968_v61 = vsel %vm676_vm2, %v2904_v36, %v17841_v53  ;;  %v2999_v23 = vsel %vm485_vm0, %v2967_v34, 0.0  ;;  %v3159_v33 = vsel %vm873_vm3, %v3095_v24, %v3063_v3  ;;  %v3260_v53 = vmul.f32 %v17842_v45, %v2935_v42  ;;  %v17843_v36 = vld [vmem:[#allocation41_spill] sm:$0xff] }
 0x318   : > { %v11494_v58 = vsel %vm485_vm0, %v2968_v61, 0.0  ;;  %v3259_v46 = vmul.f32 %v17842_v45, %v2999_v23  ;;  %v3447_v62 = vmul.f32 %v17843_v36, %v3127_v15  ;;  %v11506_v34 = vsel %vm873_vm3, %v3064_v27, %v3096_v32 }
 0x319   : > { %v3160_v61 = vsel %vm873_vm3, %v3096_v32, %v3064_v27  ;;  %v3192_v13 = vsel %vm488_vm1, %v3159_v33, 0.0  ;;  %v3571_v38 = vmul.f32 %v17845_v30, %v2999_v23  ;;  %v3384_v0 = vadd.f32 %v3324_v57, %v3260_v53 }
 0x31a   : > { %v11515_v24 = vsel %vm488_vm1, %v3160_v61, 0.0  ;;  %v3383_v3 = vadd.f32 %v3323_v31, %v3259_v46  ;;  %v3448_v49 = vmul.f32 %v17843_v36, %v3192_v13  ;;  %v3572_v28 = vmul.f32 %v17845_v30, %v2935_v42  ;;  %v17846_v46 = vld [vmem:[#allocation37_spill] sm:$0xff] }
 0x31b   : > { %v3573_v12 = vmul.f32 %v17845_v30, %v11494_v58  ;;  %v3574_v27 = vmul.f32 %v17845_v30, %v11479_v22  ;;  %v3639_v32 = vmul.f32 %v17836_v8, %v17818_v37  ;;  %v3640_v61 = vmul.f32 %v17836_v8, %v17823_v55 }
 0x31c   : > { %v3507_v23 = vadd.f32 %v3447_v62, %v3383_v3  ;;  %v3508_v33 = vadd.f32 %v3448_v49, %v3384_v0  ;;  %v3771_v31 = vmul.f32 %v17846_v46, %v3127_v15  ;;  %v3772_v42 = vmul.f32 %v17846_v46, %v3192_v13  ;;  %v17847_v62 = vld [vmem:[#allocation42_spill] sm:$0xff] }
 0x31d   : > { %v3703_v57 = vadd.f32 %v3639_v32, %v3571_v38  ;;  %v3705_v53 = vadd.f32 %v3641_v17, %v3573_v12  ;;  %v3706_v7 = vadd.f32 %v3642_v43, %v3574_v27  ;;  %v3704_v16 = vadd.f32 %v3640_v61, %v3572_v28  ;;  %v17848_v43 = vld [vmem:[#allocation43_spill] sm:$0xff] }
 0x31e   : > { %v3773_v41 = vmul.f32 %v17846_v46, %v11506_v34  ;;  %v3774_v48 = vmul.f32 %v17846_v46, %v11515_v24  ;;  %v3903_v49 = vmul.f32 %v17847_v62, %v11494_v58  ;;  %v3904_v55 = vmul.f32 %v17847_v62, %v11479_v22 }
 0x31f   : > { %v3835_v0 = vadd.f32 %v3771_v31, %v3703_v57  ;;  %v3967_v12 = vmul.f32 %v17837_v21, %v17819_v47  ;;  %v3968_v38 = vmul.f32 %v17837_v21, %v17824_v44  ;;  %v3836_v28 = vadd.f32 %v3772_v42, %v3704_v16 }
 0x320   : > { %v3837_v13 = vadd.f32 %v3773_v41, %v3705_v53  ;;  %v3838_v15 = vadd.f32 %v3774_v48, %v3706_v7  ;;  %v4091_v37 = vmul.f32 %v17848_v43, %v11506_v34  ;;  %v4092_v27 = vmul.f32 %v17848_v43, %v11515_v24 }
 0x321   : > { %v4027_v17 = vadd.f32 %v3967_v12, %v3903_v49  ;;  %v4028_v3 = vadd.f32 %v3968_v38, %v3904_v55  ;;  %v17849_v32 = vrot.slane %v17825_v54, 7  ;;  %v17850_v61 = vrot.slane %v17820_v6, 7 }
 0x322   : > { %v11556_v48 = vsel %vm485_vm0, %v11445_v63, 0.0  ;;  %v17851_v16 = vrot.slane %v17820_v6, 1 }
 0x323   : > { %v11551_v31 = vsel %vm676_vm2, %v17850_v61, %v17849_v32  ;;  %v4151_v42 = vadd.f32 %v4091_v37, %v4027_v17  ;;  %v4152_v49 = vadd.f32 %v4092_v27, %v4028_v3  ;;  %v3905_v55 = vmul.f32 %v17847_v62, %v11556_v48 }
 0x324   : > { %v11562_v41 = vsel %vm873_vm3, %v17851_v16, %v3097_v35  ;;  %v17852_v7 = vmov %v17851_v16  ;;  %v3906_v53 = vmul.f32 %v17847_v62, %v11551_v31  ;;  %v4214_v17 = vadd.f32 %v3838_v15, %v3508_v33 }
 0x325   : > { %v3161_v57 = vsel %vm873_vm3, %v3097_v35, %v17852_v7  ;;  %v4093_v38 = vmul.f32 %v17848_v43, %v11562_v41  ;;  %v4213_v35 = vadd.f32 %v3837_v13, %v3507_v23  ;;  %v4275_v61 = vadd.f32 %v4151_v42, %v3835_v0 }
 0x326   : > { %v11572_v63 = vsel %vm488_vm1, %v3161_v57, 0.0  ;;  %v4030_v12 = vadd.f32 %v3970_v40, %v3906_v53  ;;  %v4276_v16 = vadd.f32 %v4152_v49, %v3836_v28  ;;  %v4029_v37 = vadd.f32 %v11467_v2, %v3905_v55 }
 0x327   : > { %v4094_v32 = vmul.f32 %v17848_v43, %v11572_v63  ;;  %v17853_v27 = vrot.slane %v17826_v60, 7  ;;  %v17854_v7 = vrot.slane %v17821_v50, 7  ;;  %v3066_v0 = vrot.slane %v17821_v50, 1 }
 0x328   : > { %v4339_v2 = vpack.c.bf16 %v4276_v16, %v4275_v61  ;;  %v4153_v33 = vadd.f32 %v4093_v38, %v4029_v37  ;;  %v3098_v13 = vrot.slane %v17826_v60, 1  ;;  %v3261_v42 = vmul.f32 %v17842_v45, %v11494_v58 }
 0x329   : > { %v4154_v3 = vadd.f32 %v4094_v32, %v4030_v12  ;;  %v11587_v40 = vsel %vm676_vm2, %v17854_v7, %v17853_v27  ;;  %v17855_v57 = vmov %v17854_v7  ;;  %v17856_v53 = vmov %v17853_v27 }
 0x32a   : > { %v2970_v23 = vsel %vm676_vm2, %v17856_v53, %v17855_v57  ;;  %v3262_v49 = vmul.f32 %v17842_v45, %v11479_v22  ;;  %v3325_v55 = vmul.f32 %v17835_v52, %v17819_v47  ;;  %7781 = vmatprep.mubr.bf16.mxu1 %v4339_v2  ;;  %v4277_v12 = vadd.f32 %v4213_v35, %v4153_v33 }
 0x32b   : > { %v11598_v28 = vsel %vm485_vm0, %v2970_v23, 0.0  ;;  %v4278_v15 = vadd.f32 %v4214_v17, %v4154_v3  ;;  %v11609_v38 = vsel %vm873_vm3, %v3066_v0, %v3098_v13  ;;  %v3162_v32 = vsel %vm873_vm3, %v3098_v13, %v3066_v0 }
 0x32c   : > { %v3326_v61 = vmul.f32 %v17835_v52, %v17824_v44  ;;  %v11617_v58 = vsel %vm488_vm1, %v3162_v32, 0.0  ;;  %v3385_v22 = vadd.f32 %v3325_v55, %v3261_v42  ;;  %v3449_v47 = vmul.f32 %v17843_v36, %v11506_v34 }
 0x32d   : > { %v3450_v35 = vmul.f32 %v17843_v36, %v11515_v24  ;;  %v4340_v16 = vpack.c.bf16 %v4278_v15, %v4277_v12  ;;  %v3575_v17 = vmul.f32 %v17845_v30, %v11556_v48  ;;  %v3576_v3 = vmul.f32 %v17845_v30, %v11551_v31 }
 0x32e   : > { %v3386_v37 = vadd.f32 %v3326_v61, %v3262_v49  ;;  %v3509_v44 = vadd.f32 %v3449_v47, %v3385_v22  ;;  %v3643_v27 = vmul.f32 %v17836_v8, %v17820_v6  ;;  %v3644_v7 = vmul.f32 %v17836_v8, %v17825_v54 }
 0x32f   : > { %v3775_v34 = vmul.f32 %v17846_v46, %v11562_v41  ;;  %7782 = vmatmul.mubr.bf16.vlgmr.msra.gmra.mrb[32].mxu1 %v4340_v16  ;;  %v3776_v57 = vmul.f32 %v17846_v46, %v11572_v63  ;;  %v3907_v53 = vmul.f32 %v17847_v62, %v11598_v28  ;;  %v3908_v23 = vmul.f32 %v17847_v62, %v11587_v40 }
 0x330   : > { %v3510_v24 = vadd.f32 %v3450_v35, %v3386_v37  ;;  %v3707_v0 = vadd.f32 %v3643_v27, %v3575_v17  ;;  %v3708_v2 = vadd.f32 %v3644_v7, %v3576_v3  ;;  %v3971_v33 = vmul.f32 %v17837_v21, %v17821_v50 }
 0x331   : > { %v3972_v13 = vmul.f32 %v17837_v21, %v17826_v60  ;;  %v4095_v15 = vmul.f32 %v17848_v43, %v11609_v38  ;;  %v4096_v42 = vmul.f32 %v17848_v43, %v11617_v58  ;;  %v17857_v49 = vrot.slane %v11268_v20, 7 }
 0x332   : > { %v17858_v55 = vrot.slane %v17822_v39, 7  ;;  %v3839_v47 = vadd.f32 %v3775_v34, %v3707_v0  ;;  %v3840_v35 = vadd.f32 %v3776_v57, %v3708_v2  ;;  %v4031_v16 = vadd.f32 %v3971_v33, %v3907_v53 }
 0x333   : > { %v17860_v61 = vmov %v17857_v49  ;;  %v4032_v37 = vadd.f32 %v3972_v13, %v3908_v23  ;;  %v3067_v3 = vrot.slane %v17822_v39, 1  ;;  %v3099_v27 = vrot.slane %v11268_v20, 1 }
 0x334   : > { %v11653_v12 = vsel %vm676_vm2, %v17858_v55, %v17857_v49  ;;  %v17859_v32 = vmov %v17858_v55  ;;  %v3263_v7 = vmul.f32 %v17842_v45, %v11556_v48  ;;  %v4155_v49 = vadd.f32 %v4095_v15, %v4031_v16 }
 0x335   : > { %v2971_v22 = vsel %vm676_vm2, %v17860_v61, %v17859_v32  ;;  %v4156_v55 = vadd.f32 %v4096_v42, %v4032_v37  ;;  %v4215_v1 = vadd.f32 %v3839_v47, %v3509_v44  ;;  %v4216_v10 = vadd.f32 %v3840_v35, %v3510_v24 }
 0x336   : > { %v11663_v17 = vsel %vm485_vm0, %v2971_v22, 0.0  ;;  %v11671_v34 = vsel %vm873_vm3, %v3067_v3, %v3099_v27  ;;  %v3163_v57 = vsel %vm873_vm3, %v3099_v27, %v3067_v3  ;;  %v3264_v53 = vmul.f32 %v17842_v45, %v11551_v31 }
 0x337   : > { %v3327_v23 = vmul.f32 %v17835_v52, %v17820_v6  ;;  %v4279_v0 = vadd.f32 %v4215_v1, %v4155_v49  ;;  %v4280_v2 = vadd.f32 %v4216_v10, %v4156_v55  ;;  %v11681_v48 = vsel %vm488_vm1, %v3163_v57, 0.0 }
 0x338   : > { %v3328_v44 = vmul.f32 %v17835_v52, %v17825_v54  ;;  %v3451_v33 = vmul.f32 %v17843_v36, %v11562_v41  ;;  %v3452_v13 = vmul.f32 %v17843_v36, %v11572_v63  ;;  %v3577_v31 = vmul.f32 %v17845_v30, %v11598_v28 }
 0x339   : > { %v3387_v24 = vadd.f32 %v3327_v23, %v3263_v7  ;;  %v4341_v6 = vpack.c.bf16 %v4280_v2, %v4279_v0  ;;  %v3578_v10 = vmul.f32 %v17845_v30, %v11587_v40  ;;  %v3645_v15 = vmul.f32 %v17836_v8, %v17821_v50 }
 0x33a   : > { %v3388_v1 = vadd.f32 %v3328_v44, %v3264_v53  ;;  %v3646_v54 = vmul.f32 %v17836_v8, %v17826_v60  ;;  %v3777_v41 = vmul.f32 %v17846_v46, %v11609_v38  ;;  %v3778_v63 = vmul.f32 %v17846_v46, %v11617_v58 }
 0x33b   : > { %v3511_v42 = vadd.f32 %v3451_v33, %v3387_v24  ;;  %7785 = vmatprep.mubr.bf16.mxu1 %v4341_v6  ;;  %v3709_v61 = vadd.f32 %v3645_v15, %v3577_v31  ;;  %v3909_v22 = vmul.f32 %v17847_v62, %v11663_v17  ;;  %v3910_v47 = vmul.f32 %v17847_v62, %v11653_v12 }
 0x33c   : > { %v3512_v32 = vadd.f32 %v3452_v13, %v3388_v1  ;;  %v3710_v35 = vadd.f32 %v3646_v54, %v3578_v10  ;;  %v3973_v16 = vmul.f32 %v17837_v21, %v17822_v39  ;;  %v3974_v37 = vmul.f32 %v17837_v21, %v11268_v20 }
 0x33d   : > { %v4097_v3 = vmul.f32 %v17848_v43, %v11671_v34  ;;  %v3841_v27 = vadd.f32 %v3777_v41, %v3709_v61  ;;  %v4098_v7 = vmul.f32 %v17848_v43, %v11681_v48  ;;  %v17861_v49 = vrot.slane %v11272_v51, 7 }
 0x33e   : > { %v17862_v55 = vrot.slane %v11270_v4, 7  ;;  %v3842_v2 = vadd.f32 %v3778_v63, %v3710_v35  ;;  %v4033_v44 = vadd.f32 %v3973_v16, %v3909_v22  ;;  %v4034_v24 = vadd.f32 %v3974_v37, %v3910_v47 }
 0x33f   : > { %v17864_v23 = vmov %v17861_v49  ;;  %v4217_v13 = vadd.f32 %v3841_v27, %v3511_v42  ;;  %v3068_v31 = vrot.slane %v11270_v4, 1  ;;  %v3100_v6 = vrot.slane %v11272_v51, 1 }
 0x340   : > { %v11719_v57 = vsel %vm676_vm2, %v17862_v55, %v17861_v49  ;;  %v17863_v53 = vmov %v17862_v55  ;;  %v3265_v1 = vmul.f32 %v17842_v45, %v11598_v28  ;;  %v4157_v10 = vadd.f32 %v4097_v3, %v4033_v44 }
 0x341   : > { %v2972_v0 = vsel %vm676_vm2, %v17864_v23, %v17863_v53  ;;  %v4158_v15 = vadd.f32 %v4098_v7, %v4034_v24  ;;  %v4218_v54 = vadd.f32 %v3842_v2, %v3512_v32  ;;  %v3266_v41 = vmul.f32 %v17842_v45, %v11587_v40 }
 0x342   : > { %v11729_v33 = vsel %vm485_vm0, %v2972_v0, 0.0  ;;  %v11739_v63 = vsel %vm873_vm3, %v3068_v31, %v3100_v6  ;;  %v3164_v42 = vsel %vm873_vm3, %v3100_v6, %v3068_v31  ;;  %v3329_v61 = vmul.f32 %v17835_v52, %v17821_v50 }
 0x343   : > { %v3330_v22 = vmul.f32 %v17835_v52, %v17826_v60  ;;  %v4281_v28 = vadd.f32 %v4217_v13, %v4157_v10  ;;  %v4282_v47 = vadd.f32 %v4218_v54, %v4158_v15  ;;  %v11749_v32 = vsel %vm488_vm1, %v3164_v42, 0.0 }
 0x344   : > { %v3453_v40 = vmul.f32 %v17843_v36, %v11609_v38  ;;  %v3389_v35 = vadd.f32 %v3329_v61, %v3265_v1  ;;  %v3454_v37 = vmul.f32 %v17843_v36, %v11617_v58  ;;  %v3579_v50 = vmul.f32 %v17845_v30, %v11663_v17 }
 0x345   : > { %v3390_v16 = vadd.f32 %v3330_v22, %v3266_v41  ;;  %v4342_v3 = vpack.c.bf16 %v4282_v47, %v4281_v28  ;;  %v3580_v60 = vmul.f32 %v17845_v30, %v11653_v12  ;;  %v3647_v27 = vmul.f32 %v17836_v8, %v17822_v39 }
 0x346   : > { %v3648_v7 = vmul.f32 %v17836_v8, %v11268_v20  ;;  %v3513_v49 = vadd.f32 %v3453_v40, %v3389_v35  ;;  %v3779_v55 = vmul.f32 %v17846_v46, %v11671_v34  ;;  %v3780_v58 = vmul.f32 %v17846_v46, %v11681_v48 }
 0x347   : > { %v3514_v38 = vadd.f32 %v3454_v37, %v3390_v16  ;;  %7786 = vmatmul.mubr.bf16.gmra.mrb[36].mxu1 %v4342_v3  ;;  %v3711_v53 = vadd.f32 %v3647_v27, %v3579_v50  ;;  %v3911_v0 = vmul.f32 %v17847_v62, %v11729_v33  ;;  %v3912_v2 = vmul.f32 %v17847_v62, %v11719_v57 }
 0x348   : > { %v3712_v23 = vadd.f32 %v3648_v7, %v3580_v60  ;;  %v3975_v44 = vmul.f32 %v17837_v21, %v11270_v4  ;;  %v3976_v24 = vmul.f32 %v17837_v21, %v11272_v51  ;;  %v4099_v13 = vmul.f32 %v17848_v43, %v11739_v63 }
 0x349   : > { %v4100_v31 = vmul.f32 %v17848_v43, %v11749_v32  ;;  %v3843_v6 = vadd.f32 %v3779_v55, %v3711_v53  ;;  %v17865_v10 = vrot.slane %v11276_v19, 7  ;;  %v17866_v15 = vrot.slane %v11274_v5, 7 }
 0x34a   : > { %v3844_v1 = vadd.f32 %v3780_v58, %v3712_v23  ;;  %v4035_v22 = vadd.f32 %v3975_v44, %v3911_v0  ;;  %v4036_v28 = vadd.f32 %v3976_v24, %v3912_v2  ;;  %v3069_v40 = vrot.slane %v11274_v5, 1 }
 0x34b   : > { %v11785_v54 = vsel %vm676_vm2, %v17866_v15, %v17865_v10  ;;  %v17867_v41 = vmov %v17866_v15  ;;  %v17868_v42 = vmov %v17865_v10  ;;  %v4219_v35 = vadd.f32 %v3843_v6, %v3513_v49 }
 0x34c   : > { %v2973_v61 = vsel %vm676_vm2, %v17868_v42, %v17867_v41  ;;  %v4220_v16 = vadd.f32 %v3844_v1, %v3514_v38  ;;  %v3101_v37 = vrot.slane %v11276_v19, 1  ;;  %v3267_v50 = vmul.f32 %v17842_v45, %v11663_v17 }
 0x34d   : > { %v11795_v47 = vsel %vm485_vm0, %v2973_v61, 0.0  ;;  %v4159_v3 = vadd.f32 %v4099_v13, %v4035_v22  ;;  %v4160_v60 = vadd.f32 %v4100_v31, %v4036_v28  ;;  %v3268_v27 = vmul.f32 %v17842_v45, %v11653_v12 }
 0x34e   : > { %v3331_v7 = vmul.f32 %v17835_v52, %v17822_v39  ;;  %v11807_v55 = vsel %vm873_vm3, %v3069_v40, %v3101_v37  ;;  %v3165_v49 = vsel %vm873_vm3, %v3101_v37, %v3069_v40  ;;  %v3332_v38 = vmul.f32 %v17835_v52, %v11268_v20 }
 0x34f   : > { %v3455_v17 = vmul.f32 %v17843_v36, %v11671_v34  ;;  %v4283_v58 = vadd.f32 %v4219_v35, %v4159_v3  ;;  %v4284_v53 = vadd.f32 %v4220_v16, %v4160_v60  ;;  %v11817_v12 = vsel %vm488_vm1, %v3165_v49, 0.0 }
 0x350   : > { %v3391_v39 = vadd.f32 %v3331_v7, %v3267_v50  ;;  %v3392_v23 = vadd.f32 %v3332_v38, %v3268_v27  ;;  %v3456_v0 = vmul.f32 %v17843_v36, %v11681_v48  ;;  %v3581_v2 = vmul.f32 %v17845_v30, %v11729_v33 }
 0x351   : > { %v3582_v20 = vmul.f32 %v17845_v30, %v11719_v57  ;;  %v4343_v44 = vpack.c.bf16 %v4284_v53, %v4283_v58  ;;  %v3649_v34 = vmul.f32 %v17836_v8, %v11270_v4  ;;  %v3650_v13 = vmul.f32 %v17836_v8, %v11272_v51 }
 0x352   : > { %v3515_v24 = vadd.f32 %v3455_v17, %v3391_v39  ;;  %v3516_v31 = vadd.f32 %v3456_v0, %v3392_v23  ;;  %v3781_v6 = vmul.f32 %v17846_v46, %v11739_v63  ;;  %v3782_v48 = vmul.f32 %v17846_v46, %v11749_v32 }
 0x353   : > { %v3913_v1 = vmul.f32 %v17847_v62, %v11795_v47  ;;  %7789 = vmatprep.mubr.bf16.mxu1 %v4343_v44  ;;  %v3713_v10 = vadd.f32 %v3649_v34, %v3581_v2  ;;  %v3714_v15 = vadd.f32 %v3650_v13, %v3582_v20  ;;  %v3914_v41 = vmul.f32 %v17847_v62, %v11785_v54 }
 0x354   : > { %v3977_v42 = vmul.f32 %v17837_v21, %v11274_v5  ;;  %v3978_v61 = vmul.f32 %v17837_v21, %v11276_v19  ;;  %v4101_v22 = vmul.f32 %v17848_v43, %v11807_v55  ;;  %v4102_v28 = vmul.f32 %v17848_v43, %v11817_v12 }
 0x355   : > { %v17869_v40 = vrot.slane %v11280_v59, 7  ;;  %v17870_v35 = vrot.slane %v11278_v9, 7  ;;  %v3845_v37 = vadd.f32 %v3781_v6, %v3713_v10  ;;  %v3846_v50 = vadd.f32 %v3782_v48, %v3714_v15 }
 0x356   : > { %v4037_v3 = vadd.f32 %v3977_v42, %v3913_v1  ;;  %v4038_v49 = vadd.f32 %v3978_v61, %v3914_v41  ;;  %v3070_v17 = vrot.slane %v11278_v9, 1  ;;  %v3102_v58 = vrot.slane %v11280_v59, 1 }
 0x357   : > { %v11851_v16 = vsel %vm676_vm2, %v17870_v35, %v17869_v40  ;;  %v17871_v60 = vmov %v17870_v35  ;;  %v17872_v27 = vmov %v17869_v40  ;;  %v4221_v39 = vadd.f32 %v3845_v37, %v3515_v24 }
 0x358   : > { %v2974_v7 = vsel %vm676_vm2, %v17872_v27, %v17871_v60  ;;  %v4161_v53 = vadd.f32 %v4101_v22, %v4037_v3  ;;  %v4222_v23 = vadd.f32 %v3846_v50, %v3516_v31  ;;  %v3269_v0 = vmul.f32 %v17842_v45, %v11729_v33 }
 0x359   : > { %v11861_v38 = vsel %vm485_vm0, %v2974_v7, 0.0  ;;  %v4162_v2 = vadd.f32 %v4102_v28, %v4038_v49  ;;  %v11869_v20 = vsel %vm873_vm3, %v3070_v17, %v3102_v58  ;;  %v3166_v44 = vsel %vm873_vm3, %v3102_v58, %v3070_v17 }
 0x35a   : > { %v3270_v34 = vmul.f32 %v17842_v45, %v11719_v57  ;;  %v4285_v13 = vadd.f32 %v4221_v39, %v4161_v53  ;;  %v11877_v6 = vsel %vm488_vm1, %v3166_v44, 0.0  ;;  %v3333_v24 = vmul.f32 %v17835_v52, %v11270_v4 }
 0x35b   : > { %v3334_v33 = vmul.f32 %v17835_v52, %v11272_v51  ;;  %v4286_v31 = vadd.f32 %v4222_v23, %v4162_v2  ;;  %v3457_v48 = vmul.f32 %v17843_v36, %v11739_v63  ;;  %v3458_v1 = vmul.f32 %v17843_v36, %v11749_v32 }
 0x35c   : > { %v3583_v57 = vmul.f32 %v17845_v30, %v11795_v47  ;;  %v3393_v10 = vadd.f32 %v3333_v24, %v3269_v0  ;;  %v3584_v41 = vmul.f32 %v17845_v30, %v11785_v54  ;;  %v3651_v4 = vmul.f32 %v17836_v8, %v11274_v5 }
 0x35d   : > { %v3394_v15 = vadd.f32 %v3334_v33, %v3270_v34  ;;  %v4344_v42 = vpack.c.bf16 %v4286_v31, %v4285_v13  ;;  %v3652_v51 = vmul.f32 %v17836_v8, %v11276_v19  ;;  %v3783_v63 = vmul.f32 %v17846_v46, %v11807_v55 }
 0x35e   : > { %v3784_v32 = vmul.f32 %v17846_v46, %v11817_v12  ;;  %v3517_v61 = vadd.f32 %v3457_v48, %v3393_v10  ;;  %v3715_v28 = vadd.f32 %v3651_v4, %v3583_v57  ;;  %v3915_v40 = vmul.f32 %v17847_v62, %v11861_v38 }
 0x35f   : > { %v3518_v22 = vadd.f32 %v3458_v1, %v3394_v15  ;;  %7790 = vmatmul.mubr.bf16.gmra.mrb[40].mxu1 %v4344_v42  ;;  %v3716_v35 = vadd.f32 %v3652_v51, %v3584_v41  ;;  %v3916_v37 = vmul.f32 %v17847_v62, %v11851_v16  ;;  %v3979_v50 = vmul.f32 %v17837_v21, %v11278_v9 }
 0x360   : > { %v3980_v3 = vmul.f32 %v17837_v21, %v11280_v59  ;;  %v3847_v60 = vadd.f32 %v3783_v63, %v3715_v28  ;;  %v4103_v27 = vmul.f32 %v17848_v43, %v11869_v20  ;;  %v4104_v7 = vmul.f32 %v17848_v43, %v11877_v6 }
 0x361   : > { %v17873_v49 = vrot.slane %v11284_v14, 7  ;;  %v17874_v17 = vrot.slane %v11282_v26, 7  ;;  %v3848_v53 = vadd.f32 %v3784_v32, %v3716_v35  ;;  %v4039_v39 = vadd.f32 %v3979_v50, %v3915_v40 }
 0x362   : > { %v4040_v23 = vadd.f32 %v3980_v3, %v3916_v37  ;;  %v4223_v34 = vadd.f32 %v3847_v60, %v3517_v61  ;;  %v3071_v24 = vrot.slane %v11282_v26, 1  ;;  %v3103_v33 = vrot.slane %v11284_v14, 1 }
 0x363   : > { %v11917_v58 = vsel %vm676_vm2, %v17874_v17, %v17873_v49  ;;  %v17875_v0 = vmov %v17874_v17  ;;  %v17876_v2 = vmov %v17873_v49  ;;  %v4163_v31 = vadd.f32 %v4103_v27, %v4039_v39 }
 0x364   : > { %v2975_v44 = vsel %vm676_vm2, %v17876_v2, %v17875_v0  ;;  %v4164_v48 = vadd.f32 %v4104_v7, %v4040_v23  ;;  %v4224_v1 = vadd.f32 %v3848_v53, %v3518_v22  ;;  %v3271_v57 = vmul.f32 %v17842_v45, %v11795_v47 }
 0x365   : > { %v11927_v13 = vsel %vm485_vm0, %v2975_v44, 0.0  ;;  %v11935_v10 = vsel %vm873_vm3, %v3071_v24, %v3103_v33  ;;  %v3167_v15 = vsel %vm873_vm3, %v3103_v33, %v3071_v24  ;;  %v3272_v41 = vmul.f32 %v17842_v45, %v11785_v54 }
 0x366   : > { %v3335_v4 = vmul.f32 %v17835_v52, %v11274_v5  ;;  %v4287_v42 = vadd.f32 %v4223_v34, %v4163_v31  ;;  %v4288_v51 = vadd.f32 %v4224_v1, %v4164_v48  ;;  %v11945_v63 = vsel %vm488_vm1, %v3167_v15, 0.0 }
 0x367   : > { %v3336_v47 = vmul.f32 %v17835_v52, %v11276_v19  ;;  %v3459_v61 = vmul.f32 %v17843_v36, %v11807_v55  ;;  %v3460_v22 = vmul.f32 %v17843_v36, %v11817_v12  ;;  %v3585_v54 = vmul.f32 %v17845_v30, %v11861_v38 }
 0x368   : > { %v3395_v32 = vadd.f32 %v3335_v4, %v3271_v57  ;;  %v4345_v5 = vpack.c.bf16 %v4288_v51, %v4287_v42  ;;  %v3586_v40 = vmul.f32 %v17845_v30, %v11851_v16  ;;  %v3653_v35 = vmul.f32 %v17836_v8, %v11278_v9 }
 0x369   : > { %v3396_v28 = vadd.f32 %v3336_v47, %v3272_v41  ;;  %v3654_v19 = vmul.f32 %v17836_v8, %v11280_v59  ;;  %v3785_v55 = vmul.f32 %v17846_v46, %v11869_v20  ;;  %v3786_v12 = vmul.f32 %v17846_v46, %v11877_v6 }
 0x36a   : > { %v3519_v37 = vadd.f32 %v3459_v61, %v3395_v32  ;;  %7793 = vmatprep.mubr.bf16.mxu1 %v4345_v5  ;;  %v3717_v3 = vadd.f32 %v3653_v35, %v3585_v54  ;;  %v3917_v60 = vmul.f32 %v17847_v62, %v11927_v13  ;;  %v3918_v27 = vmul.f32 %v17847_v62, %v11917_v58 }
 0x36b   : > { %v3520_v50 = vadd.f32 %v3460_v22, %v3396_v28  ;;  %v3718_v7 = vadd.f32 %v3654_v19, %v3586_v40  ;;  %v3981_v49 = vmul.f32 %v17837_v21, %v11282_v26  ;;  %v3982_v17 = vmul.f32 %v17837_v21, %v11284_v14 }
 0x36c   : > { %v4105_v53 = vmul.f32 %v17848_v43, %v11935_v10  ;;  %v3849_v39 = vadd.f32 %v3785_v55, %v3717_v3  ;;  %v4106_v23 = vmul.f32 %v17848_v43, %v11945_v63  ;;  %v17877_v0 = vrot.slane %v11288_v29, 7 }
 0x36d   : > { %v17878_v2 = vrot.slane %v11286_v11, 7  ;;  %v3850_v31 = vadd.f32 %v3786_v12, %v3718_v7  ;;  %v4041_v48 = vadd.f32 %v3981_v49, %v3917_v60  ;;  %v4042_v1 = vadd.f32 %v3982_v17, %v3918_v27 }
 0x36e   : > { %v17880_v24 = vmov %v17877_v0  ;;  %v4225_v15 = vadd.f32 %v3849_v39, %v3519_v37  ;;  %v3072_v41 = vrot.slane %v11286_v11, 1  ;;  %v3104_v4 = vrot.slane %v11288_v29, 1 }
 0x36f   : > { %v11983_v44 = vsel %vm676_vm2, %v17878_v2, %v17877_v0  ;;  %v17879_v34 = vmov %v17878_v2  ;;  %v3273_v42 = vmul.f32 %v17842_v45, %v11861_v38  ;;  %v4165_v51 = vadd.f32 %v4105_v53, %v4041_v48 }
 0x370   : > { %v2976_v33 = vsel %vm676_vm2, %v17880_v24, %v17879_v34  ;;  %v4166_v47 = vadd.f32 %v4106_v23, %v4042_v1  ;;  %v4226_v32 = vadd.f32 %v3850_v31, %v3520_v50  ;;  %v3274_v61 = vmul.f32 %v17842_v45, %v11851_v16  ;;  %v17882_v31 = vld [vmem:[#allocation14_spill] sm:$0xff] }
 0x371   : > { %v11993_v57 = vsel %vm485_vm0, %v2976_v33, 0.0  ;;  %v12003_v22 = vsel %vm873_vm3, %v3072_v41, %v3104_v4  ;;  %v3168_v54 = vsel %vm873_vm3, %v3104_v4, %v3072_v41  ;;  %v3337_v5 = vmul.f32 %v17835_v52, %v11278_v9 }
 0x372   : > { %v3338_v28 = vmul.f32 %v17835_v52, %v11280_v59  ;;  %v4289_v38 = vadd.f32 %v4225_v15, %v4165_v51  ;;  %v4290_v40 = vadd.f32 %v4226_v32, %v4166_v47  ;;  %v12013_v35 = vsel %vm488_vm1, %v3168_v54, 0.0 }
 0x373   : > { %v3461_v16 = vmul.f32 %v17843_v36, %v11869_v20  ;;  %v3397_v37 = vadd.f32 %v3337_v5, %v3273_v42  ;;  %v3462_v55 = vmul.f32 %v17843_v36, %v11877_v6  ;;  %v3587_v9 = vmul.f32 %v17845_v30, %v11927_v13 }
 0x374   : > { %v3398_v19 = vadd.f32 %v3338_v28, %v3274_v61  ;;  %v4346_v12 = vpack.c.bf16 %v4290_v40, %v4289_v38  ;;  %v3588_v59 = vmul.f32 %v17845_v30, %v11917_v58  ;;  %v3655_v50 = vmul.f32 %v17836_v8, %v11282_v26 }
 0x375   : > { %v3656_v3 = vmul.f32 %v17836_v8, %v11284_v14  ;;  %v3521_v60 = vadd.f32 %v3461_v16, %v3397_v37  ;;  %v3787_v27 = vmul.f32 %v17846_v46, %v11935_v10  ;;  %v3788_v6 = vmul.f32 %v17846_v46, %v11945_v63 }
 0x376   : > { %v3522_v20 = vadd.f32 %v3462_v55, %v3398_v19  ;;  %7794 = vmatmul.mubr.bf16.gmra.mrb[44].mxu1 %v4346_v12  ;;  %v3719_v7 = vadd.f32 %v3655_v50, %v3587_v9  ;;  %v3919_v17 = vmul.f32 %v17847_v62, %v11993_v57  ;;  %v3920_v53 = vmul.f32 %v17847_v62, %v11983_v44 }
 0x377   : > { %v3720_v49 = vadd.f32 %v3656_v3, %v3588_v59  ;;  %v3983_v39 = vmul.f32 %v17837_v21, %v11286_v11  ;;  %v3984_v23 = vmul.f32 %v17837_v21, %v11288_v29  ;;  %v4107_v0 = vmul.f32 %v17848_v43, %v12003_v22 }
 0x378   : > { %v4108_v2 = vmul.f32 %v17848_v43, %v12013_v35  ;;  %v3851_v34 = vadd.f32 %v3787_v27, %v3719_v7  ;;  %v17881_v33 = vrot.slane %v11292_v25, 7  ;;  %v17883_v48 = vrot.slane %v17882_v31, 7 }
 0x379   : > { %v3852_v24 = vadd.f32 %v3788_v6, %v3720_v49  ;;  %v4043_v42 = vadd.f32 %v3983_v39, %v3919_v17  ;;  %v4044_v51 = vadd.f32 %v3984_v23, %v3920_v53  ;;  %v3073_v32 = vrot.slane %v17882_v31, 1 }
 0x37a   : > { %v12049_v1 = vsel %vm676_vm2, %v17883_v48, %v17881_v33  ;;  %v17884_v15 = vmov %v17883_v48  ;;  %v17885_v41 = vmov %v17881_v33  ;;  %v4227_v61 = vadd.f32 %v3851_v34, %v3521_v60  ;;  %v17886_v33 = vld [vmem:[#allocation13_spill] sm:$0xff] }
 0x37b   : > { %v2977_v4 = vsel %vm676_vm2, %v17885_v41, %v17884_v15  ;;  %v4228_v54 = vadd.f32 %v3852_v24, %v3522_v20  ;;  %v3105_v5 = vrot.slane %v11292_v25, 1  ;;  %v3275_v28 = vmul.f32 %v17842_v45, %v11927_v13  ;;  %v17888_v15 = vld [vmem:[#allocation15_spill] sm:$0xff] }
 0x37c   : > { %v12059_v47 = vsel %vm485_vm0, %v2977_v4, 0.0  ;;  %v4167_v38 = vadd.f32 %v4107_v0, %v4043_v42  ;;  %v4168_v40 = vadd.f32 %v4108_v2, %v4044_v51  ;;  %v3276_v16 = vmul.f32 %v17842_v45, %v11917_v58 }
 0x37d   : > { %v3339_v37 = vmul.f32 %v17835_v52, %v11282_v26  ;;  %v12071_v19 = vsel %vm873_vm3, %v3073_v32, %v3105_v5  ;;  %v3169_v55 = vsel %vm873_vm3, %v3105_v5, %v3073_v32  ;;  %v3340_v9 = vmul.f32 %v17835_v52, %v11284_v14 }
 0x37e   : > { %v3463_v13 = vmul.f32 %v17843_v36, %v11935_v10  ;;  %v4291_v12 = vadd.f32 %v4227_v61, %v4167_v38  ;;  %v4292_v59 = vadd.f32 %v4228_v54, %v4168_v40  ;;  %v12081_v58 = vsel %vm488_vm1, %v3169_v55, 0.0 }
 0x37f   : > { %v3399_v26 = vadd.f32 %v3339_v37, %v3275_v28  ;;  %v3400_v50 = vadd.f32 %v3340_v9, %v3276_v16  ;;  %v3464_v3 = vmul.f32 %v17843_v36, %v11945_v63  ;;  %v3589_v60 = vmul.f32 %v17845_v30, %v11993_v57 }
 0x380   : > { %v3590_v14 = vmul.f32 %v17845_v30, %v11983_v44  ;;  %v4347_v20 = vpack.c.bf16 %v4292_v59, %v4291_v12  ;;  %v3657_v10 = vmul.f32 %v17836_v8, %v11286_v11  ;;  %v3658_v6 = vmul.f32 %v17836_v8, %v11288_v29 }
 0x381   : > { %v3523_v27 = vadd.f32 %v3463_v13, %v3399_v26  ;;  %v3524_v7 = vadd.f32 %v3464_v3, %v3400_v50  ;;  %v3789_v49 = vmul.f32 %v17846_v46, %v12003_v22  ;;  %v3790_v63 = vmul.f32 %v17846_v46, %v12013_v35 }
 0x382   : > { %v3921_v17 = vmul.f32 %v17847_v62, %v12059_v47  ;;  %7797 = vmatprep.mubr.bf16.mxu1 %v4347_v20  ;;  %v3721_v53 = vadd.f32 %v3657_v10, %v3589_v60  ;;  %v3722_v39 = vadd.f32 %v3658_v6, %v3590_v14  ;;  %v3922_v23 = vmul.f32 %v17847_v62, %v12049_v1 }
 0x383   : > { %v3985_v0 = vmul.f32 %v17837_v21, %v17882_v31  ;;  %v3986_v2 = vmul.f32 %v17837_v21, %v11292_v25  ;;  %v4109_v34 = vmul.f32 %v17848_v43, %v12071_v19  ;;  %v4110_v24 = vmul.f32 %v17848_v43, %v12081_v58 }
 0x384   : > { %v17887_v48 = vrot.slane %v17886_v33, 7  ;;  %v17889_v41 = vrot.slane %v17888_v15, 7  ;;  %v3853_v42 = vadd.f32 %v3789_v49, %v3721_v53  ;;  %v3854_v51 = vadd.f32 %v3790_v63, %v3722_v39 }
 0x385   : > { %v4045_v32 = vadd.f32 %v3985_v0, %v3921_v17  ;;  %v4046_v28 = vadd.f32 %v3986_v2, %v3922_v23  ;;  %v3074_v40 = vrot.slane %v17888_v15, 1  ;;  %v3106_v16 = vrot.slane %v17886_v33, 1 }
 0x386   : > { %v12115_v4 = vsel %vm676_vm2, %v17889_v41, %v17887_v48  ;;  %v17890_v61 = vmov %v17889_v41  ;;  %v17891_v54 = vmov %v17887_v48  ;;  %v4229_v55 = vadd.f32 %v3853_v42, %v3523_v27 }
 0x387   : > { %v2978_v5 = vsel %vm676_vm2, %v17891_v54, %v17890_v61  ;;  %v4169_v37 = vadd.f32 %v4109_v34, %v4045_v32  ;;  %v4230_v9 = vadd.f32 %v3854_v51, %v3524_v7  ;;  %v3277_v13 = vmul.f32 %v17842_v45, %v11993_v57  ;;  %v17892_v51 = vld [vmem:[#allocation18_spill] sm:$0xff]  ;;  %v17894_v61 = vld [vmem:[#allocation19_spill] sm:$0xff] }
 0x388   : > { %v12125_v38 = vsel %vm485_vm0, %v2978_v5, 0.0  ;;  %v4170_v12 = vadd.f32 %v4110_v24, %v4046_v28  ;;  %v12133_v59 = vsel %vm873_vm3, %v3074_v40, %v3106_v16  ;;  %v3170_v26 = vsel %vm873_vm3, %v3106_v16, %v3074_v40 }
 0x389   : > { %v3278_v50 = vmul.f32 %v17842_v45, %v11983_v44  ;;  %v4293_v3 = vadd.f32 %v4229_v55, %v4169_v37  ;;  %v12141_v60 = vsel %vm488_vm1, %v3170_v26, 0.0  ;;  %v3341_v14 = vmul.f32 %v17835_v52, %v11286_v11 }
 0x38a   : > { %v3342_v57 = vmul.f32 %v17835_v52, %v11288_v29  ;;  %v4294_v20 = vadd.f32 %v4230_v9, %v4170_v12  ;;  %v3465_v27 = vmul.f32 %v17843_v36, %v12003_v22  ;;  %v3466_v10 = vmul.f32 %v17843_v36, %v12013_v35 }
 0x38b   : > { %v3591_v44 = vmul.f32 %v17845_v30, %v12059_v47  ;;  %v3401_v6 = vadd.f32 %v3341_v14, %v3277_v13  ;;  %v3592_v49 = vmul.f32 %v17845_v30, %v12049_v1  ;;  %v3659_v11 = vmul.f32 %v17836_v8, %v17882_v31 }
 0x38c   : > { %v3402_v7 = vadd.f32 %v3342_v57, %v3278_v50  ;;  %v4348_v63 = vpack.c.bf16 %v4294_v20, %v4293_v3  ;;  %v3660_v29 = vmul.f32 %v17836_v8, %v11292_v25  ;;  %v3791_v22 = vmul.f32 %v17846_v46, %v12071_v19 }
 0x38d   : > { %v3792_v35 = vmul.f32 %v17846_v46, %v12081_v58  ;;  %v3525_v17 = vadd.f32 %v3465_v27, %v3401_v6  ;;  %v3723_v39 = vadd.f32 %v3659_v11, %v3591_v44  ;;  %v3923_v23 = vmul.f32 %v17847_v62, %v12125_v38 }
 0x38e   : > { %v3526_v53 = vadd.f32 %v3466_v10, %v3402_v7  ;;  %7798 = vmatmul.mubr.bf16.gmra.mrb[48].mxu1 %v4348_v63  ;;  %v3724_v0 = vadd.f32 %v3660_v29, %v3592_v49  ;;  %v3924_v2 = vmul.f32 %v17847_v62, %v12115_v4  ;;  %v3987_v34 = vmul.f32 %v17837_v21, %v17888_v15 }
 0x38f   : > { %v3988_v24 = vmul.f32 %v17837_v21, %v17886_v33  ;;  %v3855_v48 = vadd.f32 %v3791_v22, %v3723_v39  ;;  %v4111_v41 = vmul.f32 %v17848_v43, %v12133_v59  ;;  %v4112_v42 = vmul.f32 %v17848_v43, %v12141_v60 }
 0x390   : > { %v17893_v32 = vrot.slane %v17892_v51, 7  ;;  %v17895_v54 = vrot.slane %v17894_v61, 7  ;;  %v3856_v28 = vadd.f32 %v3792_v35, %v3724_v0  ;;  %v4047_v40 = vadd.f32 %v3987_v34, %v3923_v23 }
 0x391   : > { %v4048_v16 = vadd.f32 %v3988_v24, %v3924_v2  ;;  %v4231_v13 = vadd.f32 %v3855_v48, %v3525_v17  ;;  %v3075_v26 = vrot.slane %v17894_v61, 1  ;;  %v3107_v50 = vrot.slane %v17892_v51, 1 }
 0x392   : > { %v12181_v5 = vsel %vm676_vm2, %v17895_v54, %v17893_v32  ;;  %v17896_v37 = vmov %v17895_v54  ;;  %v17897_v55 = vmov %v17893_v32  ;;  %v4171_v3 = vadd.f32 %v4111_v41, %v4047_v40 }
 0x393   : > { %v2979_v9 = vsel %vm676_vm2, %v17897_v55, %v17896_v37  ;;  %v4172_v14 = vadd.f32 %v4112_v42, %v4048_v16  ;;  %v4232_v57 = vadd.f32 %v3856_v28, %v3526_v53  ;;  %v3279_v20 = vmul.f32 %v17842_v45, %v12059_v47  ;;  %v17898_v28 = vld [vmem:[#allocation16_spill] sm:$0xff]  ;;  %v17900_v16 = vld [vmem:[#allocation17_spill] sm:$0xff] }
 0x394   : > { %v12191_v12 = vsel %vm485_vm0, %v2979_v9, 0.0  ;;  %v12199_v27 = vsel %vm873_vm3, %v3075_v26, %v3107_v50  ;;  %v3171_v10 = vsel %vm873_vm3, %v3107_v50, %v3075_v26  ;;  %v3280_v44 = vmul.f32 %v17842_v45, %v12049_v1 }
 0x395   : > { %v3343_v6 = vmul.f32 %v17835_v52, %v17882_v31  ;;  %v4295_v7 = vadd.f32 %v4231_v13, %v4171_v3  ;;  %v4296_v49 = vadd.f32 %v4232_v57, %v4172_v14  ;;  %v12209_v11 = vsel %vm488_vm1, %v3171_v10, 0.0 }
 0x396   : > { %v3344_v47 = vmul.f32 %v17835_v52, %v11292_v25  ;;  %v3467_v29 = vmul.f32 %v17843_v36, %v12071_v19  ;;  %v3468_v22 = vmul.f32 %v17843_v36, %v12081_v58  ;;  %v3593_v1 = vmul.f32 %v17845_v30, %v12125_v38 }
 0x397   : > { %v3403_v63 = vadd.f32 %v3343_v6, %v3279_v20  ;;  %v4349_v31 = vpack.c.bf16 %v4296_v49, %v4295_v7  ;;  %v3594_v17 = vmul.f32 %v17845_v30, %v12115_v4  ;;  %v3661_v53 = vmul.f32 %v17836_v8, %v17888_v15 }
 0x398   : > { %v3404_v35 = vadd.f32 %v3344_v47, %v3280_v44  ;;  %v3662_v25 = vmul.f32 %v17836_v8, %v17886_v33  ;;  %v3793_v19 = vmul.f32 %v17846_v46, %v12133_v59  ;;  %v3794_v58 = vmul.f32 %v17846_v46, %v12141_v60 }
 0x399   : > { %v3527_v39 = vadd.f32 %v3467_v29, %v3403_v63  ;;  %7801 = vmatprep.mubr.bf16.mxu1 %v4349_v31  ;;  %v3725_v0 = vadd.f32 %v3661_v53, %v3593_v1  ;;  %v3925_v2 = vmul.f32 %v17847_v62, %v12191_v12  ;;  %v3926_v34 = vmul.f32 %v17847_v62, %v12181_v5 }
 0x39a   : > { %v3528_v23 = vadd.f32 %v3468_v22, %v3404_v35  ;;  %v3726_v24 = vadd.f32 %v3662_v25, %v3594_v17  ;;  %v3989_v48 = vmul.f32 %v17837_v21, %v17894_v61  ;;  %v3990_v41 = vmul.f32 %v17837_v21, %v17892_v51 }
 0x39b   : > { %v4113_v42 = vmul.f32 %v17848_v43, %v12199_v27  ;;  %v3857_v32 = vadd.f32 %v3793_v19, %v3725_v0  ;;  %v4114_v54 = vmul.f32 %v17848_v43, %v12209_v11  ;;  %v17899_v40 = vrot.slane %v17898_v28, 7 }
 0x39c   : > { %v17901_v37 = vrot.slane %v17900_v16, 7  ;;  %v3858_v50 = vadd.f32 %v3794_v58, %v3726_v24  ;;  %v4049_v3 = vadd.f32 %v3989_v48, %v3925_v2  ;;  %v4050_v14 = vadd.f32 %v3990_v41, %v3926_v34 }
 0x39d   : > { %v17903_v13 = vmov %v17899_v40  ;;  %v4233_v20 = vadd.f32 %v3857_v32, %v3527_v39  ;;  %v3076_v10 = vrot.slane %v17900_v16, 1  ;;  %v3108_v44 = vrot.slane %v17898_v28, 1 }
 0x39e   : > { %v12247_v55 = vsel %vm676_vm2, %v17901_v37, %v17899_v40  ;;  %v17902_v9 = vmov %v17901_v37  ;;  %v3281_v6 = vmul.f32 %v17842_v45, %v12125_v38  ;;  %v4173_v7 = vadd.f32 %v4113_v42, %v4049_v3 }
 0x39f   : > { %v2980_v26 = vsel %vm676_vm2, %v17903_v13, %v17902_v9  ;;  %v4174_v49 = vadd.f32 %v4114_v54, %v4050_v14  ;;  %v4234_v47 = vadd.f32 %v3858_v50, %v3528_v23  ;;  %v3282_v63 = vmul.f32 %v17842_v45, %v12115_v4  ;;  %v17904_v13 = vld [vmem:[#allocation23_spill] sm:$0xff]  ;;  %v17906_v50 = vld [vmem:[#allocation21_spill] sm:$0xff] }
 0x3a0   : > { %v12257_v57 = vsel %vm485_vm0, %v2980_v26, 0.0  ;;  %v12267_v29 = vsel %vm873_vm3, %v3076_v10, %v3108_v44  ;;  %v3172_v22 = vsel %vm873_vm3, %v3108_v44, %v3076_v10  ;;  %v3345_v1 = vmul.f32 %v17835_v52, %v17888_v15 }
 0x3a1   : > { %v3346_v31 = vmul.f32 %v17835_v52, %v17886_v33  ;;  %v4297_v38 = vadd.f32 %v4233_v20, %v4173_v7  ;;  %v4298_v35 = vadd.f32 %v4234_v47, %v4174_v49  ;;  %v12277_v17 = vsel %vm488_vm1, %v3172_v22, 0.0 }
 0x3a2   : > { %v3469_v4 = vmul.f32 %v17843_v36, %v12133_v59  ;;  %v3405_v53 = vadd.f32 %v3345_v1, %v3281_v6  ;;  %v3470_v25 = vmul.f32 %v17843_v36, %v12141_v60  ;;  %v3595_v15 = vmul.f32 %v17845_v30, %v12191_v12 }
 0x3a3   : > { %v3406_v39 = vadd.f32 %v3346_v31, %v3282_v63  ;;  %v4350_v19 = vpack.c.bf16 %v4298_v35, %v4297_v38  ;;  %v3596_v33 = vmul.f32 %v17845_v30, %v12181_v5  ;;  %v3663_v58 = vmul.f32 %v17836_v8, %v17894_v61 }
 0x3a4   : > { %v3664_v23 = vmul.f32 %v17836_v8, %v17892_v51  ;;  %v3529_v0 = vadd.f32 %v3469_v4, %v3405_v53  ;;  %v3795_v2 = vmul.f32 %v17846_v46, %v12199_v27  ;;  %v3796_v60 = vmul.f32 %v17846_v46, %v12209_v11 }
 0x3a5   : > { %v3530_v59 = vadd.f32 %v3470_v25, %v3406_v39  ;;  %7802 = vmatmul.mubr.bf16.gmra.mrb[52].mxu1 %v4350_v19  ;;  %v3727_v34 = vadd.f32 %v3663_v58, %v3595_v15  ;;  %v3927_v48 = vmul.f32 %v17847_v62, %v12257_v57  ;;  %v3928_v41 = vmul.f32 %v17847_v62, %v12247_v55 }
 0x3a6   : > { %v3728_v24 = vadd.f32 %v3664_v23, %v3596_v33  ;;  %v3991_v42 = vmul.f32 %v17837_v21, %v17900_v16  ;;  %v3992_v32 = vmul.f32 %v17837_v21, %v17898_v28  ;;  %v4115_v54 = vmul.f32 %v17848_v43, %v12267_v29 }
 0x3a7   : > { %v4116_v40 = vmul.f32 %v17848_v43, %v12277_v17  ;;  %v3859_v37 = vadd.f32 %v3795_v2, %v3727_v34  ;;  %v17905_v26 = vrot.slane %v17904_v13, 7  ;;  %v17907_v3 = vrot.slane %v17906_v50, 7 }
 0x3a8   : > { %v3860_v9 = vadd.f32 %v3796_v60, %v3728_v24  ;;  %v4051_v6 = vadd.f32 %v3991_v42, %v3927_v48  ;;  %v4052_v7 = vadd.f32 %v3992_v32, %v3928_v41  ;;  %v3077_v47 = vrot.slane %v17906_v50, 1 }
 0x3a9   : > { %v12313_v14 = vsel %vm676_vm2, %v17907_v3, %v17905_v26  ;;  %v17908_v20 = vmov %v17907_v3  ;;  %v17909_v10 = vmov %v17905_v26  ;;  %v4235_v63 = vadd.f32 %v3859_v37, %v3529_v0  ;;  %v17910_v26 = vld [vmem:[#allocation22_spill] sm:$0xff] }
 0x3aa   : > { %v2981_v44 = vsel %vm676_vm2, %v17909_v10, %v17908_v20  ;;  %v4236_v22 = vadd.f32 %v3860_v9, %v3530_v59  ;;  %v3109_v1 = vrot.slane %v17904_v13, 1  ;;  %v3283_v31 = vmul.f32 %v17842_v45, %v12191_v12  ;;  %v17912_v20 = vld [vmem:[#allocation20_spill] sm:$0xff] }
 0x3ab   : > { %v12323_v49 = vsel %vm485_vm0, %v2981_v44, 0.0  ;;  %v4175_v38 = vadd.f32 %v4115_v54, %v4051_v6  ;;  %v4176_v35 = vadd.f32 %v4116_v40, %v4052_v7  ;;  %v3284_v4 = vmul.f32 %v17842_v45, %v12181_v5 }
 0x3ac   : > { %v3347_v53 = vmul.f32 %v17835_v52, %v17894_v61  ;;  %v12335_v39 = vsel %vm873_vm3, %v3077_v47, %v3109_v1  ;;  %v3173_v25 = vsel %vm873_vm3, %v3109_v1, %v3077_v47  ;;  %v3348_v15 = vmul.f32 %v17835_v52, %v17892_v51 }
 0x3ad   : > { %v3471_v12 = vmul.f32 %v17843_v36, %v12199_v27  ;;  %v4299_v19 = vadd.f32 %v4235_v63, %v4175_v38  ;;  %v4300_v33 = vadd.f32 %v4236_v22, %v4176_v35  ;;  %v12345_v5 = vsel %vm488_vm1, %v3173_v25, 0.0 }
 0x3ae   : > { %v3407_v61 = vadd.f32 %v3347_v53, %v3283_v31  ;;  %v3408_v58 = vadd.f32 %v3348_v15, %v3284_v4  ;;  %v3472_v23 = vmul.f32 %v17843_v36, %v12209_v11  ;;  %v3597_v0 = vmul.f32 %v17845_v30, %v12257_v57 }
 0x3af   : > { %v3598_v51 = vmul.f32 %v17845_v30, %v12247_v55  ;;  %v4351_v59 = vpack.c.bf16 %v4300_v33, %v4299_v19  ;;  %v3665_v27 = vmul.f32 %v17836_v8, %v17900_v16  ;;  %v3666_v60 = vmul.f32 %v17836_v8, %v17898_v28 }
 0x3b0   : > { %v3531_v2 = vadd.f32 %v3471_v12, %v3407_v61  ;;  %v3532_v34 = vadd.f32 %v3472_v23, %v3408_v58  ;;  %v3797_v24 = vmul.f32 %v17846_v46, %v12267_v29  ;;  %v3798_v11 = vmul.f32 %v17846_v46, %v12277_v17 }
 0x3b1   : > { %v3929_v48 = vmul.f32 %v17847_v62, %v12323_v49  ;;  %7805 = vmatprep.mubr.bf16.mxu1 %v4351_v59  ;;  %v3729_v41 = vadd.f32 %v3665_v27, %v3597_v0  ;;  %v3730_v42 = vadd.f32 %v3666_v60, %v3598_v51  ;;  %v3930_v32 = vmul.f32 %v17847_v62, %v12313_v14 }
 0x3b2   : > { %v3993_v54 = vmul.f32 %v17837_v21, %v17906_v50  ;;  %v3994_v40 = vmul.f32 %v17837_v21, %v17904_v13  ;;  %v4117_v37 = vmul.f32 %v17848_v43, %v12335_v39  ;;  %v4118_v9 = vmul.f32 %v17848_v43, %v12345_v5 }
 0x3b3   : > { %v17911_v3 = vrot.slane %v17910_v26, 7  ;;  %v17913_v10 = vrot.slane %v17912_v20, 7  ;;  %v3861_v6 = vadd.f32 %v3797_v24, %v3729_v41  ;;  %v3862_v7 = vadd.f32 %v3798_v11, %v3730_v42 }
 0x3b4   : > { %v4053_v47 = vadd.f32 %v3993_v54, %v3929_v48  ;;  %v4054_v31 = vadd.f32 %v3994_v40, %v3930_v32  ;;  %v17916_v35 = vrot.slane %v17910_v26, 1  ;;  %v17917_v4 = vrot.slane %v17912_v20, 1 }
 0x3b5   : > { %v2950_v44 = vsel %vm676_vm2, %v17913_v10, %v17911_v3  ;;  %v17914_v63 = vmov %v17913_v10  ;;  %v17915_v22 = vmov %v17911_v3  ;;  %v4237_v33 = vadd.f32 %v3861_v6, %v3531_v2 }
 0x3b6   : > { %v2982_v1 = vsel %vm676_vm2, %v17915_v22, %v17914_v63  ;;  %v3142_v53 = vsel %vm873_vm3, %v17917_v4, %v17916_v35  ;;  %v17918_v25 = vmov %v17917_v4  ;;  %v17919_v15 = vmov %v17916_v35 }
 0x3b7   : > { %v3029_v38 = vsel %vm485_vm0, %v2982_v1, 0.0  ;;  %v3174_v12 = vsel %vm873_vm3, %v17919_v15, %v17918_v25  ;;  %v4177_v19 = vadd.f32 %v4117_v37, %v4053_v47  ;;  %v4238_v61 = vadd.f32 %v3862_v7, %v3532_v34 }
 0x3b8   : > { %v3222_v58 = vsel %vm488_vm1, %v3174_v12, 0.0  ;;  %v4178_v23 = vadd.f32 %v4118_v9, %v4054_v31  ;;  %v3285_v0 = vmul.f32 %v17842_v45, %v12257_v57  ;;  %v3286_v51 = vmul.f32 %v17842_v45, %v12247_v55 }
 0x3b9   : > { %v3349_v59 = vmul.f32 %v17835_v52, %v17900_v16  ;;  %v4301_v27 = vadd.f32 %v4237_v33, %v4177_v19  ;;  %v3350_v60 = vmul.f32 %v17835_v52, %v17898_v28  ;;  %v3473_v2 = vmul.f32 %v17843_v36, %v12267_v29 }
 0x3ba   : > { %v3474_v34 = vmul.f32 %v17843_v36, %v12277_v17  ;;  %v4302_v24 = vadd.f32 %v4238_v61, %v4178_v23  ;;  %v3599_v57 = vmul.f32 %v17845_v30, %v12323_v49  ;;  %v3600_v55 = vmul.f32 %v17845_v30, %v12313_v14 }
 0x3bb   : > { %v3409_v11 = vadd.f32 %v3349_v59, %v3285_v0  ;;  %v3410_v48 = vadd.f32 %v3350_v60, %v3286_v51  ;;  %v3667_v16 = vmul.f32 %v17836_v8, %v17906_v50  ;;  %v3668_v28 = vmul.f32 %v17836_v8, %v17904_v13 }
 0x3bc   : > { %v3799_v29 = vmul.f32 %v17846_v46, %v12335_v39  ;;  %v4352_v41 = vpack.c.bf16 %v4302_v24, %v4301_v27  ;;  %v3800_v42 = vmul.f32 %v17846_v46, %v12345_v5  ;;  %v3931_v32 = vmul.f32 %v17847_v62, %v3029_v38 }
 0x3bd   : > { %v3533_v17 = vadd.f32 %v3473_v2, %v3409_v11  ;;  %v3534_v54 = vadd.f32 %v3474_v34, %v3410_v48  ;;  %v3731_v40 = vadd.f32 %v3667_v16, %v3599_v57  ;;  %v3732_v37 = vadd.f32 %v3668_v28, %v3600_v55  ;;  %v17924_v48 = vld [vmem:[#allocation46_spill] sm:$0xff]  ;;  %v17926_v16 = vld [vmem:[#allocation45_spill] sm:$0xff] }
 0x3be   : > { %v3932_v9 = vmul.f32 %v17847_v62, %v2950_v44  ;;  %7806 = vmatmul.mubr.bf16.gmra.mrb[56].mxu1 %v4352_v41  ;;  %v3995_v3 = vmul.f32 %v17837_v21, %v17912_v20  ;;  %v3996_v10 = vmul.f32 %v17837_v21, %v17910_v26  ;;  %v4119_v6 = vmul.f32 %v17848_v43, %v3142_v53 }
 0x3bf   : > { %v4120_v7 = vmul.f32 %v17848_v43, %v3222_v58  ;;  %v3863_v47 = vadd.f32 %v3799_v29, %v3731_v40  ;;  %v3864_v63 = vadd.f32 %v3800_v42, %v3732_v37  ;;  %v3287_v22 = vmul.f32 %v17842_v45, %v12323_v49 }
 0x3c0   : > { %v3288_v1 = vmul.f32 %v17842_v45, %v12313_v14  ;;  %v4055_v31 = vadd.f32 %v3995_v3, %v3931_v32  ;;  %v4056_v35 = vadd.f32 %v3996_v10, %v3932_v9  ;;  %v3351_v4 = vmul.f32 %v17835_v52, %v17906_v50 }
 0x3c1   : > { %v3352_v25 = vmul.f32 %v17835_v52, %v17904_v13  ;;  %v4239_v15 = vadd.f32 %v3863_v47, %v3533_v17  ;;  %v4240_v12 = vadd.f32 %v3864_v63, %v3534_v54  ;;  %v3475_v19 = vmul.f32 %v17843_v36, %v12335_v39 }
 0x3c2   : > { %v3476_v33 = vmul.f32 %v17843_v36, %v12345_v5  ;;  %v4179_v49 = vadd.f32 %v4119_v6, %v4055_v31  ;;  %v4180_v61 = vadd.f32 %v4120_v7, %v4056_v35  ;;  %v3411_v23 = vadd.f32 %v3351_v4, %v3287_v22 }
 0x3c3   : > { %v3412_v14 = vadd.f32 %v3352_v25, %v3288_v1  ;;  %v3601_v0 = vmul.f32 %v17845_v30, %v3029_v38  ;;  %v3602_v51 = vmul.f32 %v17845_v30, %v2950_v44  ;;  %v3669_v50 = vmul.f32 %v17836_v8, %v17912_v20  ;;  %v17920_v38 = vld [vmem:[#allocation27_spill] sm:$0xff]  ;;  %v17922_v44 = vld [vmem:[#allocation25_spill] sm:$0xff] }
 0x3c4   : > { %v3670_v13 = vmul.f32 %v17836_v8, %v17910_v26  ;;  %v4303_v59 = vadd.f32 %v4239_v15, %v4179_v49  ;;  %v4304_v27 = vadd.f32 %v4240_v12, %v4180_v61  ;;  %v3535_v39 = vadd.f32 %v3475_v19, %v3411_v23 }
 0x3c5   : > { %v3536_v60 = vadd.f32 %v3476_v33, %v3412_v14  ;;  %v3733_v2 = vadd.f32 %v3669_v50, %v3601_v0  ;;  %v3801_v34 = vmul.f32 %v17846_v46, %v3142_v53  ;;  %v3802_v24 = vmul.f32 %v17846_v46, %v3222_v58 }
 0x3c6   : > { %v3734_v5 = vadd.f32 %v3670_v13, %v3602_v51  ;;  %v4353_v11 = vpack.c.bf16 %v4304_v27, %v4303_v59  ;;  %v17921_v57 = vrot.slane %v17920_v38, 7  ;;  %v17923_v55 = vrot.slane %v17922_v44, 7 }
 0x3c7   : > { %v17925_v26 = vrot.slane %v17924_v48, 7  ;;  %v17927_v28 = vrot.slane %v17926_v16, 7  ;;  %v3865_v17 = vadd.f32 %v3801_v34, %v3733_v2  ;;  %v3080_v3 = vrot.slane %v17926_v16, 1 }
 0x3c8   : > { %v2951_v20 = vsel %vm676_vm2, %v17923_v55, %v17921_v57  ;;  %v17928_v53 = vmov %v17923_v55  ;;  %v17929_v58 = vmov %v17921_v57  ;;  %v3866_v42 = vadd.f32 %v3802_v24, %v3734_v5  ;;  %7809 = vmatprep.mubr.bf16.mxu1 %v4353_v11  ;;  %v17936_v5 = vld [vmem:[#allocation48_spill] sm:$0xff]  ;;  %v17938_v24 = vld [vmem:[#allocation47_spill] sm:$0xff] }
 0x3c9   : > { %v12465_v29 = vsel %vm676_vm2, %v17927_v28, %v17925_v26  ;;  %v2983_v41 = vsel %vm676_vm2, %v17929_v58, %v17928_v53  ;;  %v17930_v32 = vmov %v17927_v28  ;;  %v17931_v54 = vmov %v17925_v26 }
 0x3ca   : > { %v2984_v40 = vsel %vm676_vm2, %v17931_v54, %v17930_v32  ;;  %v3031_v37 = vsel %vm485_vm0, %v2983_v41, 0.0  ;;  %v3112_v10 = vrot.slane %v17924_v48, 1  ;;  %v17932_v6 = vrot.slane %v17920_v38, 1 }
 0x3cb   : > { %v12483_v9 = vsel %vm485_vm0, %v2984_v40, 0.0  ;;  %v17933_v7 = vrot.slane %v17922_v44, 1  ;;  %v4241_v63 = vadd.f32 %v3865_v17, %v3535_v39  ;;  %v4242_v22 = vadd.f32 %v3866_v42, %v3536_v60 }
 0x3cc   : > { %v17935_v31 = vmov %v17932_v6  ;;  %v3603_v4 = vmul.f32 %v17845_v30, %v3031_v37  ;;  %v12502_v25 = vsel %vm873_vm3, %v3080_v3, %v3112_v10  ;;  %v3176_v15 = vsel %vm873_vm3, %v3112_v10, %v3080_v3 }
 0x3cd   : > { %v3143_v47 = vsel %vm873_vm3, %v17933_v7, %v17932_v6  ;;  %v17934_v1 = vmov %v17933_v7  ;;  %v3604_v19 = vmul.f32 %v17845_v30, %v2951_v20  ;;  %v4354_v33 = vpack.c.bf16 %v4242_v22, %v4241_v63 }
 0x3ce   : > { %v3175_v35 = vsel %vm873_vm3, %v17935_v31, %v17934_v1  ;;  %v12511_v49 = vsel %vm488_vm1, %v3176_v15, 0.0  ;;  %v3671_v61 = vmul.f32 %v17836_v8, %v17922_v44  ;;  %v3672_v23 = vmul.f32 %v17836_v8, %v17920_v38 }
 0x3cf   : > { %v3224_v12 = vsel %vm488_vm1, %v3175_v35, 0.0  ;;  %v3803_v14 = vmul.f32 %v17846_v46, %v3143_v47  ;;  %v3933_v51 = vmul.f32 %v17847_v62, %v12483_v9  ;;  %v3934_v50 = vmul.f32 %v17847_v62, %v12465_v29  ;;  %7810 = vmatmul.mubr.bf16.gmra.mrb[60].mxu1 %v4354_v33 }
 0x3d0   : > { %v3804_v0 = vmul.f32 %v17846_v46, %v3224_v12  ;;  %v3735_v13 = vadd.f32 %v3671_v61, %v3603_v4  ;;  %v3736_v59 = vadd.f32 %v3672_v23, %v3604_v19  ;;  %v3997_v27 = vmul.f32 %v17837_v21, %v17926_v16 }
 0x3d1   : > { %v3998_v39 = vmul.f32 %v17837_v21, %v17924_v48  ;;  %v4121_v60 = vmul.f32 %v17848_v43, %v12502_v25  ;;  %v4122_v2 = vmul.f32 %v17848_v43, %v12511_v49  ;;  %v17937_v34 = vrot.slane %v17936_v5, 7 }
 0x3d2   : > { %v17939_v11 = vrot.slane %v17938_v24, 7  ;;  %v3867_v53 = vadd.f32 %v3803_v14, %v3735_v13  ;;  %v3868_v58 = vadd.f32 %v3804_v0, %v3736_v59  ;;  %v4057_v41 = vadd.f32 %v3997_v27, %v3933_v51 }
 0x3d3   : > { %v17941_v26 = vmov %v17937_v34  ;;  %v4058_v17 = vadd.f32 %v3998_v39, %v3934_v50  ;;  %v3081_v32 = vrot.slane %v17938_v24, 1  ;;  %v3113_v54 = vrot.slane %v17936_v5, 1 }
 0x3d4   : > { %v12537_v57 = vsel %vm676_vm2, %v17939_v11, %v17937_v34  ;;  %v17940_v55 = vmov %v17939_v11  ;;  %v3289_v40 = vmul.f32 %v17842_v45, %v3031_v37  ;;  %v4181_v3 = vadd.f32 %v4121_v60, %v4057_v41  ;;  %v17942_v34 = vld [vmem:[#allocation50_spill] sm:$0xff] }
 0x3d5   : > { %v2985_v28 = vsel %vm676_vm2, %v17941_v26, %v17940_v55  ;;  %v4182_v10 = vadd.f32 %v4122_v2, %v4058_v17  ;;  %v3290_v6 = vmul.f32 %v17842_v45, %v2951_v20  ;;  %v3353_v7 = vmul.f32 %v17835_v52, %v17922_v44  ;;  %v17944_v55 = vld [vmem:[#allocation49_spill] sm:$0xff] }
 0x3d6   : > { %v12547_v42 = vsel %vm485_vm0, %v2985_v28, 0.0  ;;  %v12557_v63 = vsel %vm873_vm3, %v3081_v32, %v3113_v54  ;;  %v3177_v22 = vsel %vm873_vm3, %v3113_v54, %v3081_v32  ;;  %v3354_v1 = vmul.f32 %v17835_v52, %v17920_v38 }
 0x3d7   : > { %v3477_v31 = vmul.f32 %v17843_v36, %v3143_v47  ;;  %v4307_v37 = vadd.f32 %v4181_v3, %v3867_v53  ;;  %v4308_v35 = vadd.f32 %v4182_v10, %v3868_v58  ;;  %v12566_v20 = vsel %vm488_vm1, %v3177_v22, 0.0 }
 0x3d8   : > { %v3413_v4 = vadd.f32 %v3353_v7, %v3289_v40  ;;  %v3414_v44 = vadd.f32 %v3354_v1, %v3290_v6  ;;  %v3478_v15 = vmul.f32 %v17843_v36, %v3224_v12  ;;  %v3605_v19 = vmul.f32 %v17845_v30, %v12483_v9 }
 0x3d9   : > { %v3606_v33 = vmul.f32 %v17845_v30, %v12465_v29  ;;  %v4355_v61 = vpack.c.bf16 %v4308_v35, %v4307_v37  ;;  %v3673_v47 = vmul.f32 %v17836_v8, %v17926_v16  ;;  %v3674_v23 = vmul.f32 %v17836_v8, %v17924_v48 }
 0x3da   : > { %v3537_v38 = vadd.f32 %v3477_v31, %v3413_v4  ;;  %v3538_v14 = vadd.f32 %v3478_v15, %v3414_v44  ;;  %v3805_v0 = vmul.f32 %v17846_v46, %v12502_v25  ;;  %v3806_v12 = vmul.f32 %v17846_v46, %v12511_v49 }
 0x3db   : > { %v3935_v51 = vmul.f32 %v17847_v62, %v12547_v42  ;;  %7813 = vmatprep.mubr.bf16.mxu1 %v4355_v61  ;;  %v3737_v50 = vadd.f32 %v3673_v47, %v3605_v19  ;;  %v3738_v13 = vadd.f32 %v3674_v23, %v3606_v33  ;;  %v3936_v59 = vmul.f32 %v17847_v62, %v12537_v57 }
 0x3dc   : > { %v3999_v27 = vmul.f32 %v17837_v21, %v17938_v24  ;;  %v4000_v39 = vmul.f32 %v17837_v21, %v17936_v5  ;;  %v4123_v60 = vmul.f32 %v17848_v43, %v12557_v63  ;;  %v4124_v2 = vmul.f32 %v17848_v43, %v12566_v20 }
 0x3dd   : > { %v17943_v11 = vrot.slane %v17942_v34, 7  ;;  %v17945_v26 = vrot.slane %v17944_v55, 7  ;;  %v3869_v53 = vadd.f32 %v3805_v0, %v3737_v50  ;;  %v3870_v58 = vadd.f32 %v3806_v12, %v3738_v13 }
 0x3de   : > { %v4059_v41 = vadd.f32 %v3999_v27, %v3935_v51  ;;  %v4060_v40 = vadd.f32 %v4000_v39, %v3936_v59  ;;  %v3082_v10 = vrot.slane %v17944_v55, 1  ;;  %v3114_v6 = vrot.slane %v17942_v34, 1 }
 0x3df   : > { %v12599_v28 = vsel %vm676_vm2, %v17945_v26, %v17943_v11  ;;  %v17946_v17 = vmov %v17945_v26  ;;  %v17947_v32 = vmov %v17943_v11  ;;  %v4245_v22 = vadd.f32 %v3869_v53, %v3537_v38 }
 0x3e0   : > { %v2986_v54 = vsel %vm676_vm2, %v17947_v32, %v17946_v17  ;;  %v4183_v7 = vadd.f32 %v4123_v60, %v4059_v41  ;;  %v4246_v1 = vadd.f32 %v3870_v58, %v3538_v14  ;;  %v3291_v31 = vmul.f32 %v17842_v45, %v12483_v9  ;;  %v17948_v58 = vld [vmem:[#allocation52_spill] sm:$0xff]  ;;  %v17950_v17 = vld [vmem:[#allocation51_spill] sm:$0xff] }
 0x3e1   : > { %v12609_v3 = vsel %vm485_vm0, %v2986_v54, 0.0  ;;  %v4184_v37 = vadd.f32 %v4124_v2, %v4060_v40  ;;  %v12617_v35 = vsel %vm873_vm3, %v3082_v10, %v3114_v6  ;;  %v3178_v4 = vsel %vm873_vm3, %v3114_v6, %v3082_v10 }
 0x3e2   : > { %v3292_v44 = vmul.f32 %v17842_v45, %v12465_v29  ;;  %v4309_v15 = vadd.f32 %v4245_v22, %v4183_v7  ;;  %v12625_v19 = vsel %vm488_vm1, %v3178_v4, 0.0  ;;  %v3355_v33 = vmul.f32 %v17835_v52, %v17926_v16 }
 0x3e3   : > { %v3356_v9 = vmul.f32 %v17835_v52, %v17924_v48  ;;  %v4310_v61 = vadd.f32 %v4246_v1, %v4184_v37  ;;  %v3479_v38 = vmul.f32 %v17843_v36, %v12502_v25  ;;  %v3480_v47 = vmul.f32 %v17843_v36, %v12511_v49 }
 0x3e4   : > { %v3607_v29 = vmul.f32 %v17845_v30, %v12547_v42  ;;  %v3415_v23 = vadd.f32 %v3355_v33, %v3291_v31  ;;  %v3608_v0 = vmul.f32 %v17845_v30, %v12537_v57  ;;  %v3675_v16 = vmul.f32 %v17836_v8, %v17938_v24 }
 0x3e5   : > { %v3416_v14 = vadd.f32 %v3356_v9, %v3292_v44  ;;  %v4356_v12 = vpack.c.bf16 %v4310_v61, %v4309_v15  ;;  %v3676_v48 = vmul.f32 %v17836_v8, %v17936_v5  ;;  %v3807_v25 = vmul.f32 %v17846_v46, %v12557_v63 }
 0x3e6   : > { %v3808_v49 = vmul.f32 %v17846_v46, %v12566_v20  ;;  %v3539_v51 = vadd.f32 %v3479_v38, %v3415_v23  ;;  %v3739_v13 = vadd.f32 %v3675_v16, %v3607_v29  ;;  %v3937_v59 = vmul.f32 %v17847_v62, %v12609_v3 }
 0x3e7   : > { %v3540_v50 = vadd.f32 %v3480_v47, %v3416_v14  ;;  %7814 = vmatmul.mubr.bf16.gmra.mrb[64].mxu1 %v4356_v12  ;;  %v3740_v27 = vadd.f32 %v3676_v48, %v3608_v0  ;;  %v3938_v39 = vmul.f32 %v17847_v62, %v12599_v28  ;;  %v4001_v60 = vmul.f32 %v17837_v21, %v17944_v55 }
 0x3e8   : > { %v4002_v2 = vmul.f32 %v17837_v21, %v17942_v34  ;;  %v3871_v11 = vadd.f32 %v3807_v25, %v3739_v13  ;;  %v4125_v26 = vmul.f32 %v17848_v43, %v12617_v35  ;;  %v4126_v53 = vmul.f32 %v17848_v43, %v12625_v19 }
 0x3e9   : > { %v17949_v41 = vrot.slane %v17948_v58, 7  ;;  %v17951_v32 = vrot.slane %v17950_v17, 7  ;;  %v3872_v40 = vadd.f32 %v3808_v49, %v3740_v27  ;;  %v4061_v10 = vadd.f32 %v4001_v60, %v3937_v59 }
 0x3ea   : > { %v4062_v6 = vadd.f32 %v4002_v2, %v3938_v39  ;;  %v4247_v31 = vadd.f32 %v3871_v11, %v3539_v51  ;;  %v3083_v4 = vrot.slane %v17950_v17, 1  ;;  %v3115_v44 = vrot.slane %v17948_v58, 1 }
 0x3eb   : > { %v12665_v54 = vsel %vm676_vm2, %v17951_v32, %v17949_v41  ;;  %v17952_v7 = vmov %v17951_v32  ;;  %v17953_v22 = vmov %v17949_v41  ;;  %v4185_v15 = vadd.f32 %v4125_v26, %v4061_v10 }
 0x3ec   : > { %v2987_v1 = vsel %vm676_vm2, %v17953_v22, %v17952_v7  ;;  %v4186_v33 = vadd.f32 %v4126_v53, %v4062_v6  ;;  %v4248_v9 = vadd.f32 %v3872_v40, %v3540_v50  ;;  %v3293_v61 = vmul.f32 %v17842_v45, %v12547_v42  ;;  %v17954_v40 = vld [vmem:[#allocation54_spill] sm:$0xff]  ;;  %v17956_v6 = vld [vmem:[#allocation53_spill] sm:$0xff] }
 0x3ed   : > { %v12675_v37 = vsel %vm485_vm0, %v2987_v1, 0.0  ;;  %v12683_v38 = vsel %vm873_vm3, %v3083_v4, %v3115_v44  ;;  %v3179_v47 = vsel %vm873_vm3, %v3115_v44, %v3083_v4  ;;  %v3294_v29 = vmul.f32 %v17842_v45, %v12537_v57 }
 0x3ee   : > { %v3357_v23 = vmul.f32 %v17835_v52, %v17938_v24  ;;  %v4311_v14 = vadd.f32 %v4247_v31, %v4185_v15  ;;  %v4312_v0 = vadd.f32 %v4248_v9, %v4186_v33  ;;  %v12693_v16 = vsel %vm488_vm1, %v3179_v47, 0.0 }
 0x3ef   : > { %v3358_v42 = vmul.f32 %v17835_v52, %v17936_v5  ;;  %v3481_v48 = vmul.f32 %v17843_v36, %v12557_v63  ;;  %v3482_v25 = vmul.f32 %v17843_v36, %v12566_v20  ;;  %v3609_v57 = vmul.f32 %v17845_v30, %v12609_v3 }
 0x3f0   : > { %v3417_v12 = vadd.f32 %v3357_v23, %v3293_v61  ;;  %v4357_v24 = vpack.c.bf16 %v4312_v0, %v4311_v14  ;;  %v3610_v51 = vmul.f32 %v17845_v30, %v12599_v28  ;;  %v3677_v50 = vmul.f32 %v17836_v8, %v17944_v55 }
 0x3f1   : > { %v3418_v49 = vadd.f32 %v3358_v42, %v3294_v29  ;;  %v3678_v5 = vmul.f32 %v17836_v8, %v17942_v34  ;;  %v3809_v63 = vmul.f32 %v17846_v46, %v12617_v35  ;;  %v3810_v20 = vmul.f32 %v17846_v46, %v12625_v19 }
 0x3f2   : > { %v3541_v13 = vadd.f32 %v3481_v48, %v3417_v12  ;;  %7817 = vmatprep.mubr.bf16.mxu1 %v4357_v24  ;;  %v3741_v27 = vadd.f32 %v3677_v50, %v3609_v57  ;;  %v3939_v39 = vmul.f32 %v17847_v62, %v12675_v37  ;;  %v3940_v60 = vmul.f32 %v17847_v62, %v12665_v54 }
 0x3f3   : > { %v3542_v59 = vadd.f32 %v3482_v25, %v3418_v49  ;;  %v3742_v2 = vadd.f32 %v3678_v5, %v3610_v51  ;;  %v4003_v11 = vmul.f32 %v17837_v21, %v17950_v17  ;;  %v4004_v26 = vmul.f32 %v17837_v21, %v17948_v58 }
 0x3f4   : > { %v4127_v53 = vmul.f32 %v17848_v43, %v12683_v38  ;;  %v3873_v41 = vadd.f32 %v3809_v63, %v3741_v27  ;;  %v4128_v32 = vmul.f32 %v17848_v43, %v12693_v16  ;;  %v17955_v10 = vrot.slane %v17954_v40, 7 }
 0x3f5   : > { %v17957_v7 = vrot.slane %v17956_v6, 7  ;;  %v3874_v44 = vadd.f32 %v3810_v20, %v3742_v2  ;;  %v4063_v15 = vadd.f32 %v4003_v11, %v3939_v39  ;;  %v4064_v33 = vadd.f32 %v4004_v26, %v3940_v60 }
 0x3f6   : > { %v17959_v31 = vmov %v17955_v10  ;;  %v4249_v61 = vadd.f32 %v3873_v41, %v3541_v13  ;;  %v3084_v47 = vrot.slane %v17956_v6, 1  ;;  %v3116_v29 = vrot.slane %v17954_v40, 1 }
 0x3f7   : > { %v12731_v22 = vsel %vm676_vm2, %v17957_v7, %v17955_v10  ;;  %v17958_v1 = vmov %v17957_v7  ;;  %v3295_v23 = vmul.f32 %v17842_v45, %v12609_v3  ;;  %v4187_v14 = vadd.f32 %v4127_v53, %v4063_v15 }
 0x3f8   : > { %v2988_v4 = vsel %vm676_vm2, %v17959_v31, %v17958_v1  ;;  %v4188_v0 = vadd.f32 %v4128_v32, %v4064_v33  ;;  %v4250_v42 = vadd.f32 %v3874_v44, %v3542_v59  ;;  %v3296_v12 = vmul.f32 %v17842_v45, %v12599_v28  ;;  %v17960_v31 = vld [vmem:[#allocation56_spill] sm:$0xff]  ;;  %v17962_v44 = vld [vmem:[#allocation55_spill] sm:$0xff] }
 0x3f9   : > { %v12741_v9 = vsel %vm485_vm0, %v2988_v4, 0.0  ;;  %v12751_v48 = vsel %vm873_vm3, %v3084_v47, %v3116_v29  ;;  %v3180_v25 = vsel %vm873_vm3, %v3116_v29, %v3084_v47  ;;  %v3359_v57 = vmul.f32 %v17835_v52, %v17944_v55 }
 0x3fa   : > { %v3360_v24 = vmul.f32 %v17835_v52, %v17942_v34  ;;  %v4313_v3 = vadd.f32 %v4249_v61, %v4187_v14  ;;  %v4314_v49 = vadd.f32 %v4250_v42, %v4188_v0  ;;  %v12761_v51 = vsel %vm488_vm1, %v3180_v25, 0.0 }
 0x3fb   : > { %v3483_v28 = vmul.f32 %v17843_v36, %v12617_v35  ;;  %v3419_v50 = vadd.f32 %v3359_v57, %v3295_v23  ;;  %v3484_v5 = vmul.f32 %v17843_v36, %v12625_v19  ;;  %v3611_v55 = vmul.f32 %v17845_v30, %v12675_v37 }
 0x3fc   : > { %v3420_v13 = vadd.f32 %v3360_v24, %v3296_v12  ;;  %v4358_v63 = vpack.c.bf16 %v4314_v49, %v4313_v3  ;;  %v3612_v34 = vmul.f32 %v17845_v30, %v12665_v54  ;;  %v3679_v20 = vmul.f32 %v17836_v8, %v17950_v17 }
 0x3fd   : > { %v3680_v59 = vmul.f32 %v17836_v8, %v17948_v58  ;;  %v3543_v27 = vadd.f32 %v3483_v28, %v3419_v50  ;;  %v3811_v39 = vmul.f32 %v17846_v46, %v12683_v38  ;;  %v3812_v19 = vmul.f32 %v17846_v46, %v12693_v16 }
 0x3fe   : > { %v3544_v35 = vadd.f32 %v3484_v5, %v3420_v13  ;;  %7818 = vmatmul.mubr.bf16.gmra.mrb[68].mxu1 %v4358_v63  ;;  %v3743_v60 = vadd.f32 %v3679_v20, %v3611_v55  ;;  %v3941_v11 = vmul.f32 %v17847_v62, %v12741_v9  ;;  %v3942_v26 = vmul.f32 %v17847_v62, %v12731_v22 }
 0x3ff   : > { %v3744_v2 = vadd.f32 %v3680_v59, %v3612_v34  ;;  %v4005_v53 = vmul.f32 %v17837_v21, %v17956_v6  ;;  %v4006_v41 = vmul.f32 %v17837_v21, %v17954_v40  ;;  %v4129_v32 = vmul.f32 %v17848_v43, %v12751_v48 }
 0x400   : > { %v4130_v10 = vmul.f32 %v17848_v43, %v12761_v51  ;;  %v3875_v7 = vadd.f32 %v3811_v39, %v3743_v60  ;;  %v17961_v4 = vrot.slane %v17960_v31, 7  ;;  %v17963_v15 = vrot.slane %v17962_v44, 7 }
 0x401   : > { %v3876_v1 = vadd.f32 %v3812_v19, %v3744_v2  ;;  %v4065_v23 = vadd.f32 %v4005_v53, %v3941_v11  ;;  %v4066_v14 = vadd.f32 %v4006_v41, %v3942_v26  ;;  %v3085_v42 = vrot.slane %v17962_v44, 1 }
 0x402   : > { %v12797_v33 = vsel %vm676_vm2, %v17963_v15, %v17961_v4  ;;  %v17964_v61 = vmov %v17963_v15  ;;  %v17965_v47 = vmov %v17961_v4  ;;  %v4251_v12 = vadd.f32 %v3875_v7, %v3543_v27  ;;  %v17966_v4 = vld [vmem:[#allocation58_spill] sm:$0xff] }
 0x403   : > { %v2989_v29 = vsel %vm676_vm2, %v17965_v47, %v17964_v61  ;;  %v4252_v25 = vadd.f32 %v3876_v1, %v3544_v35  ;;  %v3117_v57 = vrot.slane %v17960_v31, 1  ;;  %v3297_v24 = vmul.f32 %v17842_v45, %v12675_v37  ;;  %v17968_v61 = vld [vmem:[#allocation57_spill] sm:$0xff] }
 0x404   : > { %v12807_v0 = vsel %vm485_vm0, %v2989_v29, 0.0  ;;  %v4189_v3 = vadd.f32 %v4129_v32, %v4065_v23  ;;  %v4190_v49 = vadd.f32 %v4130_v10, %v4066_v14  ;;  %v3298_v28 = vmul.f32 %v17842_v45, %v12665_v54 }
 0x405   : > { %v3361_v50 = vmul.f32 %v17835_v52, %v17950_v17  ;;  %v12819_v13 = vsel %vm873_vm3, %v3085_v42, %v3117_v57  ;;  %v3181_v5 = vsel %vm873_vm3, %v3117_v57, %v3085_v42  ;;  %v3362_v55 = vmul.f32 %v17835_v52, %v17948_v58 }
 0x406   : > { %v3485_v37 = vmul.f32 %v17843_v36, %v12683_v38  ;;  %v4315_v63 = vadd.f32 %v4251_v12, %v4189_v3  ;;  %v4316_v34 = vadd.f32 %v4252_v25, %v4190_v49  ;;  %v12829_v54 = vsel %vm488_vm1, %v3181_v5, 0.0 }
 0x407   : > { %v3421_v17 = vadd.f32 %v3361_v50, %v3297_v24  ;;  %v3422_v20 = vadd.f32 %v3362_v55, %v3298_v28  ;;  %v3486_v59 = vmul.f32 %v17843_v36, %v12693_v16  ;;  %v3613_v27 = vmul.f32 %v17845_v30, %v12741_v9 }
 0x408   : > { %v3614_v58 = vmul.f32 %v17845_v30, %v12731_v22  ;;  %v4359_v35 = vpack.c.bf16 %v4316_v34, %v4315_v63  ;;  %v3681_v38 = vmul.f32 %v17836_v8, %v17956_v6  ;;  %v3682_v19 = vmul.f32 %v17836_v8, %v17954_v40 }
 0x409   : > { %v3545_v39 = vadd.f32 %v3485_v37, %v3421_v17  ;;  %v3546_v60 = vadd.f32 %v3486_v59, %v3422_v20  ;;  %v3813_v2 = vmul.f32 %v17846_v46, %v12751_v48  ;;  %v3814_v16 = vmul.f32 %v17846_v46, %v12761_v51 }
 0x40a   : > { %v3943_v11 = vmul.f32 %v17847_v62, %v12807_v0  ;;  %7821 = vmatprep.mubr.bf16.mxu1 %v4359_v35  ;;  %v3745_v26 = vadd.f32 %v3681_v38, %v3613_v27  ;;  %v3746_v53 = vadd.f32 %v3682_v19, %v3614_v58  ;;  %v3944_v41 = vmul.f32 %v17847_v62, %v12797_v33 }
 0x40b   : > { %v4007_v32 = vmul.f32 %v17837_v21, %v17962_v44  ;;  %v4008_v10 = vmul.f32 %v17837_v21, %v17960_v31  ;;  %v4131_v7 = vmul.f32 %v17848_v43, %v12819_v13  ;;  %v4132_v1 = vmul.f32 %v17848_v43, %v12829_v54 }
 0x40c   : > { %v17967_v15 = vrot.slane %v17966_v4, 7  ;;  %v17969_v47 = vrot.slane %v17968_v61, 7  ;;  %v3877_v23 = vadd.f32 %v3813_v2, %v3745_v26  ;;  %v3878_v14 = vadd.f32 %v3814_v16, %v3746_v53 }
 0x40d   : > { %v4067_v42 = vadd.f32 %v4007_v32, %v3943_v11  ;;  %v4068_v24 = vadd.f32 %v4008_v10, %v3944_v41  ;;  %v3086_v49 = vrot.slane %v17968_v61, 1  ;;  %v3118_v28 = vrot.slane %v17966_v4, 1 }
 0x40e   : > { %v12863_v29 = vsel %vm676_vm2, %v17969_v47, %v17967_v15  ;;  %v17970_v12 = vmov %v17969_v47  ;;  %v17971_v25 = vmov %v17967_v15  ;;  %v4253_v5 = vadd.f32 %v3877_v23, %v3545_v39 }
 0x40f   : > { %v2990_v57 = vsel %vm676_vm2, %v17971_v25, %v17970_v12  ;;  %v4191_v50 = vadd.f32 %v4131_v7, %v4067_v42  ;;  %v4254_v55 = vadd.f32 %v3878_v14, %v3546_v60  ;;  %v3299_v37 = vmul.f32 %v17842_v45, %v12741_v9  ;;  %v17972_v14 = vld [vmem:[#allocation60_spill] sm:$0xff]  ;;  %v17974_v12 = vld [vmem:[#allocation59_spill] sm:$0xff] }
 0x410   : > { %v12873_v3 = vsel %vm485_vm0, %v2990_v57, 0.0  ;;  %v4192_v63 = vadd.f32 %v4132_v1, %v4068_v24  ;;  %v12881_v34 = vsel %vm873_vm3, %v3086_v49, %v3118_v28  ;;  %v3182_v17 = vsel %vm873_vm3, %v3118_v28, %v3086_v49 }
 0x411   : > { %v3300_v20 = vmul.f32 %v17842_v45, %v12731_v22  ;;  %v4317_v59 = vadd.f32 %v4253_v5, %v4191_v50  ;;  %v12889_v27 = vsel %vm488_vm1, %v3182_v17, 0.0  ;;  %v3363_v58 = vmul.f32 %v17835_v52, %v17956_v6 }
 0x412   : > { %v3364_v9 = vmul.f32 %v17835_v52, %v17954_v40  ;;  %v4318_v35 = vadd.f32 %v4254_v55, %v4192_v63  ;;  %v3487_v39 = vmul.f32 %v17843_v36, %v12751_v48  ;;  %v3488_v38 = vmul.f32 %v17843_v36, %v12761_v51 }
 0x413   : > { %v3615_v22 = vmul.f32 %v17845_v30, %v12807_v0  ;;  %v3423_v19 = vadd.f32 %v3363_v58, %v3299_v37  ;;  %v3616_v2 = vmul.f32 %v17845_v30, %v12797_v33  ;;  %v3683_v6 = vmul.f32 %v17836_v8, %v17962_v44  ;;  %v12937_v37 = vpop.f32.mrb[32].mxu1 }
 0x414   : > { %v3424_v60 = vadd.f32 %v3364_v9, %v3300_v20  ;;  %v4360_v16 = vpack.c.bf16 %v4318_v35, %v4317_v59  ;;  %v3684_v40 = vmul.f32 %v17836_v8, %v17960_v31  ;;  %v3815_v48 = vmul.f32 %v17846_v46, %v12819_v13  ;;  %v12945_v58 = vpop.f32.mrb[33].mxu1 }
 0x415   : > { %v3816_v51 = vmul.f32 %v17846_v46, %v12829_v54  ;;  %v3547_v11 = vadd.f32 %v3487_v39, %v3423_v19  ;;  %v3747_v53 = vadd.f32 %v3683_v6, %v3615_v22  ;;  %v3945_v41 = vmul.f32 %v17847_v62, %v12873_v3  ;;  %v12949_v22 = vpop.f32.mrb[34].mxu1 }
 0x416   : > { %v3548_v26 = vadd.f32 %v3488_v38, %v3424_v60  ;;  %7822 = vmatmul.mubr.bf16.gmra.mrb[72].mxu1 %v4360_v16  ;;  %v3748_v32 = vadd.f32 %v3684_v40, %v3616_v2  ;;  %v3946_v10 = vmul.f32 %v17847_v62, %v12863_v29  ;;  %v4009_v7 = vmul.f32 %v17837_v21, %v17968_v61  ;;  %v12961_v16 = vpop.f32.mrb[35].mxu1 }
 0x417   : > { %v4010_v1 = vmul.f32 %v17837_v21, %v17966_v4  ;;  %v3879_v15 = vadd.f32 %v3815_v48, %v3747_v53  ;;  %v4133_v47 = vmul.f32 %v17848_v43, %v12881_v34  ;;  %v4134_v23 = vmul.f32 %v17848_v43, %v12889_v27 }
 0x418   : > { %v17973_v42 = vrot.slane %v17972_v14, 7  ;;  %v17975_v25 = vrot.slane %v17974_v12, 7  ;;  %v3880_v24 = vadd.f32 %v3816_v51, %v3748_v32  ;;  %v4069_v49 = vadd.f32 %v4009_v7, %v3945_v41 }
 0x419   : > { %v4070_v28 = vadd.f32 %v4010_v1, %v3946_v10  ;;  %v4255_v63 = vadd.f32 %v3879_v15, %v3547_v11  ;;  %v3087_v20 = vrot.slane %v17974_v12, 1  ;;  %v3119_v59 = vrot.slane %v17972_v14, 1 }
 0x41a   : > { %v12929_v57 = vsel %vm676_vm2, %v17975_v25, %v17973_v42  ;;  %v17976_v50 = vmov %v17975_v25  ;;  %v17977_v5 = vmov %v17973_v42  ;;  %v4193_v9 = vadd.f32 %v4133_v47, %v4069_v49 }
 0x41b   : > { %v2991_v55 = vsel %vm676_vm2, %v17977_v5, %v17976_v50  ;;  %v4194_v35 = vadd.f32 %v4134_v23, %v4070_v28  ;;  %v4256_v39 = vadd.f32 %v3880_v24, %v3548_v26  ;;  %v3301_v38 = vmul.f32 %v17842_v45, %v12807_v0  ;;  %v17978_v5 = vld [vmem:[#allocation62_spill] sm:$0xff] }
 0x41c   : > { %v12941_v17 = vsel %vm485_vm0, %v2991_v55, 0.0  ;;  %v12953_v19 = vsel %vm873_vm3, %v3087_v20, %v3119_v59  ;;  %v3183_v60 = vsel %vm873_vm3, %v3119_v59, %v3087_v20  ;;  %v3302_v2 = vmul.f32 %v17842_v45, %v12797_v33 }
 0x41d   : > { %v3365_v6 = vmul.f32 %v17835_v52, %v17962_v44  ;;  %v4319_v40 = vadd.f32 %v4255_v63, %v4193_v9  ;;  %v4320_v48 = vadd.f32 %v4256_v39, %v4194_v35  ;;  %v12965_v0 = vsel %vm488_vm1, %v3183_v60, 0.0  ;;  %v17980_v63 = vld [vmem:[#allocation61_spill] sm:$0xff] }
 0x41e   : > { %v3366_v51 = vmul.f32 %v17835_v52, %v17960_v31  ;;  %v3489_v26 = vmul.f32 %v17843_v36, %v12819_v13  ;;  %v3490_v33 = vmul.f32 %v17843_v36, %v12829_v54  ;;  %v3617_v44 = vmul.f32 %v17845_v30, %v12873_v3 }
 0x41f   : > { %v3425_v11 = vadd.f32 %v3365_v6, %v3301_v38  ;;  %v4361_v53 = vpack.c.bf16 %v4320_v48, %v4319_v40  ;;  %v3618_v32 = vmul.f32 %v17845_v30, %v12863_v29  ;;  %v3685_v10 = vmul.f32 %v17836_v8, %v17968_v61 }
 0x420   : > { %v3426_v41 = vadd.f32 %v3366_v51, %v3302_v2  ;;  %v3686_v31 = vmul.f32 %v17836_v8, %v17966_v4  ;;  %v3817_v13 = vmul.f32 %v17846_v46, %v12881_v34  ;;  %v3818_v54 = vmul.f32 %v17846_v46, %v12889_v27 }
 0x421   : > { %v3549_v7 = vadd.f32 %v3489_v26, %v3425_v11  ;;  %7825 = vmatprep.mubr.bf16.mxu1 %v4361_v53  ;;  %v3749_v15 = vadd.f32 %v3685_v10, %v3617_v44  ;;  %v3947_v47 = vmul.f32 %v17847_v62, %v12941_v17  ;;  %v3948_v23 = vmul.f32 %v17847_v62, %v12929_v57 }
 0x422   : > { %v3550_v1 = vadd.f32 %v3490_v33, %v3426_v41  ;;  %v3750_v42 = vadd.f32 %v3686_v31, %v3618_v32  ;;  %v4011_v25 = vmul.f32 %v17837_v21, %v17974_v12  ;;  %v4012_v24 = vmul.f32 %v17837_v21, %v17972_v14 }
 0x423   : > { %v4135_v49 = vmul.f32 %v17848_v43, %v12953_v19  ;;  %v3881_v28 = vadd.f32 %v3817_v13, %v3749_v15  ;;  %v4136_v50 = vmul.f32 %v17848_v43, %v12965_v0  ;;  %v17979_v55 = vrot.slane %v17978_v5, 7 }
 0x424   : > { %v17981_v20 = vrot.slane %v17980_v63, 7  ;;  %v3882_v38 = vadd.f32 %v3818_v54, %v3750_v42  ;;  %v4071_v60 = vadd.f32 %v4011_v25, %v3947_v47  ;;  %v4072_v2 = vadd.f32 %v4012_v24, %v3948_v23 }
 0x425   : > { %v17983_v35 = vmov %v17979_v55  ;;  %v4257_v40 = vadd.f32 %v3881_v28, %v3549_v7  ;;  %v3088_v48 = vrot.slane %v17980_v63, 1  ;;  %v3120_v51 = vrot.slane %v17978_v5, 1 }
 0x426   : > { %v13003_v59 = vsel %vm676_vm2, %v17981_v20, %v17979_v55  ;;  %v17982_v9 = vmov %v17981_v20  ;;  %v3303_v11 = vmul.f32 %v17842_v45, %v12873_v3  ;;  %v4195_v26 = vadd.f32 %v4135_v49, %v4071_v60 }
 0x427   : > { %v2992_v39 = vsel %vm676_vm2, %v17983_v35, %v17982_v9  ;;  %v4196_v33 = vadd.f32 %v4136_v50, %v4072_v2  ;;  %v4258_v44 = vadd.f32 %v3882_v38, %v3550_v1  ;;  %v3304_v53 = vmul.f32 %v17842_v45, %v12863_v29  ;;  %v17984_v2 = vld [vmem:[#allocation64_spill] sm:$0xff] }
 0x428   : > { %v13013_v6 = vsel %vm485_vm0, %v2992_v39, 0.0  ;;  %v13023_v41 = vsel %vm873_vm3, %v3088_v48, %v3120_v51  ;;  %v3184_v32 = vsel %vm873_vm3, %v3120_v51, %v3088_v48  ;;  %v3367_v10 = vmul.f32 %v17835_v52, %v17968_v61  ;;  %v17986_v48 = vld [vmem:[#allocation63_spill] sm:$0xff] }
 0x429   : > { %v3368_v7 = vmul.f32 %v17835_v52, %v17966_v4  ;;  %v4321_v3 = vadd.f32 %v4257_v40, %v4195_v26  ;;  %v4322_v31 = vadd.f32 %v4258_v44, %v4196_v33  ;;  %v13033_v13 = vsel %vm488_vm1, %v3184_v32, 0.0 }
 0x42a   : > { %v3491_v29 = vmul.f32 %v17843_v36, %v12881_v34  ;;  %v3427_v54 = vadd.f32 %v3367_v10, %v3303_v11  ;;  %v3492_v15 = vmul.f32 %v17843_v36, %v12889_v27  ;;  %v3619_v61 = vmul.f32 %v17845_v30, %v12941_v17 }
 0x42b   : > { %v3428_v1 = vadd.f32 %v3368_v7, %v3304_v53  ;;  %v4362_v47 = vpack.c.bf16 %v4322_v31, %v4321_v3  ;;  %v3620_v4 = vmul.f32 %v17845_v30, %v12929_v57  ;;  %v3687_v23 = vmul.f32 %v17836_v8, %v17974_v12  ;;  %v13082_v3 = vpop.f32.mrb[36].mxu1 }
 0x42c   : > { %v3688_v42 = vmul.f32 %v17836_v8, %v17972_v14  ;;  %v3551_v25 = vadd.f32 %v3491_v29, %v3427_v54  ;;  %v3819_v24 = vmul.f32 %v17846_v46, %v12953_v19  ;;  %v3820_v27 = vmul.f32 %v17846_v46, %v12965_v0 }
 0x42d   : > { %v3552_v34 = vadd.f32 %v3492_v15, %v3428_v1  ;;  %7826 = vmatmul.mubr.bf16.gmra.mrb[76].mxu1 %v4362_v47  ;;  %v3751_v49 = vadd.f32 %v3687_v23, %v3619_v61  ;;  %v3949_v50 = vmul.f32 %v17847_v62, %v13013_v6  ;;  %v3950_v55 = vmul.f32 %v17847_v62, %v13003_v59  ;;  %v13087_v15 = vpop.f32.mrb[37].mxu1 }
 0x42e   : > { %v3752_v28 = vadd.f32 %v3688_v42, %v3620_v4  ;;  %v4013_v20 = vmul.f32 %v17837_v21, %v17980_v63  ;;  %v4014_v9 = vmul.f32 %v17837_v21, %v17978_v5  ;;  %v4137_v35 = vmul.f32 %v17848_v43, %v13023_v41  ;;  %v13093_v42 = vpop.f32.mrb[38].mxu1 }
 0x42f   : > { %v4138_v39 = vmul.f32 %v17848_v43, %v13033_v13  ;;  %v3883_v38 = vadd.f32 %v3819_v24, %v3751_v49  ;;  %v17985_v40 = vrot.slane %v17984_v2, 7  ;;  %v17987_v51 = vrot.slane %v17986_v48, 7 }
 0x430   : > { %v3884_v60 = vadd.f32 %v3820_v27, %v3752_v28  ;;  %v4073_v53 = vadd.f32 %v4013_v20, %v3949_v50  ;;  %v4074_v32 = vadd.f32 %v4014_v9, %v3950_v55  ;;  %v3089_v7 = vrot.slane %v17986_v48, 1  ;;  %v13105_v27 = vpop.f32.mrb[39].mxu1 }
 0x431   : > { %v13069_v11 = vsel %vm676_vm2, %v17987_v51, %v17985_v40  ;;  %v17988_v26 = vmov %v17987_v51  ;;  %v17989_v33 = vmov %v17985_v40  ;;  %v4259_v31 = vadd.f32 %v3883_v38, %v3551_v25 }
 0x432   : > { %v2993_v44 = vsel %vm676_vm2, %v17989_v33, %v17988_v26  ;;  %v4260_v29 = vadd.f32 %v3884_v60, %v3552_v34  ;;  %v3121_v54 = vrot.slane %v17984_v2, 1  ;;  %v3305_v1 = vmul.f32 %v17842_v45, %v12941_v17 }
 0x433   : > { %v13079_v10 = vsel %vm485_vm0, %v2993_v44, 0.0  ;;  %v4197_v61 = vadd.f32 %v4137_v35, %v4073_v53  ;;  %v4198_v47 = vadd.f32 %v4138_v39, %v4074_v32  ;;  %v3306_v4 = vmul.f32 %v17842_v45, %v12929_v57 }
 0x434   : > { %v3369_v23 = vmul.f32 %v17835_v52, %v17974_v12  ;;  %v13097_v25 = vsel %vm873_vm3, %v3089_v7, %v3121_v54  ;;  %v3185_v34 = vsel %vm873_vm3, %v3121_v54, %v3089_v7  ;;  %v3370_v17 = vmul.f32 %v17835_v52, %v17972_v14  ;;  %v17992_v54 = vld [vmem:[#allocation65_spill] sm:$0xff] }
 0x435   : > { %v3493_v24 = vmul.f32 %v17843_v36, %v12953_v19  ;;  %v4323_v57 = vadd.f32 %v4259_v31, %v4197_v61  ;;  %v4324_v49 = vadd.f32 %v4260_v29, %v4198_v47  ;;  %v13109_v12 = vsel %vm488_vm1, %v3185_v34, 0.0  ;;  %v17990_v31 = vld [vmem:[#allocation66_spill] sm:$0xff] }
 0x436   : > { %v3429_v28 = vadd.f32 %v3369_v23, %v3305_v1  ;;  %v3430_v50 = vadd.f32 %v3370_v17, %v3306_v4  ;;  %v3494_v55 = vmul.f32 %v17843_v36, %v12965_v0  ;;  %v3621_v20 = vmul.f32 %v17845_v30, %v13013_v6 }
 0x437   : > { %v3622_v14 = vmul.f32 %v17845_v30, %v13003_v59  ;;  %v4363_v19 = vpack.c.bf16 %v4324_v49, %v4323_v57  ;;  %v3689_v35 = vmul.f32 %v17836_v8, %v17980_v63  ;;  %v3690_v39 = vmul.f32 %v17836_v8, %v17978_v5 }
 0x438   : > { %v3553_v9 = vadd.f32 %v3493_v24, %v3429_v28  ;;  %v3554_v38 = vadd.f32 %v3494_v55, %v3430_v50  ;;  %v3821_v60 = vmul.f32 %v17846_v46, %v13023_v41  ;;  %v3822_v0 = vmul.f32 %v17846_v46, %v13033_v13 }
 0x439   : > { %v3951_v40 = vmul.f32 %v17847_v62, %v13079_v10  ;;  %7829 = vmatprep.mubr.bf16.mxu1 %v4363_v19  ;;  %v3753_v51 = vadd.f32 %v3689_v35, %v3621_v20  ;;  %v3754_v26 = vadd.f32 %v3690_v39, %v3622_v14  ;;  %v3952_v33 = vmul.f32 %v17847_v62, %v13069_v11 }
 0x43a   : > { %v4015_v44 = vmul.f32 %v17837_v21, %v17986_v48  ;;  %v4016_v53 = vmul.f32 %v17837_v21, %v17984_v2  ;;  %v4139_v32 = vmul.f32 %v17848_v43, %v13097_v25  ;;  %v4140_v7 = vmul.f32 %v17848_v43, %v13109_v12 }
 0x43b   : > { %v17991_v29 = vrot.slane %v17990_v31, 7  ;;  %v17993_v1 = vrot.slane %v17992_v54, 7  ;;  %v3885_v47 = vadd.f32 %v3821_v60, %v3753_v51  ;;  %v3886_v4 = vadd.f32 %v3822_v0, %v3754_v26 }
 0x43c   : > { %v4075_v23 = vadd.f32 %v4015_v44, %v3951_v40  ;;  %v4076_v57 = vadd.f32 %v4016_v53, %v3952_v33  ;;  %v3090_v28 = vrot.slane %v17992_v54, 1  ;;  %v3122_v50 = vrot.slane %v17990_v31, 1 }
 0x43d   : > { %v13143_v61 = vsel %vm676_vm2, %v17993_v1, %v17991_v29  ;;  %v17994_v34 = vmov %v17993_v1  ;;  %v17995_v17 = vmov %v17991_v29  ;;  %v4261_v20 = vadd.f32 %v3885_v47, %v3553_v9 }
 0x43e   : > { %v2994_v24 = vsel %vm676_vm2, %v17995_v17, %v17994_v34  ;;  %v4199_v55 = vadd.f32 %v4139_v32, %v4075_v23  ;;  %v4262_v14 = vadd.f32 %v3886_v4, %v3554_v38  ;;  %v3307_v19 = vmul.f32 %v17842_v45, %v13013_v6 }
 0x43f   : > { %v13153_v49 = vsel %vm485_vm0, %v2994_v24, 0.0  ;;  %v4200_v35 = vadd.f32 %v4140_v7, %v4076_v57  ;;  %v13161_v39 = vsel %vm873_vm3, %v3090_v28, %v3122_v50  ;;  %v3186_v60 = vsel %vm873_vm3, %v3122_v50, %v3090_v28 }
 0x440   : > { %v3308_v0 = vmul.f32 %v17842_v45, %v13003_v59  ;;  %v4325_v40 = vadd.f32 %v4261_v20, %v4199_v55  ;;  %v13169_v51 = vsel %vm488_vm1, %v3186_v60, 0.0  ;;  %v3371_v9 = vmul.f32 %v17835_v52, %v17980_v63  ;;  %v17996_v55 = vld [vmem:[#allocation68_spill] sm:$0xff] }
 0x441   : > { %v3372_v6 = vmul.f32 %v17835_v52, %v17978_v5  ;;  %v4326_v38 = vadd.f32 %v4262_v14, %v4200_v35  ;;  %v3495_v26 = vmul.f32 %v17843_v36, %v13023_v41  ;;  %v3496_v33 = vmul.f32 %v17843_v36, %v13033_v13  ;;  %v17998_v14 = vld [vmem:[#allocation67_spill] sm:$0xff] }
 0x442   : > { %v3623_v59 = vmul.f32 %v17845_v30, %v13079_v10  ;;  %v3431_v44 = vadd.f32 %v3371_v9, %v3307_v19  ;;  %v3624_v32 = vmul.f32 %v17845_v30, %v13069_v11  ;;  %v3691_v63 = vmul.f32 %v17836_v8, %v17986_v48 }
 0x443   : > { %v3432_v53 = vadd.f32 %v3372_v6, %v3308_v0  ;;  %v4364_v7 = vpack.c.bf16 %v4326_v38, %v4325_v40  ;;  %v3692_v5 = vmul.f32 %v17836_v8, %v17984_v2  ;;  %v3823_v41 = vmul.f32 %v17846_v46, %v13097_v25 }
 0x444   : > { %v3824_v13 = vmul.f32 %v17846_v46, %v13109_v12  ;;  %v3555_v29 = vadd.f32 %v3495_v26, %v3431_v44  ;;  %v3755_v47 = vadd.f32 %v3691_v63, %v3623_v59  ;;  %v3953_v4 = vmul.f32 %v17847_v62, %v13153_v49 }
 0x445   : > { %v3556_v1 = vadd.f32 %v3496_v33, %v3432_v53  ;;  %7830 = vmatmul.mubr.bf16.gmra.mrb[80].mxu1 %v4364_v7  ;;  %v3756_v23 = vadd.f32 %v3692_v5, %v3624_v32  ;;  %v3954_v34 = vmul.f32 %v17847_v62, %v13143_v61  ;;  %v4017_v17 = vmul.f32 %v17837_v21, %v17992_v54  ;;  %v13223_v53 = vpop.f32.mrb[40].mxu1 }
 0x446   : > { %v4018_v24 = vmul.f32 %v17837_v21, %v17990_v31  ;;  %v3887_v57 = vadd.f32 %v3823_v41, %v3755_v47  ;;  %v4141_v28 = vmul.f32 %v17848_v43, %v13161_v39  ;;  %v4142_v50 = vmul.f32 %v17848_v43, %v13169_v51  ;;  %v13227_v41 = vpop.f32.mrb[41].mxu1 }
 0x447   : > { %v17997_v20 = vrot.slane %v17996_v55, 7  ;;  %v17999_v19 = vrot.slane %v17998_v14, 7  ;;  %v3888_v60 = vadd.f32 %v3824_v13, %v3756_v23  ;;  %v4077_v0 = vadd.f32 %v4017_v17, %v3953_v4  ;;  %v13239_v23 = vpop.f32.mrb[42].mxu1 }
 0x448   : > { %v4078_v40 = vadd.f32 %v4018_v24, %v3954_v34  ;;  %v4263_v26 = vadd.f32 %v3887_v57, %v3555_v29  ;;  %v3091_v59 = vrot.slane %v17998_v14, 1  ;;  %v3123_v44 = vrot.slane %v17996_v55, 1  ;;  %v13247_v24 = vpop.f32.mrb[43].mxu1 }
 0x449   : > { %v13209_v35 = vsel %vm676_vm2, %v17999_v19, %v17997_v20  ;;  %v18000_v9 = vmov %v17999_v19  ;;  %v18001_v6 = vmov %v17997_v20  ;;  %v4201_v32 = vadd.f32 %v4141_v28, %v4077_v0 }
 0x44a   : > { %v2995_v38 = vsel %vm676_vm2, %v18001_v6, %v18000_v9  ;;  %v4202_v63 = vadd.f32 %v4142_v50, %v4078_v40  ;;  %v4264_v7 = vadd.f32 %v3888_v60, %v3556_v1  ;;  %v3309_v5 = vmul.f32 %v17842_v45, %v13079_v10 }
 0x44b   : > { %v13219_v33 = vsel %vm485_vm0, %v2995_v38, 0.0  ;;  %v13231_v13 = vsel %vm873_vm3, %v3091_v59, %v3123_v44  ;;  %v3187_v29 = vsel %vm873_vm3, %v3123_v44, %v3091_v59  ;;  %v3310_v47 = vmul.f32 %v17842_v45, %v13069_v11 }
 0x44c   : > { %v3373_v4 = vmul.f32 %v17835_v52, %v17986_v48  ;;  %v4327_v1 = vadd.f32 %v4263_v26, %v4201_v32  ;;  %v4328_v34 = vadd.f32 %v4264_v7, %v4202_v63  ;;  %v13243_v10 = vsel %vm488_vm1, %v3187_v29, 0.0 }
 0x44d   : > { %v3374_v17 = vmul.f32 %v17835_v52, %v17984_v2  ;;  %v3497_v11 = vmul.f32 %v17843_v36, %v13097_v25  ;;  %v3498_v48 = vmul.f32 %v17843_v36, %v13109_v12  ;;  %v3625_v28 = vmul.f32 %v17845_v30, %v13153_v49 }
 0x44e   : > { %v3433_v57 = vadd.f32 %v3373_v4, %v3309_v5  ;;  %v4365_v50 = vpack.c.bf16 %v4328_v34, %v4327_v1  ;;  %v3626_v19 = vmul.f32 %v17845_v30, %v13143_v61  ;;  %v3693_v2 = vmul.f32 %v17836_v8, %v17992_v54  ;;  %v18002_v5 = vld [vmem:[#allocation70_spill] sm:$0xff] }
 0x44f   : > { %v3434_v20 = vadd.f32 %v3374_v17, %v3310_v47  ;;  %v3694_v0 = vmul.f32 %v17836_v8, %v17990_v31  ;;  %v3825_v25 = vmul.f32 %v17846_v46, %v13161_v39  ;;  %v3826_v12 = vmul.f32 %v17846_v46, %v13169_v51  ;;  %v18004_v47 = vld [vmem:[#allocation69_spill] sm:$0xff] }
 0x450   : > { %v3557_v60 = vadd.f32 %v3497_v11, %v3433_v57  ;;  %7833 = vmatprep.mubr.bf16.mxu1 %v4365_v50  ;;  %v3757_v9 = vadd.f32 %v3693_v2, %v3625_v28  ;;  %v3955_v6 = vmul.f32 %v17847_v62, %v13219_v33  ;;  %v3956_v38 = vmul.f32 %v17847_v62, %v13209_v35 }
 0x451   : > { %v3558_v40 = vadd.f32 %v3498_v48, %v3434_v20  ;;  %v3758_v26 = vadd.f32 %v3694_v0, %v3626_v19  ;;  %v4019_v59 = vmul.f32 %v17837_v21, %v17998_v14  ;;  %v4020_v44 = vmul.f32 %v17837_v21, %v17996_v55 }
 0x452   : > { %v4143_v32 = vmul.f32 %v17848_v43, %v13231_v13  ;;  %v3889_v63 = vadd.f32 %v3825_v25, %v3757_v9  ;;  %v4144_v7 = vmul.f32 %v17848_v43, %v13243_v10  ;;  %v18003_v29 = vrot.slane %v18002_v5, 7 }
 0x453   : > { %v18005_v4 = vrot.slane %v18004_v47, 7  ;;  %v3890_v11 = vadd.f32 %v3826_v12, %v3758_v26  ;;  %v4079_v48 = vadd.f32 %v4019_v59, %v3955_v6  ;;  %v4080_v28 = vadd.f32 %v4020_v44, %v3956_v38 }
 0x454   : > { %v18007_v17 = vmov %v18003_v29  ;;  %v4265_v20 = vadd.f32 %v3889_v63, %v3557_v60  ;;  %v3092_v19 = vrot.slane %v18004_v47, 1  ;;  %v3124_v2 = vrot.slane %v18002_v5, 1 }
 0x455   : > { %v13283_v1 = vsel %vm676_vm2, %v18005_v4, %v18003_v29  ;;  %v18006_v34 = vmov %v18005_v4  ;;  %v3311_v0 = vmul.f32 %v17842_v45, %v13153_v49  ;;  %v4203_v25 = vadd.f32 %v4143_v32, %v4079_v48 }
 0x456   : > { %v2996_v57 = vsel %vm676_vm2, %v18007_v17, %v18006_v34  ;;  %v4204_v9 = vadd.f32 %v4144_v7, %v4080_v28  ;;  %v4266_v29 = vadd.f32 %v3890_v11, %v3558_v40  ;;  %v3312_v12 = vmul.f32 %v17842_v45, %v13143_v61 }
 0x457   : > { %v13293_v50 = vsel %vm485_vm0, %v2996_v57, 0.0  ;;  %v13303_v6 = vsel %vm873_vm3, %v3092_v19, %v3124_v2  ;;  %v3188_v60 = vsel %vm873_vm3, %v3124_v2, %v3092_v19  ;;  %v3375_v38 = vmul.f32 %v17835_v52, %v17992_v54 }
 0x458   : > { %v3376_v26 = vmul.f32 %v17835_v52, %v17990_v31  ;;  %v4329_v49 = vadd.f32 %v4265_v20, %v4203_v25  ;;  %v4330_v59 = vadd.f32 %v4266_v29, %v4204_v9  ;;  %v13313_v40 = vsel %vm488_vm1, %v3188_v60, 0.0 }
 0x459   : > { %v3499_v61 = vmul.f32 %v17843_v36, %v13161_v39  ;;  %v3435_v44 = vadd.f32 %v3375_v38, %v3311_v0  ;;  %v3500_v63 = vmul.f32 %v17843_v36, %v13169_v51  ;;  %v3627_v54 = vmul.f32 %v17845_v30, %v13219_v33  ;;  %v18010_v38 = vld [vmem:[#allocation71_spill] sm:$0xff] }
 0x45a   : > { %v3436_v32 = vadd.f32 %v3376_v26, %v3312_v12  ;;  %v4366_v7 = vpack.c.bf16 %v4330_v59, %v4329_v49  ;;  %v3628_v31 = vmul.f32 %v17845_v30, %v13209_v35  ;;  %v3695_v4 = vmul.f32 %v17836_v8, %v17998_v14  ;;  %v18008_v12 = vld [vmem:[#allocation44_spill] sm:$0xff] }
 0x45b   : > { %v3696_v34 = vmul.f32 %v17836_v8, %v17996_v55  ;;  %v3559_v17 = vadd.f32 %v3499_v61, %v3435_v44  ;;  %v3827_v57 = vmul.f32 %v17846_v46, %v13231_v13  ;;  %v3828_v51 = vmul.f32 %v17846_v46, %v13243_v10 }
 0x45c   : > { %v3560_v39 = vadd.f32 %v3500_v63, %v3436_v32  ;;  %7834 = vmatmul.mubr.bf16.gmra.mrb[84].mxu1 %v4366_v7  ;;  %v3759_v11 = vadd.f32 %v3695_v4, %v3627_v54  ;;  %v3957_v28 = vmul.f32 %v17847_v62, %v13293_v50  ;;  %v3958_v20 = vmul.f32 %v17847_v62, %v13283_v1 }
 0x45d   : > { %v3760_v48 = vadd.f32 %v3696_v34, %v3628_v31  ;;  %v4021_v19 = vmul.f32 %v17837_v21, %v18004_v47  ;;  %v4022_v2 = vmul.f32 %v17837_v21, %v18002_v5  ;;  %v4145_v0 = vmul.f32 %v17848_v43, %v13303_v6  ;;  %v13362_v31 = vpop.f32.mrb[44].mxu1 }
 0x45e   : > { %v4146_v25 = vmul.f32 %v17848_v43, %v13313_v40  ;;  %v3891_v9 = vadd.f32 %v3827_v57, %v3759_v11  ;;  %v18009_v60 = vrot.slane %v18008_v12, 7  ;;  %v18011_v26 = vrot.slane %v18010_v38, 7  ;;  %18014 = vst [vmem:[#allocation24_spill] sm:$0xff] %v13362_v31  ;;  %v13367_v11 = vpop.f32.mrb[45].mxu1 }
 0x45f   : > { %v3892_v29 = vadd.f32 %v3828_v51, %v3760_v48  ;;  %v4081_v32 = vadd.f32 %v4021_v19, %v3957_v28  ;;  %v4082_v63 = vadd.f32 %v4022_v2, %v3958_v20  ;;  %v3093_v7 = vrot.slane %v18010_v38, 1  ;;  %v13373_v2 = vpop.f32.mrb[46].mxu1 }
 0x460   : > { %v13349_v49 = vsel %vm676_vm2, %v18011_v26, %v18009_v60  ;;  %v18012_v59 = vmov %v18011_v26  ;;  %v18013_v61 = vmov %v18009_v60  ;;  %v4267_v4 = vadd.f32 %v3891_v9, %v3559_v17  ;;  %18015 = vst [vmem:[#allocation29_spill] sm:$0xff] %v13373_v2 }
 0x461   : > { %v2997_v44 = vsel %vm676_vm2, %v18013_v61, %v18012_v59  ;;  %v4268_v34 = vadd.f32 %v3892_v29, %v3560_v39  ;;  %v3125_v57 = vrot.slane %v18008_v12, 1  ;;  %v3313_v51 = vmul.f32 %v17842_v45, %v13219_v33 }
 0x462   : > { %v13359_v54 = vsel %vm485_vm0, %v2997_v44, 0.0  ;;  %v4205_v48 = vadd.f32 %v4145_v0, %v4081_v32  ;;  %v4206_v28 = vadd.f32 %v4146_v25, %v4082_v63  ;;  %v3314_v20 = vmul.f32 %v17842_v45, %v13209_v35  ;;  %v13385_v25 = vpop.f32.mrb[47].mxu1 }
 0x463   : > { %v3377_v19 = vmul.f32 %v17835_v52, %v17998_v14  ;;  %v13377_v17 = vsel %vm873_vm3, %v3093_v7, %v3125_v57  ;;  %v3189_v39 = vsel %vm873_vm3, %v3125_v57, %v3093_v7  ;;  %v3378_v33 = vmul.f32 %v17835_v52, %v17996_v55 }
 0x464   : > { %v3501_v0 = vmul.f32 %v17843_v36, %v13231_v13  ;;  %v4331_v35 = vadd.f32 %v4267_v4, %v4205_v48  ;;  %v4332_v9 = vadd.f32 %v4268_v34, %v4206_v28  ;;  %v13389_v14 = vsel %vm488_vm1, %v3189_v39, 0.0  ;;  %v18016_v39 = vld [vmem:[#allocation73_spill] sm:$0xff] }
 0x465   : > { %v3437_v29 = vadd.f32 %v3377_v19, %v3313_v51  ;;  %v3438_v60 = vadd.f32 %v3378_v33, %v3314_v20  ;;  %v3502_v26 = vmul.f32 %v17843_v36, %v13243_v10  ;;  %v3629_v59 = vmul.f32 %v17845_v30, %v13293_v50 }
 0x466   : > { %v3630_v55 = vmul.f32 %v17845_v30, %v13283_v1  ;;  %v4367_v13 = vpack.c.bf16 %v4332_v9, %v4331_v35  ;;  %v3697_v44 = vmul.f32 %v17836_v8, %v18004_v47  ;;  %v3698_v32 = vmul.f32 %v17836_v8, %v18002_v5 }
 0x467   : > { %v3561_v61 = vadd.f32 %v3501_v0, %v3437_v29  ;;  %v3562_v63 = vadd.f32 %v3502_v26, %v3438_v60  ;;  %v3829_v7 = vmul.f32 %v17846_v46, %v13303_v6  ;;  %v3830_v10 = vmul.f32 %v17846_v46, %v13313_v40  ;;  %v18018_v0 = vld [vmem:[#allocation72_spill] sm:$0xff] }
 0x468   : > { %v3959_v4 = vmul.f32 %v17847_v62, %v13359_v54  ;;  %7837 = vmatprep.mubr.bf16.mxu1 %v4367_v13  ;;  %v3761_v34 = vadd.f32 %v3697_v44, %v3629_v59  ;;  %v3762_v57 = vadd.f32 %v3698_v32, %v3630_v55  ;;  %v3960_v51 = vmul.f32 %v17847_v62, %v13349_v49 }
 0x469   : > { %v4023_v48 = vmul.f32 %v17837_v21, %v18010_v38  ;;  %v4024_v28 = vmul.f32 %v17837_v21, %v18008_v12  ;;  %v4147_v20 = vmul.f32 %v17848_v43, %v13377_v17  ;;  %v4148_v19 = vmul.f32 %v17848_v43, %v13389_v14 }
 0x46a   : > { %v18017_v33 = vrot.slane %v18016_v39, 7  ;;  %v18019_v35 = vrot.slane %v18018_v0, 7  ;;  %v3893_v29 = vadd.f32 %v3829_v7, %v3761_v34  ;;  %v3894_v60 = vadd.f32 %v3830_v10, %v3762_v57 }
 0x46b   : > { %v4083_v26 = vadd.f32 %v4023_v48, %v3959_v4  ;;  %v4084_v44 = vadd.f32 %v4024_v28, %v3960_v51  ;;  %v18022_v2 = vrot.slane %v18016_v39, 1  ;;  %v18023_v31 = vrot.slane %v18018_v0, 1 }
 0x46c   : > { %v2966_v9 = vsel %vm676_vm2, %v18019_v35, %v18017_v33  ;;  %v18020_v59 = vmov %v18019_v35  ;;  %v18021_v55 = vmov %v18017_v33  ;;  %v4269_v51 = vadd.f32 %v3893_v29, %v3561_v61 }
 0x46d   : > { %v2998_v13 = vsel %vm676_vm2, %v18021_v55, %v18020_v59  ;;  %v13437_v7 = vsel %vm873_vm3, %v18023_v31, %v18022_v2  ;;  %v18024_v10 = vmov %v18023_v31  ;;  %v18025_v4 = vmov %v18022_v2 }
 0x46e   : > { %v3061_v32 = vsel %vm485_vm0, %v2998_v13, 0.0  ;;  %v3190_v34 = vsel %vm873_vm3, %v18025_v4, %v18024_v10  ;;  %v4207_v57 = vadd.f32 %v4147_v20, %v4083_v26  ;;  %v4270_v48 = vadd.f32 %v3894_v60, %v3562_v63 }
 0x46f   : > { %v3254_v28 = vsel %vm488_vm1, %v3190_v34, 0.0  ;;  %v4208_v33 = vadd.f32 %v4148_v19, %v4084_v44  ;;  %v3315_v35 = vmul.f32 %v17842_v45, %v13293_v50  ;;  %v3316_v31 = vmul.f32 %v17842_v45, %v13283_v1 }
 0x470   : > { %v3379_v2 = vmul.f32 %v17835_v52, %v18004_v47  ;;  %v4333_v59 = vadd.f32 %v4269_v51, %v4207_v57  ;;  %v3380_v55 = vmul.f32 %v17835_v52, %v18002_v5  ;;  %v3503_v61 = vmul.f32 %v17843_v36, %v13303_v6 }
 0x471   : > { %v3504_v63 = vmul.f32 %v17843_v36, %v13313_v40  ;;  %v4334_v20 = vadd.f32 %v4270_v48, %v4208_v33  ;;  %v3631_v50 = vmul.f32 %v17845_v30, %v13359_v54  ;;  %v3632_v1 = vmul.f32 %v17845_v30, %v13349_v49 }
 0x472   : > { %v3439_v19 = vadd.f32 %v3379_v2, %v3315_v35  ;;  %v3440_v29 = vadd.f32 %v3380_v55, %v3316_v31  ;;  %v3699_v47 = vmul.f32 %v17836_v8, %v18010_v38  ;;  %v3700_v5 = vmul.f32 %v17836_v8, %v18008_v12 }
 0x473   : > { %v3831_v6 = vmul.f32 %v17846_v46, %v13377_v17  ;;  %v4368_v60 = vpack.c.bf16 %v4334_v20, %v4333_v59  ;;  %v3832_v26 = vmul.f32 %v17846_v46, %v13389_v14  ;;  %v3961_v13 = vmul.f32 %v17847_v62, %v3061_v32 }
 0x474   : > { %v3563_v40 = vadd.f32 %v3503_v61, %v3439_v19  ;;  %v3564_v44 = vadd.f32 %v3504_v63, %v3440_v29  ;;  %v3763_v10 = vadd.f32 %v3699_v47, %v3631_v50  ;;  %v3764_v4 = vadd.f32 %v3700_v5, %v3632_v1 }
 0x475   : > { %v3962_v34 = vmul.f32 %v17847_v62, %v2966_v9  ;;  %7838 = vmatmul.mubr.bf16.gmra.mrb[88].mxu1 %v4368_v60  ;;  %v4025_v57 = vmul.f32 %v17837_v21, %v18018_v0  ;;  %v4026_v51 = vmul.f32 %v17837_v21, %v18016_v39  ;;  %v4149_v48 = vmul.f32 %v17848_v43, %v13437_v7 }
 0x476   : > { %v4150_v33 = vmul.f32 %v17848_v43, %v3254_v28  ;;  %v3895_v35 = vadd.f32 %v3831_v6, %v3763_v10  ;;  %v3896_v31 = vadd.f32 %v3832_v26, %v3764_v4  ;;  %v3317_v2 = vmul.f32 %v17842_v45, %v13359_v54  ;;  %v13492_v54 = vpop.f32.mrb[48].mxu1 }
 0x477   : > { %v3318_v62 = vmul.f32 %v17842_v45, %v13349_v49  ;;  %v4085_v59 = vadd.f32 %v4025_v57, %v3961_v13  ;;  %v4086_v55 = vadd.f32 %v4026_v51, %v3962_v34  ;;  %v3381_v61 = vmul.f32 %v17835_v52, %v18010_v38  ;;  %v13494_v29 = vpop.f32.mrb[49].mxu1 }
 0x478   : > { %v3382_v21 = vmul.f32 %v17835_v52, %v18008_v12  ;;  %v4271_v63 = vadd.f32 %v3895_v35, %v3563_v40  ;;  %v4272_v20 = vadd.f32 %v3896_v31, %v3564_v44  ;;  %v3505_v43 = vmul.f32 %v17843_v36, %v13377_v17  ;;  %v13502_v47 = vpop.f32.mrb[50].mxu1 }
 0x479   : > { %v3506_v19 = vmul.f32 %v17843_v36, %v13389_v14  ;;  %v4209_v50 = vadd.f32 %v4149_v48, %v4085_v59  ;;  %v4210_v45 = vadd.f32 %v4150_v33, %v4086_v55  ;;  %v3441_v49 = vadd.f32 %v3381_v61, %v3317_v2  ;;  %v13504_v60 = vpop.f32.mrb[51].mxu1 }
 0x47a   : > { %v3442_v1 = vadd.f32 %v3382_v21, %v3318_v62  ;;  %v3633_v38 = vmul.f32 %v17845_v30, %v3061_v32  ;;  %v3634_v52 = vmul.f32 %v17845_v30, %v2966_v9  ;;  %v3701_v12 = vmul.f32 %v17836_v8, %v18018_v0 }
 0x47b   : > { %v3702_v17 = vmul.f32 %v17836_v8, %v18016_v39  ;;  %v4335_v36 = vadd.f32 %v4271_v63, %v4209_v50  ;;  %v4336_v14 = vadd.f32 %v4272_v20, %v4210_v45  ;;  %v3565_v5 = vadd.f32 %v3505_v43, %v3441_v49 }
 0x47c   : > { %v3566_v6 = vadd.f32 %v3506_v19, %v3442_v1  ;;  %v3765_v40 = vadd.f32 %v3701_v12, %v3633_v38  ;;  %v3833_v32 = vmul.f32 %v17846_v46, %v13437_v7  ;;  %v3834_v30 = vmul.f32 %v17846_v46, %v3254_v28  ;;  %v13538_v1 = vpop.f32.mrb[52].mxu1 }
 0x47d   : > { %v3766_v26 = vadd.f32 %v3702_v17, %v3634_v52  ;;  %v4369_v9 = vpack.c.bf16 %v4336_v14, %v4335_v36  ;;  %v4708_v8 = vadd.f32 %v12961_v16, %v12945_v58  ;;  %v4777_v39 = vmul.f32 %v12945_v58, %v12945_v58  ;;  %v13541_v52 = vpop.f32.mrb[53].mxu1 }
 0x47e   : > { %v3897_v0 = vadd.f32 %v3833_v32, %v3765_v40  ;;  %v4778_v44 = vmul.f32 %v12961_v16, %v12961_v16  ;;  %v4779_v46 = vmul.f32 %v12937_v37, %v12937_v37  ;;  %v4780_v51 = vmul.f32 %v12949_v22, %v12949_v22  ;;  %v13543_v17 = vpop.f32.mrb[54].mxu1 }
 0x47f   : > { %v3898_v13 = vadd.f32 %v3834_v30, %v3766_v26  ;;  %7841 = vmatprep.mubr.bf16.mxu1 %v4369_v9  ;;  %v4709_v34 = vadd.f32 %v12937_v37, %v4708_v8  ;;  %v4781_v33 = vmul.f32 %v13087_v15, %v13087_v15  ;;  %v4782_v2 = vmul.f32 %v13105_v27, %v13105_v27  ;;  %v13546_v14 = vpop.f32.mrb[55].mxu1 }
 0x480   : > { %v4273_v10 = vadd.f32 %v3897_v0, %v3565_v5  ;;  %v4841_v7 = vadd.f32 %v4778_v44, %v4777_v39  ;;  %v4783_v61 = vmul.f32 %v13082_v3, %v13082_v3  ;;  %v4784_v20 = vmul.f32 %v13093_v42, %v13093_v42  ;;  %v18026_v44 = vld [vmem:[#allocation24_spill] sm:$0xff] }
 0x481   : > { %v4274_v4 = vadd.f32 %v3898_v13, %v3566_v6  ;;  %v4710_v57 = vadd.f32 %v12949_v22, %v4709_v34  ;;  %v4785_v19 = vmul.f32 %v13227_v41, %v13227_v41  ;;  %v4786_v49 = vmul.f32 %v13247_v24, %v13247_v24 }
 0x482   : > { %v4842_v48 = vadd.f32 %v4841_v7, %v4779_v46  ;;  %v4787_v5 = vmul.f32 %v13223_v53, %v13223_v53  ;;  %v4788_v26 = vmul.f32 %v13239_v23, %v13239_v23  ;;  %v4789_v30 = vmul.f32 %v13367_v11, %v13367_v11  ;;  %v18027_v46 = vld [vmem:[#allocation29_spill] sm:$0xff] }
 0x483   : > { %v4370_v28 = vpack.c.bf16 %v4274_v4, %v4273_v10  ;;  %v4711_v35 = vadd.f32 %v4710_v57, %v13087_v15  ;;  %v4790_v13 = vmul.f32 %v13385_v25, %v13385_v25  ;;  %v4791_v4 = vmul.f32 %v18026_v44, %v18026_v44 }
 0x484   : > { %v4843_v31 = vadd.f32 %v4842_v48, %v4780_v51  ;;  %v4793_v51 = vmul.f32 %v13494_v29, %v13494_v29 }
 0x485   : > { %7842 = vmatmul.mubr.bf16.gmra.mrb[92].mxu1 %v4370_v28  ;;  %v4712_v62 = vadd.f32 %v4711_v35, %v13105_v27  ;;  %v4792_v28 = vmul.f32 %v18027_v46, %v18027_v46  ;;  %v4794_v35 = vmul.f32 %v13504_v60, %v13504_v60 }
 0x486   : > { %v4844_v59 = vadd.f32 %v4843_v31, %v4781_v33 }
 0x487   : > { %v4713_v55 = vadd.f32 %v13082_v3, %v4712_v62 }
 0x488   : > { %v4845_v21 = vadd.f32 %v4844_v59, %v4782_v2  ;;  %v4795_v59 = vmul.f32 %v13492_v54, %v13492_v54 }
 0x489   : > { %v4714_v63 = vadd.f32 %v13093_v42, %v4713_v55 }
 0x48a   : > { %v4846_v43 = vadd.f32 %v4845_v21, %v4783_v61  ;;  %v4796_v21 = vmul.f32 %v13502_v47, %v13502_v47 }
 0x48b   : > { %v4715_v50 = vadd.f32 %v4714_v63, %v13227_v41 }
 0x48c   : > { %v4847_v45 = vadd.f32 %v4846_v43, %v4784_v20  ;;  %v4797_v20 = vmul.f32 %v13541_v52, %v13541_v52 }
 0x48d   : > { %v4716_v38 = vadd.f32 %v4715_v50, %v13247_v24 }
 0x48e   : > { %v4848_v12 = vadd.f32 %v4847_v45, %v4785_v19 }
 0x48f   : > { %v4717_v36 = vadd.f32 %v13223_v53, %v4716_v38 }
 0x490   : > { %v4849_v6 = vadd.f32 %v4848_v12, %v4786_v49  ;;  %v4798_v49 = vmul.f32 %v13546_v14, %v13546_v14 }
 0x491   : > { %v4718_v40 = vadd.f32 %v13239_v23, %v4717_v36  ;;  %v13579_v43 = vpop.f32.mrb[56].mxu1 }
 0x492   : > { %v4850_v32 = vadd.f32 %v4849_v6, %v4787_v5  ;;  %v13582_v50 = vpop.f32.mrb[57].mxu1 }
 0x493   : > { %v4719_v9 = vadd.f32 %v4718_v40, %v13367_v11  ;;  %v13586_v38 = vpop.f32.mrb[58].mxu1  ;;  %v4799_v40 = vmul.f32 %v13538_v1, %v13538_v1 }
 0x494   : > { %v4851_v0 = vadd.f32 %v4850_v32, %v4788_v26  ;;  %v13589_v36 = vpop.f32.mrb[59].mxu1 }
 0x495   : > { %v4720_v8 = vadd.f32 %v4719_v9, %v13385_v25 }
 0x496   : > { %v4852_v39 = vadd.f32 %v4851_v0, %v4789_v30  ;;  %v4800_v30 = vmul.f32 %v13543_v17, %v13543_v17  ;;  %v4801_v0 = vmul.f32 %v13582_v50, %v13582_v50 }
 0x497   : > { %v4721_v10 = vadd.f32 %v18026_v44, %v4720_v8 }
 0x498   : > { %v4853_v34 = vadd.f32 %v4852_v39, %v4790_v13  ;;  %v4802_v39 = vmul.f32 %v13589_v36, %v13589_v36 }
 0x499   : > { %v4722_v7 = vadd.f32 %v18027_v46, %v4721_v10 }
 0x49a   : > { %v4854_v57 = vadd.f32 %v4853_v34, %v4791_v4 }
 0x49b   : > { %v4723_v48 = vadd.f32 %v4722_v7, %v13494_v29  ;;  %v4803_v7 = vmul.f32 %v13579_v43, %v13579_v43 }
 0x49c   : > { %v4855_v33 = vadd.f32 %v4854_v57, %v4792_v28 }
 0x49d   : > { %v4724_v31 = vadd.f32 %v4723_v48, %v13504_v60  ;;  %v4804_v48 = vmul.f32 %v13586_v38, %v13586_v38 }
 0x49e   : > { %v4856_v2 = vadd.f32 %v4855_v33, %v4793_v51 }
 0x49f   : > { %v4725_v62 = vadd.f32 %v13492_v54, %v4724_v31 }
 0x4a0   : > { %v4857_v55 = vadd.f32 %v4856_v2, %v4794_v35 }
 0x4a1   : > { %v4726_v61 = vadd.f32 %v13502_v47, %v4725_v62 }
 0x4a2   : > { %v4858_v63 = vadd.f32 %v4857_v55, %v4795_v59  ;;  %v13606_v57 = vpop.f32.mrb[60].mxu1 }
 0x4a3   : > { %v4727_v19 = vadd.f32 %v4726_v61, %v13541_v52  ;;  %v13611_v35 = vpop.f32.mrb[61].mxu1 }
 0x4a4   : > { %v4859_v45 = vadd.f32 %v4858_v63, %v4796_v21  ;;  %v4805_v2 = vmul.f32 %v13611_v35, %v13611_v35  ;;  %v13616_v62 = vpop.f32.mrb[62].mxu1 }
 0x4a5   : > { %v4728_v12 = vadd.f32 %v4727_v19, %v13546_v14  ;;  %v13618_v55 = vpop.f32.mrb[63].mxu1  ;;  %v4807_v19 = vmul.f32 %v13606_v57, %v13606_v57 }
 0x4a6   : > { %v4860_v5 = vadd.f32 %v4859_v45, %v4797_v20  ;;  %v4806_v21 = vmul.f32 %v13618_v55, %v13618_v55 }
 0x4a7   : > { %v4729_v6 = vadd.f32 %v13538_v1, %v4728_v12  ;;  %v4808_v12 = vmul.f32 %v13616_v62, %v13616_v62 }
 0x4a8   : > { %v4861_v26 = vadd.f32 %v4860_v5, %v4798_v49 }
 0x4a9   : > { %v4730_v32 = vadd.f32 %v13543_v17, %v4729_v6 }
 0x4aa   : > { %v4862_v9 = vadd.f32 %v4861_v26, %v4799_v40 }
 0x4ab   : > { %v4731_v13 = vadd.f32 %v4730_v32, %v13582_v50 }
 0x4ac   : > { %v4863_v8 = vadd.f32 %v4862_v9, %v4800_v30 }
 0x4ad   : > { %v4732_v10 = vadd.f32 %v4731_v13, %v13589_v36 }
 0x4ae   : > { %v4864_v4 = vadd.f32 %v4863_v8, %v4801_v0 }
 0x4af   : > { %v4733_v34 = vadd.f32 %v13579_v43, %v4732_v10 }
 0x4b0   : > { %v4865_v28 = vadd.f32 %v4864_v4, %v4802_v39 }
 0x4b1   : > { %v4734_v51 = vadd.f32 %v13586_v38, %v4733_v34 }
 0x4b2   : > { %v4866_v33 = vadd.f32 %v4865_v28, %v4803_v7 }
 0x4b3   : > { %v4735_v31 = vadd.f32 %v4734_v51, %v13611_v35 }
 0x4b4   : > { %v4867_v59 = vadd.f32 %v4866_v33, %v4804_v48 }
 0x4b5   : > { %v4736_v61 = vadd.f32 %v4735_v31, %v13618_v55 }
 0x4b6   : > { %v4868_v63 = vadd.f32 %v4867_v59, %v4805_v2 }
 0x4b7   : > { %v4737_v20 = vadd.f32 %v13606_v57, %v4736_v61 }
 0x4b8   : > { %v4869_v45 = vadd.f32 %v4868_v63, %v4806_v21 }
 0x4b9   : > { %v4738_v49 = vadd.f32 %v13616_v62, %v4737_v20 }
 0x4ba   : > { %v4870_v5 = vadd.f32 %v4869_v45, %v4807_v19  ;;  %v13629_v40 = vpop.f32.mrb[64].mxu1 }
 0x4bb   : > { %v13631_v26 = vpop.f32.mrb[65].mxu1  ;;  %v4811_v10 = vmul.f32 %v13629_v40, %v13629_v40 }
 0x4bc   : > { %v4871_v6 = vadd.f32 %v4870_v5, %v4808_v12  ;;  %v4739_v32 = vadd.f32 %v4738_v49, %v13631_v26  ;;  %v4809_v30 = vmul.f32 %v13631_v26, %v13631_v26  ;;  %v13636_v9 = vpop.f32.mrb[66].mxu1 }
 0x4bd   : > { %v13638_v0 = vpop.f32.mrb[67].mxu1  ;;  %v4812_v7 = vmul.f32 %v13636_v9, %v13636_v9 }
 0x4be   : > { %v4872_v13 = vadd.f32 %v4871_v6, %v4809_v30  ;;  %v4740_v8 = vadd.f32 %v4739_v32, %v13638_v0  ;;  %v4810_v39 = vmul.f32 %v13638_v0, %v13638_v0 }
 0x4c0   : > { %v4741_v4 = vadd.f32 %v13629_v40, %v4740_v8  ;;  %v4873_v34 = vadd.f32 %v4872_v13, %v4810_v39 }
 0x4c2   : > { %v4874_v28 = vadd.f32 %v4873_v34, %v4811_v10  ;;  %v4742_v51 = vadd.f32 %v13636_v9, %v4741_v4 }
 0x4c4   : > { %v4875_v48 = vadd.f32 %v4874_v28, %v4812_v7 }
 0x4d1   : > { %v13649_v33 = vpop.f32.mrb[68].mxu1 }
 0x4d2   : > { %v13651_v31 = vpop.f32.mrb[69].mxu1  ;;  %v4815_v45 = vmul.f32 %v13649_v33, %v13649_v33 }
 0x4d3   : > { %v4743_v2 = vadd.f32 %v4742_v51, %v13651_v31  ;;  %v4813_v59 = vmul.f32 %v13651_v31, %v13651_v31  ;;  %v13656_v61 = vpop.f32.mrb[70].mxu1 }
 0x4d4   : > { %v13658_v21 = vpop.f32.mrb[71].mxu1  ;;  %v4816_v5 = vmul.f32 %v13656_v61, %v13656_v61 }
 0x4d5   : > { %v4876_v63 = vadd.f32 %v4875_v48, %v4813_v59  ;;  %v4744_v20 = vadd.f32 %v4743_v2, %v13658_v21  ;;  %v4814_v19 = vmul.f32 %v13658_v21, %v13658_v21 }
 0x4d7   : > { %v4745_v49 = vadd.f32 %v13649_v33, %v4744_v20  ;;  %v4877_v12 = vadd.f32 %v4876_v63, %v4814_v19 }
 0x4d9   : > { %v4878_v6 = vadd.f32 %v4877_v12, %v4815_v45  ;;  %v4746_v32 = vadd.f32 %v13656_v61, %v4745_v49 }
 0x4db   : > { %v4879_v30 = vadd.f32 %v4878_v6, %v4816_v5 }
 0x4e9   : > { %v13669_v13 = vpop.f32.mrb[72].mxu1 }
 0x4ea   : > { %18028 = vst [vmem:[#allocation28_spill] sm:$0xff] %v13669_v13  ;;  %v13671_v8 = vpop.f32.mrb[73].mxu1  ;;  %v4819_v48 = vmul.f32 %v13669_v13, %v13669_v13 }
 0x4eb   : > { %v4747_v39 = vadd.f32 %v4746_v32, %v13671_v8  ;;  %v4817_v10 = vmul.f32 %v13671_v8, %v13671_v8  ;;  %v13676_v4 = vpop.f32.mrb[74].mxu1 }
 0x4ec   : > { %18029 = vst [vmem:[#allocation33_spill] sm:$0xff] %v13676_v4  ;;  %v13678_v34 = vpop.f32.mrb[75].mxu1  ;;  %v4820_v63 = vmul.f32 %v13676_v4, %v13676_v4 }
 0x4ed   : > { %v4880_v7 = vadd.f32 %v4879_v30, %v4817_v10  ;;  %v4748_v28 = vadd.f32 %v4747_v39, %v13678_v34  ;;  %v4818_v51 = vmul.f32 %v13678_v34, %v13678_v34 }
 0x4ef   : > { %v4749_v2 = vadd.f32 %v13669_v13, %v4748_v28  ;;  %v4881_v59 = vadd.f32 %v4880_v7, %v4818_v51 }
 0x4f1   : > { %v4882_v20 = vadd.f32 %v4881_v59, %v4819_v48  ;;  %v4750_v19 = vadd.f32 %v13676_v4, %v4749_v2 }
 0x4f3   : > { %v4883_v45 = vadd.f32 %v4882_v20, %v4820_v63 }
 0x500   : > { %v13689_v49 = vpop.f32.mrb[76].mxu1 }
 0x501   : > { %18030 = vst [vmem:[#allocation34_spill] sm:$0xff] %v13689_v49  ;;  %v13691_v12 = vpop.f32.mrb[77].mxu1  ;;  %v4823_v28 = vmul.f32 %v13689_v49, %v13689_v49 }
 0x502   : > { %18031 = vst [vmem:[#allocation26_spill] sm:$0xff] %v13691_v12  ;;  %v4751_v5 = vadd.f32 %v4750_v19, %v13691_v12  ;;  %v4821_v6 = vmul.f32 %v13691_v12, %v13691_v12  ;;  %v13696_v32 = vpop.f32.mrb[78].mxu1 }
 0x503   : > { %18032 = vst [vmem:[#allocation31_spill] sm:$0xff] %v13696_v32  ;;  %v13698_v30 = vpop.f32.mrb[79].mxu1  ;;  %v4824_v2 = vmul.f32 %v13696_v32, %v13696_v32 }
 0x504   : > { %18033 = vst [vmem:[#allocation30_spill] sm:$0xff] %v13698_v30  ;;  %v4884_v39 = vadd.f32 %v4883_v45, %v4821_v6  ;;  %v4752_v10 = vadd.f32 %v4751_v5, %v13698_v30  ;;  %v4822_v7 = vmul.f32 %v13698_v30, %v13698_v30 }
 0x506   : > { %v4753_v51 = vadd.f32 %v13689_v49, %v4752_v10  ;;  %v4885_v48 = vadd.f32 %v4884_v39, %v4822_v7 }
 0x508   : > { %v4886_v59 = vadd.f32 %v4885_v48, %v4823_v28  ;;  %v4754_v63 = vadd.f32 %v13696_v32, %v4753_v51 }
 0x50a   : > { %v4887_v20 = vadd.f32 %v4886_v59, %v4824_v2 }
 0x518   : > { %v13709_v19 = vpop.f32.mrb[80].mxu1 }
 0x519   : > { %18034 = vst [vmem:[#allocation32_spill] sm:$0xff] %v13709_v19  ;;  %v13711_v45 = vpop.f32.mrb[81].mxu1  ;;  %v4827_v51 = vmul.f32 %v13709_v19, %v13709_v19 }
 0x51a   : > { %18035 = vst [vmem:[#allocation38_spill] sm:$0xff] %v13711_v45  ;;  %v4755_v5 = vadd.f32 %v4754_v63, %v13711_v45  ;;  %v4825_v6 = vmul.f32 %v13711_v45, %v13711_v45  ;;  %v13716_v18 = vpop.f32.mrb[82].mxu1 }
 0x51b   : > { %18036 = vst [vmem:[#allocation36_spill] sm:$0xff] %v13716_v18  ;;  %v13718_v10 = vpop.f32.mrb[83].mxu1  ;;  %v4828_v59 = vmul.f32 %v13716_v18, %v13716_v18 }
 0x51c   : > { %18037 = vst [vmem:[#allocation39_spill] sm:$0xff] %v13718_v10  ;;  %v4888_v39 = vadd.f32 %v4887_v20, %v4825_v6  ;;  %v4756_v7 = vadd.f32 %v4755_v5, %v13718_v10  ;;  %v4826_v28 = vmul.f32 %v13718_v10, %v13718_v10 }
 0x51e   : > { %v4757_v48 = vadd.f32 %v13709_v19, %v4756_v7  ;;  %v4889_v2 = vadd.f32 %v4888_v39, %v4826_v28 }
 0x520   : > { %v4890_v63 = vadd.f32 %v4889_v2, %v4827_v51  ;;  %v4758_v56 = vadd.f32 %v13716_v18, %v4757_v48 }
 0x522   : > { %v4891_v45 = vadd.f32 %v4890_v63, %v4828_v59 }
 0x52f   : > { %v13729_v32 = vpop.f32.mrb[84].mxu1 }
 0x530   : > { %18038 = vst [vmem:[#allocation40_spill] sm:$0xff] %v13729_v32  ;;  %v13731_v20 = vpop.f32.mrb[85].mxu1  ;;  %v4831_v48 = vmul.f32 %v13729_v32, %v13729_v32 }
 0x531   : > { %18039 = vst [vmem:[#allocation41_spill] sm:$0xff] %v13731_v20  ;;  %v4759_v5 = vadd.f32 %v4758_v56, %v13731_v20  ;;  %v4829_v6 = vmul.f32 %v13731_v20, %v13731_v20  ;;  %v13736_v10 = vpop.f32.mrb[86].mxu1 }
 0x532   : > { %18040 = vst [vmem:[#allocation35_spill] sm:$0xff] %v13736_v10  ;;  %v13738_v7 = vpop.f32.mrb[87].mxu1  ;;  %v4832_v59 = vmul.f32 %v13736_v10, %v13736_v10 }
 0x533   : > { %18041 = vst [vmem:[#allocation37_spill] sm:$0xff] %v13738_v7  ;;  %v4892_v39 = vadd.f32 %v4891_v45, %v4829_v6  ;;  %v4760_v28 = vadd.f32 %v4759_v5, %v13738_v7  ;;  %v4830_v51 = vmul.f32 %v13738_v7, %v13738_v7 }
 0x535   : > { %v4761_v56 = vadd.f32 %v13729_v32, %v4760_v28  ;;  %v4893_v2 = vadd.f32 %v4892_v39, %v4830_v51  ;;  %v8011_v39 = vld [vmem:[%s8311_s14 + $0x80] sm:$0xff]   ;;  %v8012_v28 = vld [vmem:[%s8311_s14 + $0x88] sm:$0xff]  }
 0x536   : > { %7845 = vmatprep.subr.bf16.mxu0 %v8011_v39 }
 0x537   : > { %v4894_v63 = vadd.f32 %v4893_v2, %v4831_v48  ;;  %v4762_v20 = vadd.f32 %v13736_v10, %v4761_v56  ;;  %7846 = vmatpush3.bf16.msra.mxu0 %v8011_v39  ;;  %v8014_v10 = vld [vmem:[%s8311_s14 + $0x98] sm:$0xff]   ;;  %v8015_v39 = vld [vmem:[%s8311_s14 + $0xa0] sm:$0xff]  }
 0x538   : > { %7847 = vmatprep.subr.bf16.mxu0 %v8012_v28 }
 0x539   : > { %v4895_v18 = vadd.f32 %v4894_v63, %v4832_v59 }
 0x53b   : > { %7848 = vmatpush3.bf16.msra.mxu0 %v8012_v28 }
 0x548   : > { %v13749_v45 = vpop.f32.mrb[88].mxu1 }
 0x549   : > { %18042 = vst [vmem:[#allocation42_spill] sm:$0xff] %v13749_v45  ;;  %v13751_v6 = vpop.f32.mrb[89].mxu1 }
 0x54a   : > { %18043 = vst [vmem:[#allocation43_spill] sm:$0xff] %v13751_v6  ;;  %v4763_v5 = vadd.f32 %v4762_v20, %v13751_v6  ;;  %v4833_v7 = vmul.f32 %v13751_v6, %v13751_v6  ;;  %v13756_v19 = vpop.f32.mrb[90].mxu1  ;;  %v4835_v20 = vmul.f32 %v13749_v45, %v13749_v45  ;;  %v8013_v6 = vld [vmem:[%s8311_s14 + $0x90] sm:$0xff]  }
 0x54b   : > { %18044 = vst [vmem:[#allocation14_spill] sm:$0xff] %v13756_v19  ;;  %v13760_v51 = vpop.f32.mrb[91].mxu1  ;;  %7849 = vmatprep.subr.bf16.mxu0 %v8013_v6 }
 0x54c   : > { %18045 = vst [vmem:[#allocation13_spill] sm:$0xff] %v13760_v51  ;;  %v4896_v48 = vadd.f32 %v4895_v18, %v4833_v7  ;;  %v4764_v56 = vadd.f32 %v4763_v5, %v13760_v51  ;;  %v4834_v2 = vmul.f32 %v13760_v51, %v13760_v51  ;;  %v4836_v18 = vmul.f32 %v13756_v19, %v13756_v19 }
 0x54d   : > { %7850 = vmatpush3.bf16.msra.mxu0 %v8013_v6 }
 0x54e   : > { %v4765_v59 = vadd.f32 %v13749_v45, %v4764_v56  ;;  %v4897_v63 = vadd.f32 %v4896_v48, %v4834_v2  ;;  %7851 = vmatprep.subr.bf16.mxu0 %v8014_v10 }
 0x550   : > { %v4898_v7 = vadd.f32 %v4897_v63, %v4835_v20  ;;  %v4766_v5 = vadd.f32 %v13756_v19, %v4765_v59  ;;  %v8016_v59 = vld [vmem:[%s8311_s14 + $0xa8] sm:$0xff]  }
 0x551   : > { %7852 = vmatpush3.bf16.msra.mxu0 %v8014_v10 }
 0x552   : > { %v4899_v51 = vadd.f32 %v4898_v7, %v4836_v18  ;;  %7853 = vmatprep.subr.bf16.mxu0 %v8015_v39 }
 0x555   : > { %7854 = vmatpush3.bf16.msra.mxu0 %v8015_v39 }
 0x556   : > { %7855 = vmatprep.subr.bf16.mxu0 %v8016_v59 }
 0x558   : > { %v13774_v32 = vpop.f32.mrb[92].mxu1 }
 0x559   : > { %18046 = vst [vmem:[#allocation15_spill] sm:$0xff] %v13774_v32  ;;  %v13776_v56 = vpop.f32.mrb[93].mxu1  ;;  %v4839_v7 = vmul.f32 %v13774_v32, %v13774_v32  ;;  %7856 = vmatpush3.bf16.msra.mxu0 %v8016_v59 }
 0x55a   : > { %18047 = vst [vmem:[#allocation18_spill] sm:$0xff] %v13776_v56  ;;  %v4767_v48 = vadd.f32 %v4766_v5, %v13776_v56  ;;  %v4837_v2 = vmul.f32 %v13776_v56, %v13776_v56  ;;  %v13781_v20 = vpop.f32.mrb[94].mxu1  ;;  %v8017_v5 = vld [vmem:[%s8311_s14 + $0xb0] sm:$0xff]  }
 0x55b   : > { %18048 = vst [vmem:[#allocation19_spill] sm:$0xff] %v13781_v20  ;;  %v4696_v28 = vpop.f32.mrb[95].mxu1  ;;  %v4840_v56 = vmul.f32 %v13781_v20, %v13781_v20  ;;  %7857 = vmatprep.subr.bf16.mxu0 %v8017_v5 }
 0x55c   : > { %v4900_v63 = vadd.f32 %v4899_v51, %v4837_v2  ;;  %v4768_v6 = vadd.f32 %v4767_v48, %v4696_v28  ;;  %v4838_v18 = vmul.f32 %v4696_v28, %v4696_v28  ;;  %v8018_v48 = vld [vmem:[%s8311_s14 + $0xb8] sm:$0xff]   ;;  %s8192_s14 = smov [#allocation5]  }
 0x55d   : > { %7858 = vmatpush3.bf16.msra.mxu0 %v8017_v5  ;;  %v496_v5 = vld [vmem:[%s8332_s27 + $0x1c] sm:$0x7] }
 0x55e   : > { %v4769_v19 = vadd.f32 %v13774_v32, %v4768_v6  ;;  %v4901_v45 = vadd.f32 %v4900_v63, %v4838_v18  ;;  %7859 = vmatprep.subr.bf16.mxu0 %v8018_v48 }
 0x560   : > { %v4770_v10 = vadd.f32 %v13781_v20, %v4769_v19  ;;  %v4902_v49 = vadd.f32 %v4901_v45, %v4839_v7  ;;  %v8025_v20 = vld [vmem:[%s8322_s15] sm:$0x7] }
 0x561   : > { %7860 = vmatpush3.bf16.msra.mxu0 %v8018_v48  ;;  %v18051_v48 = vld [vmem:[#allocation10_spill] sm:$0xff] }
 0x562   : > { %v4771_v30 = vrot.slane %v4770_v10, 4  ;;  %v4903_v51 = vadd.f32 %v4902_v49, %v4840_v56 }
 0x564   : > { %v4772_v2 = vadd.f32 %v4771_v30, %v4770_v10  ;;  %v4904_v12 = vrot.slane %v4903_v51, 4 }
 0x566   : > { %v4773_v4 = vrot.slane %v4772_v2, 2  ;;  %v4905_v13 = vadd.f32 %v4904_v12, %v4903_v51 }
 0x568   : > { %v4774_v39 = vadd.f32 %v4773_v4, %v4772_v2  ;;  %v4906_v63 = vrot.slane %v4905_v13, 2  ;;  %v495_v4 = vld [vmem:[%s8332_s27 + $0x18] sm:$0x7]  ;;  %v497_v2 = vld [vmem:[%s8332_s27 + $0x20] sm:$0x7] }
 0x56a   : > { %v4775_v6 = vrot.slane %v4774_v39, 1  ;;  %v4907_v18 = vadd.f32 %v4906_v63, %v4905_v13  ;;  %v18049_v13 = vld [vmem:[#allocation11_spill] sm:$0xff] }
 0x56b   : > { %v13797_v63 = vrot.slane %v496_v5, %v18049_v13 }
 0x56c   : > { %v4776_v19 = vadd.f32 %v4775_v6, %v4774_v39  ;;  %v4908_v49 = vrot.slane %v4907_v18, 1  ;;  %v13800_v39 = vrot.slane %v496_v5, %v18051_v48  ;;  %v18053_v6 = vld [vmem:[#allocation12_spill] sm:$0xff] }
 0x56d   : > { %18050 = vst [vmem:[#allocation16_spill] sm:$0xff] %v13797_v63  ;;  %v18071_v63 = vld [vmem:[#allocation36_spill] sm:$0xff] }
 0x56e   : > { %v4909_v45 = vadd.f32 %v4908_v49, %v4907_v18  ;;  %v4910_v56 = vmul.f32 0.001953125, %v4776_v19  ;;  %18052 = vst [vmem:[#allocation17_spill] sm:$0xff] %v13800_v39  ;;  %v13803_v18 = vrot.slane %v496_v5, %v18053_v6  ;;  %v13806_v19 = vrot.slane %v495_v4, %v18051_v48  ;;  %v18079_v39 = vld [vmem:[#allocation35_spill] sm:$0xff] }
 0x56f   : > { %v13809_v49 = vrot.slane %v497_v2, %v18051_v48 }
 0x570   : > { %v4911_v59 = vmul.f32 0.001953125, %v4909_v45  ;;  %v4912_v30 = vmul.f32 %v4910_v56, %v4910_v56  ;;  %18054 = vst [vmem:[#allocation23_spill] sm:$0xff] %v13803_v18  ;;  %18055 = vst [vmem:[#allocation21_spill] sm:$0xff] %v13806_v19  ;;  %v18070_v18 = vld [vmem:[#allocation32_spill] sm:$0xff]  ;;  %v18081_v19 = vld [vmem:[#allocation43_spill] sm:$0xff] }
 0x571   : > { %18056 = vst [vmem:[#allocation22_spill] sm:$0xff] %v13809_v49  ;;  %v18077_v49 = vld [vmem:[#allocation40_spill] sm:$0xff] }
 0x572   : > { %v4913_v7 = vsub.f32 %v4911_v59, %v4912_v30  ;;  %v13818_v30 = vrot.slane %v495_v4, %v18053_v6 }
 0x574   : > { %v4914_v10 = vmax.f32 %v4913_v7, 0.0  ;;  %18058 = vst [vmem:[#allocation27_spill] sm:$0xff] %v13818_v30  ;;  %v13821_v7 = vrot.slane %v497_v2, %v18049_v13  ;;  %v18073_v30 = vld [vmem:[#allocation41_spill] sm:$0xff] }
 0x576   : > { %v4915_v12 = vadd.f32 1e-05, %v4914_v10  ;;  %18059 = vst [vmem:[#allocation25_spill] sm:$0xff] %v13821_v7  ;;  %v13824_v10 = vrot.slane %v497_v2, %v18053_v6  ;;  %v18066_v6 = vld [vmem:[#allocation34_spill] sm:$0xff]  ;;  %v18069_v7 = vld [vmem:[#allocation39_spill] sm:$0xff] }
 0x578   : > { %8021 = vrsqrt.f32 %v4915_v12  ;;  %18060 = vst [vmem:[#allocation46_spill] sm:$0xff] %v13824_v10  ;;  %v8026_v12 = vld [vmem:[%s8327_s18] sm:$0x7]  ;;  %v18068_v10 = vld [vmem:[#allocation38_spill] sm:$0xff] }
 0x582   : > { %v8022_v51 = vpop.eup %8021 }
 0x583   : > { %v4917_v32 = vmul.f32 %v8025_v20, %v8022_v51  ;;  %v13815_v20 = vrot.slane %v495_v4, %v18049_v13 }
 0x585   : > { %v4918_v45 = vmul.f32 %v4917_v32, %v4910_v56  ;;  %v13812_v59 = vrot.slane %v4917_v32, %v18051_v48  ;;  %18057 = vst [vmem:[#allocation20_spill] sm:$0xff] %v13815_v20  ;;  %v18075_v20 = vld [vmem:[#allocation37_spill] sm:$0xff] }
 0x587   : > { %v4919_v5 = vsub.f32 %v8026_v12, %v4918_v45  ;;  %v4985_v51 = vmul.f32 %v13812_v59, %v4696_v28  ;;  %v13830_v32 = vmul.f32 %v13812_v59, %v12945_v58  ;;  %v13834_v56 = vmul.f32 %v13812_v59, %v12961_v16  ;;  %v18065_v12 = vld [vmem:[#allocation30_spill] sm:$0xff] }
 0x588   : > { %v13838_v4 = vmul.f32 %v12937_v37, %v13812_v59  ;;  %v13842_v2 = vmul.f32 %v12949_v22, %v13812_v59  ;;  %v13846_v13 = vmul.f32 %v13812_v59, %v13087_v15  ;;  %v13850_v58 = vmul.f32 %v13812_v59, %v13105_v27 }
 0x589   : > { %v13853_v28 = vrot.slane %v4919_v5, %v18051_v48  ;;  %v13857_v16 = vmul.f32 %v13082_v3, %v13812_v59  ;;  %v13861_v37 = vmul.f32 %v13093_v42, %v13812_v59  ;;  %v13865_v22 = vmul.f32 %v13812_v59, %v13227_v41  ;;  %v18062_v5 = vld [vmem:[#allocation28_spill] sm:$0xff] }
 0x58a   : > { %v13869_v15 = vmul.f32 %v13812_v59, %v13247_v24  ;;  %v13873_v27 = vmul.f32 %v13223_v53, %v13812_v59  ;;  %v13877_v3 = vmul.f32 %v13239_v23, %v13812_v59  ;;  %v13881_v42 = vmul.f32 %v13812_v59, %v13367_v11 }
 0x58b   : > { %v5053_v48 = vadd.f32 %v13853_v28, %v4985_v51  ;;  %v13886_v41 = vmul.f32 %v13812_v59, %v13385_v25  ;;  %v13890_v24 = vmul.f32 %v18026_v44, %v13812_v59  ;;  %v13894_v53 = vmul.f32 %v18027_v46, %v13812_v59  ;;  %v18063_v51 = vld [vmem:[#allocation33_spill] sm:$0xff] }
 0x58c   : > { %v13898_v23 = vmul.f32 %v13812_v59, %v13494_v29  ;;  %v13902_v11 = vmul.f32 %v13812_v59, %v13504_v60  ;;  %v13906_v25 = vmul.f32 %v13492_v54, %v13812_v59  ;;  %v13910_v44 = vmul.f32 %v13502_v47, %v13812_v59 }
 0x58d   : > { %v13912_v45 = vmax.f32 %v5053_v48, 0.0  ;;  %v13916_v46 = vmul.f32 %v13812_v59, %v13541_v52  ;;  %v13920_v29 = vmul.f32 %v13812_v59, %v13546_v14  ;;  %v13924_v60 = vmul.f32 %v13538_v1, %v13812_v59  ;;  %v18064_v48 = vld [vmem:[#allocation26_spill] sm:$0xff] }
 0x58e   : > { %v13928_v54 = vmul.f32 %v13543_v17, %v13812_v59  ;;  %v13932_v47 = vmul.f32 %v13812_v59, %v13582_v50  ;;  %v13936_v52 = vmul.f32 %v13812_v59, %v13589_v36  ;;  %v13940_v14 = vmul.f32 %v13579_v43, %v13812_v59 }
 0x58f   : > { %18061 = vst [vmem:[#allocation45_spill] sm:$0xff] %v13912_v45  ;;  %v13945_v1 = vmul.f32 %v13586_v38, %v13812_v59  ;;  %v13949_v17 = vmul.f32 %v13812_v59, %v13611_v35  ;;  %v13953_v50 = vmul.f32 %v13812_v59, %v13618_v55  ;;  %v13957_v36 = vmul.f32 %v13606_v57, %v13812_v59  ;;  %v18067_v45 = vld [vmem:[#allocation31_spill] sm:$0xff] }
 0x590   : > { %v13961_v43 = vmul.f32 %v13616_v62, %v13812_v59  ;;  %v13965_v38 = vmul.f32 %v13812_v59, %v13631_v26  ;;  %v13969_v35 = vmul.f32 %v13812_v59, %v13638_v0  ;;  %v13973_v55 = vmul.f32 %v13629_v40, %v13812_v59 }
 0x591   : > { %v13977_v57 = vmul.f32 %v13636_v9, %v13812_v59  ;;  %v13981_v62 = vmul.f32 %v13812_v59, %v13651_v31  ;;  %v13985_v26 = vmul.f32 %v13812_v59, %v13658_v21  ;;  %v13989_v0 = vmul.f32 %v13649_v33, %v13812_v59 }
 0x592   : > { %v13993_v40 = vmul.f32 %v13656_v61, %v13812_v59  ;;  %v13997_v9 = vmul.f32 %v13812_v59, %v13671_v8  ;;  %v14001_v31 = vmul.f32 %v13812_v59, %v13678_v34  ;;  %v14005_v21 = vmul.f32 %v18062_v5, %v13812_v59 }
 0x593   : > { %v14009_v33 = vmul.f32 %v18063_v51, %v13812_v59  ;;  %v14013_v61 = vmul.f32 %v13812_v59, %v18064_v48  ;;  %v14017_v8 = vmul.f32 %v13812_v59, %v18065_v12  ;;  %v14021_v34 = vmul.f32 %v18066_v6, %v13812_v59 }
 0x594   : > { %v14025_v5 = vmul.f32 %v18067_v45, %v13812_v59  ;;  %v14029_v51 = vmul.f32 %v13812_v59, %v18068_v10  ;;  %v14033_v48 = vmul.f32 %v13812_v59, %v18069_v7  ;;  %v14037_v12 = vmul.f32 %v18070_v18, %v13812_v59 }
 0x595   : > { %v14041_v6 = vmul.f32 %v18071_v63, %v13812_v59  ;;  %v14045_v45 = vmul.f32 %v13812_v59, %v18073_v30  ;;  %v14049_v10 = vmul.f32 %v13812_v59, %v18075_v20  ;;  %v14053_v7 = vmul.f32 %v18077_v49, %v13812_v59 }
 0x596   : > { %v14057_v18 = vmul.f32 %v18079_v39, %v13812_v59  ;;  %v14061_v63 = vmul.f32 %v13812_v59, %v18081_v19 }
 0x597   : > { %18072 = vst [vmem:[#allocation48_spill] sm:$0xff] %v14041_v6  ;;  %18074 = vst [vmem:[#allocation47_spill] sm:$0xff] %v14045_v45  ;;  %v18083_v6 = vld [vmem:[#allocation13_spill] sm:$0xff]  ;;  %v18085_v45 = vld [vmem:[#allocation42_spill] sm:$0xff] }
 0x598   : > { %18076 = vst [vmem:[#allocation50_spill] sm:$0xff] %v14049_v10  ;;  %18078 = vst [vmem:[#allocation49_spill] sm:$0xff] %v14053_v7  ;;  %v14065_v30 = vmul.f32 %v13812_v59, %v18083_v6  ;;  %v14069_v20 = vmul.f32 %v18085_v45, %v13812_v59  ;;  %v18087_v10 = vld [vmem:[#allocation14_spill] sm:$0xff]  ;;  %v14089_v45 = vadd.f32 %v13853_v28, %v13830_v32 }
 0x599   : > { %18080 = vst [vmem:[#allocation52_spill] sm:$0xff] %v14057_v18  ;;  %18082 = vst [vmem:[#allocation51_spill] sm:$0xff] %v14061_v63  ;;  %v14073_v49 = vmul.f32 %v18087_v10, %v13812_v59  ;;  %v18089_v7 = vld [vmem:[#allocation18_spill] sm:$0xff]  ;;  %v18091_v18 = vld [vmem:[#allocation15_spill] sm:$0xff]  ;;  %v4993_v10 = vadd.f32 %v13853_v28, %v13834_v56  ;;  %v4999_v32 = vadd.f32 %v13853_v28, %v13861_v37 }
 0x59a   : > { %18084 = vst [vmem:[#allocation54_spill] sm:$0xff] %v14065_v30  ;;  %18086 = vst [vmem:[#allocation53_spill] sm:$0xff] %v14069_v20  ;;  %v14077_v39 = vmul.f32 %v13812_v59, %v18089_v7  ;;  %v14081_v19 = vmul.f32 %v18091_v18, %v13812_v59  ;;  %v18093_v63 = vld [vmem:[#allocation19_spill] sm:$0xff]  ;;  %v4995_v7 = vadd.f32 %v13853_v28, %v13842_v2 }
 0x59b   : > { %18088 = vst [vmem:[#allocation56_spill] sm:$0xff] %v14073_v49  ;;  %v14085_v6 = vmul.f32 %v18093_v63, %v13812_v59  ;;  %18095 = vst [vmem:[#allocation60_spill] sm:$0xff] %v14089_v45  ;;  %v4994_v49 = vadd.f32 %v13853_v28, %v13838_v4  ;;  %v4996_v18 = vadd.f32 %v13853_v28, %v13846_v13 }
 0x59c   : > { %18090 = vst [vmem:[#allocation55_spill] sm:$0xff] %v14077_v39  ;;  %18092 = vst [vmem:[#allocation58_spill] sm:$0xff] %v14081_v19  ;;  %v4997_v59 = vadd.f32 %v13853_v28, %v13850_v58  ;;  %v4998_v63 = vadd.f32 %v13853_v28, %v13857_v16  ;;  %v5000_v56 = vadd.f32 %v13853_v28, %v13865_v22 }
 0x59d   : > { %18094 = vst [vmem:[#allocation57_spill] sm:$0xff] %v14085_v6  ;;  %v5001_v4 = vadd.f32 %v13853_v28, %v13869_v15  ;;  %v5002_v2 = vadd.f32 %v13853_v28, %v13873_v27  ;;  %v5003_v13 = vadd.f32 %v13853_v28, %v13877_v3  ;;  %v5004_v58 = vadd.f32 %v13853_v28, %v13881_v42 }
 0x59e   : > { %v5005_v16 = vadd.f32 %v13853_v28, %v13886_v41  ;;  %v5006_v37 = vadd.f32 %v13853_v28, %v13890_v24  ;;  %v5007_v22 = vadd.f32 %v13853_v28, %v13894_v53  ;;  %v5008_v15 = vadd.f32 %v13853_v28, %v13898_v23  ;;  %v18096_v45 = vld [vmem:[#allocation48_spill] sm:$0xff]  ;;  %v18097_v6 = vld [vmem:[#allocation47_spill] sm:$0xff] }
 0x59f   : > { %v5009_v27 = vadd.f32 %v13853_v28, %v13902_v11  ;;  %v5010_v3 = vadd.f32 %v13853_v28, %v13906_v25  ;;  %v5011_v42 = vadd.f32 %v13853_v28, %v13910_v44  ;;  %v5012_v41 = vadd.f32 %v13853_v28, %v13916_v46  ;;  %v18098_v19 = vld [vmem:[#allocation50_spill] sm:$0xff]  ;;  %v18099_v39 = vld [vmem:[#allocation49_spill] sm:$0xff] }
 0x5a0   : > { %v5013_v24 = vadd.f32 %v13853_v28, %v13920_v29  ;;  %v5014_v53 = vadd.f32 %v13853_v28, %v13924_v60  ;;  %v5015_v23 = vadd.f32 %v13853_v28, %v13928_v54  ;;  %v5016_v11 = vadd.f32 %v13853_v28, %v13932_v47  ;;  %v18100_v20 = vld [vmem:[#allocation52_spill] sm:$0xff]  ;;  %v18101_v30 = vld [vmem:[#allocation51_spill] sm:$0xff] }
 0x5a1   : > { %v5017_v25 = vadd.f32 %v13853_v28, %v13936_v52  ;;  %v5018_v44 = vadd.f32 %v13853_v28, %v13940_v14  ;;  %v5019_v46 = vadd.f32 %v13853_v28, %v13945_v1  ;;  %v5020_v29 = vadd.f32 %v13853_v28, %v13949_v17 }
 0x5a2   : > { %v5021_v60 = vadd.f32 %v13853_v28, %v13953_v50  ;;  %v5022_v54 = vadd.f32 %v13853_v28, %v13957_v36  ;;  %v5023_v47 = vadd.f32 %v13853_v28, %v13961_v43  ;;  %v5024_v52 = vadd.f32 %v13853_v28, %v13965_v38 }
 0x5a3   : > { %v5025_v14 = vadd.f32 %v13853_v28, %v13969_v35  ;;  %v5026_v1 = vadd.f32 %v13853_v28, %v13973_v55  ;;  %v5027_v17 = vadd.f32 %v13853_v28, %v13977_v57  ;;  %v5028_v50 = vadd.f32 %v13853_v28, %v13981_v62 }
 0x5a4   : > { %v5029_v36 = vadd.f32 %v13853_v28, %v13985_v26  ;;  %v5030_v43 = vadd.f32 %v13853_v28, %v13989_v0  ;;  %v5031_v38 = vadd.f32 %v13853_v28, %v13993_v40  ;;  %v5032_v35 = vadd.f32 %v13853_v28, %v13997_v9 }
 0x5a5   : > { %v5033_v55 = vadd.f32 %v13853_v28, %v14001_v31  ;;  %v5034_v57 = vadd.f32 %v13853_v28, %v14005_v21  ;;  %v5035_v62 = vadd.f32 %v13853_v28, %v14009_v33  ;;  %v5036_v26 = vadd.f32 %v13853_v28, %v14013_v61 }
 0x5a6   : > { %v5037_v0 = vadd.f32 %v13853_v28, %v14017_v8  ;;  %v5038_v40 = vadd.f32 %v13853_v28, %v14021_v34  ;;  %v5039_v9 = vadd.f32 %v13853_v28, %v14025_v5  ;;  %v5040_v31 = vadd.f32 %v13853_v28, %v14029_v51 }
 0x5a7   : > { %v5041_v21 = vadd.f32 %v13853_v28, %v14033_v48  ;;  %v5042_v33 = vadd.f32 %v13853_v28, %v14037_v12  ;;  %v5043_v61 = vadd.f32 %v13853_v28, %v18096_v45  ;;  %v5044_v8 = vadd.f32 %v13853_v28, %v18097_v6  ;;  %v18102_v12 = vld [vmem:[#allocation54_spill] sm:$0xff]  ;;  %v18103_v6 = vld [vmem:[#allocation53_spill] sm:$0xff] }
 0x5a8   : > { %v5045_v34 = vadd.f32 %v13853_v28, %v18098_v19  ;;  %v5046_v5 = vadd.f32 %v13853_v28, %v18099_v39  ;;  %v5047_v51 = vadd.f32 %v13853_v28, %v18100_v20  ;;  %v5048_v48 = vadd.f32 %v13853_v28, %v18101_v30  ;;  %v18104_v39 = vld [vmem:[#allocation56_spill] sm:$0xff]  ;;  %v18105_v30 = vld [vmem:[#allocation55_spill] sm:$0xff] }
 0x5a9   : > { %v5049_v45 = vadd.f32 %v13853_v28, %v18102_v12  ;;  %v5050_v19 = vadd.f32 %v13853_v28, %v18103_v6  ;;  %v5051_v20 = vadd.f32 %v13853_v28, %v18104_v39  ;;  %v5052_v12 = vadd.f32 %v13853_v28, %v18105_v30  ;;  %v18106_v6 = vld [vmem:[#allocation58_spill] sm:$0xff]  ;;  %v18107_v30 = vld [vmem:[#allocation57_spill] sm:$0xff] }
 0x5aa   : > { %v5054_v39 = vadd.f32 %v13853_v28, %v18106_v6  ;;  %v5055_v6 = vadd.f32 %v13853_v28, %v18107_v30  ;;  %v18108_v28 = vld [vmem:[#allocation60_spill] sm:$0xff] }
 0x5ab   : > { %v14216_v30 = vmax.f32 %v18108_v28, 0.0  ;;  %v14218_v28 = vmax.f32 %v4993_v10, 0.0  ;;  %v14222_v10 = vmax.f32 %v4995_v7, 0.0  ;;  %v14230_v7 = vmax.f32 %v4999_v32, 0.0 }
 0x5ac   : > { %v14246_v32 = vmax.f32 %v5007_v22, 0.0  ;;  %v14266_v22 = vmax.f32 %v5017_v25, 0.0  ;;  %v14286_v25 = vmax.f32 %v5027_v17, 0.0  ;;  %v14306_v17 = vmax.f32 %v5037_v0, 0.0 }
 0x5ad   : > { %18109 = vst [vmem:[#allocation59_spill] sm:$0xff] %v14216_v30  ;;  %18110 = vst [vmem:[#allocation62_spill] sm:$0xff] %v14218_v28  ;;  %v14220_v30 = vmax.f32 %v4994_v49, 0.0  ;;  %v14224_v28 = vmax.f32 %v4996_v18, 0.0  ;;  %v14226_v49 = vmax.f32 %v4997_v59, 0.0  ;;  %v14234_v18 = vmax.f32 %v5001_v4, 0.0 }
 0x5ae   : > { %18112 = vst [vmem:[#allocation64_spill] sm:$0xff] %v14222_v10  ;;  %18116 = vst [vmem:[#allocation68_spill] sm:$0xff] %v14230_v7  ;;  %v14232_v10 = vmax.f32 %v5000_v56, 0.0  ;;  %v14238_v59 = vmax.f32 %v5003_v13, 0.0  ;;  %v14248_v7 = vmax.f32 %v5008_v15, 0.0  ;;  %v14250_v56 = vmax.f32 %v5009_v27, 0.0 }
 0x5af   : > { %18111 = vst [vmem:[#allocation61_spill] sm:$0xff] %v14220_v30  ;;  %18113 = vst [vmem:[#allocation63_spill] sm:$0xff] %v14224_v28  ;;  %v14228_v30 = vmax.f32 %v4998_v63, 0.0  ;;  %v14236_v28 = vmax.f32 %v5002_v2, 0.0  ;;  %v14242_v63 = vmax.f32 %v5005_v16, 0.0  ;;  %v14254_v4 = vmax.f32 %v5011_v42, 0.0 }
 0x5b0   : > { %18114 = vst [vmem:[#allocation66_spill] sm:$0xff] %v14226_v49  ;;  %18117 = vst [vmem:[#allocation67_spill] sm:$0xff] %v14232_v10  ;;  %v14240_v49 = vmax.f32 %v5004_v58, 0.0  ;;  %v14252_v10 = vmax.f32 %v5010_v3, 0.0  ;;  %v14256_v2 = vmax.f32 %v5012_v41, 0.0  ;;  %v14258_v13 = vmax.f32 %v5013_v24, 0.0 }
 0x5b1   : > { %18115 = vst [vmem:[#allocation65_spill] sm:$0xff] %v14228_v30  ;;  %v14244_v30 = vmax.f32 %v5006_v37, 0.0  ;;  %v14260_v58 = vmax.f32 %v5014_v53, 0.0  ;;  %v14262_v16 = vmax.f32 %v5015_v23, 0.0  ;;  %v14264_v37 = vmax.f32 %v5016_v11, 0.0  ;;  %18122 = vst [vmem:[#allocation73_spill] sm:$0xff] %v14266_v22 }
 0x5b2   : > { %18118 = vst [vmem:[#allocation70_spill] sm:$0xff] %v14256_v2  ;;  %v14268_v15 = vmax.f32 %v5018_v44, 0.0  ;;  %v14270_v27 = vmax.f32 %v5019_v46, 0.0  ;;  %v14272_v3 = vmax.f32 %v5020_v29, 0.0  ;;  %v14274_v42 = vmax.f32 %v5021_v60, 0.0  ;;  %18132 = vst [vmem:[#allocation34_spill] sm:$0xff] %v14286_v25 }
 0x5b3   : > { %18119 = vst [vmem:[#allocation69_spill] sm:$0xff] %v14260_v58  ;;  %18120 = vst [vmem:[#allocation44_spill] sm:$0xff] %v14262_v16  ;;  %v14276_v41 = vmax.f32 %v5022_v54, 0.0  ;;  %v14278_v24 = vmax.f32 %v5023_v47, 0.0  ;;  %v14280_v53 = vmax.f32 %v5024_v52, 0.0  ;;  %v14282_v23 = vmax.f32 %v5025_v14, 0.0 }
 0x5b4   : > { %18121 = vst [vmem:[#allocation71_spill] sm:$0xff] %v14264_v37  ;;  %18123 = vst [vmem:[#allocation72_spill] sm:$0xff] %v14268_v15  ;;  %v14284_v11 = vmax.f32 %v5026_v1, 0.0  ;;  %v14288_v44 = vmax.f32 %v5028_v50, 0.0  ;;  %v14290_v46 = vmax.f32 %v5029_v36, 0.0  ;;  %v14292_v29 = vmax.f32 %v5030_v43, 0.0 }
 0x5b5   : > { %18124 = vst [vmem:[#allocation24_spill] sm:$0xff] %v14270_v27  ;;  %18125 = vst [vmem:[#allocation29_spill] sm:$0xff] %v14272_v3  ;;  %v14294_v60 = vmax.f32 %v5031_v38, 0.0  ;;  %v14296_v54 = vmax.f32 %v5032_v35, 0.0  ;;  %v14298_v47 = vmax.f32 %v5033_v55, 0.0  ;;  %v14300_v52 = vmax.f32 %v5034_v57, 0.0 }
 0x5b6   : > { %18126 = vst [vmem:[#allocation11_spill] sm:$0xff] %v14274_v42  ;;  %18127 = vst [vmem:[#allocation10_spill] sm:$0xff] %v14276_v41  ;;  %v14302_v14 = vmax.f32 %v5035_v62, 0.0  ;;  %v14304_v1 = vmax.f32 %v5036_v26, 0.0  ;;  %v14308_v50 = vmax.f32 %v5038_v40, 0.0  ;;  %v14310_v36 = vmax.f32 %v5039_v9, 0.0 }
 0x5b7   : > { %18128 = vst [vmem:[#allocation28_spill] sm:$0xff] %v14278_v24  ;;  %18129 = vst [vmem:[#allocation33_spill] sm:$0xff] %v14280_v53  ;;  %v14312_v43 = vmax.f32 %v5040_v31, 0.0  ;;  %v14314_v38 = vmax.f32 %v5041_v21, 0.0  ;;  %v14316_v35 = vmax.f32 %v5042_v33, 0.0  ;;  %v14318_v55 = vmax.f32 %v5043_v61, 0.0 }
 0x5b8   : > { %18130 = vst [vmem:[#allocation26_spill] sm:$0xff] %v14282_v23  ;;  %18131 = vst [vmem:[#allocation30_spill] sm:$0xff] %v14284_v11  ;;  %v14320_v57 = vmax.f32 %v5044_v8, 0.0  ;;  %v14322_v62 = vmax.f32 %v5045_v34, 0.0  ;;  %v14324_v26 = vmax.f32 %v5046_v5, 0.0  ;;  %v14326_v0 = vmax.f32 %v5047_v51, 0.0 }
 0x5b9   : > { %18133 = vst [vmem:[#allocation31_spill] sm:$0xff] %v14288_v44  ;;  %18134 = vst [vmem:[#allocation38_spill] sm:$0xff] %v14290_v46  ;;  %v14328_v40 = vmax.f32 %v5048_v48, 0.0  ;;  %v14330_v9 = vmax.f32 %v5049_v45, 0.0  ;;  %v14332_v31 = vmax.f32 %v5050_v19, 0.0  ;;  %v14334_v21 = vmax.f32 %v5051_v20, 0.0 }
 0x5ba   : > { %18135 = vst [vmem:[#allocation39_spill] sm:$0xff] %v14292_v29  ;;  %18136 = vst [vmem:[#allocation32_spill] sm:$0xff] %v14294_v60  ;;  %v14336_v33 = vmax.f32 %v5052_v12, 0.0  ;;  %v14338_v61 = vmax.f32 %v5054_v39, 0.0  ;;  %v14340_v8 = vmax.f32 %v5055_v6, 0.0  ;;  %v18160_v34 = vld [vmem:[#allocation59_spill] sm:$0xff] }
 0x5bb   : > { %18137 = vst [vmem:[#allocation36_spill] sm:$0xff] %v14296_v54  ;;  %18138 = vst [vmem:[#allocation41_spill] sm:$0xff] %v14298_v47  ;;  %v18161_v5 = vld [vmem:[#allocation61_spill] sm:$0xff]  ;;  %v18162_v51 = vld [vmem:[#allocation63_spill] sm:$0xff]  ;;  %v5312_v12 = vrot.slane %v18160_v34, 1 }
 0x5bc   : > { %18139 = vst [vmem:[#allocation37_spill] sm:$0xff] %v14300_v52  ;;  %18140 = vst [vmem:[#allocation40_spill] sm:$0xff] %v14302_v14  ;;  %v18163_v48 = vld [vmem:[#allocation65_spill] sm:$0xff]  ;;  %v18164_v45 = vld [vmem:[#allocation67_spill] sm:$0xff]  ;;  %v5313_v29 = vrot.slane %v18161_v5, 1 }
 0x5bd   : > { %18141 = vst [vmem:[#allocation35_spill] sm:$0xff] %v14304_v1  ;;  %18142 = vst [vmem:[#allocation43_spill] sm:$0xff] %v14306_v17  ;;  %v18165_v52 = vld [vmem:[#allocation62_spill] sm:$0xff]  ;;  %v18166_v1 = vld [vmem:[#allocation64_spill] sm:$0xff] }
 0x5be   : > { %18143 = vst [vmem:[#allocation13_spill] sm:$0xff] %v14308_v50  ;;  %18144 = vst [vmem:[#allocation42_spill] sm:$0xff] %v14310_v36  ;;  %v18167_v50 = vld [vmem:[#allocation66_spill] sm:$0xff]  ;;  %v18187_v23 = vld [vmem:[#allocation16_spill] sm:$0xff] }
 0x5bf   : > { %18145 = vst [vmem:[#allocation14_spill] sm:$0xff] %v14312_v43  ;;  %18146 = vst [vmem:[#allocation18_spill] sm:$0xff] %v14314_v38  ;;  %v5153_v38 = vrot.slane %v18166_v1, 7  ;;  %v18168_v43 = vld [vmem:[#allocation68_spill] sm:$0xff]  ;;  %v5346_v20 = vrot.slane %v18167_v50, 1 }
 0x5c0   : > { %18147 = vst [vmem:[#allocation15_spill] sm:$0xff] %v14316_v35  ;;  %18148 = vst [vmem:[#allocation19_spill] sm:$0xff] %v14318_v55 }
 0x5c1   : > { %18149 = vst [vmem:[#allocation48_spill] sm:$0xff] %v14320_v57  ;;  %18150 = vst [vmem:[#allocation47_spill] sm:$0xff] %v14322_v62  ;;  %v18178_v62 = vld [vmem:[#allocation17_spill] sm:$0xff] }
 0x5c2   : > { %18151 = vst [vmem:[#allocation50_spill] sm:$0xff] %v14324_v26  ;;  %18152 = vst [vmem:[#allocation49_spill] sm:$0xff] %v14326_v0  ;;  %v5152_v0 = vrot.slane %v18165_v52, 7  ;;  %v5890_v39 = vmul.f32 %v18178_v62, %v18161_v5  ;;  %v5891_v55 = vmul.f32 %v18178_v62, %v18166_v1 }
 0x5c3   : > { %18153 = vst [vmem:[#allocation52_spill] sm:$0xff] %v14328_v40  ;;  %18154 = vst [vmem:[#allocation51_spill] sm:$0xff] %v14330_v9  ;;  %v18175_v9 = vrot.slane %v18167_v50, 7 }
 0x5c4   : > { %18155 = vst [vmem:[#allocation54_spill] sm:$0xff] %v14332_v31  ;;  %18156 = vst [vmem:[#allocation53_spill] sm:$0xff] %v14334_v21  ;;  %v18174_v31 = vrot.slane %v18162_v51, 7 }
 0x5c5   : > { %18157 = vst [vmem:[#allocation56_spill] sm:$0xff] %v14336_v33  ;;  %18158 = vst [vmem:[#allocation55_spill] sm:$0xff] %v14338_v61  ;;  %v5344_v33 = vrot.slane %v18165_v52, 1  ;;  %v18179_v61 = vld [vmem:[#allocation22_spill] sm:$0xff] }
 0x5c6   : > { %18159 = vst [vmem:[#allocation58_spill] sm:$0xff] %v14340_v8  ;;  %v14411_v19 = vsel %vm676_vm2, %v18175_v9, %v18174_v31  ;;  %v18177_v31 = vld [vmem:[#allocation21_spill] sm:$0xff]  ;;  %v14433_v57 = vmul.f32 %v18179_v61, %v18162_v51  ;;  %v6219_v54 = vmul.f32 %v18179_v61, %v18167_v50  ;;  %v18180_v9 = vrot.slane %v18160_v34, 7 }
 0x5c7   : > { %v5572_v35 = vmul.f32 %v18177_v31, %v18160_v34  ;;  %v5573_v6 = vmul.f32 %v18177_v31, %v18165_v52  ;;  %v18181_v8 = vrot.slane %v18161_v5, 7  ;;  %v5376_v44 = vsel %vm873_vm3, %v5312_v12, %v5344_v33 }
 0x5c8   : > { %v5184_v21 = vsel %vm676_vm2, %v18180_v9, %v5152_v0  ;;  %v18182_v40 = vmov %v18180_v9 }
 0x5c9   : > { %v14445_v26 = vsel %vm676_vm2, %v18181_v8, %v5153_v38  ;;  %v5216_v36 = vsel %vm676_vm2, %v5152_v0, %v18182_v40  ;;  %v18183_v14 = vmov %v18181_v8  ;;  %v5345_v8 = vrot.slane %v18166_v1, 1  ;;  %v18184_v40 = vld [vmem:[#allocation20_spill] sm:$0xff] }
 0x5ca   : > { %v5217_v47 = vsel %vm676_vm2, %v5153_v38, %v18183_v14  ;;  %v5248_v9 = vsel %vm485_vm0, %v5216_v36, 0.0  ;;  %v5408_v0 = vsel %vm873_vm3, %v5344_v33, %v5312_v12  ;;  %v5509_v14 = vmul.f32 %v18184_v40, %v5184_v21  ;;  %v18185_v38 = vld [vmem:[#allocation27_spill] sm:$0xff] }
 0x5cb   : > { %v14460_v60 = vsel %vm485_vm0, %v5217_v47, 0.0  ;;  %v5508_v46 = vmul.f32 %v18184_v40, %v5248_v9  ;;  %v5696_v11 = vmul.f32 %v18185_v38, %v5376_v44  ;;  %v14472_v36 = vsel %vm873_vm3, %v5313_v29, %v5345_v8 }
 0x5cc   : > { %v5409_v47 = vsel %vm873_vm3, %v5345_v8, %v5313_v29  ;;  %v5441_v53 = vsel %vm488_vm1, %v5408_v0, 0.0  ;;  %v5820_v41 = vmul.f32 %v18187_v23, %v5248_v9  ;;  %v5633_v24 = vadd.f32 %v5573_v6, %v5509_v14 }
 0x5cd   : > { %v14481_v33 = vsel %vm488_vm1, %v5409_v47, 0.0  ;;  %v5632_v12 = vadd.f32 %v5572_v35, %v5508_v46  ;;  %v5697_v3 = vmul.f32 %v18185_v38, %v5441_v53  ;;  %v5821_v42 = vmul.f32 %v18187_v23, %v5184_v21  ;;  %v18188_v46 = vld [vmem:[#allocation23_spill] sm:$0xff] }
 0x5ce   : > { %v5822_v15 = vmul.f32 %v18187_v23, %v14460_v60  ;;  %v5823_v29 = vmul.f32 %v18187_v23, %v14445_v26  ;;  %v5888_v8 = vmul.f32 %v18178_v62, %v18160_v34  ;;  %v5889_v47 = vmul.f32 %v18178_v62, %v18165_v52 }
 0x5cf   : > { %v5756_v9 = vadd.f32 %v5696_v11, %v5632_v12  ;;  %v5757_v0 = vadd.f32 %v5697_v3, %v5633_v24  ;;  %v6020_v35 = vmul.f32 %v18188_v46, %v5376_v44  ;;  %v6021_v21 = vmul.f32 %v18188_v46, %v5441_v53  ;;  %v18189_v11 = vld [vmem:[#allocation25_spill] sm:$0xff] }
 0x5d0   : > { %v5952_v6 = vadd.f32 %v5888_v8, %v5820_v41  ;;  %v5954_v14 = vadd.f32 %v5890_v39, %v5822_v15  ;;  %v5955_v27 = vadd.f32 %v5891_v55, %v5823_v29  ;;  %v5953_v37 = vadd.f32 %v5889_v47, %v5821_v42  ;;  %v18190_v55 = vld [vmem:[#allocation46_spill] sm:$0xff] }
 0x5d1   : > { %v6022_v22 = vmul.f32 %v18188_v46, %v14472_v36  ;;  %v6023_v58 = vmul.f32 %v18188_v46, %v14481_v33  ;;  %v6152_v3 = vmul.f32 %v18189_v11, %v14460_v60  ;;  %v6153_v52 = vmul.f32 %v18189_v11, %v14445_v26 }
 0x5d2   : > { %v6084_v24 = vadd.f32 %v6020_v35, %v5952_v6  ;;  %v6216_v15 = vmul.f32 %v18179_v61, %v18161_v5  ;;  %v6217_v41 = vmul.f32 %v18179_v61, %v18166_v1  ;;  %v6085_v42 = vadd.f32 %v6021_v21, %v5953_v37 }
 0x5d3   : > { %v6086_v53 = vadd.f32 %v6022_v22, %v5954_v14  ;;  %v6087_v44 = vadd.f32 %v6023_v58, %v5955_v27  ;;  %v6340_v34 = vmul.f32 %v18190_v55, %v14472_v36  ;;  %v6341_v29 = vmul.f32 %v18190_v55, %v14481_v33 }
 0x5d4   : > { %v6276_v39 = vadd.f32 %v6216_v15, %v6152_v3  ;;  %v6277_v12 = vadd.f32 %v6217_v41, %v6153_v52  ;;  %v18191_v8 = vrot.slane %v18167_v50, 7  ;;  %v18192_v47 = vrot.slane %v18162_v51, 7 }
 0x5d5   : > { %v14522_v58 = vsel %vm485_vm0, %v14411_v19, 0.0  ;;  %v18193_v37 = vrot.slane %v18162_v51, 1 }
 0x5d6   : > { %v14517_v35 = vsel %vm676_vm2, %v18192_v47, %v18191_v8  ;;  %v6400_v21 = vadd.f32 %v6340_v34, %v6276_v39  ;;  %v6401_v3 = vadd.f32 %v6341_v29, %v6277_v12  ;;  %v6154_v52 = vmul.f32 %v18189_v11, %v14522_v58 }
 0x5d7   : > { %v14528_v22 = vsel %vm873_vm3, %v18193_v37, %v5346_v20  ;;  %v18194_v27 = vmov %v18193_v37  ;;  %v6155_v14 = vmul.f32 %v18189_v11, %v14517_v35  ;;  %v6463_v39 = vadd.f32 %v6087_v44, %v5757_v0 }
 0x5d8   : > { %v5410_v6 = vsel %vm873_vm3, %v5346_v20, %v18194_v27  ;;  %v6342_v41 = vmul.f32 %v18190_v55, %v14528_v22  ;;  %v6462_v20 = vadd.f32 %v6086_v53, %v5756_v9  ;;  %v6524_v47 = vadd.f32 %v6400_v21, %v6084_v24 }
 0x5d9   : > { %v14538_v19 = vsel %vm488_vm1, %v5410_v6, 0.0  ;;  %v6279_v15 = vadd.f32 %v6219_v54, %v6155_v14  ;;  %v6525_v37 = vadd.f32 %v6401_v3, %v6085_v42  ;;  %v6278_v34 = vadd.f32 %v14433_v57, %v6154_v52 }
 0x5da   : > { %v6343_v8 = vmul.f32 %v18190_v55, %v14538_v19  ;;  %v18195_v29 = vrot.slane %v18168_v43, 7  ;;  %v18196_v27 = vrot.slane %v18163_v48, 7  ;;  %v5315_v24 = vrot.slane %v18163_v48, 1 }
 0x5db   : > { %v6588_v57 = vpack.c.bf16 %v6525_v37, %v6524_v47  ;;  %v6402_v0 = vadd.f32 %v6342_v41, %v6278_v34  ;;  %v5347_v53 = vrot.slane %v18168_v43, 1  ;;  %v5510_v21 = vmul.f32 %v18184_v40, %v14460_v60 }
 0x5dc   : > { %v6403_v12 = vadd.f32 %v6343_v8, %v6279_v15  ;;  %v14553_v54 = vsel %vm676_vm2, %v18196_v27, %v18195_v29  ;;  %v18197_v6 = vmov %v18196_v27  ;;  %v18198_v14 = vmov %v18195_v29 }
 0x5dd   : > { %v5219_v9 = vsel %vm676_vm2, %v18198_v14, %v18197_v6  ;;  %v5511_v3 = vmul.f32 %v18184_v40, %v14445_v26  ;;  %v5574_v52 = vmul.f32 %v18177_v31, %v18161_v5  ;;  %7861 = vmatprep.mubr.bf16.mxu0 %v6588_v57  ;;  %v6526_v15 = vadd.f32 %v6462_v20, %v6402_v0 }
 0x5de   : > { %v14564_v42 = vsel %vm485_vm0, %v5219_v9, 0.0  ;;  %v6527_v44 = vadd.f32 %v6463_v39, %v6403_v12  ;;  %v14575_v41 = vsel %vm873_vm3, %v5315_v24, %v5347_v53  ;;  %v5411_v8 = vsel %vm873_vm3, %v5347_v53, %v5315_v24 }
 0x5df   : > { %v5575_v47 = vmul.f32 %v18177_v31, %v18166_v1  ;;  %v14583_v60 = vsel %vm488_vm1, %v5411_v8, 0.0  ;;  %v5634_v26 = vadd.f32 %v5574_v52, %v5510_v21  ;;  %v5698_v5 = vmul.f32 %v18185_v38, %v14472_v36 }
 0x5e0   : > { %v5699_v20 = vmul.f32 %v18185_v38, %v14481_v33  ;;  %v6589_v37 = vpack.c.bf16 %v6527_v44, %v6526_v15  ;;  %v5824_v39 = vmul.f32 %v18187_v23, %v14522_v58  ;;  %v5825_v12 = vmul.f32 %v18187_v23, %v14517_v35 }
 0x5e1   : > { %v5635_v34 = vadd.f32 %v5575_v47, %v5511_v3  ;;  %v5758_v1 = vadd.f32 %v5698_v5, %v5634_v26  ;;  %v5892_v29 = vmul.f32 %v18178_v62, %v18162_v51  ;;  %v5893_v27 = vmul.f32 %v18178_v62, %v18167_v50 }
 0x5e2   : > { %v6024_v36 = vmul.f32 %v18188_v46, %v14528_v22  ;;  %7862 = vmatmul.mubr.bf16.vlgmr.msra.gmra.mrb[32].mxu0 %v6589_v37  ;;  %v6025_v6 = vmul.f32 %v18188_v46, %v14538_v19  ;;  %v6156_v14 = vmul.f32 %v18189_v11, %v14564_v42  ;;  %v6157_v9 = vmul.f32 %v18189_v11, %v14553_v54 }
 0x5e3   : > { %v5759_v33 = vadd.f32 %v5699_v20, %v5635_v34  ;;  %v5956_v24 = vadd.f32 %v5892_v29, %v5824_v39  ;;  %v5957_v57 = vadd.f32 %v5893_v27, %v5825_v12  ;;  %v6220_v0 = vmul.f32 %v18179_v61, %v18163_v48 }
 0x5e4   : > { %v6221_v53 = vmul.f32 %v18179_v61, %v18168_v43  ;;  %v6344_v44 = vmul.f32 %v18190_v55, %v14575_v41  ;;  %v6345_v21 = vmul.f32 %v18190_v55, %v14583_v60  ;;  %v18199_v3 = vrot.slane %v14234_v18, 7 }
 0x5e5   : > { %v18200_v52 = vrot.slane %v18164_v45, 7  ;;  %v6088_v5 = vadd.f32 %v6024_v36, %v5956_v24  ;;  %v6089_v20 = vadd.f32 %v6025_v6, %v5957_v57  ;;  %v6280_v37 = vadd.f32 %v6220_v0, %v6156_v14 }
 0x5e6   : > { %v18202_v47 = vmov %v18199_v3  ;;  %v6281_v34 = vadd.f32 %v6221_v53, %v6157_v9  ;;  %v5316_v12 = vrot.slane %v18164_v45, 1  ;;  %v5348_v29 = vrot.slane %v14234_v18, 1 }
 0x5e7   : > { %v14619_v15 = vsel %vm676_vm2, %v18200_v52, %v18199_v3  ;;  %v18201_v8 = vmov %v18200_v52  ;;  %v5512_v27 = vmul.f32 %v18184_v40, %v14522_v58  ;;  %v6404_v3 = vadd.f32 %v6344_v44, %v6280_v37 }
 0x5e8   : > { %v5220_v26 = vsel %vm676_vm2, %v18202_v47, %v18201_v8  ;;  %v6405_v52 = vadd.f32 %v6345_v21, %v6281_v34  ;;  %v6464_v16 = vadd.f32 %v6088_v5, %v5758_v1  ;;  %v6465_v2 = vadd.f32 %v6089_v20, %v5759_v33 }
 0x5e9   : > { %v14629_v39 = vsel %vm485_vm0, %v5220_v26, 0.0  ;;  %v14637_v36 = vsel %vm873_vm3, %v5316_v12, %v5348_v29  ;;  %v5412_v6 = vsel %vm873_vm3, %v5348_v29, %v5316_v12  ;;  %v5513_v14 = vmul.f32 %v18184_v40, %v14517_v35 }
 0x5ea   : > { %v5576_v9 = vmul.f32 %v18177_v31, %v18162_v51  ;;  %v6528_v24 = vadd.f32 %v6464_v16, %v6404_v3  ;;  %v6529_v57 = vadd.f32 %v6465_v2, %v6405_v52  ;;  %v14647_v58 = vsel %vm488_vm1, %v5412_v6, 0.0 }
 0x5eb   : > { %v5577_v1 = vmul.f32 %v18177_v31, %v18167_v50  ;;  %v5700_v0 = vmul.f32 %v18185_v38, %v14528_v22  ;;  %v5701_v53 = vmul.f32 %v18185_v38, %v14538_v19  ;;  %v5826_v35 = vmul.f32 %v18187_v23, %v14564_v42 }
 0x5ec   : > { %v5636_v33 = vadd.f32 %v5576_v9, %v5512_v27  ;;  %v6590_v51 = vpack.c.bf16 %v6529_v57, %v6528_v24  ;;  %v5827_v2 = vmul.f32 %v18187_v23, %v14553_v54  ;;  %v5894_v44 = vmul.f32 %v18178_v62, %v18163_v48 }
 0x5ed   : > { %v5637_v16 = vadd.f32 %v5577_v1, %v5513_v14  ;;  %v5895_v50 = vmul.f32 %v18178_v62, %v18168_v43  ;;  %v6026_v22 = vmul.f32 %v18188_v46, %v14575_v41  ;;  %v6027_v19 = vmul.f32 %v18188_v46, %v14583_v60 }
 0x5ee   : > { %v5760_v21 = vadd.f32 %v5700_v0, %v5636_v33  ;;  %7865 = vmatprep.mubr.bf16.mxu0 %v6590_v51  ;;  %v5958_v47 = vadd.f32 %v5894_v44, %v5826_v35  ;;  %v6158_v26 = vmul.f32 %v18189_v11, %v14629_v39  ;;  %v6159_v5 = vmul.f32 %v18189_v11, %v14619_v15 }
 0x5ef   : > { %v5761_v8 = vadd.f32 %v5701_v53, %v5637_v16  ;;  %v5959_v20 = vadd.f32 %v5895_v50, %v5827_v2  ;;  %v6222_v37 = vmul.f32 %v18179_v61, %v18164_v45  ;;  %v6223_v34 = vmul.f32 %v18179_v61, %v14234_v18 }
 0x5f0   : > { %v6346_v12 = vmul.f32 %v18190_v55, %v14637_v36  ;;  %v6090_v29 = vadd.f32 %v6026_v22, %v5958_v47  ;;  %v6347_v27 = vmul.f32 %v18190_v55, %v14647_v58  ;;  %v18203_v3 = vrot.slane %v14238_v59, 7 }
 0x5f1   : > { %v18204_v52 = vrot.slane %v14236_v28, 7  ;;  %v6091_v57 = vadd.f32 %v6027_v19, %v5959_v20  ;;  %v6282_v1 = vadd.f32 %v6222_v37, %v6158_v26  ;;  %v6283_v33 = vadd.f32 %v6223_v34, %v6159_v5 }
 0x5f2   : > { %v18206_v9 = vmov %v18203_v3  ;;  %v6466_v53 = vadd.f32 %v6090_v29, %v5760_v21  ;;  %v5317_v35 = vrot.slane %v14236_v28, 1  ;;  %v5349_v51 = vrot.slane %v14238_v59, 1 }
 0x5f3   : > { %v14685_v6 = vsel %vm676_vm2, %v18204_v52, %v18203_v3  ;;  %v18205_v14 = vmov %v18204_v52  ;;  %v5514_v16 = vmul.f32 %v18184_v40, %v14564_v42  ;;  %v6406_v2 = vadd.f32 %v6346_v12, %v6282_v1 }
 0x5f4   : > { %v5221_v24 = vsel %vm676_vm2, %v18206_v9, %v18205_v14  ;;  %v6407_v44 = vadd.f32 %v6347_v27, %v6283_v33  ;;  %v6467_v50 = vadd.f32 %v6091_v57, %v5761_v8  ;;  %v5515_v22 = vmul.f32 %v18184_v40, %v14553_v54 }
 0x5f5   : > { %v14695_v0 = vsel %vm485_vm0, %v5221_v24, 0.0  ;;  %v14705_v19 = vsel %vm873_vm3, %v5317_v35, %v5349_v51  ;;  %v5413_v21 = vsel %vm873_vm3, %v5349_v51, %v5317_v35  ;;  %v5578_v47 = vmul.f32 %v18177_v31, %v18163_v48 }
 0x5f6   : > { %v5579_v26 = vmul.f32 %v18177_v31, %v18168_v43  ;;  %v6530_v42 = vadd.f32 %v6466_v53, %v6406_v2  ;;  %v6531_v5 = vadd.f32 %v6467_v50, %v6407_v44  ;;  %v14715_v8 = vsel %vm488_vm1, %v5413_v21, 0.0 }
 0x5f7   : > { %v5702_v54 = vmul.f32 %v18185_v38, %v14575_v41  ;;  %v5638_v20 = vadd.f32 %v5578_v47, %v5514_v16  ;;  %v5703_v34 = vmul.f32 %v18185_v38, %v14583_v60  ;;  %v5828_v48 = vmul.f32 %v18187_v23, %v14629_v39 }
 0x5f8   : > { %v5639_v37 = vadd.f32 %v5579_v26, %v5515_v22  ;;  %v6591_v12 = vpack.c.bf16 %v6531_v5, %v6530_v42  ;;  %v5829_v43 = vmul.f32 %v18187_v23, %v14619_v15  ;;  %v5896_v29 = vmul.f32 %v18178_v62, %v18164_v45 }
 0x5f9   : > { %v5897_v27 = vmul.f32 %v18178_v62, %v14234_v18  ;;  %v5762_v3 = vadd.f32 %v5702_v54, %v5638_v20  ;;  %v6028_v52 = vmul.f32 %v18188_v46, %v14637_v36  ;;  %v6029_v60 = vmul.f32 %v18188_v46, %v14647_v58 }
 0x5fa   : > { %v5763_v41 = vadd.f32 %v5703_v34, %v5639_v37  ;;  %7866 = vmatmul.mubr.bf16.gmra.mrb[36].mxu0 %v6591_v12  ;;  %v5960_v14 = vadd.f32 %v5896_v29, %v5828_v48  ;;  %v6160_v24 = vmul.f32 %v18189_v11, %v14695_v0  ;;  %v6161_v57 = vmul.f32 %v18189_v11, %v14685_v6 }
 0x5fb   : > { %v5961_v9 = vadd.f32 %v5897_v27, %v5829_v43  ;;  %v6224_v1 = vmul.f32 %v18179_v61, %v14236_v28  ;;  %v6225_v33 = vmul.f32 %v18179_v61, %v14238_v59  ;;  %v6348_v53 = vmul.f32 %v18190_v55, %v14705_v19 }
 0x5fc   : > { %v6349_v35 = vmul.f32 %v18190_v55, %v14715_v8  ;;  %v6092_v51 = vadd.f32 %v6028_v52, %v5960_v14  ;;  %v18207_v2 = vrot.slane %v14242_v63, 7  ;;  %v18208_v44 = vrot.slane %v14240_v49, 7 }
 0x5fd   : > { %v6093_v16 = vadd.f32 %v6029_v60, %v5961_v9  ;;  %v6284_v26 = vadd.f32 %v6224_v1, %v6160_v24  ;;  %v6285_v42 = vadd.f32 %v6225_v33, %v6161_v57  ;;  %v5318_v54 = vrot.slane %v14240_v49, 1 }
 0x5fe   : > { %v14751_v50 = vsel %vm676_vm2, %v18208_v44, %v18207_v2  ;;  %v18209_v22 = vmov %v18208_v44  ;;  %v18210_v21 = vmov %v18207_v2  ;;  %v6468_v20 = vadd.f32 %v6092_v51, %v5762_v3 }
 0x5ff   : > { %v5222_v47 = vsel %vm676_vm2, %v18210_v21, %v18209_v22  ;;  %v6469_v37 = vadd.f32 %v6093_v16, %v5763_v41  ;;  %v5350_v34 = vrot.slane %v14242_v63, 1  ;;  %v5516_v48 = vmul.f32 %v18184_v40, %v14629_v39 }
 0x600   : > { %v14761_v5 = vsel %vm485_vm0, %v5222_v47, 0.0  ;;  %v6408_v12 = vadd.f32 %v6348_v53, %v6284_v26  ;;  %v6409_v43 = vadd.f32 %v6349_v35, %v6285_v42  ;;  %v5517_v29 = vmul.f32 %v18184_v40, %v14619_v15 }
 0x601   : > { %v5580_v27 = vmul.f32 %v18177_v31, %v18164_v45  ;;  %v14773_v52 = vsel %vm873_vm3, %v5318_v54, %v5350_v34  ;;  %v5414_v3 = vsel %vm873_vm3, %v5350_v34, %v5318_v54  ;;  %v5581_v41 = vmul.f32 %v18177_v31, %v14234_v18 }
 0x602   : > { %v5704_v39 = vmul.f32 %v18185_v38, %v14637_v36  ;;  %v6532_v60 = vadd.f32 %v6468_v20, %v6408_v12  ;;  %v6533_v14 = vadd.f32 %v6469_v37, %v6409_v43  ;;  %v14783_v15 = vsel %vm488_vm1, %v5414_v3, 0.0 }
 0x603   : > { %v5640_v45 = vadd.f32 %v5580_v27, %v5516_v48  ;;  %v5641_v9 = vadd.f32 %v5581_v41, %v5517_v29  ;;  %v5705_v24 = vmul.f32 %v18185_v38, %v14647_v58  ;;  %v5830_v57 = vmul.f32 %v18187_v23, %v14695_v0 }
 0x604   : > { %v5831_v18 = vmul.f32 %v18187_v23, %v14685_v6  ;;  %v6592_v1 = vpack.c.bf16 %v6533_v14, %v6532_v60  ;;  %v5898_v36 = vmul.f32 %v18178_v62, %v14236_v28  ;;  %v5899_v53 = vmul.f32 %v18178_v62, %v14238_v59 }
 0x605   : > { %v5764_v33 = vadd.f32 %v5704_v39, %v5640_v45  ;;  %v5765_v35 = vadd.f32 %v5705_v24, %v5641_v9  ;;  %v6030_v51 = vmul.f32 %v18188_v46, %v14705_v19  ;;  %v6031_v58 = vmul.f32 %v18188_v46, %v14715_v8 }
 0x606   : > { %v6162_v16 = vmul.f32 %v18189_v11, %v14761_v5  ;;  %7869 = vmatprep.mubr.bf16.mxu0 %v6592_v1  ;;  %v5962_v2 = vadd.f32 %v5898_v36, %v5830_v57  ;;  %v5963_v44 = vadd.f32 %v5899_v53, %v5831_v18  ;;  %v6163_v22 = vmul.f32 %v18189_v11, %v14751_v50 }
 0x607   : > { %v6226_v21 = vmul.f32 %v18179_v61, %v14240_v49  ;;  %v6227_v47 = vmul.f32 %v18179_v61, %v14242_v63  ;;  %v6350_v26 = vmul.f32 %v18190_v55, %v14773_v52  ;;  %v6351_v42 = vmul.f32 %v18190_v55, %v14783_v15 }
 0x608   : > { %v18211_v54 = vrot.slane %v14246_v32, 7  ;;  %v18212_v20 = vrot.slane %v14244_v30, 7  ;;  %v6094_v34 = vadd.f32 %v6030_v51, %v5962_v2  ;;  %v6095_v48 = vadd.f32 %v6031_v58, %v5963_v44 }
 0x609   : > { %v6286_v12 = vadd.f32 %v6226_v21, %v6162_v16  ;;  %v6287_v3 = vadd.f32 %v6227_v47, %v6163_v22  ;;  %v5319_v39 = vrot.slane %v14244_v30, 1  ;;  %v5351_v60 = vrot.slane %v14246_v32, 1 }
 0x60a   : > { %v14817_v37 = vsel %vm676_vm2, %v18212_v20, %v18211_v54  ;;  %v18213_v43 = vmov %v18212_v20  ;;  %v18214_v29 = vmov %v18211_v54  ;;  %v6470_v45 = vadd.f32 %v6094_v34, %v5764_v33 }
 0x60b   : > { %v5223_v27 = vsel %vm676_vm2, %v18214_v29, %v18213_v43  ;;  %v6410_v14 = vadd.f32 %v6350_v26, %v6286_v12  ;;  %v6471_v9 = vadd.f32 %v6095_v48, %v5765_v35  ;;  %v5518_v24 = vmul.f32 %v18184_v40, %v14695_v0 }
 0x60c   : > { %v14827_v41 = vsel %vm485_vm0, %v5223_v27, 0.0  ;;  %v6411_v57 = vadd.f32 %v6351_v42, %v6287_v3  ;;  %v14835_v18 = vsel %vm873_vm3, %v5319_v39, %v5351_v60  ;;  %v5415_v1 = vsel %vm873_vm3, %v5351_v60, %v5319_v39 }
 0x60d   : > { %v5519_v36 = vmul.f32 %v18184_v40, %v14685_v6  ;;  %v6534_v53 = vadd.f32 %v6470_v45, %v6410_v14  ;;  %v14843_v51 = vsel %vm488_vm1, %v5415_v1, 0.0  ;;  %v5582_v33 = vmul.f32 %v18177_v31, %v14236_v28 }
 0x60e   : > { %v5583_v0 = vmul.f32 %v18177_v31, %v14238_v59  ;;  %v6535_v35 = vadd.f32 %v6471_v9, %v6411_v57  ;;  %v5706_v58 = vmul.f32 %v18185_v38, %v14705_v19  ;;  %v5707_v16 = vmul.f32 %v18185_v38, %v14715_v8 }
 0x60f   : > { %v5832_v6 = vmul.f32 %v18187_v23, %v14761_v5  ;;  %v5642_v2 = vadd.f32 %v5582_v33, %v5518_v24  ;;  %v5833_v22 = vmul.f32 %v18187_v23, %v14751_v50  ;;  %v5900_v28 = vmul.f32 %v18178_v62, %v14240_v49 }
 0x610   : > { %v5643_v44 = vadd.f32 %v5583_v0, %v5519_v36  ;;  %v6593_v21 = vpack.c.bf16 %v6535_v35, %v6534_v53  ;;  %v5901_v59 = vmul.f32 %v18178_v62, %v14242_v63  ;;  %v6032_v19 = vmul.f32 %v18188_v46, %v14773_v52 }
 0x611   : > { %v6033_v8 = vmul.f32 %v18188_v46, %v14783_v15  ;;  %v5766_v47 = vadd.f32 %v5706_v58, %v5642_v2  ;;  %v5964_v42 = vadd.f32 %v5900_v28, %v5832_v6  ;;  %v6164_v54 = vmul.f32 %v18189_v11, %v14827_v41 }
 0x612   : > { %v5767_v26 = vadd.f32 %v5707_v16, %v5643_v44  ;;  %7870 = vmatmul.mubr.bf16.gmra.mrb[40].mxu0 %v6593_v21  ;;  %v5965_v20 = vadd.f32 %v5901_v59, %v5833_v22  ;;  %v6165_v34 = vmul.f32 %v18189_v11, %v14817_v37  ;;  %v6228_v48 = vmul.f32 %v18179_v61, %v14244_v30 }
 0x613   : > { %v6229_v12 = vmul.f32 %v18179_v61, %v14246_v32  ;;  %v6096_v43 = vadd.f32 %v6032_v19, %v5964_v42  ;;  %v6352_v29 = vmul.f32 %v18190_v55, %v14835_v18  ;;  %v6353_v27 = vmul.f32 %v18190_v55, %v14843_v51 }
 0x614   : > { %v18215_v3 = vrot.slane %v14250_v56, 7  ;;  %v18216_v39 = vrot.slane %v14248_v7, 7  ;;  %v6097_v14 = vadd.f32 %v6033_v8, %v5965_v20  ;;  %v6288_v45 = vadd.f32 %v6228_v48, %v6164_v54 }
 0x615   : > { %v6289_v9 = vadd.f32 %v6229_v12, %v6165_v34  ;;  %v6472_v36 = vadd.f32 %v6096_v43, %v5766_v47  ;;  %v5320_v33 = vrot.slane %v14248_v7, 1  ;;  %v5352_v0 = vrot.slane %v14250_v56, 1 }
 0x616   : > { %v14883_v60 = vsel %vm676_vm2, %v18216_v39, %v18215_v3  ;;  %v18217_v24 = vmov %v18216_v39  ;;  %v18218_v57 = vmov %v18215_v3  ;;  %v6412_v35 = vadd.f32 %v6352_v29, %v6288_v45 }
 0x617   : > { %v5224_v1 = vsel %vm676_vm2, %v18218_v57, %v18217_v24  ;;  %v6413_v58 = vadd.f32 %v6353_v27, %v6289_v9  ;;  %v6473_v16 = vadd.f32 %v6097_v14, %v5767_v26  ;;  %v5520_v6 = vmul.f32 %v18184_v40, %v14761_v5 }
 0x618   : > { %v14893_v53 = vsel %vm485_vm0, %v5224_v1, 0.0  ;;  %v14901_v2 = vsel %vm873_vm3, %v5320_v33, %v5352_v0  ;;  %v5416_v44 = vsel %vm873_vm3, %v5352_v0, %v5320_v33  ;;  %v5521_v22 = vmul.f32 %v18184_v40, %v14751_v50 }
 0x619   : > { %v5584_v28 = vmul.f32 %v18177_v31, %v14240_v49  ;;  %v6536_v21 = vadd.f32 %v6472_v36, %v6412_v35  ;;  %v6537_v59 = vadd.f32 %v6473_v16, %v6413_v58  ;;  %v14911_v19 = vsel %vm488_vm1, %v5416_v44, 0.0 }
 0x61a   : > { %v5585_v5 = vmul.f32 %v18177_v31, %v14242_v63  ;;  %v5708_v47 = vmul.f32 %v18185_v38, %v14773_v52  ;;  %v5709_v26 = vmul.f32 %v18185_v38, %v14783_v15  ;;  %v5834_v50 = vmul.f32 %v18187_v23, %v14827_v41 }
 0x61b   : > { %v5644_v8 = vadd.f32 %v5584_v28, %v5520_v6  ;;  %v6594_v49 = vpack.c.bf16 %v6537_v59, %v6536_v21  ;;  %v5835_v54 = vmul.f32 %v18187_v23, %v14817_v37  ;;  %v5902_v20 = vmul.f32 %v18178_v62, %v14244_v30 }
 0x61c   : > { %v5645_v42 = vadd.f32 %v5585_v5, %v5521_v22  ;;  %v5903_v63 = vmul.f32 %v18178_v62, %v14246_v32  ;;  %v6034_v52 = vmul.f32 %v18188_v46, %v14835_v18  ;;  %v6035_v15 = vmul.f32 %v18188_v46, %v14843_v51 }
 0x61d   : > { %v5768_v34 = vadd.f32 %v5708_v47, %v5644_v8  ;;  %7873 = vmatprep.mubr.bf16.mxu0 %v6594_v49  ;;  %v5966_v12 = vadd.f32 %v5902_v20, %v5834_v50  ;;  %v6166_v43 = vmul.f32 %v18189_v11, %v14893_v53  ;;  %v6167_v29 = vmul.f32 %v18189_v11, %v14883_v60 }
 0x61e   : > { %v5769_v48 = vadd.f32 %v5709_v26, %v5645_v42  ;;  %v5967_v27 = vadd.f32 %v5903_v63, %v5835_v54  ;;  %v6230_v3 = vmul.f32 %v18179_v61, %v14248_v7  ;;  %v6231_v39 = vmul.f32 %v18179_v61, %v14250_v56 }
 0x61f   : > { %v6354_v14 = vmul.f32 %v18190_v55, %v14901_v2  ;;  %v6098_v45 = vadd.f32 %v6034_v52, %v5966_v12  ;;  %v6355_v9 = vmul.f32 %v18190_v55, %v14911_v19  ;;  %v18219_v24 = vrot.slane %v14254_v4, 7 }
 0x620   : > { %v18220_v57 = vrot.slane %v14252_v10, 7  ;;  %v6099_v35 = vadd.f32 %v6035_v15, %v5967_v27  ;;  %v6290_v58 = vadd.f32 %v6230_v3, %v6166_v43  ;;  %v6291_v16 = vadd.f32 %v6231_v39, %v6167_v29 }
 0x621   : > { %v18222_v33 = vmov %v18219_v24  ;;  %v6474_v44 = vadd.f32 %v6098_v45, %v5768_v34  ;;  %v5321_v22 = vrot.slane %v14252_v10, 1  ;;  %v5353_v28 = vrot.slane %v14254_v4, 1 }
 0x622   : > { %v14949_v1 = vsel %vm676_vm2, %v18220_v57, %v18219_v24  ;;  %v18221_v36 = vmov %v18220_v57  ;;  %v5522_v21 = vmul.f32 %v18184_v40, %v14827_v41  ;;  %v6414_v59 = vadd.f32 %v6354_v14, %v6290_v58 }
 0x623   : > { %v5225_v0 = vsel %vm676_vm2, %v18222_v33, %v18221_v36  ;;  %v6415_v5 = vadd.f32 %v6355_v9, %v6291_v16  ;;  %v6475_v8 = vadd.f32 %v6099_v35, %v5769_v48  ;;  %v5523_v47 = vmul.f32 %v18184_v40, %v14817_v37  ;;  %v18224_v35 = vld [vmem:[#allocation70_spill] sm:$0xff] }
 0x624   : > { %v14959_v6 = vsel %vm485_vm0, %v5225_v0, 0.0  ;;  %v14969_v26 = vsel %vm873_vm3, %v5321_v22, %v5353_v28  ;;  %v5417_v50 = vsel %vm873_vm3, %v5353_v28, %v5321_v22  ;;  %v5586_v49 = vmul.f32 %v18177_v31, %v14244_v30 }
 0x625   : > { %v5587_v42 = vmul.f32 %v18177_v31, %v14246_v32  ;;  %v6538_v41 = vadd.f32 %v6474_v44, %v6414_v59  ;;  %v6539_v54 = vadd.f32 %v6475_v8, %v6415_v5  ;;  %v14979_v20 = vsel %vm488_vm1, %v5417_v50, 0.0 }
 0x626   : > { %v5710_v37 = vmul.f32 %v18185_v38, %v14835_v18  ;;  %v5646_v34 = vadd.f32 %v5586_v49, %v5522_v21  ;;  %v5711_v52 = vmul.f32 %v18185_v38, %v14843_v51  ;;  %v5836_v30 = vmul.f32 %v18187_v23, %v14893_v53 }
 0x627   : > { %v5647_v63 = vadd.f32 %v5587_v42, %v5523_v47  ;;  %v6595_v15 = vpack.c.bf16 %v6539_v54, %v6538_v41  ;;  %v5837_v32 = vmul.f32 %v18187_v23, %v14883_v60  ;;  %v5904_v48 = vmul.f32 %v18178_v62, %v14248_v7 }
 0x628   : > { %v5905_v12 = vmul.f32 %v18178_v62, %v14250_v56  ;;  %v5770_v43 = vadd.f32 %v5710_v37, %v5646_v34  ;;  %v6036_v29 = vmul.f32 %v18188_v46, %v14901_v2  ;;  %v6037_v51 = vmul.f32 %v18188_v46, %v14911_v19 }
 0x629   : > { %v5771_v18 = vadd.f32 %v5711_v52, %v5647_v63  ;;  %7874 = vmatmul.mubr.bf16.gmra.mrb[44].mxu0 %v6595_v15  ;;  %v5968_v27 = vadd.f32 %v5904_v48, %v5836_v30  ;;  %v6168_v39 = vmul.f32 %v18189_v11, %v14959_v6  ;;  %v6169_v14 = vmul.f32 %v18189_v11, %v14949_v1 }
 0x62a   : > { %v5969_v3 = vadd.f32 %v5905_v12, %v5837_v32  ;;  %v6232_v45 = vmul.f32 %v18179_v61, %v14252_v10  ;;  %v6233_v9 = vmul.f32 %v18179_v61, %v14254_v4  ;;  %v6356_v24 = vmul.f32 %v18190_v55, %v14969_v26 }
 0x62b   : > { %v6357_v57 = vmul.f32 %v18190_v55, %v14979_v20  ;;  %v6100_v36 = vadd.f32 %v6036_v29, %v5968_v27  ;;  %v18223_v0 = vrot.slane %v14258_v13, 7  ;;  %v18225_v58 = vrot.slane %v18224_v35, 7 }
 0x62c   : > { %v6101_v33 = vadd.f32 %v6037_v51, %v5969_v3  ;;  %v6292_v21 = vadd.f32 %v6232_v45, %v6168_v39  ;;  %v6293_v59 = vadd.f32 %v6233_v9, %v6169_v14  ;;  %v5322_v8 = vrot.slane %v18224_v35, 1 }
 0x62d   : > { %v15015_v16 = vsel %vm676_vm2, %v18225_v58, %v18223_v0  ;;  %v18226_v44 = vmov %v18225_v58  ;;  %v18227_v22 = vmov %v18223_v0  ;;  %v6476_v47 = vadd.f32 %v6100_v36, %v5770_v43  ;;  %v18228_v0 = vld [vmem:[#allocation44_spill] sm:$0xff] }
 0x62e   : > { %v5226_v28 = vsel %vm676_vm2, %v18227_v22, %v18226_v44  ;;  %v6477_v50 = vadd.f32 %v6101_v33, %v5771_v18  ;;  %v5354_v49 = vrot.slane %v14258_v13, 1  ;;  %v5524_v42 = vmul.f32 %v18184_v40, %v14893_v53  ;;  %v18230_v44 = vld [vmem:[#allocation69_spill] sm:$0xff] }
 0x62f   : > { %v15025_v5 = vsel %vm485_vm0, %v5226_v28, 0.0  ;;  %v6416_v41 = vadd.f32 %v6356_v24, %v6292_v21  ;;  %v6417_v54 = vadd.f32 %v6357_v57, %v6293_v59  ;;  %v5525_v37 = vmul.f32 %v18184_v40, %v14883_v60 }
 0x630   : > { %v5588_v34 = vmul.f32 %v18177_v31, %v14248_v7  ;;  %v15037_v63 = vsel %vm873_vm3, %v5322_v8, %v5354_v49  ;;  %v5418_v52 = vsel %vm873_vm3, %v5354_v49, %v5322_v8  ;;  %v5589_v30 = vmul.f32 %v18177_v31, %v14250_v56 }
 0x631   : > { %v5712_v53 = vmul.f32 %v18185_v38, %v14901_v2  ;;  %v6540_v15 = vadd.f32 %v6476_v47, %v6416_v41  ;;  %v6541_v32 = vadd.f32 %v6477_v50, %v6417_v54  ;;  %v15047_v60 = vsel %vm488_vm1, %v5418_v52, 0.0 }
 0x632   : > { %v5648_v7 = vadd.f32 %v5588_v34, %v5524_v42  ;;  %v5649_v48 = vadd.f32 %v5589_v30, %v5525_v37  ;;  %v5713_v12 = vmul.f32 %v18185_v38, %v14911_v19  ;;  %v5838_v43 = vmul.f32 %v18187_v23, %v14959_v6 }
 0x633   : > { %v5839_v56 = vmul.f32 %v18187_v23, %v14949_v1  ;;  %v6596_v18 = vpack.c.bf16 %v6541_v32, %v6540_v15  ;;  %v5906_v2 = vmul.f32 %v18178_v62, %v14252_v10  ;;  %v5907_v51 = vmul.f32 %v18178_v62, %v14254_v4 }
 0x634   : > { %v5772_v29 = vadd.f32 %v5712_v53, %v5648_v7  ;;  %v5773_v27 = vadd.f32 %v5713_v12, %v5649_v48  ;;  %v6038_v3 = vmul.f32 %v18188_v46, %v14969_v26  ;;  %v6039_v19 = vmul.f32 %v18188_v46, %v14979_v20 }
 0x635   : > { %v6170_v39 = vmul.f32 %v18189_v11, %v15025_v5  ;;  %7877 = vmatprep.mubr.bf16.mxu0 %v6596_v18  ;;  %v5970_v14 = vadd.f32 %v5906_v2, %v5838_v43  ;;  %v5971_v45 = vadd.f32 %v5907_v51, %v5839_v56  ;;  %v6171_v9 = vmul.f32 %v18189_v11, %v15015_v16 }
 0x636   : > { %v6234_v24 = vmul.f32 %v18179_v61, %v18224_v35  ;;  %v6235_v57 = vmul.f32 %v18179_v61, %v14258_v13  ;;  %v6358_v36 = vmul.f32 %v18190_v55, %v15037_v63  ;;  %v6359_v33 = vmul.f32 %v18190_v55, %v15047_v60 }
 0x637   : > { %v18229_v58 = vrot.slane %v18228_v0, 7  ;;  %v18231_v22 = vrot.slane %v18230_v44, 7  ;;  %v6102_v21 = vadd.f32 %v6038_v3, %v5970_v14  ;;  %v6103_v59 = vadd.f32 %v6039_v19, %v5971_v45 }
 0x638   : > { %v6294_v8 = vadd.f32 %v6234_v24, %v6170_v39  ;;  %v6295_v42 = vadd.f32 %v6235_v57, %v6171_v9  ;;  %v5323_v54 = vrot.slane %v18230_v44, 1  ;;  %v5355_v37 = vrot.slane %v18228_v0, 1 }
 0x639   : > { %v15081_v28 = vsel %vm676_vm2, %v18231_v22, %v18229_v58  ;;  %v18232_v47 = vmov %v18231_v22  ;;  %v18233_v50 = vmov %v18229_v58  ;;  %v6478_v52 = vadd.f32 %v6102_v21, %v5772_v29 }
 0x63a   : > { %v5227_v49 = vsel %vm676_vm2, %v18233_v50, %v18232_v47  ;;  %v6418_v34 = vadd.f32 %v6358_v36, %v6294_v8  ;;  %v6479_v30 = vadd.f32 %v6103_v59, %v5773_v27  ;;  %v5526_v53 = vmul.f32 %v18184_v40, %v14959_v6  ;;  %v18234_v59 = vld [vmem:[#allocation73_spill] sm:$0xff]  ;;  %v18236_v47 = vld [vmem:[#allocation71_spill] sm:$0xff] }
 0x63b   : > { %v15091_v41 = vsel %vm485_vm0, %v5227_v49, 0.0  ;;  %v6419_v15 = vadd.f32 %v6359_v33, %v6295_v42  ;;  %v15099_v32 = vsel %vm873_vm3, %v5323_v54, %v5355_v37  ;;  %v5419_v7 = vsel %vm873_vm3, %v5355_v37, %v5323_v54 }
 0x63c   : > { %v5527_v48 = vmul.f32 %v18184_v40, %v14949_v1  ;;  %v6542_v12 = vadd.f32 %v6478_v52, %v6418_v34  ;;  %v15107_v43 = vsel %vm488_vm1, %v5419_v7, 0.0  ;;  %v5590_v56 = vmul.f32 %v18177_v31, %v14252_v10 }
 0x63d   : > { %v5591_v6 = vmul.f32 %v18177_v31, %v14254_v4  ;;  %v6543_v18 = vadd.f32 %v6479_v30, %v6419_v15  ;;  %v5714_v29 = vmul.f32 %v18185_v38, %v14969_v26  ;;  %v5715_v2 = vmul.f32 %v18185_v38, %v14979_v20 }
 0x63e   : > { %v5840_v1 = vmul.f32 %v18187_v23, %v15025_v5  ;;  %v5650_v51 = vadd.f32 %v5590_v56, %v5526_v53  ;;  %v5841_v3 = vmul.f32 %v18187_v23, %v15015_v16  ;;  %v5908_v10 = vmul.f32 %v18178_v62, %v18224_v35 }
 0x63f   : > { %v5651_v27 = vadd.f32 %v5591_v6, %v5527_v48  ;;  %v6597_v19 = vpack.c.bf16 %v6543_v18, %v6542_v12  ;;  %v5909_v4 = vmul.f32 %v18178_v62, %v14258_v13  ;;  %v6040_v26 = vmul.f32 %v18188_v46, %v15037_v63 }
 0x640   : > { %v6041_v20 = vmul.f32 %v18188_v46, %v15047_v60  ;;  %v5774_v39 = vadd.f32 %v5714_v29, %v5650_v51  ;;  %v5972_v45 = vadd.f32 %v5908_v10, %v5840_v1  ;;  %v6172_v9 = vmul.f32 %v18189_v11, %v15091_v41 }
 0x641   : > { %v5775_v14 = vadd.f32 %v5715_v2, %v5651_v27  ;;  %7878 = vmatmul.mubr.bf16.gmra.mrb[48].mxu0 %v6597_v19  ;;  %v5973_v24 = vadd.f32 %v5909_v4, %v5841_v3  ;;  %v6173_v57 = vmul.f32 %v18189_v11, %v15081_v28  ;;  %v6236_v36 = vmul.f32 %v18179_v61, %v18230_v44 }
 0x642   : > { %v6237_v33 = vmul.f32 %v18179_v61, %v18228_v0  ;;  %v6104_v58 = vadd.f32 %v6040_v26, %v5972_v45  ;;  %v6360_v22 = vmul.f32 %v18190_v55, %v15099_v32  ;;  %v6361_v21 = vmul.f32 %v18190_v55, %v15107_v43 }
 0x643   : > { %v18235_v8 = vrot.slane %v18234_v59, 7  ;;  %v18237_v50 = vrot.slane %v18236_v47, 7  ;;  %v6105_v42 = vadd.f32 %v6041_v20, %v5973_v24  ;;  %v6296_v54 = vadd.f32 %v6236_v36, %v6172_v9 }
 0x644   : > { %v6297_v37 = vadd.f32 %v6237_v33, %v6173_v57  ;;  %v6480_v53 = vadd.f32 %v6104_v58, %v5774_v39  ;;  %v5324_v7 = vrot.slane %v18236_v47, 1  ;;  %v5356_v48 = vrot.slane %v18234_v59, 1 }
 0x645   : > { %v15147_v49 = vsel %vm676_vm2, %v18237_v50, %v18235_v8  ;;  %v18238_v34 = vmov %v18237_v50  ;;  %v18239_v52 = vmov %v18235_v8  ;;  %v6420_v12 = vadd.f32 %v6360_v22, %v6296_v54 }
 0x646   : > { %v5228_v30 = vsel %vm676_vm2, %v18239_v52, %v18238_v34  ;;  %v6421_v56 = vadd.f32 %v6361_v21, %v6297_v37  ;;  %v6481_v6 = vadd.f32 %v6105_v42, %v5775_v14  ;;  %v5528_v18 = vmul.f32 %v18184_v40, %v15025_v5  ;;  %v18240_v42 = vld [vmem:[#allocation24_spill] sm:$0xff] }
 0x647   : > { %v15157_v15 = vsel %vm485_vm0, %v5228_v30, 0.0  ;;  %v15165_v29 = vsel %vm873_vm3, %v5324_v7, %v5356_v48  ;;  %v5420_v2 = vsel %vm873_vm3, %v5356_v48, %v5324_v7  ;;  %v5529_v1 = vmul.f32 %v18184_v40, %v15015_v16  ;;  %v18242_v37 = vld [vmem:[#allocation72_spill] sm:$0xff] }
 0x648   : > { %v5592_v51 = vmul.f32 %v18177_v31, %v18224_v35  ;;  %v6544_v27 = vadd.f32 %v6480_v53, %v6420_v12  ;;  %v6545_v3 = vadd.f32 %v6481_v6, %v6421_v56  ;;  %v15175_v10 = vsel %vm488_vm1, %v5420_v2, 0.0 }
 0x649   : > { %v5593_v5 = vmul.f32 %v18177_v31, %v14258_v13  ;;  %v5716_v4 = vmul.f32 %v18185_v38, %v15037_v63  ;;  %v5717_v26 = vmul.f32 %v18185_v38, %v15047_v60  ;;  %v5842_v16 = vmul.f32 %v18187_v23, %v15091_v41 }
 0x64a   : > { %v5652_v19 = vadd.f32 %v5592_v51, %v5528_v18  ;;  %v6598_v35 = vpack.c.bf16 %v6545_v3, %v6544_v27  ;;  %v5843_v39 = vmul.f32 %v18187_v23, %v15081_v28  ;;  %v5910_v14 = vmul.f32 %v18178_v62, %v18230_v44 }
 0x64b   : > { %v5653_v20 = vadd.f32 %v5593_v5, %v5529_v1  ;;  %v5911_v13 = vmul.f32 %v18178_v62, %v18228_v0  ;;  %v6042_v63 = vmul.f32 %v18188_v46, %v15099_v32  ;;  %v6043_v60 = vmul.f32 %v18188_v46, %v15107_v43 }
 0x64c   : > { %v5776_v45 = vadd.f32 %v5716_v4, %v5652_v19  ;;  %7881 = vmatprep.mubr.bf16.mxu0 %v6598_v35  ;;  %v5974_v24 = vadd.f32 %v5910_v14, %v5842_v16  ;;  %v6174_v57 = vmul.f32 %v18189_v11, %v15157_v15  ;;  %v6175_v36 = vmul.f32 %v18189_v11, %v15147_v49 }
 0x64d   : > { %v5777_v9 = vadd.f32 %v5717_v26, %v5653_v20  ;;  %v5975_v33 = vadd.f32 %v5911_v13, %v5843_v39  ;;  %v6238_v58 = vmul.f32 %v18179_v61, %v18236_v47  ;;  %v6239_v22 = vmul.f32 %v18179_v61, %v18234_v59 }
 0x64e   : > { %v6362_v21 = vmul.f32 %v18190_v55, %v15165_v29  ;;  %v6106_v8 = vadd.f32 %v6042_v63, %v5974_v24  ;;  %v6363_v50 = vmul.f32 %v18190_v55, %v15175_v10  ;;  %v18241_v54 = vrot.slane %v18240_v42, 7 }
 0x64f   : > { %v18243_v34 = vrot.slane %v18242_v37, 7  ;;  %v6107_v48 = vadd.f32 %v6043_v60, %v5975_v33  ;;  %v6298_v12 = vadd.f32 %v6238_v58, %v6174_v57  ;;  %v6299_v56 = vadd.f32 %v6239_v22, %v6175_v36 }
 0x650   : > { %v18245_v53 = vmov %v18241_v54  ;;  %v6482_v18 = vadd.f32 %v6106_v8, %v5776_v45  ;;  %v5325_v2 = vrot.slane %v18242_v37, 1  ;;  %v5357_v1 = vrot.slane %v18240_v42, 1 }
 0x651   : > { %v15213_v52 = vsel %vm676_vm2, %v18243_v34, %v18241_v54  ;;  %v18244_v30 = vmov %v18243_v34  ;;  %v5530_v51 = vmul.f32 %v18184_v40, %v15091_v41  ;;  %v6422_v27 = vadd.f32 %v6362_v21, %v6298_v12 }
 0x652   : > { %v5229_v7 = vsel %vm676_vm2, %v18245_v53, %v18244_v30  ;;  %v6423_v3 = vadd.f32 %v6363_v50, %v6299_v56  ;;  %v6483_v5 = vadd.f32 %v6107_v48, %v5777_v9  ;;  %v5531_v19 = vmul.f32 %v18184_v40, %v15081_v28  ;;  %v18246_v53 = vld [vmem:[#allocation11_spill] sm:$0xff]  ;;  %v18248_v48 = vld [vmem:[#allocation29_spill] sm:$0xff] }
 0x653   : > { %v15223_v6 = vsel %vm485_vm0, %v5229_v7, 0.0  ;;  %v15233_v4 = vsel %vm873_vm3, %v5325_v2, %v5357_v1  ;;  %v5421_v26 = vsel %vm873_vm3, %v5357_v1, %v5325_v2  ;;  %v5594_v16 = vmul.f32 %v18177_v31, %v18230_v44 }
 0x654   : > { %v5595_v35 = vmul.f32 %v18177_v31, %v18228_v0  ;;  %v6546_v41 = vadd.f32 %v6482_v18, %v6422_v27  ;;  %v6547_v20 = vadd.f32 %v6483_v5, %v6423_v3  ;;  %v15243_v39 = vsel %vm488_vm1, %v5421_v26, 0.0 }
 0x655   : > { %v5718_v28 = vmul.f32 %v18185_v38, %v15099_v32  ;;  %v5654_v14 = vadd.f32 %v5594_v16, %v5530_v51  ;;  %v5719_v13 = vmul.f32 %v18185_v38, %v15107_v43  ;;  %v5844_v44 = vmul.f32 %v18187_v23, %v15157_v15 }
 0x656   : > { %v5655_v45 = vadd.f32 %v5595_v35, %v5531_v19  ;;  %v6599_v63 = vpack.c.bf16 %v6547_v20, %v6546_v41  ;;  %v5845_v0 = vmul.f32 %v18187_v23, %v15147_v49  ;;  %v5912_v60 = vmul.f32 %v18178_v62, %v18236_v47 }
 0x657   : > { %v5913_v9 = vmul.f32 %v18178_v62, %v18234_v59  ;;  %v5778_v24 = vadd.f32 %v5718_v28, %v5654_v14  ;;  %v6044_v57 = vmul.f32 %v18188_v46, %v15165_v29  ;;  %v6045_v43 = vmul.f32 %v18188_v46, %v15175_v10 }
 0x658   : > { %v5779_v32 = vadd.f32 %v5719_v13, %v5655_v45  ;;  %7882 = vmatmul.mubr.bf16.gmra.mrb[52].mxu0 %v6599_v63  ;;  %v5976_v36 = vadd.f32 %v5912_v60, %v5844_v44  ;;  %v6176_v58 = vmul.f32 %v18189_v11, %v15223_v6  ;;  %v6177_v22 = vmul.f32 %v18189_v11, %v15213_v52 }
 0x659   : > { %v5977_v33 = vadd.f32 %v5913_v9, %v5845_v0  ;;  %v6240_v21 = vmul.f32 %v18179_v61, %v18242_v37  ;;  %v6241_v8 = vmul.f32 %v18179_v61, %v18240_v42  ;;  %v6364_v50 = vmul.f32 %v18190_v55, %v15233_v4 }
 0x65a   : > { %v6365_v54 = vmul.f32 %v18190_v55, %v15243_v39  ;;  %v6108_v34 = vadd.f32 %v6044_v57, %v5976_v36  ;;  %v18247_v7 = vrot.slane %v18246_v53, 7  ;;  %v18249_v12 = vrot.slane %v18248_v48, 7 }
 0x65b   : > { %v6109_v30 = vadd.f32 %v6045_v43, %v5977_v33  ;;  %v6300_v51 = vadd.f32 %v6240_v21, %v6176_v58  ;;  %v6301_v27 = vadd.f32 %v6241_v8, %v6177_v22  ;;  %v5326_v5 = vrot.slane %v18248_v48, 1 }
 0x65c   : > { %v15279_v56 = vsel %vm676_vm2, %v18249_v12, %v18247_v7  ;;  %v18250_v18 = vmov %v18249_v12  ;;  %v18251_v2 = vmov %v18247_v7  ;;  %v6484_v19 = vadd.f32 %v6108_v34, %v5778_v24  ;;  %v18252_v7 = vld [vmem:[#allocation28_spill] sm:$0xff] }
 0x65d   : > { %v5230_v1 = vsel %vm676_vm2, %v18251_v2, %v18250_v18  ;;  %v6485_v26 = vadd.f32 %v6109_v30, %v5779_v32  ;;  %v5358_v16 = vrot.slane %v18246_v53, 1  ;;  %v5532_v35 = vmul.f32 %v18184_v40, %v15157_v15  ;;  %v18254_v18 = vld [vmem:[#allocation10_spill] sm:$0xff] }
 0x65e   : > { %v15289_v3 = vsel %vm485_vm0, %v5230_v1, 0.0  ;;  %v6424_v41 = vadd.f32 %v6364_v50, %v6300_v51  ;;  %v6425_v20 = vadd.f32 %v6365_v54, %v6301_v27  ;;  %v5533_v28 = vmul.f32 %v18184_v40, %v15147_v49 }
 0x65f   : > { %v5596_v14 = vmul.f32 %v18177_v31, %v18236_v47  ;;  %v15301_v45 = vsel %vm873_vm3, %v5326_v5, %v5358_v16  ;;  %v5422_v13 = vsel %vm873_vm3, %v5358_v16, %v5326_v5  ;;  %v5597_v44 = vmul.f32 %v18177_v31, %v18234_v59 }
 0x660   : > { %v5720_v15 = vmul.f32 %v18185_v38, %v15165_v29  ;;  %v6548_v63 = vadd.f32 %v6484_v19, %v6424_v41  ;;  %v6549_v0 = vadd.f32 %v6485_v26, %v6425_v20  ;;  %v15311_v49 = vsel %vm488_vm1, %v5422_v13, 0.0 }
 0x661   : > { %v5656_v47 = vadd.f32 %v5596_v14, %v5532_v35  ;;  %v5657_v60 = vadd.f32 %v5597_v44, %v5533_v28  ;;  %v5721_v9 = vmul.f32 %v18185_v38, %v15175_v10  ;;  %v5846_v24 = vmul.f32 %v18187_v23, %v15223_v6 }
 0x662   : > { %v5847_v59 = vmul.f32 %v18187_v23, %v15213_v52  ;;  %v6600_v32 = vpack.c.bf16 %v6549_v0, %v6548_v63  ;;  %v5914_v29 = vmul.f32 %v18178_v62, %v18242_v37  ;;  %v5915_v43 = vmul.f32 %v18178_v62, %v18240_v42 }
 0x663   : > { %v5780_v57 = vadd.f32 %v5720_v15, %v5656_v47  ;;  %v5781_v36 = vadd.f32 %v5721_v9, %v5657_v60  ;;  %v6046_v33 = vmul.f32 %v18188_v46, %v15233_v4  ;;  %v6047_v10 = vmul.f32 %v18188_v46, %v15243_v39 }
 0x664   : > { %v6178_v58 = vmul.f32 %v18189_v11, %v15289_v3  ;;  %7885 = vmatprep.mubr.bf16.mxu0 %v6600_v32  ;;  %v5978_v22 = vadd.f32 %v5914_v29, %v5846_v24  ;;  %v5979_v21 = vadd.f32 %v5915_v43, %v5847_v59  ;;  %v6179_v8 = vmul.f32 %v18189_v11, %v15279_v56 }
 0x665   : > { %v6242_v50 = vmul.f32 %v18179_v61, %v18248_v48  ;;  %v6243_v54 = vmul.f32 %v18179_v61, %v18246_v53  ;;  %v6366_v34 = vmul.f32 %v18190_v55, %v15301_v45  ;;  %v6367_v30 = vmul.f32 %v18190_v55, %v15311_v49 }
 0x666   : > { %v18253_v12 = vrot.slane %v18252_v7, 7  ;;  %v18255_v2 = vrot.slane %v18254_v18, 7  ;;  %v6110_v51 = vadd.f32 %v6046_v33, %v5978_v22  ;;  %v6111_v27 = vadd.f32 %v6047_v10, %v5979_v21 }
 0x667   : > { %v6302_v5 = vadd.f32 %v6242_v50, %v6178_v58  ;;  %v6303_v35 = vadd.f32 %v6243_v54, %v6179_v8  ;;  %v18258_v20 = vrot.slane %v18252_v7, 1  ;;  %v18259_v28 = vrot.slane %v18254_v18, 1 }
 0x668   : > { %v5199_v1 = vsel %vm676_vm2, %v18255_v2, %v18253_v12  ;;  %v18256_v19 = vmov %v18255_v2  ;;  %v18257_v26 = vmov %v18253_v12  ;;  %v6486_v0 = vadd.f32 %v6110_v51, %v5780_v57 }
 0x669   : > { %v5231_v16 = vsel %vm676_vm2, %v18257_v26, %v18256_v19  ;;  %v5391_v14 = vsel %vm873_vm3, %v18259_v28, %v18258_v20  ;;  %v18260_v13 = vmov %v18259_v28  ;;  %v18261_v44 = vmov %v18258_v20 }
 0x66a   : > { %v5278_v41 = vsel %vm485_vm0, %v5231_v16, 0.0  ;;  %v5423_v15 = vsel %vm873_vm3, %v18261_v44, %v18260_v13  ;;  %v6426_v63 = vadd.f32 %v6366_v34, %v6302_v5  ;;  %v6487_v47 = vadd.f32 %v6111_v27, %v5781_v36 }
 0x66b   : > { %v5471_v60 = vsel %vm488_vm1, %v5423_v15, 0.0  ;;  %v6427_v9 = vadd.f32 %v6367_v30, %v6303_v35  ;;  %v5534_v24 = vmul.f32 %v18184_v40, %v15223_v6  ;;  %v5535_v59 = vmul.f32 %v18184_v40, %v15213_v52 }
 0x66c   : > { %v5598_v32 = vmul.f32 %v18177_v31, %v18242_v37  ;;  %v6550_v29 = vadd.f32 %v6486_v0, %v6426_v63  ;;  %v5599_v43 = vmul.f32 %v18177_v31, %v18240_v42  ;;  %v5722_v57 = vmul.f32 %v18185_v38, %v15233_v4 }
 0x66d   : > { %v5723_v36 = vmul.f32 %v18185_v38, %v15243_v39  ;;  %v6551_v33 = vadd.f32 %v6487_v47, %v6427_v9  ;;  %v5848_v6 = vmul.f32 %v18187_v23, %v15289_v3  ;;  %v5849_v52 = vmul.f32 %v18187_v23, %v15279_v56 }
 0x66e   : > { %v5658_v10 = vadd.f32 %v5598_v32, %v5534_v24  ;;  %v5659_v58 = vadd.f32 %v5599_v43, %v5535_v59  ;;  %v5916_v37 = vmul.f32 %v18178_v62, %v18248_v48  ;;  %v5917_v42 = vmul.f32 %v18178_v62, %v18246_v53 }
 0x66f   : > { %v6048_v4 = vmul.f32 %v18188_v46, %v15301_v45  ;;  %v6601_v22 = vpack.c.bf16 %v6551_v33, %v6550_v29  ;;  %v6049_v21 = vmul.f32 %v18188_v46, %v15311_v49  ;;  %v6180_v8 = vmul.f32 %v18189_v11, %v5278_v41 }
 0x670   : > { %v5782_v39 = vadd.f32 %v5722_v57, %v5658_v10  ;;  %v5783_v50 = vadd.f32 %v5723_v36, %v5659_v58  ;;  %v5980_v54 = vadd.f32 %v5916_v37, %v5848_v6  ;;  %v5981_v34 = vadd.f32 %v5917_v42, %v5849_v52  ;;  %v18266_v58 = vld [vmem:[#allocation34_spill] sm:$0xff] }
 0x671   : > { %v6181_v30 = vmul.f32 %v18189_v11, %v5199_v1  ;;  %7886 = vmatmul.mubr.bf16.gmra.mrb[56].mxu0 %v6601_v22  ;;  %v6244_v12 = vmul.f32 %v18179_v61, %v18254_v18  ;;  %v6245_v2 = vmul.f32 %v18179_v61, %v18252_v7  ;;  %v6368_v51 = vmul.f32 %v18190_v55, %v5391_v14  ;;  %v18268_v37 = vld [vmem:[#allocation30_spill] sm:$0xff] }
 0x672   : > { %v6369_v27 = vmul.f32 %v18190_v55, %v5471_v60  ;;  %v6112_v5 = vadd.f32 %v6048_v4, %v5980_v54  ;;  %v6113_v19 = vadd.f32 %v6049_v21, %v5981_v34  ;;  %v5536_v26 = vmul.f32 %v18184_v40, %v15289_v3 }
 0x673   : > { %v5537_v16 = vmul.f32 %v18184_v40, %v15279_v56  ;;  %v6304_v35 = vadd.f32 %v6244_v12, %v6180_v8  ;;  %v6305_v20 = vadd.f32 %v6245_v2, %v6181_v30  ;;  %v5600_v28 = vmul.f32 %v18177_v31, %v18248_v48 }
 0x674   : > { %v5601_v13 = vmul.f32 %v18177_v31, %v18246_v53  ;;  %v6488_v44 = vadd.f32 %v6112_v5, %v5782_v39  ;;  %v6489_v15 = vadd.f32 %v6113_v19, %v5783_v50  ;;  %v5724_v63 = vmul.f32 %v18185_v38, %v15301_v45 }
 0x675   : > { %v5725_v0 = vmul.f32 %v18185_v38, %v15311_v49  ;;  %v6428_v3 = vadd.f32 %v6368_v51, %v6304_v35  ;;  %v6429_v47 = vadd.f32 %v6369_v27, %v6305_v20  ;;  %v5660_v9 = vadd.f32 %v5600_v28, %v5536_v26 }
 0x676   : > { %v5661_v56 = vadd.f32 %v5601_v13, %v5537_v16  ;;  %v5850_v24 = vmul.f32 %v18187_v23, %v5278_v41  ;;  %v5851_v59 = vmul.f32 %v18187_v23, %v5199_v1  ;;  %v5918_v48 = vmul.f32 %v18178_v62, %v18254_v18  ;;  %v18262_v41 = vld [vmem:[#allocation26_spill] sm:$0xff]  ;;  %v18264_v1 = vld [vmem:[#allocation33_spill] sm:$0xff] }
 0x677   : > { %v5919_v53 = vmul.f32 %v18178_v62, %v18252_v7  ;;  %v6552_v32 = vadd.f32 %v6488_v44, %v6428_v3  ;;  %v6553_v29 = vadd.f32 %v6489_v15, %v6429_v47  ;;  %v5784_v45 = vadd.f32 %v5724_v63, %v5660_v9 }
 0x678   : > { %v5785_v43 = vadd.f32 %v5725_v0, %v5661_v56  ;;  %v5982_v57 = vadd.f32 %v5918_v48, %v5850_v24  ;;  %v6050_v36 = vmul.f32 %v18188_v46, %v5391_v14  ;;  %v6051_v33 = vmul.f32 %v18188_v46, %v5471_v60 }
 0x679   : > { %v5983_v49 = vadd.f32 %v5919_v53, %v5851_v59  ;;  %v6602_v10 = vpack.c.bf16 %v6553_v29, %v6552_v32  ;;  %v18263_v6 = vrot.slane %v18262_v41, 7  ;;  %v18265_v52 = vrot.slane %v18264_v1, 7 }
 0x67a   : > { %v18267_v7 = vrot.slane %v18266_v58, 7  ;;  %v18269_v42 = vrot.slane %v18268_v37, 7  ;;  %v6114_v39 = vadd.f32 %v6050_v36, %v5982_v57  ;;  %v5329_v12 = vrot.slane %v18268_v37, 1 }
 0x67b   : > { %v5200_v18 = vsel %vm676_vm2, %v18265_v52, %v18263_v6  ;;  %v18270_v14 = vmov %v18265_v52  ;;  %v18271_v60 = vmov %v18263_v6  ;;  %v6115_v21 = vadd.f32 %v6051_v33, %v5983_v49  ;;  %7889 = vmatprep.mubr.bf16.mxu0 %v6602_v10  ;;  %v18278_v49 = vld [vmem:[#allocation38_spill] sm:$0xff]  ;;  %v18280_v33 = vld [vmem:[#allocation31_spill] sm:$0xff] }
 0x67c   : > { %v15431_v4 = vsel %vm676_vm2, %v18269_v42, %v18267_v7  ;;  %v5232_v22 = vsel %vm676_vm2, %v18271_v60, %v18270_v14  ;;  %v18272_v8 = vmov %v18269_v42  ;;  %v18273_v50 = vmov %v18267_v7 }
 0x67d   : > { %v5233_v54 = vsel %vm676_vm2, %v18273_v50, %v18272_v8  ;;  %v5280_v34 = vsel %vm485_vm0, %v5232_v22, 0.0  ;;  %v5361_v2 = vrot.slane %v18266_v58, 1  ;;  %v18274_v51 = vrot.slane %v18262_v41, 1 }
 0x67e   : > { %v15449_v30 = vsel %vm485_vm0, %v5233_v54, 0.0  ;;  %v18275_v27 = vrot.slane %v18264_v1, 1  ;;  %v6490_v19 = vadd.f32 %v6114_v39, %v5784_v45  ;;  %v6491_v26 = vadd.f32 %v6115_v21, %v5785_v43 }
 0x67f   : > { %v18277_v35 = vmov %v18274_v51  ;;  %v5852_v28 = vmul.f32 %v18187_v23, %v5280_v34  ;;  %v15468_v13 = vsel %vm873_vm3, %v5329_v12, %v5361_v2  ;;  %v5425_v44 = vsel %vm873_vm3, %v5361_v2, %v5329_v12 }
 0x680   : > { %v5392_v5 = vsel %vm873_vm3, %v18275_v27, %v18274_v51  ;;  %v18276_v16 = vmov %v18275_v27  ;;  %v5853_v63 = vmul.f32 %v18187_v23, %v5200_v18  ;;  %v6603_v0 = vpack.c.bf16 %v6491_v26, %v6490_v19 }
 0x681   : > { %v5424_v20 = vsel %vm873_vm3, %v18277_v35, %v18276_v16  ;;  %v15477_v3 = vsel %vm488_vm1, %v5425_v44, 0.0  ;;  %v5920_v47 = vmul.f32 %v18178_v62, %v18264_v1  ;;  %v5921_v9 = vmul.f32 %v18178_v62, %v18262_v41 }
 0x682   : > { %v5473_v15 = vsel %vm488_vm1, %v5424_v20, 0.0  ;;  %v6052_v56 = vmul.f32 %v18188_v46, %v5392_v5  ;;  %v6182_v59 = vmul.f32 %v18189_v11, %v15449_v30  ;;  %v6183_v48 = vmul.f32 %v18189_v11, %v15431_v4  ;;  %7890 = vmatmul.mubr.bf16.gmra.mrb[60].mxu0 %v6603_v0 }
 0x683   : > { %v6053_v24 = vmul.f32 %v18188_v46, %v5473_v15  ;;  %v5984_v53 = vadd.f32 %v5920_v47, %v5852_v28  ;;  %v5985_v32 = vadd.f32 %v5921_v9, %v5853_v63  ;;  %v6246_v29 = vmul.f32 %v18179_v61, %v18268_v37 }
 0x684   : > { %v6247_v45 = vmul.f32 %v18179_v61, %v18266_v58  ;;  %v6370_v43 = vmul.f32 %v18190_v55, %v15468_v13  ;;  %v6371_v57 = vmul.f32 %v18190_v55, %v15477_v3  ;;  %v18279_v36 = vrot.slane %v18278_v49, 7 }
 0x685   : > { %v18281_v10 = vrot.slane %v18280_v33, 7  ;;  %v6116_v14 = vadd.f32 %v6052_v56, %v5984_v53  ;;  %v6117_v60 = vadd.f32 %v6053_v24, %v5985_v32  ;;  %v6306_v22 = vadd.f32 %v6246_v29, %v6182_v59 }
 0x686   : > { %v18283_v7 = vmov %v18279_v36  ;;  %v6307_v39 = vadd.f32 %v6247_v45, %v6183_v48  ;;  %v5330_v8 = vrot.slane %v18280_v33, 1  ;;  %v5362_v50 = vrot.slane %v18278_v49, 1 }
 0x687   : > { %v15503_v6 = vsel %vm676_vm2, %v18281_v10, %v18279_v36  ;;  %v18282_v52 = vmov %v18281_v10  ;;  %v5538_v54 = vmul.f32 %v18184_v40, %v5280_v34  ;;  %v6430_v12 = vadd.f32 %v6370_v43, %v6306_v22  ;;  %v18284_v36 = vld [vmem:[#allocation32_spill] sm:$0xff] }
 0x688   : > { %v5234_v42 = vsel %vm676_vm2, %v18283_v7, %v18282_v52  ;;  %v6431_v2 = vadd.f32 %v6371_v57, %v6307_v39  ;;  %v5539_v51 = vmul.f32 %v18184_v40, %v5200_v18  ;;  %v5602_v27 = vmul.f32 %v18177_v31, %v18264_v1  ;;  %v18286_v52 = vld [vmem:[#allocation39_spill] sm:$0xff] }
 0x689   : > { %v15513_v21 = vsel %vm485_vm0, %v5234_v42, 0.0  ;;  %v15523_v19 = vsel %vm873_vm3, %v5330_v8, %v5362_v50  ;;  %v5426_v26 = vsel %vm873_vm3, %v5362_v50, %v5330_v8  ;;  %v5603_v16 = vmul.f32 %v18177_v31, %v18262_v41 }
 0x68a   : > { %v5726_v35 = vmul.f32 %v18185_v38, %v5392_v5  ;;  %v6556_v34 = vadd.f32 %v6430_v12, %v6116_v14  ;;  %v6557_v20 = vadd.f32 %v6431_v2, %v6117_v60  ;;  %v15532_v18 = vsel %vm488_vm1, %v5426_v26, 0.0 }
 0x68b   : > { %v5662_v28 = vadd.f32 %v5602_v27, %v5538_v54  ;;  %v5663_v1 = vadd.f32 %v5603_v16, %v5539_v51  ;;  %v5727_v44 = vmul.f32 %v18185_v38, %v5473_v15  ;;  %v5854_v63 = vmul.f32 %v18187_v23, %v15449_v30 }
 0x68c   : > { %v5855_v0 = vmul.f32 %v18187_v23, %v15431_v4  ;;  %v6604_v47 = vpack.c.bf16 %v6557_v20, %v6556_v34  ;;  %v5922_v5 = vmul.f32 %v18178_v62, %v18268_v37  ;;  %v5923_v9 = vmul.f32 %v18178_v62, %v18266_v58 }
 0x68d   : > { %v5786_v41 = vadd.f32 %v5726_v35, %v5662_v28  ;;  %v5787_v56 = vadd.f32 %v5727_v44, %v5663_v1  ;;  %v6054_v24 = vmul.f32 %v18188_v46, %v15468_v13  ;;  %v6055_v15 = vmul.f32 %v18188_v46, %v15477_v3 }
 0x68e   : > { %v6184_v59 = vmul.f32 %v18189_v11, %v15513_v21  ;;  %7893 = vmatprep.mubr.bf16.mxu0 %v6604_v47  ;;  %v5986_v48 = vadd.f32 %v5922_v5, %v5854_v63  ;;  %v5987_v53 = vadd.f32 %v5923_v9, %v5855_v0  ;;  %v6185_v32 = vmul.f32 %v18189_v11, %v15503_v6 }
 0x68f   : > { %v6248_v29 = vmul.f32 %v18179_v61, %v18280_v33  ;;  %v6249_v45 = vmul.f32 %v18179_v61, %v18278_v49  ;;  %v6372_v43 = vmul.f32 %v18190_v55, %v15523_v19  ;;  %v6373_v57 = vmul.f32 %v18190_v55, %v15532_v18 }
 0x690   : > { %v18285_v10 = vrot.slane %v18284_v36, 7  ;;  %v18287_v7 = vrot.slane %v18286_v52, 7  ;;  %v6118_v14 = vadd.f32 %v6054_v24, %v5986_v48  ;;  %v6119_v60 = vadd.f32 %v6055_v15, %v5987_v53 }
 0x691   : > { %v6308_v22 = vadd.f32 %v6248_v29, %v6184_v59  ;;  %v6309_v54 = vadd.f32 %v6249_v45, %v6185_v32  ;;  %v5331_v2 = vrot.slane %v18286_v52, 1  ;;  %v5363_v51 = vrot.slane %v18284_v36, 1 }
 0x692   : > { %v15565_v42 = vsel %vm676_vm2, %v18287_v7, %v18285_v10  ;;  %v18288_v39 = vmov %v18287_v7  ;;  %v18289_v8 = vmov %v18285_v10  ;;  %v6494_v26 = vadd.f32 %v6118_v14, %v5786_v41 }
 0x693   : > { %v5235_v50 = vsel %vm676_vm2, %v18289_v8, %v18288_v39  ;;  %v6432_v27 = vadd.f32 %v6372_v43, %v6308_v22  ;;  %v6495_v16 = vadd.f32 %v6119_v60, %v5787_v56  ;;  %v5540_v35 = vmul.f32 %v18184_v40, %v15449_v30  ;;  %v18290_v60 = vld [vmem:[#allocation41_spill] sm:$0xff]  ;;  %v18292_v39 = vld [vmem:[#allocation36_spill] sm:$0xff] }
 0x694   : > { %v15575_v12 = vsel %vm485_vm0, %v5235_v50, 0.0  ;;  %v6433_v34 = vadd.f32 %v6373_v57, %v6309_v54  ;;  %v15583_v20 = vsel %vm873_vm3, %v5331_v2, %v5363_v51  ;;  %v5427_v28 = vsel %vm873_vm3, %v5363_v51, %v5331_v2 }
 0x695   : > { %v5541_v1 = vmul.f32 %v18184_v40, %v15431_v4  ;;  %v6558_v44 = vadd.f32 %v6494_v26, %v6432_v27  ;;  %v15591_v63 = vsel %vm488_vm1, %v5427_v28, 0.0  ;;  %v5604_v0 = vmul.f32 %v18177_v31, %v18268_v37 }
 0x696   : > { %v5605_v30 = vmul.f32 %v18177_v31, %v18266_v58  ;;  %v6559_v47 = vadd.f32 %v6495_v16, %v6433_v34  ;;  %v5728_v41 = vmul.f32 %v18185_v38, %v15468_v13  ;;  %v5729_v5 = vmul.f32 %v18185_v38, %v15477_v3 }
 0x697   : > { %v5856_v4 = vmul.f32 %v18187_v23, %v15513_v21  ;;  %v5664_v9 = vadd.f32 %v5604_v0, %v5540_v35  ;;  %v5857_v24 = vmul.f32 %v18187_v23, %v15503_v6  ;;  %v5924_v37 = vmul.f32 %v18178_v62, %v18280_v33 }
 0x698   : > { %v5665_v56 = vadd.f32 %v5605_v30, %v5541_v1  ;;  %v6605_v15 = vpack.c.bf16 %v6559_v47, %v6558_v44  ;;  %v5925_v58 = vmul.f32 %v18178_v62, %v18278_v49  ;;  %v6056_v13 = vmul.f32 %v18188_v46, %v15523_v19 }
 0x699   : > { %v6057_v3 = vmul.f32 %v18188_v46, %v15532_v18  ;;  %v5788_v59 = vadd.f32 %v5728_v41, %v5664_v9  ;;  %v5988_v53 = vadd.f32 %v5924_v37, %v5856_v4  ;;  %v6186_v32 = vmul.f32 %v18189_v11, %v15575_v12 }
 0x69a   : > { %v5789_v48 = vadd.f32 %v5729_v5, %v5665_v56  ;;  %7894 = vmatmul.mubr.bf16.gmra.mrb[64].mxu0 %v6605_v15  ;;  %v5989_v29 = vadd.f32 %v5925_v58, %v5857_v24  ;;  %v6187_v45 = vmul.f32 %v18189_v11, %v15565_v42  ;;  %v6250_v43 = vmul.f32 %v18179_v61, %v18286_v52 }
 0x69b   : > { %v6251_v57 = vmul.f32 %v18179_v61, %v18284_v36  ;;  %v6120_v10 = vadd.f32 %v6056_v13, %v5988_v53  ;;  %v6374_v7 = vmul.f32 %v18190_v55, %v15583_v20  ;;  %v6375_v14 = vmul.f32 %v18190_v55, %v15591_v63 }
 0x69c   : > { %v18291_v22 = vrot.slane %v18290_v60, 7  ;;  %v18293_v8 = vrot.slane %v18292_v39, 7  ;;  %v6121_v54 = vadd.f32 %v6057_v3, %v5989_v29  ;;  %v6310_v2 = vadd.f32 %v6250_v43, %v6186_v32 }
 0x69d   : > { %v6311_v51 = vadd.f32 %v6251_v57, %v6187_v45  ;;  %v6496_v35 = vadd.f32 %v6120_v10, %v5788_v59  ;;  %v5332_v28 = vrot.slane %v18292_v39, 1  ;;  %v5364_v1 = vrot.slane %v18290_v60, 1 }
 0x69e   : > { %v15631_v50 = vsel %vm676_vm2, %v18293_v8, %v18291_v22  ;;  %v18294_v27 = vmov %v18293_v8  ;;  %v18295_v26 = vmov %v18291_v22  ;;  %v6434_v44 = vadd.f32 %v6374_v7, %v6310_v2 }
 0x69f   : > { %v5236_v16 = vsel %vm676_vm2, %v18295_v26, %v18294_v27  ;;  %v6435_v0 = vadd.f32 %v6375_v14, %v6311_v51  ;;  %v6497_v30 = vadd.f32 %v6121_v54, %v5789_v48  ;;  %v5542_v47 = vmul.f32 %v18184_v40, %v15513_v21  ;;  %v18296_v54 = vld [vmem:[#allocation40_spill] sm:$0xff]  ;;  %v18298_v51 = vld [vmem:[#allocation37_spill] sm:$0xff] }
 0x6a0   : > { %v15641_v34 = vsel %vm485_vm0, %v5236_v16, 0.0  ;;  %v15649_v41 = vsel %vm873_vm3, %v5332_v28, %v5364_v1  ;;  %v5428_v5 = vsel %vm873_vm3, %v5364_v1, %v5332_v28  ;;  %v5543_v4 = vmul.f32 %v18184_v40, %v15503_v6 }
 0x6a1   : > { %v5606_v9 = vmul.f32 %v18177_v31, %v18280_v33  ;;  %v6560_v56 = vadd.f32 %v6496_v35, %v6434_v44  ;;  %v6561_v24 = vadd.f32 %v6497_v30, %v6435_v0  ;;  %v15659_v37 = vsel %vm488_vm1, %v5428_v5, 0.0 }
 0x6a2   : > { %v5607_v21 = vmul.f32 %v18177_v31, %v18278_v49  ;;  %v5730_v58 = vmul.f32 %v18185_v38, %v15523_v19  ;;  %v5731_v13 = vmul.f32 %v18185_v38, %v15532_v18  ;;  %v5858_v6 = vmul.f32 %v18187_v23, %v15575_v12 }
 0x6a3   : > { %v5666_v15 = vadd.f32 %v5606_v9, %v5542_v47  ;;  %v6606_v33 = vpack.c.bf16 %v6561_v24, %v6560_v56  ;;  %v5859_v59 = vmul.f32 %v18187_v23, %v15565_v42  ;;  %v5926_v48 = vmul.f32 %v18178_v62, %v18286_v52 }
 0x6a4   : > { %v5667_v3 = vadd.f32 %v5607_v21, %v5543_v4  ;;  %v5927_v49 = vmul.f32 %v18178_v62, %v18284_v36  ;;  %v6058_v19 = vmul.f32 %v18188_v46, %v15583_v20  ;;  %v6059_v18 = vmul.f32 %v18188_v46, %v15591_v63 }
 0x6a5   : > { %v5790_v53 = vadd.f32 %v5730_v58, %v5666_v15  ;;  %7897 = vmatprep.mubr.bf16.mxu0 %v6606_v33  ;;  %v5990_v29 = vadd.f32 %v5926_v48, %v5858_v6  ;;  %v6188_v45 = vmul.f32 %v18189_v11, %v15641_v34  ;;  %v6189_v43 = vmul.f32 %v18189_v11, %v15631_v50 }
 0x6a6   : > { %v5791_v32 = vadd.f32 %v5731_v13, %v5667_v3  ;;  %v5991_v57 = vadd.f32 %v5927_v49, %v5859_v59  ;;  %v6252_v10 = vmul.f32 %v18179_v61, %v18292_v39  ;;  %v6253_v7 = vmul.f32 %v18179_v61, %v18290_v60 }
 0x6a7   : > { %v6376_v14 = vmul.f32 %v18190_v55, %v15649_v41  ;;  %v6122_v22 = vadd.f32 %v6058_v19, %v5990_v29  ;;  %v6377_v8 = vmul.f32 %v18190_v55, %v15659_v37  ;;  %v18297_v2 = vrot.slane %v18296_v54, 7 }
 0x6a8   : > { %v18299_v27 = vrot.slane %v18298_v51, 7  ;;  %v6123_v1 = vadd.f32 %v6059_v18, %v5991_v57  ;;  %v6312_v44 = vadd.f32 %v6252_v10, %v6188_v45  ;;  %v6313_v0 = vadd.f32 %v6253_v7, %v6189_v43 }
 0x6a9   : > { %v18301_v35 = vmov %v18297_v2  ;;  %v6498_v47 = vadd.f32 %v6122_v22, %v5790_v53  ;;  %v5333_v5 = vrot.slane %v18298_v51, 1  ;;  %v5365_v4 = vrot.slane %v18296_v54, 1 }
 0x6aa   : > { %v15697_v26 = vsel %vm676_vm2, %v18299_v27, %v18297_v2  ;;  %v18300_v16 = vmov %v18299_v27  ;;  %v5544_v9 = vmul.f32 %v18184_v40, %v15575_v12  ;;  %v6436_v56 = vadd.f32 %v6376_v14, %v6312_v44 }
 0x6ab   : > { %v5237_v28 = vsel %vm676_vm2, %v18301_v35, %v18300_v16  ;;  %v6437_v24 = vadd.f32 %v6377_v8, %v6313_v0  ;;  %v6499_v21 = vadd.f32 %v6123_v1, %v5791_v32  ;;  %v5545_v15 = vmul.f32 %v18184_v40, %v15565_v42  ;;  %v18302_v35 = vld [vmem:[#allocation43_spill] sm:$0xff] }
 0x6ac   : > { %v15707_v30 = vsel %vm485_vm0, %v5237_v28, 0.0  ;;  %v15717_v58 = vsel %vm873_vm3, %v5333_v5, %v5365_v4  ;;  %v5429_v13 = vsel %vm873_vm3, %v5365_v4, %v5333_v5  ;;  %v5608_v6 = vmul.f32 %v18177_v31, %v18286_v52  ;;  %v18304_v1 = vld [vmem:[#allocation35_spill] sm:$0xff] }
 0x6ad   : > { %v5609_v33 = vmul.f32 %v18177_v31, %v18284_v36  ;;  %v6562_v12 = vadd.f32 %v6498_v47, %v6436_v56  ;;  %v6563_v3 = vadd.f32 %v6499_v21, %v6437_v24  ;;  %v15727_v59 = vsel %vm488_vm1, %v5429_v13, 0.0 }
 0x6ae   : > { %v5732_v42 = vmul.f32 %v18185_v38, %v15583_v20  ;;  %v5668_v48 = vadd.f32 %v5608_v6, %v5544_v9  ;;  %v5733_v49 = vmul.f32 %v18185_v38, %v15591_v63  ;;  %v5860_v52 = vmul.f32 %v18187_v23, %v15641_v34 }
 0x6af   : > { %v5669_v53 = vadd.f32 %v5609_v33, %v5545_v15  ;;  %v6607_v19 = vpack.c.bf16 %v6563_v3, %v6562_v12  ;;  %v5861_v36 = vmul.f32 %v18187_v23, %v15631_v50  ;;  %v5928_v18 = vmul.f32 %v18178_v62, %v18292_v39 }
 0x6b0   : > { %v5929_v32 = vmul.f32 %v18178_v62, %v18290_v60  ;;  %v5792_v29 = vadd.f32 %v5732_v42, %v5668_v48  ;;  %v6060_v45 = vmul.f32 %v18188_v46, %v15649_v41  ;;  %v6061_v63 = vmul.f32 %v18188_v46, %v15659_v37 }
 0x6b1   : > { %v5793_v20 = vadd.f32 %v5733_v49, %v5669_v53  ;;  %7898 = vmatmul.mubr.bf16.gmra.mrb[68].mxu0 %v6607_v19  ;;  %v5992_v43 = vadd.f32 %v5928_v18, %v5860_v52  ;;  %v6190_v10 = vmul.f32 %v18189_v11, %v15707_v30  ;;  %v6191_v7 = vmul.f32 %v18189_v11, %v15697_v26 }
 0x6b2   : > { %v5993_v57 = vadd.f32 %v5929_v32, %v5861_v36  ;;  %v6254_v14 = vmul.f32 %v18179_v61, %v18298_v51  ;;  %v6255_v22 = vmul.f32 %v18179_v61, %v18296_v54  ;;  %v6378_v8 = vmul.f32 %v18190_v55, %v15717_v58 }
 0x6b3   : > { %v6379_v2 = vmul.f32 %v18190_v55, %v15727_v59  ;;  %v6124_v27 = vadd.f32 %v6060_v45, %v5992_v43  ;;  %v18303_v28 = vrot.slane %v18302_v35, 7  ;;  %v18305_v44 = vrot.slane %v18304_v1, 7 }
 0x6b4   : > { %v6125_v16 = vadd.f32 %v6061_v63, %v5993_v57  ;;  %v6314_v9 = vadd.f32 %v6254_v14, %v6190_v10  ;;  %v6315_v56 = vadd.f32 %v6255_v22, %v6191_v7  ;;  %v5334_v21 = vrot.slane %v18304_v1, 1 }
 0x6b5   : > { %v15763_v0 = vsel %vm676_vm2, %v18305_v44, %v18303_v28  ;;  %v18306_v47 = vmov %v18305_v44  ;;  %v18307_v5 = vmov %v18303_v28  ;;  %v6500_v15 = vadd.f32 %v6124_v27, %v5792_v29  ;;  %v18308_v28 = vld [vmem:[#allocation42_spill] sm:$0xff] }
 0x6b6   : > { %v5238_v4 = vsel %vm676_vm2, %v18307_v5, %v18306_v47  ;;  %v6501_v13 = vadd.f32 %v6125_v16, %v5793_v20  ;;  %v5366_v6 = vrot.slane %v18302_v35, 1  ;;  %v5546_v33 = vmul.f32 %v18184_v40, %v15641_v34  ;;  %v18310_v47 = vld [vmem:[#allocation13_spill] sm:$0xff] }
 0x6b7   : > { %v15773_v24 = vsel %vm485_vm0, %v5238_v4, 0.0  ;;  %v6438_v12 = vadd.f32 %v6378_v8, %v6314_v9  ;;  %v6439_v3 = vadd.f32 %v6379_v2, %v6315_v56  ;;  %v5547_v42 = vmul.f32 %v18184_v40, %v15631_v50 }
 0x6b8   : > { %v5610_v48 = vmul.f32 %v18177_v31, %v18292_v39  ;;  %v15785_v53 = vsel %vm873_vm3, %v5334_v21, %v5366_v6  ;;  %v5430_v49 = vsel %vm873_vm3, %v5366_v6, %v5334_v21  ;;  %v5611_v52 = vmul.f32 %v18177_v31, %v18290_v60 }
 0x6b9   : > { %v5734_v34 = vmul.f32 %v18185_v38, %v15649_v41  ;;  %v6564_v19 = vadd.f32 %v6500_v15, %v6438_v12  ;;  %v6565_v36 = vadd.f32 %v6501_v13, %v6439_v3  ;;  %v15795_v50 = vsel %vm488_vm1, %v5430_v49, 0.0 }
 0x6ba   : > { %v5670_v39 = vadd.f32 %v5610_v48, %v5546_v33  ;;  %v5671_v18 = vadd.f32 %v5611_v52, %v5547_v42  ;;  %v5735_v32 = vmul.f32 %v18185_v38, %v15659_v37  ;;  %v5862_v29 = vmul.f32 %v18187_v23, %v15707_v30 }
 0x6bb   : > { %v5863_v60 = vmul.f32 %v18187_v23, %v15697_v26  ;;  %v6608_v20 = vpack.c.bf16 %v6565_v36, %v6564_v19  ;;  %v5930_v41 = vmul.f32 %v18178_v62, %v18298_v51  ;;  %v5931_v63 = vmul.f32 %v18178_v62, %v18296_v54 }
 0x6bc   : > { %v5794_v45 = vadd.f32 %v5734_v34, %v5670_v39  ;;  %v5795_v43 = vadd.f32 %v5735_v32, %v5671_v18  ;;  %v6062_v57 = vmul.f32 %v18188_v46, %v15717_v58  ;;  %v6063_v37 = vmul.f32 %v18188_v46, %v15727_v59 }
 0x6bd   : > { %v6192_v10 = vmul.f32 %v18189_v11, %v15773_v24  ;;  %7901 = vmatprep.mubr.bf16.mxu0 %v6608_v20  ;;  %v5994_v7 = vadd.f32 %v5930_v41, %v5862_v29  ;;  %v5995_v14 = vadd.f32 %v5931_v63, %v5863_v60  ;;  %v6193_v22 = vmul.f32 %v18189_v11, %v15763_v0 }
 0x6be   : > { %v6256_v8 = vmul.f32 %v18179_v61, %v18304_v1  ;;  %v6257_v2 = vmul.f32 %v18179_v61, %v18302_v35  ;;  %v6380_v27 = vmul.f32 %v18190_v55, %v15785_v53  ;;  %v6381_v16 = vmul.f32 %v18190_v55, %v15795_v50 }
 0x6bf   : > { %v18309_v44 = vrot.slane %v18308_v28, 7  ;;  %v18311_v5 = vrot.slane %v18310_v47, 7  ;;  %v6126_v9 = vadd.f32 %v6062_v57, %v5994_v7  ;;  %v6127_v56 = vadd.f32 %v6063_v37, %v5995_v14 }
 0x6c0   : > { %v6316_v21 = vadd.f32 %v6256_v8, %v6192_v10  ;;  %v6317_v33 = vadd.f32 %v6257_v2, %v6193_v22  ;;  %v5335_v3 = vrot.slane %v18310_v47, 1  ;;  %v5367_v42 = vrot.slane %v18308_v28, 1 }
 0x6c1   : > { %v15829_v4 = vsel %vm676_vm2, %v18311_v5, %v18309_v44  ;;  %v18312_v15 = vmov %v18311_v5  ;;  %v18313_v13 = vmov %v18309_v44  ;;  %v6502_v49 = vadd.f32 %v6126_v9, %v5794_v45 }
 0x6c2   : > { %v5239_v6 = vsel %vm676_vm2, %v18313_v13, %v18312_v15  ;;  %v6440_v48 = vadd.f32 %v6380_v27, %v6316_v21  ;;  %v6503_v52 = vadd.f32 %v6127_v56, %v5795_v43  ;;  %v5548_v34 = vmul.f32 %v18184_v40, %v15707_v30  ;;  %v18314_v56 = vld [vmem:[#allocation18_spill] sm:$0xff] }
 0x6c3   : > { %v15839_v12 = vsel %vm485_vm0, %v5239_v6, 0.0  ;;  %v6441_v19 = vadd.f32 %v6381_v16, %v6317_v33  ;;  %v15847_v36 = vsel %vm873_vm3, %v5335_v3, %v5367_v42  ;;  %v5431_v39 = vsel %vm873_vm3, %v5367_v42, %v5335_v3  ;;  %v18316_v15 = vld [vmem:[#allocation14_spill] sm:$0xff] }
 0x6c4   : > { %v5549_v18 = vmul.f32 %v18184_v40, %v15697_v26  ;;  %v6566_v32 = vadd.f32 %v6502_v49, %v6440_v48  ;;  %v15855_v29 = vsel %vm488_vm1, %v5431_v39, 0.0  ;;  %v5612_v60 = vmul.f32 %v18177_v31, %v18298_v51 }
 0x6c5   : > { %v5613_v30 = vmul.f32 %v18177_v31, %v18296_v54  ;;  %v6567_v20 = vadd.f32 %v6503_v52, %v6441_v19  ;;  %v5736_v45 = vmul.f32 %v18185_v38, %v15717_v58  ;;  %v5737_v41 = vmul.f32 %v18185_v38, %v15727_v59 }
 0x6c6   : > { %v5864_v26 = vmul.f32 %v18187_v23, %v15773_v24  ;;  %v5672_v63 = vadd.f32 %v5612_v60, %v5548_v34  ;;  %v5865_v57 = vmul.f32 %v18187_v23, %v15763_v0  ;;  %v5932_v51 = vmul.f32 %v18178_v62, %v18304_v1  ;;  %v15903_v34 = vpop.f32.mrb[32].mxu0 }
 0x6c7   : > { %v5673_v43 = vadd.f32 %v5613_v30, %v5549_v18  ;;  %v6609_v37 = vpack.c.bf16 %v6567_v20, %v6566_v32  ;;  %v5933_v54 = vmul.f32 %v18178_v62, %v18302_v35  ;;  %v6064_v58 = vmul.f32 %v18188_v46, %v15785_v53  ;;  %v15911_v60 = vpop.f32.mrb[33].mxu0 }
 0x6c8   : > { %v6065_v59 = vmul.f32 %v18188_v46, %v15795_v50  ;;  %v5796_v10 = vadd.f32 %v5736_v45, %v5672_v63  ;;  %v5996_v14 = vadd.f32 %v5932_v51, %v5864_v26  ;;  %v6194_v22 = vmul.f32 %v18189_v11, %v15839_v12  ;;  %v15915_v26 = vpop.f32.mrb[34].mxu0 }
 0x6c9   : > { %v5797_v7 = vadd.f32 %v5737_v41, %v5673_v43  ;;  %7902 = vmatmul.mubr.bf16.gmra.mrb[72].mxu0 %v6609_v37  ;;  %v5997_v8 = vadd.f32 %v5933_v54, %v5865_v57  ;;  %v6195_v2 = vmul.f32 %v18189_v11, %v15829_v4  ;;  %v6258_v27 = vmul.f32 %v18179_v61, %v18310_v47  ;;  %v15927_v37 = vpop.f32.mrb[35].mxu0 }
 0x6ca   : > { %v6259_v16 = vmul.f32 %v18179_v61, %v18308_v28  ;;  %v6128_v44 = vadd.f32 %v6064_v58, %v5996_v14  ;;  %v6382_v5 = vmul.f32 %v18190_v55, %v15847_v36  ;;  %v6383_v9 = vmul.f32 %v18190_v55, %v15855_v29 }
 0x6cb   : > { %v18315_v21 = vrot.slane %v18314_v56, 7  ;;  %v18317_v13 = vrot.slane %v18316_v15, 7  ;;  %v6129_v33 = vadd.f32 %v6065_v59, %v5997_v8  ;;  %v6318_v3 = vadd.f32 %v6258_v27, %v6194_v22 }
 0x6cc   : > { %v6319_v42 = vadd.f32 %v6259_v16, %v6195_v2  ;;  %v6504_v19 = vadd.f32 %v6128_v44, %v5796_v10  ;;  %v5336_v18 = vrot.slane %v18316_v15, 1  ;;  %v5368_v32 = vrot.slane %v18314_v56, 1 }
 0x6cd   : > { %v15895_v6 = vsel %vm676_vm2, %v18317_v13, %v18315_v21  ;;  %v18318_v48 = vmov %v18317_v13  ;;  %v18319_v49 = vmov %v18315_v21  ;;  %v6442_v30 = vadd.f32 %v6382_v5, %v6318_v3 }
 0x6ce   : > { %v5240_v52 = vsel %vm676_vm2, %v18319_v49, %v18318_v48  ;;  %v6443_v20 = vadd.f32 %v6383_v9, %v6319_v42  ;;  %v6505_v45 = vadd.f32 %v6129_v33, %v5797_v7  ;;  %v5550_v41 = vmul.f32 %v18184_v40, %v15773_v24  ;;  %v18320_v49 = vld [vmem:[#allocation19_spill] sm:$0xff] }
 0x6cf   : > { %v15907_v39 = vsel %vm485_vm0, %v5240_v52, 0.0  ;;  %v15919_v63 = vsel %vm873_vm3, %v5336_v18, %v5368_v32  ;;  %v5432_v43 = vsel %vm873_vm3, %v5368_v32, %v5336_v18  ;;  %v5551_v57 = vmul.f32 %v18184_v40, %v15763_v0 }
 0x6d0   : > { %v5614_v51 = vmul.f32 %v18177_v31, %v18304_v1  ;;  %v6568_v54 = vadd.f32 %v6504_v19, %v6442_v30  ;;  %v6569_v58 = vadd.f32 %v6505_v45, %v6443_v20  ;;  %v15931_v24 = vsel %vm488_vm1, %v5432_v43, 0.0  ;;  %v18322_v19 = vld [vmem:[#allocation15_spill] sm:$0xff] }
 0x6d1   : > { %v5615_v59 = vmul.f32 %v18177_v31, %v18302_v35  ;;  %v5738_v7 = vmul.f32 %v18185_v38, %v15785_v53  ;;  %v5739_v0 = vmul.f32 %v18185_v38, %v15795_v50  ;;  %v5866_v1 = vmul.f32 %v18187_v23, %v15839_v12 }
 0x6d2   : > { %v5674_v10 = vadd.f32 %v5614_v51, %v5550_v41  ;;  %v6610_v14 = vpack.c.bf16 %v6569_v58, %v6568_v54  ;;  %v5867_v8 = vmul.f32 %v18187_v23, %v15829_v4  ;;  %v5934_v2 = vmul.f32 %v18178_v62, %v18310_v47 }
 0x6d3   : > { %v5675_v22 = vadd.f32 %v5615_v59, %v5551_v57  ;;  %v5935_v35 = vmul.f32 %v18178_v62, %v18308_v28  ;;  %v6066_v53 = vmul.f32 %v18188_v46, %v15847_v36  ;;  %v6067_v50 = vmul.f32 %v18188_v46, %v15855_v29 }
 0x6d4   : > { %v5798_v27 = vadd.f32 %v5738_v7, %v5674_v10  ;;  %7905 = vmatprep.mubr.bf16.mxu0 %v6610_v14  ;;  %v5998_v44 = vadd.f32 %v5934_v2, %v5866_v1  ;;  %v6196_v5 = vmul.f32 %v18189_v11, %v15907_v39  ;;  %v6197_v9 = vmul.f32 %v18189_v11, %v15895_v6 }
 0x6d5   : > { %v5799_v16 = vadd.f32 %v5739_v0, %v5675_v22  ;;  %v5999_v21 = vadd.f32 %v5935_v35, %v5867_v8  ;;  %v6260_v13 = vmul.f32 %v18179_v61, %v18316_v15  ;;  %v6261_v33 = vmul.f32 %v18179_v61, %v18314_v56 }
 0x6d6   : > { %v6384_v3 = vmul.f32 %v18190_v55, %v15919_v63  ;;  %v6130_v42 = vadd.f32 %v6066_v53, %v5998_v44  ;;  %v6385_v48 = vmul.f32 %v18190_v55, %v15931_v24  ;;  %v18321_v52 = vrot.slane %v18320_v49, 7 }
 0x6d7   : > { %v18323_v18 = vrot.slane %v18322_v19, 7  ;;  %v6131_v41 = vadd.f32 %v6067_v50, %v5999_v21  ;;  %v6320_v43 = vadd.f32 %v6260_v13, %v6196_v5  ;;  %v6321_v57 = vadd.f32 %v6261_v33, %v6197_v9 }
 0x6d8   : > { %v18325_v20 = vmov %v18321_v52  ;;  %v6506_v54 = vadd.f32 %v6130_v42, %v5798_v27  ;;  %v5337_v58 = vrot.slane %v18322_v19, 1  ;;  %v5369_v59 = vrot.slane %v18320_v49, 1 }
 0x6d9   : > { %v15969_v32 = vsel %vm676_vm2, %v18323_v18, %v18321_v52  ;;  %v18324_v30 = vmov %v18323_v18  ;;  %v5552_v10 = vmul.f32 %v18184_v40, %v15839_v12  ;;  %v6444_v7 = vadd.f32 %v6384_v3, %v6320_v43 }
 0x6da   : > { %v5241_v45 = vsel %vm676_vm2, %v18325_v20, %v18324_v30  ;;  %v6445_v0 = vadd.f32 %v6385_v48, %v6321_v57  ;;  %v6507_v1 = vadd.f32 %v6131_v41, %v5799_v16  ;;  %v5553_v14 = vmul.f32 %v18184_v40, %v15829_v4  ;;  %v18326_v57 = vld [vmem:[#allocation47_spill] sm:$0xff] }
 0x6db   : > { %v15979_v51 = vsel %vm485_vm0, %v5241_v45, 0.0  ;;  %v15989_v22 = vsel %vm873_vm3, %v5337_v58, %v5369_v59  ;;  %v5433_v8 = vsel %vm873_vm3, %v5369_v59, %v5337_v58  ;;  %v5616_v2 = vmul.f32 %v18177_v31, %v18310_v47  ;;  %v18328_v58 = vld [vmem:[#allocation48_spill] sm:$0xff] }
 0x6dc   : > { %v5617_v27 = vmul.f32 %v18177_v31, %v18308_v28  ;;  %v6570_v12 = vadd.f32 %v6506_v54, %v6444_v7  ;;  %v6571_v35 = vadd.f32 %v6507_v1, %v6445_v0  ;;  %v15999_v53 = vsel %vm488_vm1, %v5433_v8, 0.0 }
 0x6dd   : > { %v5740_v4 = vmul.f32 %v18185_v38, %v15847_v36  ;;  %v5676_v50 = vadd.f32 %v5616_v2, %v5552_v10  ;;  %v5741_v44 = vmul.f32 %v18185_v38, %v15855_v29  ;;  %v5868_v47 = vmul.f32 %v18187_v23, %v15907_v39 }
 0x6de   : > { %v5677_v16 = vadd.f32 %v5617_v27, %v5553_v14  ;;  %v6611_v5 = vpack.c.bf16 %v6571_v35, %v6570_v12  ;;  %v5869_v28 = vmul.f32 %v18187_v23, %v15895_v6  ;;  %v5936_v9 = vmul.f32 %v18178_v62, %v18316_v15  ;;  %v16048_v12 = vpop.f32.mrb[36].mxu0 }
 0x6df   : > { %v5937_v21 = vmul.f32 %v18178_v62, %v18314_v56  ;;  %v5800_v13 = vadd.f32 %v5740_v4, %v5676_v50  ;;  %v6068_v33 = vmul.f32 %v18188_v46, %v15919_v63  ;;  %v6069_v29 = vmul.f32 %v18188_v46, %v15931_v24 }
 0x6e0   : > { %v5801_v36 = vadd.f32 %v5741_v44, %v5677_v16  ;;  %7906 = vmatmul.mubr.bf16.gmra.mrb[76].mxu0 %v6611_v5  ;;  %v6000_v3 = vadd.f32 %v5936_v9, %v5868_v47  ;;  %v6198_v48 = vmul.f32 %v18189_v11, %v15979_v51  ;;  %v6199_v52 = vmul.f32 %v18189_v11, %v15969_v32  ;;  %v16053_v44 = vpop.f32.mrb[37].mxu0 }
 0x6e1   : > { %v6001_v42 = vadd.f32 %v5937_v21, %v5869_v28  ;;  %v6262_v18 = vmul.f32 %v18179_v61, %v18322_v19  ;;  %v6263_v30 = vmul.f32 %v18179_v61, %v18320_v49  ;;  %v6386_v20 = vmul.f32 %v18190_v55, %v15989_v22  ;;  %v16059_v21 = vpop.f32.mrb[38].mxu0 }
 0x6e2   : > { %v6387_v45 = vmul.f32 %v18190_v55, %v15999_v53  ;;  %v6132_v41 = vadd.f32 %v6068_v33, %v6000_v3  ;;  %v18327_v54 = vrot.slane %v18326_v57, 7  ;;  %v18329_v59 = vrot.slane %v18328_v58, 7 }
 0x6e3   : > { %v6133_v43 = vadd.f32 %v6069_v29, %v6001_v42  ;;  %v6322_v14 = vadd.f32 %v6262_v18, %v6198_v48  ;;  %v6323_v8 = vadd.f32 %v6263_v30, %v6199_v52  ;;  %v5338_v27 = vrot.slane %v18328_v58, 1  ;;  %v16071_v29 = vpop.f32.mrb[39].mxu0 }
 0x6e4   : > { %v16035_v10 = vsel %vm676_vm2, %v18329_v59, %v18327_v54  ;;  %v18330_v7 = vmov %v18329_v59  ;;  %v18331_v0 = vmov %v18327_v54  ;;  %v6508_v35 = vadd.f32 %v6132_v41, %v5800_v13 }
 0x6e5   : > { %v5242_v1 = vsel %vm676_vm2, %v18331_v0, %v18330_v7  ;;  %v6509_v4 = vadd.f32 %v6133_v43, %v5801_v36  ;;  %v5370_v50 = vrot.slane %v18326_v57, 1  ;;  %v5554_v16 = vmul.f32 %v18184_v40, %v15907_v39 }
 0x6e6   : > { %v16045_v2 = vsel %vm485_vm0, %v5242_v1, 0.0  ;;  %v6446_v47 = vadd.f32 %v6386_v20, %v6322_v14  ;;  %v6447_v5 = vadd.f32 %v6387_v45, %v6323_v8  ;;  %v5555_v28 = vmul.f32 %v18184_v40, %v15895_v6 }
 0x6e7   : > { %v5618_v9 = vmul.f32 %v18177_v31, %v18316_v15  ;;  %v16063_v13 = vsel %vm873_vm3, %v5338_v27, %v5370_v50  ;;  %v5434_v36 = vsel %vm873_vm3, %v5370_v50, %v5338_v27  ;;  %v5619_v39 = vmul.f32 %v18177_v31, %v18314_v56  ;;  %v18334_v50 = vld [vmem:[#allocation50_spill] sm:$0xff] }
 0x6e8   : > { %v5742_v33 = vmul.f32 %v18185_v38, %v15919_v63  ;;  %v6572_v6 = vadd.f32 %v6508_v35, %v6446_v47  ;;  %v6573_v3 = vadd.f32 %v6509_v4, %v6447_v5  ;;  %v16075_v15 = vsel %vm488_vm1, %v5434_v36, 0.0  ;;  %v18332_v35 = vld [vmem:[#allocation49_spill] sm:$0xff] }
 0x6e9   : > { %v5678_v42 = vadd.f32 %v5618_v9, %v5554_v16  ;;  %v5679_v48 = vadd.f32 %v5619_v39, %v5555_v28  ;;  %v5743_v52 = vmul.f32 %v18185_v38, %v15931_v24  ;;  %v5870_v18 = vmul.f32 %v18187_v23, %v15979_v51 }
 0x6ea   : > { %v5871_v56 = vmul.f32 %v18187_v23, %v15969_v32  ;;  %v6612_v63 = vpack.c.bf16 %v6573_v3, %v6572_v6  ;;  %v5938_v20 = vmul.f32 %v18178_v62, %v18322_v19  ;;  %v5939_v45 = vmul.f32 %v18178_v62, %v18320_v49 }
 0x6eb   : > { %v5802_v30 = vadd.f32 %v5742_v33, %v5678_v42  ;;  %v5803_v41 = vadd.f32 %v5743_v52, %v5679_v48  ;;  %v6070_v43 = vmul.f32 %v18188_v46, %v15989_v22  ;;  %v6071_v24 = vmul.f32 %v18188_v46, %v15999_v53 }
 0x6ec   : > { %v6200_v54 = vmul.f32 %v18189_v11, %v16045_v2  ;;  %7909 = vmatprep.mubr.bf16.mxu0 %v6612_v63  ;;  %v6002_v59 = vadd.f32 %v5938_v20, %v5870_v18  ;;  %v6003_v7 = vadd.f32 %v5939_v45, %v5871_v56  ;;  %v6201_v0 = vmul.f32 %v18189_v11, %v16035_v10 }
 0x6ed   : > { %v6264_v1 = vmul.f32 %v18179_v61, %v18328_v58  ;;  %v6265_v14 = vmul.f32 %v18179_v61, %v18326_v57  ;;  %v6388_v8 = vmul.f32 %v18190_v55, %v16063_v13  ;;  %v6389_v27 = vmul.f32 %v18190_v55, %v16075_v15 }
 0x6ee   : > { %v18333_v4 = vrot.slane %v18332_v35, 7  ;;  %v18335_v16 = vrot.slane %v18334_v50, 7  ;;  %v6134_v5 = vadd.f32 %v6070_v43, %v6002_v59  ;;  %v6135_v28 = vadd.f32 %v6071_v24, %v6003_v7 }
 0x6ef   : > { %v6324_v9 = vadd.f32 %v6264_v1, %v6200_v54  ;;  %v6325_v6 = vadd.f32 %v6265_v14, %v6201_v0  ;;  %v5339_v42 = vrot.slane %v18334_v50, 1  ;;  %v5371_v48 = vrot.slane %v18332_v35, 1 }
 0x6f0   : > { %v16109_v47 = vsel %vm676_vm2, %v18335_v16, %v18333_v4  ;;  %v18336_v36 = vmov %v18335_v16  ;;  %v18337_v39 = vmov %v18333_v4  ;;  %v6510_v18 = vadd.f32 %v6134_v5, %v5802_v30 }
 0x6f1   : > { %v5243_v33 = vsel %vm676_vm2, %v18337_v39, %v18336_v36  ;;  %v6448_v52 = vadd.f32 %v6388_v8, %v6324_v9  ;;  %v6511_v56 = vadd.f32 %v6135_v28, %v5803_v41  ;;  %v5556_v63 = vmul.f32 %v18184_v40, %v15979_v51 }
 0x6f2   : > { %v16119_v3 = vsel %vm485_vm0, %v5243_v33, 0.0  ;;  %v6449_v20 = vadd.f32 %v6389_v27, %v6325_v6  ;;  %v16127_v45 = vsel %vm873_vm3, %v5339_v42, %v5371_v48  ;;  %v5435_v43 = vsel %vm873_vm3, %v5371_v48, %v5339_v42 }
 0x6f3   : > { %v5557_v24 = vmul.f32 %v18184_v40, %v15969_v32  ;;  %v6574_v54 = vadd.f32 %v6510_v18, %v6448_v52  ;;  %v16135_v59 = vsel %vm488_vm1, %v5435_v43, 0.0  ;;  %v5620_v30 = vmul.f32 %v18177_v31, %v18322_v19  ;;  %v18338_v52 = vld [vmem:[#allocation51_spill] sm:$0xff] }
 0x6f4   : > { %v5621_v51 = vmul.f32 %v18177_v31, %v18320_v49  ;;  %v6575_v41 = vadd.f32 %v6511_v56, %v6449_v20  ;;  %v5744_v7 = vmul.f32 %v18185_v38, %v15989_v22  ;;  %v5745_v0 = vmul.f32 %v18185_v38, %v15999_v53  ;;  %v18340_v56 = vld [vmem:[#allocation52_spill] sm:$0xff] }
 0x6f5   : > { %v5872_v32 = vmul.f32 %v18187_v23, %v16045_v2  ;;  %v5680_v1 = vadd.f32 %v5620_v30, %v5556_v63  ;;  %v5873_v8 = vmul.f32 %v18187_v23, %v16035_v10  ;;  %v5940_v19 = vmul.f32 %v18178_v62, %v18328_v58 }
 0x6f6   : > { %v5681_v14 = vadd.f32 %v5621_v51, %v5557_v24  ;;  %v6613_v27 = vpack.c.bf16 %v6575_v41, %v6574_v54  ;;  %v5941_v49 = vmul.f32 %v18178_v62, %v18326_v57  ;;  %v6072_v22 = vmul.f32 %v18188_v46, %v16063_v13 }
 0x6f7   : > { %v6073_v53 = vmul.f32 %v18188_v46, %v16075_v15  ;;  %v5804_v4 = vadd.f32 %v5744_v7, %v5680_v1  ;;  %v6004_v5 = vadd.f32 %v5940_v19, %v5872_v32  ;;  %v6202_v28 = vmul.f32 %v18189_v11, %v16119_v3 }
 0x6f8   : > { %v5805_v16 = vadd.f32 %v5745_v0, %v5681_v14  ;;  %7910 = vmatmul.mubr.bf16.gmra.mrb[80].mxu0 %v6613_v27  ;;  %v6005_v9 = vadd.f32 %v5941_v49, %v5873_v8  ;;  %v6203_v36 = vmul.f32 %v18189_v11, %v16109_v47  ;;  %v6266_v39 = vmul.f32 %v18179_v61, %v18334_v50  ;;  %v16189_v14 = vpop.f32.mrb[40].mxu0 }
 0x6f9   : > { %v6267_v33 = vmul.f32 %v18179_v61, %v18332_v35  ;;  %v6136_v6 = vadd.f32 %v6072_v22, %v6004_v5  ;;  %v6390_v42 = vmul.f32 %v18190_v55, %v16127_v45  ;;  %v6391_v48 = vmul.f32 %v18190_v55, %v16135_v59  ;;  %v16193_v22 = vpop.f32.mrb[41].mxu0 }
 0x6fa   : > { %v18339_v18 = vrot.slane %v18338_v52, 7  ;;  %v18341_v63 = vrot.slane %v18340_v56, 7  ;;  %v6137_v43 = vadd.f32 %v6073_v53, %v6005_v9  ;;  %v6326_v24 = vadd.f32 %v6266_v39, %v6202_v28  ;;  %v16205_v9 = vpop.f32.mrb[42].mxu0 }
 0x6fb   : > { %v6327_v54 = vadd.f32 %v6267_v33, %v6203_v36  ;;  %v6512_v7 = vadd.f32 %v6136_v6, %v5804_v4  ;;  %v5340_v32 = vrot.slane %v18340_v56, 1  ;;  %v5372_v1 = vrot.slane %v18338_v52, 1  ;;  %v16213_v33 = vpop.f32.mrb[43].mxu0 }
 0x6fc   : > { %v16175_v20 = vsel %vm676_vm2, %v18341_v63, %v18339_v18  ;;  %v18342_v30 = vmov %v18341_v63  ;;  %v18343_v51 = vmov %v18339_v18  ;;  %v6450_v8 = vadd.f32 %v6390_v42, %v6326_v24 }
 0x6fd   : > { %v5244_v41 = vsel %vm676_vm2, %v18343_v51, %v18342_v30  ;;  %v6451_v19 = vadd.f32 %v6391_v48, %v6327_v54  ;;  %v6513_v27 = vadd.f32 %v6137_v43, %v5805_v16  ;;  %v5558_v49 = vmul.f32 %v18184_v40, %v16045_v2 }
 0x6fe   : > { %v16185_v0 = vsel %vm485_vm0, %v5244_v41, 0.0  ;;  %v16197_v53 = vsel %vm873_vm3, %v5340_v32, %v5372_v1  ;;  %v5436_v4 = vsel %vm873_vm3, %v5372_v1, %v5340_v32  ;;  %v5559_v5 = vmul.f32 %v18184_v40, %v16035_v10 }
 0x6ff   : > { %v5622_v28 = vmul.f32 %v18177_v31, %v18328_v58  ;;  %v6576_v16 = vadd.f32 %v6512_v7, %v6450_v8  ;;  %v6577_v36 = vadd.f32 %v6513_v27, %v6451_v19  ;;  %v16209_v2 = vsel %vm488_vm1, %v5436_v4, 0.0 }
 0x700   : > { %v5623_v39 = vmul.f32 %v18177_v31, %v18326_v57  ;;  %v5746_v10 = vmul.f32 %v18185_v38, %v16063_v13  ;;  %v5747_v58 = vmul.f32 %v18185_v38, %v16075_v15  ;;  %v5874_v42 = vmul.f32 %v18187_v23, %v16119_v3 }
 0x701   : > { %v5682_v6 = vadd.f32 %v5622_v28, %v5558_v49  ;;  %v6614_v48 = vpack.c.bf16 %v6577_v36, %v6576_v16  ;;  %v5875_v63 = vmul.f32 %v18187_v23, %v16109_v47  ;;  %v5942_v57 = vmul.f32 %v18178_v62, %v18334_v50  ;;  %v18344_v49 = vld [vmem:[#allocation53_spill] sm:$0xff] }
 0x702   : > { %v5683_v18 = vadd.f32 %v5623_v39, %v5559_v5  ;;  %v5943_v24 = vmul.f32 %v18178_v62, %v18332_v35  ;;  %v6074_v13 = vmul.f32 %v18188_v46, %v16127_v45  ;;  %v6075_v15 = vmul.f32 %v18188_v46, %v16135_v59  ;;  %v18346_v5 = vld [vmem:[#allocation54_spill] sm:$0xff] }
 0x703   : > { %v5806_v43 = vadd.f32 %v5746_v10, %v5682_v6  ;;  %7913 = vmatprep.mubr.bf16.mxu0 %v6614_v48  ;;  %v6006_v30 = vadd.f32 %v5942_v57, %v5874_v42  ;;  %v6204_v51 = vmul.f32 %v18189_v11, %v16185_v0  ;;  %v6205_v41 = vmul.f32 %v18189_v11, %v16175_v20 }
 0x704   : > { %v5807_v54 = vadd.f32 %v5747_v58, %v5683_v18  ;;  %v6007_v7 = vadd.f32 %v5943_v24, %v5875_v63  ;;  %v6268_v32 = vmul.f32 %v18179_v61, %v18340_v56  ;;  %v6269_v1 = vmul.f32 %v18179_v61, %v18338_v52 }
 0x705   : > { %v6392_v8 = vmul.f32 %v18190_v55, %v16197_v53  ;;  %v6138_v19 = vadd.f32 %v6074_v13, %v6006_v30  ;;  %v6393_v27 = vmul.f32 %v18190_v55, %v16209_v2  ;;  %v18345_v4 = vrot.slane %v18344_v49, 7 }
 0x706   : > { %v18347_v28 = vrot.slane %v18346_v5, 7  ;;  %v6139_v10 = vadd.f32 %v6075_v15, %v6007_v7  ;;  %v6328_v58 = vadd.f32 %v6268_v32, %v6204_v51  ;;  %v6329_v42 = vadd.f32 %v6269_v1, %v6205_v41 }
 0x707   : > { %v18349_v39 = vmov %v18345_v4  ;;  %v6514_v18 = vadd.f32 %v6138_v19, %v5806_v43  ;;  %v5341_v63 = vrot.slane %v18346_v5, 1  ;;  %v5373_v57 = vrot.slane %v18344_v49, 1 }
 0x708   : > { %v16249_v16 = vsel %vm676_vm2, %v18347_v28, %v18345_v4  ;;  %v18348_v36 = vmov %v18347_v28  ;;  %v5560_v24 = vmul.f32 %v18184_v40, %v16119_v3  ;;  %v6452_v13 = vadd.f32 %v6392_v8, %v6328_v58 }
 0x709   : > { %v5245_v6 = vsel %vm676_vm2, %v18349_v39, %v18348_v36  ;;  %v6453_v30 = vadd.f32 %v6393_v27, %v6329_v42  ;;  %v6515_v4 = vadd.f32 %v6139_v10, %v5807_v54  ;;  %v5561_v15 = vmul.f32 %v18184_v40, %v16109_v47 }
 0x70a   : > { %v16259_v48 = vsel %vm485_vm0, %v5245_v6, 0.0  ;;  %v16269_v51 = vsel %vm873_vm3, %v5341_v63, %v5373_v57  ;;  %v5437_v43 = vsel %vm873_vm3, %v5373_v57, %v5341_v63  ;;  %v5624_v41 = vmul.f32 %v18177_v31, %v18334_v50 }
 0x70b   : > { %v5625_v7 = vmul.f32 %v18177_v31, %v18332_v35  ;;  %v6578_v3 = vadd.f32 %v6514_v18, %v6452_v13  ;;  %v6579_v32 = vadd.f32 %v6515_v4, %v6453_v30  ;;  %v16279_v54 = vsel %vm488_vm1, %v5437_v43, 0.0 }
 0x70c   : > { %v5748_v47 = vmul.f32 %v18185_v38, %v16127_v45  ;;  %v5684_v1 = vadd.f32 %v5624_v41, %v5560_v24  ;;  %v5749_v19 = vmul.f32 %v18185_v38, %v16135_v59  ;;  %v5876_v50 = vmul.f32 %v18187_v23, %v16185_v0  ;;  %v18352_v41 = vld [vmem:[#allocation56_spill] sm:$0xff] }
 0x70d   : > { %v5685_v8 = vadd.f32 %v5625_v7, %v5561_v15  ;;  %v6615_v27 = vpack.c.bf16 %v6579_v32, %v6578_v3  ;;  %v5877_v35 = vmul.f32 %v18187_v23, %v16175_v20  ;;  %v5944_v28 = vmul.f32 %v18178_v62, %v18340_v56  ;;  %v18350_v15 = vld [vmem:[#allocation45_spill] sm:$0xff] }
 0x70e   : > { %v5945_v36 = vmul.f32 %v18178_v62, %v18338_v52  ;;  %v5808_v39 = vadd.f32 %v5748_v47, %v5684_v1  ;;  %v6076_v6 = vmul.f32 %v18188_v46, %v16197_v53  ;;  %v6077_v59 = vmul.f32 %v18188_v46, %v16209_v2 }
 0x70f   : > { %v5809_v45 = vadd.f32 %v5749_v19, %v5685_v8  ;;  %7914 = vmatmul.mubr.bf16.gmra.mrb[84].mxu0 %v6615_v27  ;;  %v6008_v10 = vadd.f32 %v5944_v28, %v5876_v50  ;;  %v6206_v42 = vmul.f32 %v18189_v11, %v16259_v48  ;;  %v6207_v18 = vmul.f32 %v18189_v11, %v16249_v16 }
 0x710   : > { %v6009_v58 = vadd.f32 %v5945_v36, %v5877_v35  ;;  %v6270_v63 = vmul.f32 %v18179_v61, %v18346_v5  ;;  %v6271_v57 = vmul.f32 %v18179_v61, %v18344_v49  ;;  %v6394_v24 = vmul.f32 %v18190_v55, %v16269_v51  ;;  %v16328_v35 = vpop.f32.mrb[44].mxu0 }
 0x711   : > { %v6395_v13 = vmul.f32 %v18190_v55, %v16279_v54  ;;  %v6140_v30 = vadd.f32 %v6076_v6, %v6008_v10  ;;  %v18351_v43 = vrot.slane %v18350_v15, 7  ;;  %v18353_v7 = vrot.slane %v18352_v41, 7  ;;  %18356 = vst [vmem:[#allocation57_spill] sm:$0xff] %v16328_v35  ;;  %v16333_v10 = vpop.f32.mrb[45].mxu0 }
 0x712   : > { %v6141_v4 = vadd.f32 %v6077_v59, %v6009_v58  ;;  %v6330_v8 = vadd.f32 %v6270_v63, %v6206_v42  ;;  %v6331_v19 = vadd.f32 %v6271_v57, %v6207_v18  ;;  %v5342_v27 = vrot.slane %v18352_v41, 1  ;;  %v16339_v57 = vpop.f32.mrb[46].mxu0 }
 0x713   : > { %v16315_v3 = vsel %vm676_vm2, %v18353_v7, %v18351_v43  ;;  %v18354_v32 = vmov %v18353_v7  ;;  %v18355_v47 = vmov %v18351_v43  ;;  %v6516_v28 = vadd.f32 %v6140_v30, %v5808_v39  ;;  %18357 = vst [vmem:[#allocation60_spill] sm:$0xff] %v16339_v57 }
 0x714   : > { %v5246_v1 = vsel %vm676_vm2, %v18355_v47, %v18354_v32  ;;  %v6517_v36 = vadd.f32 %v6141_v4, %v5809_v45  ;;  %v5374_v6 = vrot.slane %v18350_v15, 1  ;;  %v5562_v59 = vmul.f32 %v18184_v40, %v16185_v0 }
 0x715   : > { %v16325_v50 = vsel %vm485_vm0, %v5246_v1, 0.0  ;;  %v6454_v58 = vadd.f32 %v6394_v24, %v6330_v8  ;;  %v6455_v42 = vadd.f32 %v6395_v13, %v6331_v19  ;;  %v5563_v18 = vmul.f32 %v18184_v40, %v16175_v20  ;;  %v16351_v13 = vpop.f32.mrb[47].mxu0 }
 0x716   : > { %v5626_v63 = vmul.f32 %v18177_v31, %v18340_v56  ;;  %v16343_v39 = vsel %vm873_vm3, %v5342_v27, %v5374_v6  ;;  %v5438_v45 = vsel %vm873_vm3, %v5374_v6, %v5342_v27  ;;  %v5627_v0 = vmul.f32 %v18177_v31, %v18338_v52 }
 0x717   : > { %v5750_v24 = vmul.f32 %v18185_v38, %v16197_v53  ;;  %v6580_v20 = vadd.f32 %v6516_v28, %v6454_v58  ;;  %v6581_v30 = vadd.f32 %v6517_v36, %v6455_v42  ;;  %v16355_v56 = vsel %vm488_vm1, %v5438_v45, 0.0  ;;  %v18358_v45 = vld [vmem:[#allocation58_spill] sm:$0xff] }
 0x718   : > { %v5686_v4 = vadd.f32 %v5626_v63, %v5562_v59  ;;  %v5687_v43 = vadd.f32 %v5627_v0, %v5563_v18  ;;  %v5751_v7 = vmul.f32 %v18185_v38, %v16209_v2  ;;  %v5878_v32 = vmul.f32 %v18187_v23, %v16259_v48 }
 0x719   : > { %v5879_v52 = vmul.f32 %v18187_v23, %v16249_v16  ;;  %v6616_v53 = vpack.c.bf16 %v6581_v30, %v6580_v20  ;;  %v5946_v1 = vmul.f32 %v18178_v62, %v18346_v5  ;;  %v5947_v8 = vmul.f32 %v18178_v62, %v18344_v49 }
 0x71a   : > { %v5810_v47 = vadd.f32 %v5750_v24, %v5686_v4  ;;  %v5811_v19 = vadd.f32 %v5751_v7, %v5687_v43  ;;  %v6078_v27 = vmul.f32 %v18188_v46, %v16269_v51  ;;  %v6079_v2 = vmul.f32 %v18188_v46, %v16279_v54  ;;  %v18360_v24 = vld [vmem:[#allocation55_spill] sm:$0xff] }
 0x71b   : > { %v6208_v28 = vmul.f32 %v18189_v11, %v16325_v50  ;;  %7917 = vmatprep.mubr.bf16.mxu0 %v6616_v53  ;;  %v6010_v36 = vadd.f32 %v5946_v1, %v5878_v32  ;;  %v6011_v6 = vadd.f32 %v5947_v8, %v5879_v52  ;;  %v6209_v59 = vmul.f32 %v18189_v11, %v16315_v3 }
 0x71c   : > { %v6272_v58 = vmul.f32 %v18179_v61, %v18352_v41  ;;  %v6273_v42 = vmul.f32 %v18179_v61, %v18350_v15  ;;  %v6396_v18 = vmul.f32 %v18190_v55, %v16343_v39  ;;  %v6397_v63 = vmul.f32 %v18190_v55, %v16355_v56 }
 0x71d   : > { %v18359_v0 = vrot.slane %v18358_v45, 7  ;;  %v18361_v20 = vrot.slane %v18360_v24, 7  ;;  %v6142_v4 = vadd.f32 %v6078_v27, %v6010_v36  ;;  %v6143_v43 = vadd.f32 %v6079_v2, %v6011_v6 }
 0x71e   : > { %v6332_v7 = vadd.f32 %v6272_v58, %v6208_v28  ;;  %v6333_v1 = vadd.f32 %v6273_v42, %v6209_v59  ;;  %v18364_v57 = vrot.slane %v18358_v45, 1  ;;  %v18365_v35 = vrot.slane %v18360_v24, 1 }
 0x71f   : > { %v5215_v30 = vsel %vm676_vm2, %v18361_v20, %v18359_v0  ;;  %v18362_v32 = vmov %v18361_v20  ;;  %v18363_v52 = vmov %v18359_v0  ;;  %v6518_v59 = vadd.f32 %v6142_v4, %v5810_v47 }
 0x720   : > { %v5247_v53 = vsel %vm676_vm2, %v18363_v52, %v18362_v32  ;;  %v16403_v27 = vsel %vm873_vm3, %v18365_v35, %v18364_v57  ;;  %v18366_v2 = vmov %v18365_v35  ;;  %v18367_v28 = vmov %v18364_v57 }
 0x721   : > { %v5310_v8 = vsel %vm485_vm0, %v5247_v53, 0.0  ;;  %v5439_v36 = vsel %vm873_vm3, %v18367_v28, %v18366_v2  ;;  %v6456_v6 = vadd.f32 %v6396_v18, %v6332_v7  ;;  %v6519_v58 = vadd.f32 %v6143_v43, %v5811_v19 }
 0x722   : > { %v5503_v42 = vsel %vm488_vm1, %v5439_v36, 0.0  ;;  %v6457_v0 = vadd.f32 %v6397_v63, %v6333_v1  ;;  %v5564_v20 = vmul.f32 %v18184_v40, %v16259_v48  ;;  %v5565_v35 = vmul.f32 %v18184_v40, %v16249_v16 }
 0x723   : > { %v5628_v57 = vmul.f32 %v18177_v31, %v18346_v5  ;;  %v6582_v32 = vadd.f32 %v6518_v59, %v6456_v6  ;;  %v5629_v17 = vmul.f32 %v18177_v31, %v18344_v49  ;;  %v5752_v47 = vmul.f32 %v18185_v38, %v16269_v51 }
 0x724   : > { %v5753_v25 = vmul.f32 %v18185_v38, %v16279_v54  ;;  %v6583_v19 = vadd.f32 %v6519_v58, %v6457_v0  ;;  %v5880_v48 = vmul.f32 %v18187_v23, %v16325_v50  ;;  %v5881_v16 = vmul.f32 %v18187_v23, %v16315_v3 }
 0x725   : > { %v5688_v18 = vadd.f32 %v5628_v57, %v5564_v20  ;;  %v5689_v63 = vadd.f32 %v5629_v17, %v5565_v35  ;;  %v5948_v5 = vmul.f32 %v18178_v62, %v18352_v41  ;;  %v5949_v49 = vmul.f32 %v18178_v62, %v18350_v15 }
 0x726   : > { %v6080_v51 = vmul.f32 %v18188_v46, %v16343_v39  ;;  %v6617_v4 = vpack.c.bf16 %v6583_v19, %v6582_v32  ;;  %v6081_v43 = vmul.f32 %v18188_v46, %v16355_v56  ;;  %v6210_v7 = vmul.f32 %v18189_v11, %v5310_v8 }
 0x727   : > { %v5812_v54 = vadd.f32 %v5752_v47, %v5688_v18  ;;  %v5813_v52 = vadd.f32 %v5753_v25, %v5689_v63  ;;  %v6012_v53 = vadd.f32 %v5948_v5, %v5880_v48  ;;  %v6013_v1 = vadd.f32 %v5949_v49, %v5881_v16 }
 0x728   : > { %v6211_v2 = vmul.f32 %v18189_v11, %v5215_v30  ;;  %7918 = vmatmul.mubr.bf16.gmra.mrb[88].mxu0 %v6617_v4  ;;  %v6274_v28 = vmul.f32 %v18179_v61, %v18360_v24  ;;  %v6275_v36 = vmul.f32 %v18179_v61, %v18358_v45  ;;  %v6398_v6 = vmul.f32 %v18190_v55, %v16403_v27 }
 0x729   : > { %v6399_v59 = vmul.f32 %v18190_v55, %v5503_v42  ;;  %v6144_v58 = vadd.f32 %v6080_v51, %v6012_v53  ;;  %v6145_v0 = vadd.f32 %v6081_v43, %v6013_v1  ;;  %v5566_v20 = vmul.f32 %v18184_v40, %v16325_v50  ;;  %v16458_v50 = vpop.f32.mrb[48].mxu0 }
 0x72a   : > { %v5567_v11 = vmul.f32 %v18184_v40, %v16315_v3  ;;  %v6334_v35 = vadd.f32 %v6274_v28, %v6210_v7  ;;  %v6335_v57 = vadd.f32 %v6275_v36, %v6211_v2  ;;  %v5630_v32 = vmul.f32 %v18177_v31, %v18352_v41  ;;  %v16460_v48 = vpop.f32.mrb[49].mxu0 }
 0x72b   : > { %v5631_v61 = vmul.f32 %v18177_v31, %v18350_v15  ;;  %v6520_v17 = vadd.f32 %v6144_v58, %v5812_v54  ;;  %v6521_v47 = vadd.f32 %v6145_v0, %v5813_v52  ;;  %v5754_v55 = vmul.f32 %v18185_v38, %v16343_v39  ;;  %v16468_v16 = vpop.f32.mrb[50].mxu0 }
 0x72c   : > { %v5755_v25 = vmul.f32 %v18185_v38, %v16355_v56  ;;  %v6458_v19 = vadd.f32 %v6398_v6, %v6334_v35  ;;  %v6459_v40 = vadd.f32 %v6399_v59, %v6335_v57  ;;  %v5690_v3 = vadd.f32 %v5630_v32, %v5566_v20  ;;  %v16470_v49 = vpop.f32.mrb[51].mxu0 }
 0x72d   : > { %v5691_v18 = vadd.f32 %v5631_v61, %v5567_v11  ;;  %v5882_v41 = vmul.f32 %v18187_v23, %v5310_v8  ;;  %v5883_v31 = vmul.f32 %v18187_v23, %v5215_v30  ;;  %v5950_v15 = vmul.f32 %v18178_v62, %v18360_v24 }
 0x72e   : > { %v5951_v39 = vmul.f32 %v18178_v62, %v18358_v45  ;;  %v6584_v38 = vadd.f32 %v6520_v17, %v6458_v19  ;;  %v6585_v56 = vadd.f32 %v6521_v47, %v6459_v40  ;;  %v5814_v63 = vadd.f32 %v5754_v55, %v5690_v3  ;;  %v16504_v40 = vpop.f32.mrb[52].mxu0 }
 0x72f   : > { %v5815_v5 = vadd.f32 %v5755_v25, %v5691_v18  ;;  %v6014_v51 = vadd.f32 %v5950_v15, %v5882_v41  ;;  %v6082_v8 = vmul.f32 %v18188_v46, %v16403_v27  ;;  %v6083_v23 = vmul.f32 %v18188_v46, %v5503_v42  ;;  %v16507_v41 = vpop.f32.mrb[53].mxu0 }
 0x730   : > { %v6015_v4 = vadd.f32 %v5951_v39, %v5883_v31  ;;  %v6618_v30 = vpack.c.bf16 %v6585_v56, %v6584_v38  ;;  %v7026_v24 = vmul.f32 %v15911_v60, %v15911_v60  ;;  %v6957_v54 = vadd.f32 %v15927_v37, %v15911_v60  ;;  %v16509_v31 = vpop.f32.mrb[54].mxu0 }
 0x731   : > { %v6146_v62 = vadd.f32 %v6082_v8, %v6014_v51  ;;  %v7027_v43 = vmul.f32 %v15927_v37, %v15927_v37  ;;  %v7028_v7 = vmul.f32 %v15903_v34, %v15903_v34  ;;  %v7029_v53 = vmul.f32 %v15915_v26, %v15915_v26  ;;  %v16514_v56 = vpop.f32.mrb[55].mxu0 }
 0x732   : > { %v6147_v45 = vadd.f32 %v6083_v23, %v6015_v4  ;;  %7921 = vmatprep.mubr.bf16.mxu0 %v6618_v30  ;;  %v6958_v46 = vadd.f32 %v15903_v34, %v6957_v54  ;;  %v7030_v36 = vmul.f32 %v16053_v44, %v16053_v44  ;;  %v7031_v58 = vmul.f32 %v16071_v29, %v16071_v29 }
 0x733   : > { %v6522_v52 = vadd.f32 %v6146_v62, %v5814_v63  ;;  %v7090_v42 = vadd.f32 %v7027_v43, %v7026_v24  ;;  %v7032_v11 = vmul.f32 %v16048_v12, %v16048_v12  ;;  %v7033_v32 = vmul.f32 %v16059_v21, %v16059_v21 }
 0x734   : > { %v6523_v27 = vadd.f32 %v6147_v45, %v5815_v5  ;;  %v6959_v28 = vadd.f32 %v15915_v26, %v6958_v46  ;;  %v7034_v47 = vmul.f32 %v16193_v22, %v16193_v22  ;;  %v7035_v19 = vmul.f32 %v16213_v33, %v16213_v33  ;;  %v18368_v45 = vld [vmem:[#allocation57_spill] sm:$0xff] }
 0x735   : > { %v7091_v2 = vadd.f32 %v7090_v42, %v7028_v7  ;;  %v7036_v15 = vmul.f32 %v16189_v14, %v16189_v14  ;;  %v7037_v63 = vmul.f32 %v16205_v9, %v16205_v9  ;;  %v7038_v4 = vmul.f32 %v16333_v10, %v16333_v10 }
 0x736   : > { %v6619_v1 = vpack.c.bf16 %v6523_v27, %v6522_v52  ;;  %v6960_v6 = vadd.f32 %v6959_v28, %v16053_v44  ;;  %v7039_v30 = vmul.f32 %v16351_v13, %v16351_v13  ;;  %v7040_v54 = vmul.f32 %v18368_v45, %v18368_v45  ;;  %v18369_v52 = vld [vmem:[#allocation60_spill] sm:$0xff] }
 0x737   : > { %v7092_v59 = vadd.f32 %v7091_v2, %v7029_v53  ;;  %v7041_v27 = vmul.f32 %v18369_v52, %v18369_v52  ;;  %v7042_v53 = vmul.f32 %v16460_v48, %v16460_v48  ;;  %v7043_v28 = vmul.f32 %v16470_v49, %v16470_v49 }
 0x738   : > { %7922 = vmatmul.mubr.bf16.gmra.mrb[92].mxu0 %v6619_v1  ;;  %v6961_v20 = vadd.f32 %v6960_v6, %v16071_v29 }
 0x739   : > { %v7093_v0 = vadd.f32 %v7092_v59, %v7030_v36  ;;  %v7044_v59 = vmul.f32 %v16458_v50, %v16458_v50 }
 0x73a   : > { %v6962_v35 = vadd.f32 %v16048_v12, %v6961_v20  ;;  %v7045_v20 = vmul.f32 %v16468_v16, %v16468_v16 }
 0x73b   : > { %v7094_v57 = vadd.f32 %v7093_v0, %v7031_v58 }
 0x73c   : > { %v6963_v17 = vadd.f32 %v16059_v21, %v6962_v35 }
 0x73d   : > { %v7095_v61 = vadd.f32 %v7094_v57, %v7032_v11  ;;  %v7046_v57 = vmul.f32 %v16507_v41, %v16507_v41 }
 0x73e   : > { %v6964_v55 = vadd.f32 %v6963_v17, %v16193_v22 }
 0x73f   : > { %v7096_v25 = vadd.f32 %v7095_v61, %v7033_v32 }
 0x740   : > { %v6965_v18 = vadd.f32 %v6964_v55, %v16213_v33 }
 0x741   : > { %v7097_v3 = vadd.f32 %v7096_v25, %v7034_v47  ;;  %v7047_v47 = vmul.f32 %v16514_v56, %v16514_v56 }
 0x742   : > { %v6966_v39 = vadd.f32 %v16189_v14, %v6965_v18 }
 0x743   : > { %v7098_v38 = vadd.f32 %v7097_v3, %v7035_v19 }
 0x744   : > { %v6967_v51 = vadd.f32 %v16205_v9, %v6966_v39  ;;  %v16545_v32 = vpop.f32.mrb[56].mxu0 }
 0x745   : > { %v7099_v5 = vadd.f32 %v7098_v38, %v7036_v15  ;;  %v16550_v55 = vpop.f32.mrb[57].mxu0  ;;  %v7048_v15 = vmul.f32 %v16504_v40, %v16504_v40 }
 0x746   : > { %v6968_v8 = vadd.f32 %v6967_v51, %v16333_v10  ;;  %v16552_v25 = vpop.f32.mrb[58].mxu0 }
 0x747   : > { %v7100_v23 = vadd.f32 %v7099_v5, %v7037_v63  ;;  %v16555_v18 = vpop.f32.mrb[59].mxu0  ;;  %v7049_v63 = vmul.f32 %v16509_v31, %v16509_v31 }
 0x748   : > { %v6969_v62 = vadd.f32 %v6968_v8, %v16351_v13 }
 0x749   : > { %v7101_v24 = vadd.f32 %v7100_v23, %v7038_v4  ;;  %v7050_v4 = vmul.f32 %v16550_v55, %v16550_v55 }
 0x74a   : > { %v6970_v43 = vadd.f32 %v18368_v45, %v6969_v62 }
 0x74b   : > { %v7102_v7 = vadd.f32 %v7101_v24, %v7039_v30  ;;  %v7051_v30 = vmul.f32 %v16555_v18, %v16555_v18 }
 0x74c   : > { %v6971_v42 = vadd.f32 %v18369_v52, %v6970_v43 }
 0x74d   : > { %v7103_v46 = vadd.f32 %v7102_v7, %v7040_v54  ;;  %v7052_v54 = vmul.f32 %v16545_v32, %v16545_v32 }
 0x74e   : > { %v6972_v1 = vadd.f32 %v6971_v42, %v16460_v48 }
 0x74f   : > { %v7104_v2 = vadd.f32 %v7103_v46, %v7041_v27  ;;  %v7053_v27 = vmul.f32 %v16552_v25, %v16552_v25 }
 0x750   : > { %v6973_v6 = vadd.f32 %v6972_v1, %v16470_v49 }
 0x751   : > { %v7105_v36 = vadd.f32 %v7104_v2, %v7042_v53 }
 0x752   : > { %v6974_v58 = vadd.f32 %v16458_v50, %v6973_v6 }
 0x753   : > { %v7106_v0 = vadd.f32 %v7105_v36, %v7043_v28 }
 0x754   : > { %v6975_v35 = vadd.f32 %v16468_v16, %v6974_v58 }
 0x755   : > { %v7107_v11 = vadd.f32 %v7106_v0, %v7044_v59  ;;  %v16574_v42 = vpop.f32.mrb[60].mxu0 }
 0x756   : > { %v6976_v61 = vadd.f32 %v6975_v35, %v16507_v41  ;;  %v16577_v1 = vpop.f32.mrb[61].mxu0 }
 0x757   : > { %v7108_v17 = vadd.f32 %v7107_v11, %v7045_v20  ;;  %v7054_v28 = vmul.f32 %v16577_v1, %v16577_v1  ;;  %v16582_v6 = vpop.f32.mrb[62].mxu0  ;;  %v7056_v11 = vmul.f32 %v16574_v42, %v16574_v42 }
 0x758   : > { %v6977_v3 = vadd.f32 %v6976_v61, %v16514_v56  ;;  %v16584_v59 = vpop.f32.mrb[63].mxu0  ;;  %v7057_v61 = vmul.f32 %v16582_v6, %v16582_v6 }
 0x759   : > { %v7109_v19 = vadd.f32 %v7108_v17, %v7046_v57  ;;  %v7055_v20 = vmul.f32 %v16584_v59, %v16584_v59 }
 0x75a   : > { %v6978_v39 = vadd.f32 %v16504_v40, %v6977_v3 }
 0x75b   : > { %v7110_v38 = vadd.f32 %v7109_v19, %v7047_v47 }
 0x75c   : > { %v6979_v51 = vadd.f32 %v16509_v31, %v6978_v39 }
 0x75d   : > { %v7111_v5 = vadd.f32 %v7110_v38, %v7048_v15 }
 0x75e   : > { %v6980_v8 = vadd.f32 %v6979_v51, %v16550_v55 }
 0x75f   : > { %v7112_v23 = vadd.f32 %v7111_v5, %v7049_v63 }
 0x760   : > { %v6981_v62 = vadd.f32 %v6980_v8, %v16555_v18 }
 0x761   : > { %v7113_v24 = vadd.f32 %v7112_v23, %v7050_v4 }
 0x762   : > { %v6982_v43 = vadd.f32 %v16545_v32, %v6981_v62 }
 0x763   : > { %v7114_v7 = vadd.f32 %v7113_v24, %v7051_v30 }
 0x764   : > { %v6983_v53 = vadd.f32 %v16552_v25, %v6982_v43 }
 0x765   : > { %v7115_v46 = vadd.f32 %v7114_v7, %v7052_v54 }
 0x766   : > { %v6984_v2 = vadd.f32 %v6983_v53, %v16577_v1 }
 0x767   : > { %v7116_v36 = vadd.f32 %v7115_v46, %v7053_v27 }
 0x768   : > { %v6985_v0 = vadd.f32 %v6984_v2, %v16584_v59 }
 0x769   : > { %v7117_v58 = vadd.f32 %v7116_v36, %v7054_v28 }
 0x76a   : > { %v6986_v35 = vadd.f32 %v16574_v42, %v6985_v0 }
 0x76b   : > { %v7118_v57 = vadd.f32 %v7117_v58, %v7055_v20 }
 0x76c   : > { %v6987_v47 = vadd.f32 %v16582_v6, %v6986_v35 }
 0x76d   : > { %v7119_v17 = vadd.f32 %v7118_v57, %v7056_v11  ;;  %v16595_v3 = vpop.f32.mrb[64].mxu0 }
 0x76e   : > { %v16597_v15 = vpop.f32.mrb[65].mxu0  ;;  %v7060_v23 = vmul.f32 %v16595_v3, %v16595_v3 }
 0x76f   : > { %v7120_v19 = vadd.f32 %v7119_v17, %v7057_v61  ;;  %v6988_v39 = vadd.f32 %v6987_v47, %v16597_v15  ;;  %v7058_v38 = vmul.f32 %v16597_v15, %v16597_v15  ;;  %v16602_v63 = vpop.f32.mrb[66].mxu0 }
 0x770   : > { %v16604_v5 = vpop.f32.mrb[67].mxu0  ;;  %v7061_v62 = vmul.f32 %v16602_v63, %v16602_v63 }
 0x771   : > { %v7121_v51 = vadd.f32 %v7120_v19, %v7058_v38  ;;  %v6989_v4 = vadd.f32 %v6988_v39, %v16604_v5  ;;  %v7059_v8 = vmul.f32 %v16604_v5, %v16604_v5 }
 0x773   : > { %v6990_v30 = vadd.f32 %v16595_v3, %v6989_v4  ;;  %v7122_v24 = vadd.f32 %v7121_v51, %v7059_v8 }
 0x775   : > { %v7123_v54 = vadd.f32 %v7122_v24, %v7060_v23  ;;  %v6991_v43 = vadd.f32 %v16602_v63, %v6990_v30 }
 0x777   : > { %v7124_v7 = vadd.f32 %v7123_v54, %v7061_v62 }
 0x784   : > { %v16615_v27 = vpop.f32.mrb[68].mxu0 }
 0x785   : > { %v16617_v46 = vpop.f32.mrb[69].mxu0  ;;  %v7064_v11 = vmul.f32 %v16615_v27, %v16615_v27 }
 0x786   : > { %v6992_v53 = vadd.f32 %v6991_v43, %v16617_v46  ;;  %v7062_v2 = vmul.f32 %v16617_v46, %v16617_v46  ;;  %v16622_v28 = vpop.f32.mrb[70].mxu0 }
 0x787   : > { %v16624_v36 = vpop.f32.mrb[71].mxu0  ;;  %v7065_v61 = vmul.f32 %v16622_v28, %v16622_v28 }
 0x788   : > { %v7125_v58 = vadd.f32 %v7124_v7, %v7062_v2  ;;  %v6993_v0 = vadd.f32 %v6992_v53, %v16624_v36  ;;  %v7063_v20 = vmul.f32 %v16624_v36, %v16624_v36 }
 0x78a   : > { %v6994_v35 = vadd.f32 %v16615_v27, %v6993_v0  ;;  %v7126_v57 = vadd.f32 %v7125_v58, %v7063_v20 }
 0x78c   : > { %v7127_v17 = vadd.f32 %v7126_v57, %v7064_v11  ;;  %v6995_v47 = vadd.f32 %v16622_v28, %v6994_v35 }
 0x78e   : > { %v7128_v19 = vadd.f32 %v7127_v17, %v7065_v61 }
 0x79c   : > { %v16635_v39 = vpop.f32.mrb[72].mxu0 }
 0x79d   : > { %18370 = vst [vmem:[#allocation59_spill] sm:$0xff] %v16635_v39  ;;  %v16637_v38 = vpop.f32.mrb[73].mxu0  ;;  %v7068_v54 = vmul.f32 %v16635_v39, %v16635_v39 }
 0x79e   : > { %18371 = vst [vmem:[#allocation61_spill] sm:$0xff] %v16637_v38  ;;  %v6996_v51 = vadd.f32 %v6995_v47, %v16637_v38  ;;  %v7066_v4 = vmul.f32 %v16637_v38, %v16637_v38  ;;  %v16642_v8 = vpop.f32.mrb[74].mxu0 }
 0x79f   : > { %18372 = vst [vmem:[#allocation63_spill] sm:$0xff] %v16642_v8  ;;  %v16644_v23 = vpop.f32.mrb[75].mxu0  ;;  %v7069_v53 = vmul.f32 %v16642_v8, %v16642_v8 }
 0x7a0   : > { %18373 = vst [vmem:[#allocation65_spill] sm:$0xff] %v16644_v23  ;;  %v7129_v30 = vadd.f32 %v7128_v19, %v7066_v4  ;;  %v6997_v24 = vadd.f32 %v6996_v51, %v16644_v23  ;;  %v7067_v62 = vmul.f32 %v16644_v23, %v16644_v23 }
 0x7a2   : > { %v6998_v43 = vadd.f32 %v16635_v39, %v6997_v24  ;;  %v7130_v7 = vadd.f32 %v7129_v30, %v7067_v62 }
 0x7a4   : > { %v7131_v2 = vadd.f32 %v7130_v7, %v7068_v54  ;;  %v6999_v58 = vadd.f32 %v16642_v8, %v6998_v43 }
 0x7a6   : > { %v7132_v0 = vadd.f32 %v7131_v2, %v7069_v53 }
 0x7b3   : > { %v16655_v20 = vpop.f32.mrb[76].mxu0 }
 0x7b4   : > { %18374 = vst [vmem:[#allocation67_spill] sm:$0xff] %v16655_v20  ;;  %v16657_v11 = vpop.f32.mrb[77].mxu0  ;;  %v7072_v4 = vmul.f32 %v16655_v20, %v16655_v20 }
 0x7b5   : > { %18375 = vst [vmem:[#allocation62_spill] sm:$0xff] %v16657_v11  ;;  %v7000_v35 = vadd.f32 %v6999_v58, %v16657_v11  ;;  %v7070_v57 = vmul.f32 %v16657_v11, %v16657_v11  ;;  %v16662_v61 = vpop.f32.mrb[78].mxu0 }
 0x7b6   : > { %18376 = vst [vmem:[#allocation64_spill] sm:$0xff] %v16662_v61  ;;  %v16664_v17 = vpop.f32.mrb[79].mxu0  ;;  %v7073_v62 = vmul.f32 %v16662_v61, %v16662_v61 }
 0x7b7   : > { %18377 = vst [vmem:[#allocation66_spill] sm:$0xff] %v16664_v17  ;;  %v7133_v47 = vadd.f32 %v7132_v0, %v7070_v57  ;;  %v7001_v19 = vadd.f32 %v7000_v35, %v16664_v17  ;;  %v7071_v51 = vmul.f32 %v16664_v17, %v16664_v17 }
 0x7b9   : > { %v7002_v30 = vadd.f32 %v16655_v20, %v7001_v19  ;;  %v7134_v24 = vadd.f32 %v7133_v47, %v7071_v51 }
 0x7bb   : > { %v7135_v54 = vadd.f32 %v7134_v24, %v7072_v4  ;;  %v7003_v43 = vadd.f32 %v16662_v61, %v7002_v30 }
 0x7bd   : > { %v7136_v7 = vadd.f32 %v7135_v54, %v7073_v62 }
 0x7cb   : > { %v16675_v53 = vpop.f32.mrb[80].mxu0 }
 0x7cc   : > { %18378 = vst [vmem:[#allocation68_spill] sm:$0xff] %v16675_v53  ;;  %v16677_v2 = vpop.f32.mrb[81].mxu0  ;;  %v7076_v4 = vmul.f32 %v16675_v53, %v16675_v53 }
 0x7cd   : > { %18379 = vst [vmem:[#allocation8_spill] sm:$0xff] %v16677_v2  ;;  %v7004_v58 = vadd.f32 %v7003_v43, %v16677_v2  ;;  %v7074_v0 = vmul.f32 %v16677_v2, %v16677_v2  ;;  %v16682_v35 = vpop.f32.mrb[82].mxu0 }
 0x7ce   : > { %18380 = vst [vmem:[#allocation21_spill] sm:$0xff] %v16682_v35  ;;  %v16684_v57 = vpop.f32.mrb[83].mxu0  ;;  %v7077_v62 = vmul.f32 %v16682_v35, %v16682_v35 }
 0x7cf   : > { %18381 = vst [vmem:[#allocation17_spill] sm:$0xff] %v16684_v57  ;;  %v7137_v47 = vadd.f32 %v7136_v7, %v7074_v0  ;;  %v7005_v19 = vadd.f32 %v7004_v58, %v16684_v57  ;;  %v7075_v51 = vmul.f32 %v16684_v57, %v16684_v57 }
 0x7d1   : > { %v7006_v30 = vadd.f32 %v16675_v53, %v7005_v19  ;;  %v7138_v24 = vadd.f32 %v7137_v47, %v7075_v51 }
 0x7d3   : > { %v7139_v54 = vadd.f32 %v7138_v24, %v7076_v4  ;;  %v7007_v43 = vadd.f32 %v16682_v35, %v7006_v30 }
 0x7d5   : > { %v7140_v2 = vadd.f32 %v7139_v54, %v7077_v62 }
 0x7e2   : > { %v16695_v61 = vpop.f32.mrb[84].mxu0 }
 0x7e3   : > { %18382 = vst [vmem:[#allocation22_spill] sm:$0xff] %v16695_v61  ;;  %v16697_v7 = vpop.f32.mrb[85].mxu0  ;;  %v7080_v30 = vmul.f32 %v16695_v61, %v16695_v61 }
 0x7e4   : > { %18383 = vst [vmem:[#allocation20_spill] sm:$0xff] %v16697_v7  ;;  %v7008_v58 = vadd.f32 %v7007_v43, %v16697_v7  ;;  %v7078_v0 = vmul.f32 %v16697_v7, %v16697_v7  ;;  %v16702_v57 = vpop.f32.mrb[86].mxu0 }
 0x7e5   : > { %18384 = vst [vmem:[#allocation27_spill] sm:$0xff] %v16702_v57  ;;  %v16704_v19 = vpop.f32.mrb[87].mxu0  ;;  %v7081_v54 = vmul.f32 %v16702_v57, %v16702_v57 }
 0x7e6   : > { %18385 = vst [vmem:[#allocation9_spill] sm:$0xff] %v16704_v19  ;;  %v7141_v47 = vadd.f32 %v7140_v2, %v7078_v0  ;;  %v7009_v51 = vadd.f32 %v7008_v58, %v16704_v19  ;;  %v7079_v4 = vmul.f32 %v16704_v19, %v16704_v19 }
 0x7e8   : > { %v7010_v24 = vadd.f32 %v16695_v61, %v7009_v51  ;;  %v7142_v62 = vadd.f32 %v7141_v47, %v7079_v4 }
 0x7ea   : > { %v7143_v43 = vadd.f32 %v7142_v62, %v7080_v30  ;;  %v7011_v7 = vadd.f32 %v16702_v57, %v7010_v24 }
 0x7ec   : > { %v7144_v35 = vadd.f32 %v7143_v43, %v7081_v54 }
 0x7fb   : > { %v16715_v53 = vpop.f32.mrb[88].mxu0 }
 0x7fc   : > { %18386 = vst [vmem:[#allocation16_spill] sm:$0xff] %v16715_v53  ;;  %v16717_v2 = vpop.f32.mrb[89].mxu0  ;;  %v7084_v24 = vmul.f32 %v16715_v53, %v16715_v53 }
 0x7fd   : > { %18387 = vst [vmem:[#allocation23_spill] sm:$0xff] %v16717_v2  ;;  %v7012_v58 = vadd.f32 %v7011_v7, %v16717_v2  ;;  %v7082_v0 = vmul.f32 %v16717_v2, %v16717_v2  ;;  %v16722_v19 = vpop.f32.mrb[90].mxu0 }
 0x7fe   : > { %18388 = vst [vmem:[#allocation25_spill] sm:$0xff] %v16722_v19  ;;  %v16724_v51 = vpop.f32.mrb[91].mxu0  ;;  %v7085_v7 = vmul.f32 %v16722_v19, %v16722_v19 }
 0x7ff   : > { %18389 = vst [vmem:[#allocation46_spill] sm:$0xff] %v16724_v51  ;;  %v7145_v47 = vadd.f32 %v7144_v35, %v7082_v0  ;;  %v7013_v4 = vadd.f32 %v7012_v58, %v16724_v51  ;;  %v7083_v30 = vmul.f32 %v16724_v51, %v16724_v51 }
 0x801   : > { %v7014_v62 = vadd.f32 %v16715_v53, %v7013_v4  ;;  %v7146_v54 = vadd.f32 %v7145_v47, %v7083_v30 }
 0x803   : > { %v7147_v43 = vadd.f32 %v7146_v54, %v7084_v24  ;;  %v7015_v2 = vadd.f32 %v16722_v19, %v7014_v62 }
 0x805   : > { %v7148_v57 = vadd.f32 %v7147_v43, %v7085_v7 }
 0x80b   : > { %v16735_v61 = vpop.f32.mrb[92].mxu0 }
 0x80c   : > { %18390 = vst [vmem:[#allocation70_spill] sm:$0xff] %v16735_v61  ;;  %v16737_v35 = vpop.f32.mrb[93].mxu0  ;;  %v7088_v24 = vmul.f32 %v16735_v61, %v16735_v61 }
 0x80d   : > { %18391 = vst [vmem:[#allocation44_spill] sm:$0xff] %v16737_v35  ;;  %v7016_v58 = vadd.f32 %v7015_v2, %v16737_v35  ;;  %v7086_v0 = vmul.f32 %v16737_v35, %v16737_v35  ;;  %v16742_v51 = vpop.f32.mrb[94].mxu0 }
 0x80e   : > { %v6945_v4 = vpop.f32.mrb[95].mxu0  ;;  %v7089_v7 = vmul.f32 %v16742_v51, %v16742_v51 }
 0x80f   : > { %v7149_v47 = vadd.f32 %v7148_v57, %v7086_v0  ;;  %v7017_v30 = vadd.f32 %v7016_v58, %v6945_v4  ;;  %v7087_v53 = vmul.f32 %v6945_v4, %v6945_v4 }
 0x811   : > { %v7018_v62 = vadd.f32 %v16735_v61, %v7017_v30  ;;  %v7150_v54 = vadd.f32 %v7149_v47, %v7087_v53 }
 0x813   : > { %v7019_v2 = vadd.f32 %v16742_v51, %v7018_v62  ;;  %v7151_v43 = vadd.f32 %v7150_v54, %v7088_v24 }
 0x815   : > { %v7020_v19 = vrot.slane %v7019_v2, 4  ;;  %v7152_v35 = vadd.f32 %v7151_v43, %v7089_v7  ;;  %v8027_v7 = vld [vmem:[%s8322_s15] sm:$0x7]  ;;  %s17317_s15 = sshll.u32 %s8192_s14, 4  ;;  %s7440_s15 = int_to_ptr.vmem [resolvable:$true] %s17317_s15 }
 0x816   : > { %p8130_p10 = scmp.lt.s32.totalorder %s7440_s15, %s7440_s15 }
 0x817   : > { %v7021_v20 = vadd.f32 %v7020_v19, %v7019_v2  ;;  %v7153_v17 = vrot.slane %v7152_v35, 4 }
 0x819   : > { %v7022_v11 = vrot.slane %v7021_v20, 2  ;;  %v7154_v57 = vadd.f32 %v7153_v17, %v7152_v35  ;;  %v18392_v35 = vld [vmem:[#allocation12_spill] sm:$0xff] }
 0x81b   : > { %v7023_v58 = vadd.f32 %v7022_v11, %v7021_v20  ;;  %v7155_v0 = vrot.slane %v7154_v57, 2  ;;  %v8028_v11 = vld [vmem:[%s8327_s18] sm:$0x7]  ;;  %s8123_s18 = scalar_lea.vmem %s7440_s15, 8192 }
 0x81c   : > { %p8124_p4 = scmp.ne.s32.totalorder %s7440_s15, %s8123_s18  ;;  %p8131_p12 = scmp.lt.s32.totalorder %s8123_s18, %s8123_s18 }
 0x81d   : > { %v7024_v8 = vrot.slane %v7023_v58, 1  ;;  %v7156_v39 = vadd.f32 %v7155_v0, %v7154_v57  ;;  %v8029_v0 = vld [vmem:[#allocation5 + $0x1e8] sm:$0xff] }
 0x81e   : > { %p8125_p5 = pnand %p8124_p4, %p7956_p8  ;;  %p8132_p0 = por %p8131_p12, %p8130_p10 }
 0x81f   : > { %v7025_v30 = vadd.f32 %v7024_v8, %v7023_v58  ;;  %v7157_v53 = vrot.slane %v7156_v39, 1 }
 0x820   : > { %p8126_p6 = pneg %p8125_p5 }
 0x821   : > { %v7158_v47 = vadd.f32 %v7157_v53, %v7156_v39  ;;  %v7159_v61 = vmul.f32 0.001953125, %v7025_v30  ;;  %v18393_v53 = vld [vmem:[#allocation61_spill] sm:$0xff] }
 0x822   : > { %p8133_p1 = pnand %p8132_p0, %p8126_p6 }
 0x823   : > { %v7160_v23 = vmul.f32 0.001953125, %v7158_v47  ;;  %v7161_v38 = vmul.f32 %v7159_v61, %v7159_v61  ;;  %v18394_v47 = vld [vmem:[#allocation65_spill] sm:$0xff] }
 0x825   : > { %v7162_v62 = vsub.f32 %v7160_v23, %v7161_v38 }
 0x827   : > { %v7163_v24 = vmax.f32 %v7162_v62, 0.0  ;;  %v18395_v62 = vld [vmem:[#allocation59_spill] sm:$0xff] }
 0x829   : > { %v7164_v54 = vadd.f32 1e-05, %v7163_v24  ;;  %v18396_v24 = vld [vmem:[#allocation63_spill] sm:$0xff] }
 0x82b   : > { %8023 = vrsqrt.f32 %v7164_v54  ;;  %v18397_v54 = vld [vmem:[#allocation62_spill] sm:$0xff] }
 0x835   : > { %v8024_v19 = vpop.eup %8023 }
 0x836   : > { %v7166_v2 = vmul.f32 %v8027_v7, %v8024_v19  ;;  %v18398_v19 = vld [vmem:[#allocation66_spill] sm:$0xff] }
 0x838   : > { %v7167_v17 = vmul.f32 %v7166_v2, %v7159_v61  ;;  %v16752_v20 = vrot.slane %v7166_v2, %v18392_v35  ;;  %v18399_v2 = vld [vmem:[#allocation67_spill] sm:$0xff] }
 0x83a   : > { %v7168_v43 = vsub.f32 %v8028_v11, %v7167_v17  ;;  %v7234_v8 = vmul.f32 %v16752_v20, %v6945_v4  ;;  %v16758_v39 = vmul.f32 %v16752_v20, %v15911_v60  ;;  %v16762_v38 = vmul.f32 %v16752_v20, %v15927_v37 }
 0x83b   : > { %v16766_v23 = vmul.f32 %v15903_v34, %v16752_v20  ;;  %v16770_v61 = vmul.f32 %v15915_v26, %v16752_v20  ;;  %v16774_v57 = vmul.f32 %v16752_v20, %v16053_v44  ;;  %v16778_v60 = vmul.f32 %v16752_v20, %v16071_v29 }
 0x83c   : > { %v16781_v4 = vrot.slane %v7168_v43, %v18392_v35  ;;  %v16785_v37 = vmul.f32 %v16048_v12, %v16752_v20  ;;  %v16789_v34 = vmul.f32 %v16059_v21, %v16752_v20  ;;  %v16793_v26 = vmul.f32 %v16752_v20, %v16193_v22  ;;  %v18400_v35 = vld [vmem:[#allocation64_spill] sm:$0xff] }
 0x83d   : > { %v16797_v44 = vmul.f32 %v16752_v20, %v16213_v33  ;;  %v16801_v29 = vmul.f32 %v16189_v14, %v16752_v20  ;;  %v16805_v12 = vmul.f32 %v16205_v9, %v16752_v20  ;;  %v16809_v21 = vmul.f32 %v16752_v20, %v16333_v10  ;;  %v18401_v43 = vld [vmem:[#allocation8_spill] sm:$0xff] }
 0x83e   : > { %v7302_v58 = vadd.f32 %v16781_v4, %v7234_v8  ;;  %v16814_v22 = vmul.f32 %v16752_v20, %v16351_v13  ;;  %v16818_v33 = vmul.f32 %v18368_v45, %v16752_v20  ;;  %v16822_v14 = vmul.f32 %v18369_v52, %v16752_v20 }
 0x83f   : > { %v16826_v9 = vmul.f32 %v16752_v20, %v16460_v48  ;;  %v16830_v10 = vmul.f32 %v16752_v20, %v16470_v49  ;;  %v16834_v13 = vmul.f32 %v16458_v50, %v16752_v20  ;;  %v16838_v45 = vmul.f32 %v16468_v16, %v16752_v20 }
 0x840   : > { %v7366_v30 = vadd.f32 %v8029_v0, %v7302_v58  ;;  %v16842_v52 = vmul.f32 %v16752_v20, %v16507_v41  ;;  %v16846_v48 = vmul.f32 %v16752_v20, %v16514_v56  ;;  %v16850_v49 = vmul.f32 %v16504_v40, %v16752_v20  ;;  %v18402_v58 = vld [vmem:[#allocation17_spill] sm:$0xff] }
 0x841   : > { %v16854_v50 = vmul.f32 %v16509_v31, %v16752_v20  ;;  %v16858_v16 = vmul.f32 %v16752_v20, %v16550_v55  ;;  %v16862_v41 = vmul.f32 %v16752_v20, %v16555_v18  ;;  %v16866_v56 = vmul.f32 %v16545_v32, %v16752_v20 }
 0x842   : > { %7430 = vst [vmem:[#allocation5 + $0x1e8] sm:$0xff] %v7366_v30  ;;  %v16870_v40 = vmul.f32 %v16552_v25, %v16752_v20  ;;  %v16874_v31 = vmul.f32 %v16752_v20, %v16577_v1  ;;  %v16878_v55 = vmul.f32 %v16752_v20, %v16584_v59  ;;  %v16882_v18 = vmul.f32 %v16574_v42, %v16752_v20  ;;  %v18403_v30 = vld [vmem:[#allocation68_spill] sm:$0xff] }
 0x843   : > { %v16886_v32 = vmul.f32 %v16582_v6, %v16752_v20  ;;  %v16890_v25 = vmul.f32 %v16752_v20, %v16597_v15  ;;  %v16894_v1 = vmul.f32 %v16752_v20, %v16604_v5  ;;  %v16898_v59 = vmul.f32 %v16595_v3, %v16752_v20 }
 0x844   : > { %v16902_v42 = vmul.f32 %v16602_v63, %v16752_v20  ;;  %v16906_v6 = vmul.f32 %v16752_v20, %v16617_v46  ;;  %v16910_v15 = vmul.f32 %v16752_v20, %v16624_v36  ;;  %v16914_v5 = vmul.f32 %v16615_v27, %v16752_v20 }
 0x845   : > { %v16918_v3 = vmul.f32 %v16622_v28, %v16752_v20  ;;  %v16922_v63 = vmul.f32 %v16752_v20, %v18393_v53  ;;  %v16926_v46 = vmul.f32 %v16752_v20, %v18394_v47  ;;  %v16930_v36 = vmul.f32 %v18395_v62, %v16752_v20  ;;  %v18405_v47 = vld [vmem:[#allocation21_spill] sm:$0xff] }
 0x846   : > { %v16934_v27 = vmul.f32 %v18396_v24, %v16752_v20  ;;  %v16938_v28 = vmul.f32 %v16752_v20, %v18397_v54  ;;  %v16942_v7 = vmul.f32 %v16752_v20, %v18398_v19  ;;  %v16946_v17 = vmul.f32 %v18399_v2, %v16752_v20  ;;  %v18407_v24 = vld [vmem:[#allocation20_spill] sm:$0xff]  ;;  %v18409_v19 = vld [vmem:[#allocation9_spill] sm:$0xff] }
 0x847   : > { %v16950_v11 = vmul.f32 %v18400_v35, %v16752_v20  ;;  %v16954_v8 = vmul.f32 %v16752_v20, %v18401_v43  ;;  %v16958_v0 = vmul.f32 %v16752_v20, %v18402_v58  ;;  %v16962_v53 = vmul.f32 %v18403_v30, %v16752_v20  ;;  %v18411_v35 = vld [vmem:[#allocation22_spill] sm:$0xff]  ;;  %v18413_v58 = vld [vmem:[#allocation27_spill] sm:$0xff] }
 0x848   : > { %v16966_v62 = vmul.f32 %v18405_v47, %v16752_v20  ;;  %v16970_v54 = vmul.f32 %v16752_v20, %v18407_v24  ;;  %v16974_v2 = vmul.f32 %v16752_v20, %v18409_v19  ;;  %v16978_v43 = vmul.f32 %v18411_v35, %v16752_v20 }
 0x849   : > { %18404 = vst [vmem:[#allocation69_spill] sm:$0xff] %v16962_v53  ;;  %v16982_v30 = vmul.f32 %v18413_v58, %v16752_v20  ;;  %v18415_v53 = vld [vmem:[#allocation23_spill] sm:$0xff] }
 0x84a   : > { %18406 = vst [vmem:[#allocation73_spill] sm:$0xff] %v16966_v62  ;;  %18408 = vst [vmem:[#allocation71_spill] sm:$0xff] %v16970_v54  ;;  %v16986_v47 = vmul.f32 %v16752_v20, %v18415_v53  ;;  %v18416_v62 = vld [vmem:[#allocation46_spill] sm:$0xff]  ;;  %v18417_v54 = vld [vmem:[#allocation16_spill] sm:$0xff] }
 0x84b   : > { %18410 = vst [vmem:[#allocation24_spill] sm:$0xff] %v16974_v2  ;;  %18412 = vst [vmem:[#allocation72_spill] sm:$0xff] %v16978_v43  ;;  %v16990_v24 = vmul.f32 %v16752_v20, %v18416_v62  ;;  %v16994_v19 = vmul.f32 %v18417_v54, %v16752_v20  ;;  %v18418_v2 = vld [vmem:[#allocation25_spill] sm:$0xff]  ;;  %v18419_v43 = vld [vmem:[#allocation44_spill] sm:$0xff]  ;;  %v17010_v62 = vmul.f32 %v16742_v51, %v16752_v20 }
 0x84c   : > { %18414 = vst [vmem:[#allocation11_spill] sm:$0xff] %v16982_v30  ;;  %v16998_v35 = vmul.f32 %v18418_v2, %v16752_v20  ;;  %v17002_v58 = vmul.f32 %v16752_v20, %v18419_v43  ;;  %v18420_v30 = vld [vmem:[#allocation70_spill] sm:$0xff]  ;;  %v17014_v54 = vadd.f32 %v16781_v4, %v16758_v39  ;;  %v17018_v2 = vadd.f32 %v16781_v4, %v16762_v38 }
 0x84d   : > { %v17006_v53 = vmul.f32 %v18420_v30, %v16752_v20  ;;  %v17022_v43 = vadd.f32 %v16781_v4, %v16766_v23  ;;  %v17026_v30 = vadd.f32 %v16781_v4, %v16770_v61  ;;  %v17030_v51 = vadd.f32 %v16781_v4, %v16774_v57 }
 0x84e   : > { %v17034_v20 = vadd.f32 %v16781_v4, %v16778_v60  ;;  %v17038_v39 = vadd.f32 %v16781_v4, %v16785_v37  ;;  %v17042_v38 = vadd.f32 %v16781_v4, %v16789_v34  ;;  %v17046_v23 = vadd.f32 %v16781_v4, %v16793_v26 }
 0x84f   : > { %v17050_v61 = vadd.f32 %v16781_v4, %v16797_v44  ;;  %v17054_v57 = vadd.f32 %v16781_v4, %v16801_v29  ;;  %v17058_v60 = vadd.f32 %v16781_v4, %v16805_v12  ;;  %v17062_v37 = vadd.f32 %v16781_v4, %v16809_v21 }
 0x850   : > { %v17066_v34 = vadd.f32 %v16781_v4, %v16814_v22  ;;  %v17070_v26 = vadd.f32 %v16781_v4, %v16818_v33  ;;  %v17074_v44 = vadd.f32 %v16781_v4, %v16822_v14  ;;  %v17078_v29 = vadd.f32 %v16781_v4, %v16826_v9 }
 0x851   : > { %v17082_v12 = vadd.f32 %v16781_v4, %v16830_v10  ;;  %v17086_v21 = vadd.f32 %v16781_v4, %v16834_v13  ;;  %v17090_v22 = vadd.f32 %v16781_v4, %v16838_v45  ;;  %v17094_v33 = vadd.f32 %v16781_v4, %v16842_v52 }
 0x852   : > { %v17098_v14 = vadd.f32 %v16781_v4, %v16846_v48  ;;  %v17102_v9 = vadd.f32 %v16781_v4, %v16850_v49  ;;  %v17106_v10 = vadd.f32 %v16781_v4, %v16854_v50  ;;  %v17110_v13 = vadd.f32 %v16781_v4, %v16858_v16 }
 0x853   : > { %v17114_v45 = vadd.f32 %v16781_v4, %v16862_v41  ;;  %v17118_v52 = vadd.f32 %v16781_v4, %v16866_v56  ;;  %v17122_v48 = vadd.f32 %v16781_v4, %v16870_v40  ;;  %v17126_v49 = vadd.f32 %v16781_v4, %v16874_v31 }
 0x854   : > { %v17130_v50 = vadd.f32 %v16781_v4, %v16878_v55  ;;  %v17134_v16 = vadd.f32 %v16781_v4, %v16882_v18  ;;  %v17138_v41 = vadd.f32 %v16781_v4, %v16886_v32  ;;  %v17142_v56 = vadd.f32 %v16781_v4, %v16890_v25 }
 0x855   : > { %v17146_v40 = vadd.f32 %v16781_v4, %v16894_v1  ;;  %v17150_v31 = vadd.f32 %v16781_v4, %v16898_v59  ;;  %v17154_v55 = vadd.f32 %v16781_v4, %v16902_v42  ;;  %v17158_v18 = vadd.f32 %v16781_v4, %v16906_v6 }
 0x856   : > { %v17162_v32 = vadd.f32 %v16781_v4, %v16910_v15  ;;  %v17166_v25 = vadd.f32 %v16781_v4, %v16914_v5  ;;  %v17170_v1 = vadd.f32 %v16781_v4, %v16918_v3  ;;  %v17174_v59 = vadd.f32 %v16781_v4, %v16922_v63 }
 0x857   : > { %v17178_v42 = vadd.f32 %v16781_v4, %v16926_v46  ;;  %v17182_v6 = vadd.f32 %v16781_v4, %v16930_v36  ;;  %v17186_v15 = vadd.f32 %v16781_v4, %v16934_v27  ;;  %v17190_v5 = vadd.f32 %v16781_v4, %v16938_v28  ;;  %v18426_v28 = vld [vmem:[#allocation69_spill] sm:$0xff] }
 0x858   : > { %v17194_v3 = vadd.f32 %v16781_v4, %v16942_v7  ;;  %v17198_v63 = vadd.f32 %v16781_v4, %v16946_v17  ;;  %v17202_v46 = vadd.f32 %v16781_v4, %v16950_v11  ;;  %v17206_v36 = vadd.f32 %v16781_v4, %v16954_v8 }
 0x859   : > { %v17210_v27 = vadd.f32 %v16781_v4, %v16958_v0  ;;  %v17214_v7 = vadd.f32 %v16781_v4, %v18426_v28 }
 0x85a   : > { %18421 = vst [vmem:[#allocation29_spill] sm:$0xff] %v17194_v3  ;;  %18422 = vst [vmem:[#allocation28_spill] sm:$0xff] %v17198_v63  ;;  %v18427_v3 = vld [vmem:[#allocation73_spill] sm:$0xff]  ;;  %v18428_v63 = vld [vmem:[#allocation71_spill] sm:$0xff] }
 0x85b   : > { %18423 = vst [vmem:[#allocation10_spill] sm:$0xff] %v17202_v46  ;;  %18424 = vst [vmem:[#allocation26_spill] sm:$0xff] %v17206_v36  ;;  %v17218_v17 = vadd.f32 %v16781_v4, %v18427_v3  ;;  %v17222_v11 = vadd.f32 %v16781_v4, %v18428_v63  ;;  %v18429_v46 = vld [vmem:[#allocation24_spill] sm:$0xff]  ;;  %v17238_v3 = vadd.f32 %v16781_v4, %v16986_v47 }
 0x85c   : > { %18425 = vst [vmem:[#allocation33_spill] sm:$0xff] %v17210_v27  ;;  %v17226_v8 = vadd.f32 %v16781_v4, %v18429_v46  ;;  %v18430_v36 = vld [vmem:[#allocation72_spill] sm:$0xff]  ;;  %v18432_v27 = vld [vmem:[#allocation11_spill] sm:$0xff]  ;;  %v17242_v63 = vadd.f32 %v16781_v4, %v16990_v24  ;;  %v17246_v46 = vadd.f32 %v16781_v4, %v16994_v19  ;;  %v17258_v47 = vadd.f32 %v16781_v4, %v17006_v53 }
 0x85d   : > { %v17230_v0 = vadd.f32 %v16781_v4, %v18430_v36  ;;  %v17234_v28 = vadd.f32 %v16781_v4, %v18432_v27  ;;  %18434 = vst [vmem:[#allocation38_spill] sm:$0xff] %v17238_v3  ;;  %v17250_v36 = vadd.f32 %v16781_v4, %v16998_v35  ;;  %v17254_v27 = vadd.f32 %v16781_v4, %v17002_v58  ;;  %v8032_v35 = vld [vmem:[#allocation5 + $0x10] sm:$0xff] }
 0x85e   : > { %18435 = vst [vmem:[#allocation31_spill] sm:$0xff] %v17242_v63  ;;  %18436 = vst [vmem:[#allocation32_spill] sm:$0xff] %v17246_v46  ;;  %v17262_v24 = vadd.f32 %v16781_v4, %v17010_v62  ;;  %v8030_v63 = vld [vmem:[#allocation5] sm:$0xff]  ;;  %v8031_v46 = vld [vmem:[#allocation5 + $0x8] sm:$0xff] }
 0x85f   : > { %18431 = vst [vmem:[#allocation34_spill] sm:$0xff] %v17230_v0  ;;  %18433 = vst [vmem:[#allocation30_spill] sm:$0xff] %v17234_v28  ;;  %v7305_v19 = vadd.f32 %v8030_v63, %v17014_v54  ;;  %v7306_v3 = vadd.f32 %v8031_v46, %v17018_v2  ;;  %v8033_v28 = vld [vmem:[#allocation5 + $0x18] sm:$0xff]  ;;  %v8036_v4 = vld [vmem:[#allocation5 + $0x30] sm:$0xff] }
 0x860   : > { %18437 = vst [vmem:[#allocation39_spill] sm:$0xff] %v17250_v36  ;;  %18438 = vst [vmem:[#allocation41_spill] sm:$0xff] %v17254_v27  ;;  %v7307_v36 = vadd.f32 %v8032_v35, %v17022_v43  ;;  %v7308_v58 = vadd.f32 %v8033_v28, %v17026_v30  ;;  %v8034_v27 = vld [vmem:[#allocation5 + $0x20] sm:$0xff]  ;;  %v7311_v62 = vadd.f32 %v8036_v4, %v17038_v39  ;;  %v8039_v43 = vld [vmem:[#allocation5 + $0x48] sm:$0xff] }
 0x861   : > { %18439 = vst [vmem:[#allocation36_spill] sm:$0xff] %v17258_v47  ;;  %18440 = vst [vmem:[#allocation40_spill] sm:$0xff] %v17262_v24  ;;  %v7309_v53 = vadd.f32 %v8034_v27, %v17030_v51  ;;  %v8035_v47 = vld [vmem:[#allocation5 + $0x28] sm:$0xff]  ;;  %v8037_v24 = vld [vmem:[#allocation5 + $0x38] sm:$0xff]  ;;  %v7314_v46 = vadd.f32 %v8039_v43, %v17050_v61 }
 0x862   : > { %v7310_v0 = vadd.f32 %v8035_v47, %v17034_v20  ;;  %v7312_v54 = vadd.f32 %v8037_v24, %v17042_v38  ;;  %v8038_v63 = vld [vmem:[#allocation5 + $0x40] sm:$0xff]  ;;  %7369 = vst [vmem:[#allocation5] sm:$0xff] %v7305_v19  ;;  %v8040_v30 = vld [vmem:[#allocation5 + $0x50] sm:$0xff]  ;;  %v8041_v51 = vld [vmem:[#allocation5 + $0x58] sm:$0xff] }
 0x863   : > { %v7313_v2 = vadd.f32 %v8038_v63, %v17046_v23  ;;  %v7315_v28 = vadd.f32 %v8040_v30, %v17054_v57  ;;  %v7316_v27 = vadd.f32 %v8041_v51, %v17058_v60  ;;  %v8042_v20 = vld [vmem:[#allocation5 + $0x60] sm:$0xff]  ;;  %7370 = vst [vmem:[#allocation5 + $0x8] sm:$0xff] %v7306_v3  ;;  %7371 = vst [vmem:[#allocation5 + $0x10] sm:$0xff] %v7307_v36  ;;  %v8043_v39 = vld [vmem:[#allocation5 + $0x68] sm:$0xff] }
 0x864   : > { %v7317_v47 = vadd.f32 %v8042_v20, %v17062_v37  ;;  %7372 = vst [vmem:[#allocation5 + $0x18] sm:$0xff] %v7308_v58  ;;  %7373 = vst [vmem:[#allocation5 + $0x20] sm:$0xff] %v7309_v53  ;;  %v7318_v38 = vadd.f32 %v8043_v39, %v17066_v34  ;;  %v8044_v23 = vld [vmem:[#allocation5 + $0x70] sm:$0xff]  ;;  %v8045_v61 = vld [vmem:[#allocation5 + $0x78] sm:$0xff] }
 0x865   : > { %v7319_v24 = vadd.f32 %v8044_v23, %v17070_v26  ;;  %v7320_v19 = vadd.f32 %v8045_v61, %v17074_v44  ;;  %v8046_v57 = vld [vmem:[#allocation5 + $0x80] sm:$0xff]  ;;  %7374 = vst [vmem:[#allocation5 + $0x28] sm:$0xff] %v7310_v0  ;;  %7375 = vst [vmem:[#allocation5 + $0x30] sm:$0xff] %v7311_v62  ;;  %v8047_v60 = vld [vmem:[#allocation5 + $0x88] sm:$0xff] }
 0x866   : > { %v7321_v35 = vadd.f32 %v8046_v57, %v17078_v29  ;;  %7376 = vst [vmem:[#allocation5 + $0x38] sm:$0xff] %v7312_v54  ;;  %7377 = vst [vmem:[#allocation5 + $0x40] sm:$0xff] %v7313_v2  ;;  %v7322_v37 = vadd.f32 %v8047_v60, %v17082_v12  ;;  %v8048_v3 = vld [vmem:[#allocation5 + $0x90] sm:$0xff]  ;;  %v8049_v34 = vld [vmem:[#allocation5 + $0x98] sm:$0xff] }
 0x867   : > { %v7323_v36 = vadd.f32 %v8048_v3, %v17086_v21  ;;  %v7324_v58 = vadd.f32 %v8049_v34, %v17090_v22  ;;  %v8050_v26 = vld [vmem:[#allocation5 + $0xa0] sm:$0xff]  ;;  %7378 = vst [vmem:[#allocation5 + $0x48] sm:$0xff] %v7314_v46  ;;  %7379 = vst [vmem:[#allocation5 + $0x50] sm:$0xff] %v7315_v28  ;;  %v8051_v44 = vld [vmem:[#allocation5 + $0xa8] sm:$0xff] }
 0x868   : > { %v7325_v53 = vadd.f32 %v8050_v26, %v17094_v33  ;;  %7380 = vst [vmem:[#allocation5 + $0x58] sm:$0xff] %v7316_v27  ;;  %7381 = vst [vmem:[#allocation5 + $0x60] sm:$0xff] %v7317_v47  ;;  %v7326_v29 = vadd.f32 %v8051_v44, %v17098_v14  ;;  %v8052_v0 = vld [vmem:[#allocation5 + $0xb0] sm:$0xff]  ;;  %v8053_v12 = vld [vmem:[#allocation5 + $0xb8] sm:$0xff] }
 0x869   : > { %v7327_v4 = vadd.f32 %v8052_v0, %v17102_v9  ;;  %v7328_v62 = vadd.f32 %v8053_v12, %v17106_v10  ;;  %v8054_v21 = vld [vmem:[#allocation5 + $0xc0] sm:$0xff]  ;;  %7382 = vst [vmem:[#allocation5 + $0x68] sm:$0xff] %v7318_v38  ;;  %7383 = vst [vmem:[#allocation5 + $0x70] sm:$0xff] %v7319_v24  ;;  %v8055_v22 = vld [vmem:[#allocation5 + $0xc8] sm:$0xff] }
 0x86a   : > { %v7329_v54 = vadd.f32 %v8054_v21, %v17110_v13  ;;  %7384 = vst [vmem:[#allocation5 + $0x78] sm:$0xff] %v7320_v19  ;;  %7385 = vst [vmem:[#allocation5 + $0x80] sm:$0xff] %v7321_v35  ;;  %v7330_v33 = vadd.f32 %v8055_v22, %v17114_v45  ;;  %v8056_v63 = vld [vmem:[#allocation5 + $0xd0] sm:$0xff]  ;;  %v8057_v14 = vld [vmem:[#allocation5 + $0xd8] sm:$0xff] }
 0x86b   : > { %v7331_v2 = vadd.f32 %v8056_v63, %v17118_v52  ;;  %v7332_v43 = vadd.f32 %v8057_v14, %v17122_v48  ;;  %v8058_v9 = vld [vmem:[#allocation5 + $0xe0] sm:$0xff]  ;;  %7386 = vst [vmem:[#allocation5 + $0x88] sm:$0xff] %v7322_v37  ;;  %7387 = vst [vmem:[#allocation5 + $0x90] sm:$0xff] %v7323_v36  ;;  %v8059_v10 = vld [vmem:[#allocation5 + $0xe8] sm:$0xff] }
 0x86c   : > { %v7333_v46 = vadd.f32 %v8058_v9, %v17126_v49  ;;  %7388 = vst [vmem:[#allocation5 + $0x98] sm:$0xff] %v7324_v58  ;;  %7389 = vst [vmem:[#allocation5 + $0xa0] sm:$0xff] %v7325_v53  ;;  %v7334_v13 = vadd.f32 %v8059_v10, %v17130_v50  ;;  %v8060_v30 = vld [vmem:[#allocation5 + $0xf0] sm:$0xff]  ;;  %v8061_v45 = vld [vmem:[#allocation5 + $0xf8] sm:$0xff] }
 0x86d   : > { %v7335_v28 = vadd.f32 %v8060_v30, %v17134_v16  ;;  %v7336_v51 = vadd.f32 %v8061_v45, %v17138_v41  ;;  %v8062_v52 = vld [vmem:[#allocation5 + $0x100] sm:$0xff]  ;;  %7390 = vst [vmem:[#allocation5 + $0xa8] sm:$0xff] %v7326_v29  ;;  %7391 = vst [vmem:[#allocation5 + $0xb0] sm:$0xff] %v7327_v4  ;;  %v8063_v48 = vld [vmem:[#allocation5 + $0x108] sm:$0xff] }
 0x86e   : > { %v7337_v27 = vadd.f32 %v8062_v52, %v17142_v56  ;;  %7392 = vst [vmem:[#allocation5 + $0xb8] sm:$0xff] %v7328_v62  ;;  %7393 = vst [vmem:[#allocation5 + $0xc0] sm:$0xff] %v7329_v54  ;;  %v7338_v49 = vadd.f32 %v8063_v48, %v17146_v40  ;;  %v8064_v20 = vld [vmem:[#allocation5 + $0x110] sm:$0xff]  ;;  %v8065_v50 = vld [vmem:[#allocation5 + $0x118] sm:$0xff] }
 0x86f   : > { %v7339_v47 = vadd.f32 %v8064_v20, %v17150_v31  ;;  %v7340_v39 = vadd.f32 %v8065_v50, %v17154_v55  ;;  %v8066_v16 = vld [vmem:[#allocation5 + $0x120] sm:$0xff]  ;;  %7394 = vst [vmem:[#allocation5 + $0xc8] sm:$0xff] %v7330_v33  ;;  %7395 = vst [vmem:[#allocation5 + $0xd0] sm:$0xff] %v7331_v2  ;;  %v8067_v41 = vld [vmem:[#allocation5 + $0x128] sm:$0xff] }
 0x870   : > { %v7341_v38 = vadd.f32 %v8066_v16, %v17158_v18  ;;  %7396 = vst [vmem:[#allocation5 + $0xd8] sm:$0xff] %v7332_v43  ;;  %7397 = vst [vmem:[#allocation5 + $0xe0] sm:$0xff] %v7333_v46  ;;  %v7342_v56 = vadd.f32 %v8067_v41, %v17162_v32  ;;  %v8068_v23 = vld [vmem:[#allocation5 + $0x130] sm:$0xff]  ;;  %v8069_v40 = vld [vmem:[#allocation5 + $0x138] sm:$0xff] }
 0x871   : > { %v7343_v24 = vadd.f32 %v8068_v23, %v17166_v25  ;;  %v7344_v61 = vadd.f32 %v8069_v40, %v17170_v1  ;;  %v8070_v31 = vld [vmem:[#allocation5 + $0x140] sm:$0xff]  ;;  %7398 = vst [vmem:[#allocation5 + $0xe8] sm:$0xff] %v7334_v13  ;;  %7399 = vst [vmem:[#allocation5 + $0xf0] sm:$0xff] %v7335_v28  ;;  %v8071_v55 = vld [vmem:[#allocation5 + $0x148] sm:$0xff] }
 0x872   : > { %v7345_v19 = vadd.f32 %v8070_v31, %v17174_v59  ;;  %7400 = vst [vmem:[#allocation5 + $0xf8] sm:$0xff] %v7336_v51  ;;  %7401 = vst [vmem:[#allocation5 + $0x100] sm:$0xff] %v7337_v27  ;;  %v7346_v18 = vadd.f32 %v8071_v55, %v17178_v42  ;;  %v8072_v57 = vld [vmem:[#allocation5 + $0x150] sm:$0xff]  ;;  %v8073_v32 = vld [vmem:[#allocation5 + $0x158] sm:$0xff] }
 0x873   : > { %v7347_v35 = vadd.f32 %v8072_v57, %v17182_v6  ;;  %v7348_v60 = vadd.f32 %v8073_v32, %v17186_v15  ;;  %v8074_v25 = vld [vmem:[#allocation5 + $0x160] sm:$0xff]  ;;  %7402 = vst [vmem:[#allocation5 + $0x108] sm:$0xff] %v7338_v49  ;;  %7403 = vst [vmem:[#allocation5 + $0x110] sm:$0xff] %v7339_v47  ;;  %v8075_v1 = vld [vmem:[#allocation5 + $0x168] sm:$0xff] }
 0x874   : > { %v7349_v37 = vadd.f32 %v8074_v25, %v17190_v5  ;;  %7404 = vst [vmem:[#allocation5 + $0x118] sm:$0xff] %v7340_v39  ;;  %7405 = vst [vmem:[#allocation5 + $0x120] sm:$0xff] %v7341_v38  ;;  %v18441_v59 = vld [vmem:[#allocation29_spill] sm:$0xff]  ;;  %v8076_v36 = vld [vmem:[#allocation5 + $0x170] sm:$0xff] }
 0x875   : > { %v7350_v3 = vadd.f32 %v8075_v1, %v18441_v59  ;;  %v18442_v34 = vld [vmem:[#allocation28_spill] sm:$0xff]  ;;  %v8077_v42 = vld [vmem:[#allocation5 + $0x178] sm:$0xff]  ;;  %v18443_v26 = vld [vmem:[#allocation10_spill] sm:$0xff]  ;;  %7406 = vst [vmem:[#allocation5 + $0x128] sm:$0xff] %v7342_v56 }
 0x876   : > { %v7351_v58 = vadd.f32 %v8076_v36, %v18442_v34  ;;  %v7352_v53 = vadd.f32 %v8077_v42, %v18443_v26  ;;  %v8078_v6 = vld [vmem:[#allocation5 + $0x180] sm:$0xff]  ;;  %v18444_v44 = vld [vmem:[#allocation26_spill] sm:$0xff]  ;;  %7407 = vst [vmem:[#allocation5 + $0x130] sm:$0xff] %v7343_v24  ;;  %7408 = vst [vmem:[#allocation5 + $0x138] sm:$0xff] %v7344_v61 }
 0x877   : > { %v7353_v29 = vadd.f32 %v8078_v6, %v18444_v44  ;;  %7409 = vst [vmem:[#allocation5 + $0x140] sm:$0xff] %v7345_v19  ;;  %v8079_v15 = vld [vmem:[#allocation5 + $0x188] sm:$0xff]  ;;  %v8080_v4 = vld [vmem:[#allocation5 + $0x190] sm:$0xff]  ;;  %v8081_v62 = vld [vmem:[#allocation5 + $0x198] sm:$0xff] }
 0x878   : > { %v18445_v5 = vld [vmem:[#allocation33_spill] sm:$0xff]  ;;  %v7355_v12 = vadd.f32 %v8080_v4, %v17214_v7  ;;  %v7356_v21 = vadd.f32 %v8081_v62, %v17218_v17  ;;  %v8082_v54 = vld [vmem:[#allocation5 + $0x1a0] sm:$0xff]  ;;  %7410 = vst [vmem:[#allocation5 + $0x148] sm:$0xff] %v7346_v18  ;;  %7411 = vst [vmem:[#allocation5 + $0x150] sm:$0xff] %v7347_v35 }
 0x879   : > { %v7354_v0 = vadd.f32 %v8079_v15, %v18445_v5  ;;  %v7357_v22 = vadd.f32 %v8082_v54, %v17222_v11  ;;  %7412 = vst [vmem:[#allocation5 + $0x158] sm:$0xff] %v7348_v60  ;;  %7413 = vst [vmem:[#allocation5 + $0x160] sm:$0xff] %v7349_v37  ;;  %v8083_v33 = vld [vmem:[#allocation5 + $0x1a8] sm:$0xff]  ;;  %v8084_v2 = vld [vmem:[#allocation5 + $0x1b0] sm:$0xff] }
 0x87a   : > { %v7358_v63 = vadd.f32 %v8083_v33, %v17226_v8  ;;  %v18446_v14 = vld [vmem:[#allocation34_spill] sm:$0xff]  ;;  %v8085_v7 = vld [vmem:[#allocation5 + $0x1b8] sm:$0xff]  ;;  %v8086_v17 = vld [vmem:[#allocation5 + $0x1c0] sm:$0xff]  ;;  %7414 = vst [vmem:[#allocation5 + $0x168] sm:$0xff] %v7350_v3 }
 0x87b   : > { %v7359_v43 = vadd.f32 %v8084_v2, %v18446_v14  ;;  %v18447_v9 = vld [vmem:[#allocation30_spill] sm:$0xff]  ;;  %7415 = vst [vmem:[#allocation5 + $0x170] sm:$0xff] %v7351_v58  ;;  %7416 = vst [vmem:[#allocation5 + $0x178] sm:$0xff] %v7352_v53  ;;  %v8087_v11 = vld [vmem:[#allocation5 + $0x1c8] sm:$0xff] }
 0x87c   : > { %v7360_v46 = vadd.f32 %v8085_v7, %v18447_v9  ;;  %v18448_v10 = vld [vmem:[#allocation38_spill] sm:$0xff]  ;;  %7417 = vst [vmem:[#allocation5 + $0x180] sm:$0xff] %v7353_v29  ;;  %v18449_v30 = vld [vmem:[#allocation31_spill] sm:$0xff]  ;;  %v18450_v51 = vld [vmem:[#allocation32_spill] sm:$0xff] }
 0x87d   : > { %v7361_v13 = vadd.f32 %v8086_v17, %v18448_v10  ;;  %v7362_v28 = vadd.f32 %v8087_v11, %v18449_v30  ;;  %v8088_v45 = vld [vmem:[#allocation5 + $0x1d0] sm:$0xff]  ;;  %v8089_v52 = vld [vmem:[#allocation5 + $0x1d8] sm:$0xff]  ;;  %v8090_v49 = vld [vmem:[#allocation5 + $0x1e0] sm:$0xff]  ;;  %7418 = vst [vmem:[#allocation5 + $0x188] sm:$0xff] %v7354_v0 }
 0x87e   : > { %v7363_v8 = vadd.f32 %v8088_v45, %v18450_v51  ;;  %v18451_v27 = vld [vmem:[#allocation39_spill] sm:$0xff]  ;;  %v18452_v20 = vld [vmem:[#allocation41_spill] sm:$0xff]  ;;  %7419 = vst [vmem:[#allocation5 + $0x190] sm:$0xff] %v7355_v12  ;;  %7420 = vst [vmem:[#allocation5 + $0x198] sm:$0xff] %v7356_v21 }
 0x87f   : > { %v7364_v48 = vadd.f32 %v8089_v52, %v18451_v27  ;;  %v7365_v47 = vadd.f32 %v8090_v49, %v18452_v20  ;;  %7421 = vst [vmem:[#allocation5 + $0x1a0] sm:$0xff] %v7357_v22  ;;  %v8091_v50 = vld [vmem:[#allocation5 + $0x1f0] sm:$0xff]  ;;  %v18453_v39 = vld [vmem:[#allocation36_spill] sm:$0xff]  ;;  %v8092_v38 = vld [vmem:[#allocation5 + $0x1f8] sm:$0xff] }
 0x880   : > { %v7367_v16 = vadd.f32 %v8091_v50, %v18453_v39  ;;  %v18454_v41 = vld [vmem:[#allocation40_spill] sm:$0xff]  ;;  %7422 = vst [vmem:[#allocation5 + $0x1a8] sm:$0xff] %v7358_v63  ;;  %7423 = vst [vmem:[#allocation5 + $0x1b0] sm:$0xff] %v7359_v43 }
 0x881   : > { %v7368_v56 = vadd.f32 %v8092_v38, %v18454_v41  ;;  %7424 = vst [vmem:[#allocation5 + $0x1b8] sm:$0xff] %v7360_v46  ;;  %7425 = vst [vmem:[#allocation5 + $0x1c0] sm:$0xff] %v7361_v13 }
 0x882   : > { %7426 = vst [vmem:[#allocation5 + $0x1c8] sm:$0xff] %v7362_v28  ;;  %7427 = vst [vmem:[#allocation5 + $0x1d0] sm:$0xff] %v7363_v8 }
 0x883   : > { %7428 = vst [vmem:[#allocation5 + $0x1d8] sm:$0xff] %v7364_v48  ;;  %7429 = vst [vmem:[#allocation5 + $0x1e0] sm:$0xff] %v7365_v47 }
 0x884   : > { %7431 = vst [vmem:[#allocation5 + $0x1f0] sm:$0xff] %v7367_v16  ;;  %7432 = vst [vmem:[#allocation5 + $0x1f8] sm:$0xff] %v7368_v56 }
 0x885   : > { %8136 = shalt.err (!%p8133_p1)
}
 0x886   : > { %s8137_s29 = scalar_lea.hbm %s17371_s5, 8192 }
 0x887   : > { %p8138_p2 = scmp.ne.s32.totalorder %s17371_s5, %s8137_s29  ;;  %p8143_p3 = scmp.lt.u32.totalorder %s8137_s29, %s17371_s5 }
 0x889   : > { %p8139_p11 = pnand %p8138_p2, %p7956_p8 }
 0x88b   : > { %p8140_p13 = pneg %p8139_p11 }
 0x88d   : > { %p8145_p9 = pnand %p8143_p3, %p8140_p13 }
 0x88f   : > { %8148 = shalt.err (!%p8145_p9)
}
 0x890   : > { %s8193_s13 = smov 128   ;;  %s8194_s6 = smov 8  }
 0x891   : > { %7948 = dma.vmem_to_hbm [thread:$0]  (%p7956_p8), %s7440_s15, 8192, %s17371_s5, [#allocation4], %s8193_s13, %s8193_s13, %s8194_s6  }
 0x892   : > { %8170 = dma.done.wait (%p7956_p8), [#allocation4], 8192  }
 0x893   : > { %8172 = vsyncadd (%p7956_p8), [#allocation4], 4294959104 }
 0x894 PF: > { %p16_p7 = scmp.ge.s32.totalorder %s8247_s23, 10   ;;  %s18455_s18 = smov %s8179_s19 }
 0x895   : > { %s18456_s19 = smov %s8183_s20  ;;  %s18457_s20 = smov %s8257_s26 }
 0x896   : > { %s18458_s21 = smov %s8247_s23  ;;  %18 = sbr.rel (!%p16_p7) target bundleno = 4 (0x4), region = 90 }
 0x89d   :  { %7455 = vsyncpa [#allocation3], 1 }
 0x89e   :  { %7457 = vsyncpa [#allocation3 + $0x1], 1 }
 0x89f   :  { %7458 = vsyncpa [#allocation4], 1 }
 0x8a0   :  { %7460 = vsyncpa [#allocation4 + $0x1], 1 }

</bundles_post_ra>
